<compile_context>
chip_gen: v6e
topology: v6e:2x2x1
jax: 0.10.0
libtpu: 0.0.40
codegen_flags: <defaults>
</compile_context>

<pallas_src>
import math

import jax
import jax.numpy as jnp
from jax.experimental import pallas as pl
from jax.experimental.pallas import tpu as pltpu

VMEM = pl.BlockSpec(memory_space=pltpu.MemorySpace.VMEM)

PER_DIR = 7                       # wi_r, wi_z, wi_n, wh_r, wh_z, wh_n, bias(4,H)
PER_LAYER = 2 * PER_DIR + 2       # fwd + bwd + ln_gamma + ln_beta


# ----------------------------------------------------------------------------
# Fused whole-forward kernel
# ----------------------------------------------------------------------------
def _make_kernel(num_layers, T, Bp, H, n_weights):
    n_inputs = 3 + n_weights      # x2d, eps2d, tmean, weights...

    def kernel(*refs):
        x_ref, eps_ref, tmean_ref = refs[0], refs[1], refs[2]
        w = refs[3:3 + n_weights]
        out_ref = refs[n_inputs]
        (gi_fr, gi_fz, gi_fn, gi_br, gi_bz, gi_bn,
         seq_f, seq_b, act) = refs[n_inputs + 1:]

        x2d = x_ref[...]                                           # (T*Bp, Din)
        # mask_nonzero trick: keep rows whose input row-sum is nonzero
        keep = (jnp.sum(x2d, axis=-1, keepdims=True) != 0.0).astype(jnp.float32)

        for l in range(num_layers):
            base = l * PER_LAYER
            cur2d = x2d if l == 0 else act[...]                    # (T*Bp, Fin)

            rec = []
            for gi_refs, off in (((gi_fr, gi_fz, gi_fn), base),
                                 ((gi_br, gi_bz, gi_bn), base + PER_DIR)):
                wi_r, wi_z, wi_n = w[off][...], w[off + 1][...], w[off + 2][...]
                wh_r, wh_z, wh_n = w[off + 3][...], w[off + 4][...], w[off + 5][...]
                bias = w[off + 6][...]                             # (4, H)
                b_r, b_z, b_in, b_hn = bias[0:1], bias[1:2], bias[2:3], bias[3:4]
                g_r, g_z, g_n = gi_refs
                # hoisted input projection: one matmul per gate for all T steps
                g_r[...] = jnp.dot(cur2d, wi_r, preferred_element_type=jnp.float32) + b_r
                g_z[...] = jnp.dot(cur2d, wi_z, preferred_element_type=jnp.float32) + b_z
                g_n[...] = jnp.dot(cur2d, wi_n, preferred_element_type=jnp.float32) + b_in
                rec.append((wh_r, wh_z, wh_n, b_hn))

            (fwr, fwz, fwn, fbn), (bwr, bwz, bwn, bbn) = rec

            h_f = jnp.zeros((Bp, H), jnp.float32)
            h_b = jnp.zeros((Bp, H), jnp.float32)
            # static Python time loop: every slice start is a compile-time
            # constant and a multiple of 8 (Bp is sublane-aligned)
            for t in range(T):
                rf = pl.ds(t * Bp, Bp)                             # fwd: time t
                rb = pl.ds((T - 1 - t) * Bp, Bp)                   # bwd: time T-1-t
                # forward direction (PyTorch gate order r, z, n)
                r = jax.nn.sigmoid(gi_fr[rf, :] +
                                   jnp.dot(h_f, fwr, preferred_element_type=jnp.float32))
                zg = jax.nn.sigmoid(gi_fz[rf, :] +
                                    jnp.dot(h_f, fwz, preferred_element_type=jnp.float32))
                n = jnp.tanh(gi_fn[rf, :] + r *
                             (jnp.dot(h_f, fwn, preferred_element_type=jnp.float32) + fbn))
                h_f = (1.0 - zg) * n + zg * h_f
                seq_f[rf, :] = h_f
                # backward direction (reversed time index; no jnp.flip anywhere)
                r2 = jax.nn.sigmoid(gi_br[rb, :] +
                                    jnp.dot(h_b, bwr, preferred_element_type=jnp.float32))
                z2 = jax.nn.sigmoid(gi_bz[rb, :] +
                                    jnp.dot(h_b, bwz, preferred_element_type=jnp.float32))
                n2 = jnp.tanh(gi_bn[rb, :] + r2 *
                              (jnp.dot(h_b, bwn, preferred_element_type=jnp.float32) + bbn))
                h_b = (1.0 - z2) * n2 + z2 * h_b
                seq_b[rb, :] = h_b

            # sum of directions + LayerNorm(H), eps=1e-5
            gamma = w[base + 2 * PER_DIR][...]                     # (1, H)
            beta = w[base + 2 * PER_DIR + 1][...]                  # (1, H)
            s = seq_f[...] + seq_b[...]                            # (T*Bp, H)
            mu = jnp.mean(s, axis=-1, keepdims=True)
            c = s - mu
            var = jnp.mean(c * c, axis=-1, keepdims=True)
            act[...] = c * jax.lax.rsqrt(var + 1e-5) * gamma + beta

        hw = num_layers * PER_LAYER
        wm, bm = w[hw][...], w[hw + 1][...]
        wv, bv = w[hw + 2][...], w[hw + 3][...]
        wc, bc = w[hw + 4][...], w[hw + 5][...]

        h2d = act[...]                                             # (T*Bp, H)
        mean_h = jnp.dot(h2d, wm, preferred_element_type=jnp.float32) + bm
        log_var = jnp.dot(h2d, wv, preferred_element_type=jnp.float32) + bv
        z_lat = (mean_h + jnp.exp(0.5 * log_var) * eps_ref[...]) * keep
        # mean over time as a tiny constant matmul (avoids (T,B,H) relayout)
        h_all = jnp.dot(tmean_ref[...], z_lat, preferred_element_type=jnp.float32)  # (Bp, H)
        out_ref[...] = jnp.dot(h_all, wc, preferred_element_type=jnp.float32) + bc

    return kernel


# ----------------------------------------------------------------------------
# Wrapper: pad batch to sublane multiple, flatten params, single pallas_call
# ----------------------------------------------------------------------------
def vae_forward(params, x_btd, eps_tbh):
    B, T, Din = x_btd.shape
    layers = params["layers"]
    num_layers = len(layers)
    H = layers[0]["fwd"][3].shape[0]          # wh_r is (H, H)
    O = params["wc"].shape[1]

    Bp = max(8, ((B + 7) // 8) * 8)           # sublane-aligned batch

    # time-major flatten: row index = t*Bp + b  (contiguous (Bp,H) slab per step)
    x_tbd = jnp.transpose(x_btd, (1, 0, 2)).astype(jnp.float32)     # (T, B, Din)
    x_tbd = jnp.pad(x_tbd, ((0, 0), (0, Bp - B), (0, 0)))           # padded rows are
    x2d = x_tbd.reshape(T * Bp, Din)                                # all-zero -> keep=0

    eps = jnp.pad(eps_tbh.astype(jnp.float32), ((0, 0), (0, Bp - B), (0, 0)))
    eps2d = eps.reshape(T * Bp, H)

    # constant (Bp, T*Bp) matrix implementing mean over the time axis
    cols = jnp.arange(T * Bp)[None, :]
    rows = jnp.arange(Bp)[:, None]
    tmean = jnp.where(cols % Bp == rows, 1.0 / T, 0.0).astype(jnp.float32)

    flat_w = []
    for layer in layers:
        flat_w.extend(layer["fwd"])
        flat_w.extend(layer["bwd"])
        flat_w.append(layer["ln_gamma"])
        flat_w.append(layer["ln_beta"])
    flat_w.extend([params["wm"], params["bm"], params["wv"], params["bv"],
                   params["wc"], params["bc"]])

    kernel = _make_kernel(num_layers, T, Bp, H, len(flat_w))
    n_inputs = 3 + len(flat_w)

    out = pl.pallas_call(
        kernel,
        out_shape=jax.ShapeDtypeStruct((Bp, O), jnp.float32),
        in_specs=[VMEM] * n_inputs,
        out_specs=VMEM,
        scratch_shapes=[pltpu.VMEM((T * Bp, H), jnp.float32) for _ in range(9)],
    )(x2d, eps2d, tmean, *flat_w)
    return out[:B]


# ----------------------------------------------------------------------------
# Parameter init (PyTorch conventions) and one-time preprocessing
# ----------------------------------------------------------------------------
def init_torch_params(key, f_in, f_hid, num_layers=2):
    def uni(k, shape, bound):
        return jax.random.uniform(k, shape, jnp.float32, -bound, bound)

    bound = 1.0 / math.sqrt(f_hid)
    gru_layers, ln_layers = [], []
    for l in range(num_layers):
        in_dim = f_in if l == 0 else f_hid
        dirs = {}
        for d in ("fwd", "bwd"):
            key, k1, k2, k3, k4 = jax.random.split(key, 5)
            dirs[d] = (uni(k1, (3 * f_hid, in_dim), bound),   # weight_ih
                       uni(k2, (3 * f_hid, f_hid), bound),    # weight_hh
                       uni(k3, (3 * f_hid,), bound),          # bias_ih
                       uni(k4, (3 * f_hid,), bound))          # bias_hh
        gru_layers.append(dirs)
        ln_layers.append((jnp.ones((f_hid,), jnp.float32),
                          jnp.zeros((f_hid,), jnp.float32)))
    key, k1, k2, k3, k4, k5, k6 = jax.random.split(key, 7)
    return {
        "gru": gru_layers,
        "ln": ln_layers,
        "mean_w": uni(k1, (f_hid, f_hid), bound), "mean_b": uni(k2, (f_hid,), bound),
        "var_w": uni(k3, (f_hid, f_hid), bound), "var_b": uni(k4, (f_hid,), bound),
        "cls_w": uni(k5, (2, f_hid), bound), "cls_b": uni(k6, (2,), bound),
    }


def _split_gates_t(w):                        # (3H, X) -> three (X, H) slabs
    H = w.shape[0] // 3
    return w[:H].T, w[H:2 * H].T, w[2 * H:].T


def preprocess_params(raw):
    """Pre-transpose + gate-separate + bias-combine once (not per forward)."""
    layers = []
    for gru, (gamma, beta) in zip(raw["gru"], raw["ln"]):
        layer = {}
        for d in ("fwd", "bwd"):
            w_ih, w_hh, b_ih, b_hh = gru[d]
            H = w_hh.shape[1]
            wi_r, wi_z, wi_n = _split_gates_t(w_ih)
            wh_r, wh_z, wh_n = _split_gates_t(w_hh)
            bias = jnp.stack([b_ih[:H] + b_hh[:H],            # r (combined)
                              b_ih[H:2 * H] + b_hh[H:2 * H],  # z (combined)
                              b_ih[2 * H:],                   # n input part
                              b_hh[2 * H:]], axis=0)          # n hidden part (scaled by r)
            layer[d] = (wi_r, wi_z, wi_n, wh_r, wh_z, wh_n, bias)
        layer["ln_gamma"] = gamma.reshape(1, -1)
        layer["ln_beta"] = beta.reshape(1, -1)
        layers.append(layer)
    return {
        "layers": layers,
        "wm": raw["mean_w"].T, "bm": raw["mean_b"].reshape(1, -1),
        "wv": raw["var_w"].T, "bv": raw["var_b"].reshape(1, -1),
        "wc": raw["cls_w"].T, "bc": raw["cls_b"].reshape(1, -1),
    }


# ----------------------------------------------------------------------------
# Pure-JAX reference (same math, torch-convention weights) for correctness
# ----------------------------------------------------------------------------
def _gru_direction_ref(x_tbf, w_ih, w_hh, b_ih, b_hh, reverse):
    H = w_hh.shape[1]
    B = x_tbf.shape[1]

    def step(h, x_t):
        gi = x_t @ w_ih.T + b_ih
        gh = h @ w_hh.T + b_hh
        r = jax.nn.sigmoid(gi[:, :H] + gh[:, :H])
        z = jax.nn.sigmoid(gi[:, H:2 * H] + gh[:, H:2 * H])
        n = jnp.tanh(gi[:, 2 * H:] + r * gh[:, 2 * H:])
        h_new = (1.0 - z) * n + z * h
        return h_new, h_new

    _, ys = jax.lax.scan(step, jnp.zeros((B, H), jnp.float32), x_tbf, reverse=reverse)
    return ys


def vae_ref(raw, x_btd, eps_tbh):
    x = jnp.transpose(x_btd, (1, 0, 2)).astype(jnp.float32)        # (T, B, Din)
    cur = x
    for gru, (gamma, beta) in zip(raw["gru"], raw["ln"]):
        f = _gru_direction_ref(cur, *gru["fwd"], reverse=False)
        b = _gru_direction_ref(cur, *gru["bwd"], reverse=True)
        s = f + b
        mu = jnp.mean(s, axis=-1, keepdims=True)
        var = jnp.mean((s - mu) ** 2, axis=-1, keepdims=True)
        cur = (s - mu) * jax.lax.rsqrt(var + 1e-5) * gamma + beta
    mean_h = cur @ raw["mean_w"].T + raw["mean_b"]
    log_var = cur @ raw["var_w"].T + raw["var_b"]
    z = mean_h + jnp.exp(0.5 * log_var) * eps_tbh
    keep = (jnp.sum(x, axis=-1, keepdims=True) != 0.0).astype(jnp.float32)
    z = z * keep
    h_all = jnp.mean(z, axis=0)                                    # (B, H)
    return h_all @ raw["cls_w"].T + raw["cls_b"]


# ----------------------------------------------------------------------------
if __name__ == "__main__":
    B, T = 2, 8
    f_in, f_hid, num_layers = 16, 32, 2

    root = jax.random.PRNGKey(0)
    kp, kx, ke = jax.random.split(root, 3)

    raw = init_torch_params(kp, f_in, f_hid, num_layers)
    params = preprocess_params(raw)

    x = jax.random.normal(kx, (B, T, f_in), jnp.float32)
    # zero a few rows so the mask_nonzero path is actually exercised
    x = x.at[0, 5, :].set(0.0).at[1, 0, :].set(0.0).at[1, 7, :].set(0.0)

    # Gaussian noise for reparametrize(), generated outside for determinism
    eps = jax.random.normal(ke, (T, B, f_hid), jnp.float32)

    fwd = jax.jit(vae_forward)
    out = jax.block_until_ready(fwd(params, x, eps))
    ref = jax.block_until_ready(vae_ref(raw, x, eps))

    assert out.shape == (B, 2), out.shape
    max_err = float(jnp.max(jnp.abs(out - ref)))
    assert jnp.allclose(out, ref, atol=5e-4, rtol=5e-4), max_err

    print("KERNEL_OK")
</pallas_src>

<mosaic_0001>
module attributes {stable_mosaic.version = 11 : i64} {
  func.func @kernel(%arg0: memref<64x16xf32, #tpu.memory_space<vmem>>, %arg1: memref<64x32xf32, #tpu.memory_space<vmem>>, %arg2: memref<8x64xf32, #tpu.memory_space<vmem>>, %arg3: memref<16x32xf32, #tpu.memory_space<vmem>>, %arg4: memref<16x32xf32, #tpu.memory_space<vmem>>, %arg5: memref<16x32xf32, #tpu.memory_space<vmem>>, %arg6: memref<32x32xf32, #tpu.memory_space<vmem>>, %arg7: memref<32x32xf32, #tpu.memory_space<vmem>>, %arg8: memref<32x32xf32, #tpu.memory_space<vmem>>, %arg9: memref<4x32xf32, #tpu.memory_space<vmem>>, %arg10: memref<16x32xf32, #tpu.memory_space<vmem>>, %arg11: memref<16x32xf32, #tpu.memory_space<vmem>>, %arg12: memref<16x32xf32, #tpu.memory_space<vmem>>, %arg13: memref<32x32xf32, #tpu.memory_space<vmem>>, %arg14: memref<32x32xf32, #tpu.memory_space<vmem>>, %arg15: memref<32x32xf32, #tpu.memory_space<vmem>>, %arg16: memref<4x32xf32, #tpu.memory_space<vmem>>, %arg17: memref<1x32xf32, #tpu.memory_space<vmem>>, %arg18: memref<1x32xf32, #tpu.memory_space<vmem>>, %arg19: memref<32x32xf32, #tpu.memory_space<vmem>>, %arg20: memref<32x32xf32, #tpu.memory_space<vmem>>, %arg21: memref<32x32xf32, #tpu.memory_space<vmem>>, %arg22: memref<32x32xf32, #tpu.memory_space<vmem>>, %arg23: memref<32x32xf32, #tpu.memory_space<vmem>>, %arg24: memref<32x32xf32, #tpu.memory_space<vmem>>, %arg25: memref<4x32xf32, #tpu.memory_space<vmem>>, %arg26: memref<32x32xf32, #tpu.memory_space<vmem>>, %arg27: memref<32x32xf32, #tpu.memory_space<vmem>>, %arg28: memref<32x32xf32, #tpu.memory_space<vmem>>, %arg29: memref<32x32xf32, #tpu.memory_space<vmem>>, %arg30: memref<32x32xf32, #tpu.memory_space<vmem>>, %arg31: memref<32x32xf32, #tpu.memory_space<vmem>>, %arg32: memref<4x32xf32, #tpu.memory_space<vmem>>, %arg33: memref<1x32xf32, #tpu.memory_space<vmem>>, %arg34: memref<1x32xf32, #tpu.memory_space<vmem>>, %arg35: memref<32x32xf32, #tpu.memory_space<vmem>>, %arg36: memref<1x32xf32, #tpu.memory_space<vmem>>, %arg37: memref<32x32xf32, #tpu.memory_space<vmem>>, %arg38: memref<1x32xf32, #tpu.memory_space<vmem>>, %arg39: memref<32x2xf32, #tpu.memory_space<vmem>>, %arg40: memref<1x2xf32, #tpu.memory_space<vmem>>, %arg41: memref<8x2xf32, #tpu.memory_space<vmem>>, %arg42: memref<64x32xf32, #tpu.memory_space<vmem>>, %arg43: memref<64x32xf32, #tpu.memory_space<vmem>>, %arg44: memref<64x32xf32, #tpu.memory_space<vmem>>, %arg45: memref<64x32xf32, #tpu.memory_space<vmem>>, %arg46: memref<64x32xf32, #tpu.memory_space<vmem>>, %arg47: memref<64x32xf32, #tpu.memory_space<vmem>>, %arg48: memref<64x32xf32, #tpu.memory_space<vmem>>, %arg49: memref<64x32xf32, #tpu.memory_space<vmem>>, %arg50: memref<64x32xf32, #tpu.memory_space<vmem>>) attributes {dimension_semantics = [], scalar_prefetch = 0 : i64, scratch_operands = 9 : i64, tpu.core_type = #tpu.core_type<tc>} {
    %c0 = arith.constant 0 : index
    %c0_0 = arith.constant 0 : index
    %0 = vector.load %arg0[%c0, %c0_0] : memref<64x16xf32, #tpu.memory_space<vmem>>, vector<64x16xf32>
    %cst = arith.constant dense<0.000000e+00> : vector<64xf32>
    %1 = vector.multi_reduction <add>, %0, %cst [1] : vector<64x16xf32> to vector<64xf32>
    %2 = vector.shape_cast %1 : vector<64xf32> to vector<64x1xf32>
    %cst_1 = arith.constant 0.000000e+00 : f32
    %3 = vector.broadcast %cst_1 : f32 to vector<64x1xf32>
    %4 = arith.cmpf one, %2, %3 : vector<64x1xf32>
    %5 = arith.extui %4 : vector<64x1xi1> to vector<64x1xi32>
    %6 = arith.sitofp %5 : vector<64x1xi32> to vector<64x1xf32>
    %c0_2 = arith.constant 0 : index
    %c0_3 = arith.constant 0 : index
    %7 = vector.load %arg3[%c0_2, %c0_3] : memref<16x32xf32, #tpu.memory_space<vmem>>, vector<16x32xf32>
    %c0_4 = arith.constant 0 : index
    %c0_5 = arith.constant 0 : index
    %8 = vector.load %arg4[%c0_4, %c0_5] : memref<16x32xf32, #tpu.memory_space<vmem>>, vector<16x32xf32>
    %c0_6 = arith.constant 0 : index
    %c0_7 = arith.constant 0 : index
    %9 = vector.load %arg5[%c0_6, %c0_7] : memref<16x32xf32, #tpu.memory_space<vmem>>, vector<16x32xf32>
    %c0_8 = arith.constant 0 : index
    %c0_9 = arith.constant 0 : index
    %10 = vector.load %arg6[%c0_8, %c0_9] : memref<32x32xf32, #tpu.memory_space<vmem>>, vector<32x32xf32>
    %c0_10 = arith.constant 0 : index
    %c0_11 = arith.constant 0 : index
    %11 = vector.load %arg7[%c0_10, %c0_11] : memref<32x32xf32, #tpu.memory_space<vmem>>, vector<32x32xf32>
    %c0_12 = arith.constant 0 : index
    %c0_13 = arith.constant 0 : index
    %12 = vector.load %arg8[%c0_12, %c0_13] : memref<32x32xf32, #tpu.memory_space<vmem>>, vector<32x32xf32>
    %c0_14 = arith.constant 0 : index
    %c0_15 = arith.constant 0 : index
    %13 = vector.load %arg9[%c0_14, %c0_15] : memref<4x32xf32, #tpu.memory_space<vmem>>, vector<4x32xf32>
    %14 = vector.extract_strided_slice %13 {offsets = [0, 0], sizes = [1, 32], strides = [1, 1]} : vector<4x32xf32> to vector<1x32xf32>
    %15 = vector.extract_strided_slice %13 {offsets = [1, 0], sizes = [1, 32], strides = [1, 1]} : vector<4x32xf32> to vector<1x32xf32>
    %16 = vector.extract_strided_slice %13 {offsets = [2, 0], sizes = [1, 32], strides = [1, 1]} : vector<4x32xf32> to vector<1x32xf32>
    %17 = vector.extract_strided_slice %13 {offsets = [3, 0], sizes = [1, 32], strides = [1, 1]} : vector<4x32xf32> to vector<1x32xf32>
    %cst_16 = arith.constant dense<0.000000e+00> : vector<64x32xf32>
    %18 = tpu.matmul %0, %7, %cst_16 {dimension_numbers = #tpu.dot_dimension_numbers<[1], [0], [0], [1], [0, 0, 1, 1], [], []>} : vector<64x16xf32>, vector<16x32xf32>, vector<64x32xf32> -> vector<64x32xf32>
    %19 = vector.broadcast %14 : vector<1x32xf32> to vector<64x32xf32>
    %20 = arith.addf %18, %19 : vector<64x32xf32>
    %c0_17 = arith.constant 0 : index
    %c0_18 = arith.constant 0 : index
    %21 = vector.load %arg42[%c0_17, %c0_18] : memref<64x32xf32, #tpu.memory_space<vmem>>, vector<64x32xf32>
    tpu.vector_store %arg42[%c0_17, %c0_18], %20 {strides = array<i32>} : memref<64x32xf32, #tpu.memory_space<vmem>>, vector<64x32xf32>,
    %cst_19 = arith.constant dense<0.000000e+00> : vector<64x32xf32>
    %22 = tpu.matmul %0, %8, %cst_19 {dimension_numbers = #tpu.dot_dimension_numbers<[1], [0], [0], [1], [0, 0, 1, 1], [], []>} : vector<64x16xf32>, vector<16x32xf32>, vector<64x32xf32> -> vector<64x32xf32>
    %23 = vector.broadcast %15 : vector<1x32xf32> to vector<64x32xf32>
    %24 = arith.addf %22, %23 : vector<64x32xf32>
    %c0_20 = arith.constant 0 : index
    %c0_21 = arith.constant 0 : index
    %25 = vector.load %arg43[%c0_20, %c0_21] : memref<64x32xf32, #tpu.memory_space<vmem>>, vector<64x32xf32>
    tpu.vector_store %arg43[%c0_20, %c0_21], %24 {strides = array<i32>} : memref<64x32xf32, #tpu.memory_space<vmem>>, vector<64x32xf32>,
    %cst_22 = arith.constant dense<0.000000e+00> : vector<64x32xf32>
    %26 = tpu.matmul %0, %9, %cst_22 {dimension_numbers = #tpu.dot_dimension_numbers<[1], [0], [0], [1], [0, 0, 1, 1], [], []>} : vector<64x16xf32>, vector<16x32xf32>, vector<64x32xf32> -> vector<64x32xf32>
    %27 = vector.broadcast %16 : vector<1x32xf32> to vector<64x32xf32>
    %28 = arith.addf %26, %27 : vector<64x32xf32>
    %c0_23 = arith.constant 0 : index
    %c0_24 = arith.constant 0 : index
    %29 = vector.load %arg44[%c0_23, %c0_24] : memref<64x32xf32, #tpu.memory_space<vmem>>, vector<64x32xf32>
    tpu.vector_store %arg44[%c0_23, %c0_24], %28 {strides = array<i32>} : memref<64x32xf32, #tpu.memory_space<vmem>>, vector<64x32xf32>,
    %c0_25 = arith.constant 0 : index
    %c0_26 = arith.constant 0 : index
    %30 = vector.load %arg10[%c0_25, %c0_26] : memref<16x32xf32, #tpu.memory_space<vmem>>, vector<16x32xf32>
    %c0_27 = arith.constant 0 : index
    %c0_28 = arith.constant 0 : index
    %31 = vector.load %arg11[%c0_27, %c0_28] : memref<16x32xf32, #tpu.memory_space<vmem>>, vector<16x32xf32>
    %c0_29 = arith.constant 0 : index
    %c0_30 = arith.constant 0 : index
    %32 = vector.load %arg12[%c0_29, %c0_30] : memref<16x32xf32, #tpu.memory_space<vmem>>, vector<16x32xf32>
    %c0_31 = arith.constant 0 : index
    %c0_32 = arith.constant 0 : index
    %33 = vector.load %arg13[%c0_31, %c0_32] : memref<32x32xf32, #tpu.memory_space<vmem>>, vector<32x32xf32>
    %c0_33 = arith.constant 0 : index
    %c0_34 = arith.constant 0 : index
    %34 = vector.load %arg14[%c0_33, %c0_34] : memref<32x32xf32, #tpu.memory_space<vmem>>, vector<32x32xf32>
    %c0_35 = arith.constant 0 : index
    %c0_36 = arith.constant 0 : index
    %35 = vector.load %arg15[%c0_35, %c0_36] : memref<32x32xf32, #tpu.memory_space<vmem>>, vector<32x32xf32>
    %c0_37 = arith.constant 0 : index
    %c0_38 = arith.constant 0 : index
    %36 = vector.load %arg16[%c0_37, %c0_38] : memref<4x32xf32, #tpu.memory_space<vmem>>, vector<4x32xf32>
    %37 = vector.extract_strided_slice %36 {offsets = [0, 0], sizes = [1, 32], strides = [1, 1]} : vector<4x32xf32> to vector<1x32xf32>
    %38 = vector.extract_strided_slice %36 {offsets = [1, 0], sizes = [1, 32], strides = [1, 1]} : vector<4x32xf32> to vector<1x32xf32>
    %39 = vector.extract_strided_slice %36 {offsets = [2, 0], sizes = [1, 32], strides = [1, 1]} : vector<4x32xf32> to vector<1x32xf32>
    %40 = vector.extract_strided_slice %36 {offsets = [3, 0], sizes = [1, 32], strides = [1, 1]} : vector<4x32xf32> to vector<1x32xf32>
    %cst_39 = arith.constant dense<0.000000e+00> : vector<64x32xf32>
    %41 = tpu.matmul %0, %30, %cst_39 {dimension_numbers = #tpu.dot_dimension_numbers<[1], [0], [0], [1], [0, 0, 1, 1], [], []>} : vector<64x16xf32>, vector<16x32xf32>, vector<64x32xf32> -> vector<64x32xf32>
    %42 = vector.broadcast %37 : vector<1x32xf32> to vector<64x32xf32>
    %43 = arith.addf %41, %42 : vector<64x32xf32>
    %c0_40 = arith.constant 0 : index
    %c0_41 = arith.constant 0 : index
    %44 = vector.load %arg45[%c0_40, %c0_41] : memref<64x32xf32, #tpu.memory_space<vmem>>, vector<64x32xf32>
    tpu.vector_store %arg45[%c0_40, %c0_41], %43 {strides = array<i32>} : memref<64x32xf32, #tpu.memory_space<vmem>>, vector<64x32xf32>,
    %cst_42 = arith.constant dense<0.000000e+00> : vector<64x32xf32>
    %45 = tpu.matmul %0, %31, %cst_42 {dimension_numbers = #tpu.dot_dimension_numbers<[1], [0], [0], [1], [0, 0, 1, 1], [], []>} : vector<64x16xf32>, vector<16x32xf32>, vector<64x32xf32> -> vector<64x32xf32>
    %46 = vector.broadcast %38 : vector<1x32xf32> to vector<64x32xf32>
    %47 = arith.addf %45, %46 : vector<64x32xf32>
    %c0_43 = arith.constant 0 : index
    %c0_44 = arith.constant 0 : index
    %48 = vector.load %arg46[%c0_43, %c0_44] : memref<64x32xf32, #tpu.memory_space<vmem>>, vector<64x32xf32>
    tpu.vector_store %arg46[%c0_43, %c0_44], %47 {strides = array<i32>} : memref<64x32xf32, #tpu.memory_space<vmem>>, vector<64x32xf32>,
    %cst_45 = arith.constant dense<0.000000e+00> : vector<64x32xf32>
    %49 = tpu.matmul %0, %32, %cst_45 {dimension_numbers = #tpu.dot_dimension_numbers<[1], [0], [0], [1], [0, 0, 1, 1], [], []>} : vector<64x16xf32>, vector<16x32xf32>, vector<64x32xf32> -> vector<64x32xf32>
    %50 = vector.broadcast %39 : vector<1x32xf32> to vector<64x32xf32>
    %51 = arith.addf %49, %50 : vector<64x32xf32>
    %c0_46 = arith.constant 0 : index
    %c0_47 = arith.constant 0 : index
    %52 = vector.load %arg47[%c0_46, %c0_47] : memref<64x32xf32, #tpu.memory_space<vmem>>, vector<64x32xf32>
    tpu.vector_store %arg47[%c0_46, %c0_47], %51 {strides = array<i32>} : memref<64x32xf32, #tpu.memory_space<vmem>>, vector<64x32xf32>,
    %cst_48 = arith.constant 0.000000e+00 : f32
    %53 = vector.broadcast %cst_48 : f32 to vector<8x32xf32>
    %cst_49 = arith.constant 0.000000e+00 : f32
    %54 = vector.broadcast %cst_49 : f32 to vector<8x32xf32>
    %c0_50 = arith.constant 0 : index
    %c0_51 = arith.constant 0 : index
    %55 = vector.load %arg42[%c0_50, %c0_51] : memref<64x32xf32, #tpu.memory_space<vmem>>, vector<8x32xf32>
    %cst_52 = arith.constant dense<0.000000e+00> : vector<8x32xf32>
    %56 = tpu.matmul %53, %10, %cst_52 {dimension_numbers = #tpu.dot_dimension_numbers<[1], [0], [0], [1], [0, 0, 1, 1], [], []>} : vector<8x32xf32>, vector<32x32xf32>, vector<8x32xf32> -> vector<8x32xf32>
    %57 = arith.addf %55, %56 : vector<8x32xf32>
    %58 = arith.negf %57 : vector<8x32xf32>
    %59 = math.exp %58 : vector<8x32xf32>
    %cst_53 = arith.constant 1.000000e+00 : f32
    %60 = vector.broadcast %cst_53 : f32 to vector<8x32xf32>
    %61 = arith.addf %60, %59 : vector<8x32xf32>
    %62 = arith.divf %60, %61 : vector<8x32xf32>
    %c0_54 = arith.constant 0 : index
    %c0_55 = arith.constant 0 : index
    %63 = vector.load %arg43[%c0_54, %c0_55] : memref<64x32xf32, #tpu.memory_space<vmem>>, vector<8x32xf32>
    %cst_56 = arith.constant dense<0.000000e+00> : vector<8x32xf32>
    %64 = tpu.matmul %53, %11, %cst_56 {dimension_numbers = #tpu.dot_dimension_numbers<[1], [0], [0], [1], [0, 0, 1, 1], [], []>} : vector<8x32xf32>, vector<32x32xf32>, vector<8x32xf32> -> vector<8x32xf32>
    %65 = arith.addf %63, %64 : vector<8x32xf32>
    %66 = arith.negf %65 : vector<8x32xf32>
    %67 = math.exp %66 : vector<8x32xf32>
    %cst_57 = arith.constant 1.000000e+00 : f32
    %68 = vector.broadcast %cst_57 : f32 to vector<8x32xf32>
    %69 = arith.addf %68, %67 : vector<8x32xf32>
    %70 = arith.divf %68, %69 : vector<8x32xf32>
    %c0_58 = arith.constant 0 : index
    %c0_59 = arith.constant 0 : index
    %71 = vector.load %arg44[%c0_58, %c0_59] : memref<64x32xf32, #tpu.memory_space<vmem>>, vector<8x32xf32>
    %cst_60 = arith.constant dense<0.000000e+00> : vector<8x32xf32>
    %72 = tpu.matmul %53, %12, %cst_60 {dimension_numbers = #tpu.dot_dimension_numbers<[1], [0], [0], [1], [0, 0, 1, 1], [], []>} : vector<8x32xf32>, vector<32x32xf32>, vector<8x32xf32> -> vector<8x32xf32>
    %73 = vector.broadcast %17 : vector<1x32xf32> to vector<8x32xf32>
    %74 = arith.addf %72, %73 : vector<8x32xf32>
    %75 = arith.mulf %62, %74 : vector<8x32xf32>
    %76 = arith.addf %71, %75 : vector<8x32xf32>
    %77 = math.tanh %76 : vector<8x32xf32>
    %cst_61 = arith.constant 1.000000e+00 : f32
    %78 = vector.broadcast %cst_61 : f32 to vector<8x32xf32>
    %79 = arith.subf %78, %70 : vector<8x32xf32>
    %80 = arith.mulf %79, %77 : vector<8x32xf32>
    %81 = arith.mulf %70, %53 : vector<8x32xf32>
    %82 = arith.addf %80, %81 : vector<8x32xf32>
    %c0_62 = arith.constant 0 : index
    %c0_63 = arith.constant 0 : index
    %83 = vector.load %arg48[%c0_62, %c0_63] : memref<64x32xf32, #tpu.memory_space<vmem>>, vector<8x32xf32>
    tpu.vector_store %arg48[%c0_62, %c0_63], %82 {strides = array<i32>} : memref<64x32xf32, #tpu.memory_space<vmem>>, vector<8x32xf32>,
    %c56 = arith.constant 56 : index
    %c0_64 = arith.constant 0 : index
    %84 = vector.load %arg45[%c56, %c0_64] : memref<64x32xf32, #tpu.memory_space<vmem>>, vector<8x32xf32>
    %cst_65 = arith.constant dense<0.000000e+00> : vector<8x32xf32>
    %85 = tpu.matmul %54, %33, %cst_65 {dimension_numbers = #tpu.dot_dimension_numbers<[1], [0], [0], [1], [0, 0, 1, 1], [], []>} : vector<8x32xf32>, vector<32x32xf32>, vector<8x32xf32> -> vector<8x32xf32>
    %86 = arith.addf %84, %85 : vector<8x32xf32>
    %87 = arith.negf %86 : vector<8x32xf32>
    %88 = math.exp %87 : vector<8x32xf32>
    %cst_66 = arith.constant 1.000000e+00 : f32
    %89 = vector.broadcast %cst_66 : f32 to vector<8x32xf32>
    %90 = arith.addf %89, %88 : vector<8x32xf32>
    %91 = arith.divf %89, %90 : vector<8x32xf32>
    %c56_67 = arith.constant 56 : index
    %c0_68 = arith.constant 0 : index
    %92 = vector.load %arg46[%c56_67, %c0_68] : memref<64x32xf32, #tpu.memory_space<vmem>>, vector<8x32xf32>
    %cst_69 = arith.constant dense<0.000000e+00> : vector<8x32xf32>
    %93 = tpu.matmul %54, %34, %cst_69 {dimension_numbers = #tpu.dot_dimension_numbers<[1], [0], [0], [1], [0, 0, 1, 1], [], []>} : vector<8x32xf32>, vector<32x32xf32>, vector<8x32xf32> -> vector<8x32xf32>
    %94 = arith.addf %92, %93 : vector<8x32xf32>
    %95 = arith.negf %94 : vector<8x32xf32>
    %96 = math.exp %95 : vector<8x32xf32>
    %cst_70 = arith.constant 1.000000e+00 : f32
    %97 = vector.broadcast %cst_70 : f32 to vector<8x32xf32>
    %98 = arith.addf %97, %96 : vector<8x32xf32>
    %99 = arith.divf %97, %98 : vector<8x32xf32>
    %c56_71 = arith.constant 56 : index
    %c0_72 = arith.constant 0 : index
    %100 = vector.load %arg47[%c56_71, %c0_72] : memref<64x32xf32, #tpu.memory_space<vmem>>, vector<8x32xf32>
    %cst_73 = arith.constant dense<0.000000e+00> : vector<8x32xf32>
    %101 = tpu.matmul %54, %35, %cst_73 {dimension_numbers = #tpu.dot_dimension_numbers<[1], [0], [0], [1], [0, 0, 1, 1], [], []>} : vector<8x32xf32>, vector<32x32xf32>, vector<8x32xf32> -> vector<8x32xf32>
    %102 = vector.broadcast %40 : vector<1x32xf32> to vector<8x32xf32>
    %103 = arith.addf %101, %102 : vector<8x32xf32>
    %104 = arith.mulf %91, %103 : vector<8x32xf32>
    %105 = arith.addf %100, %104 : vector<8x32xf32>
    %106 = math.tanh %105 : vector<8x32xf32>
    %cst_74 = arith.constant 1.000000e+00 : f32
    %107 = vector.broadcast %cst_74 : f32 to vector<8x32xf32>
    %108 = arith.subf %107, %99 : vector<8x32xf32>
    %109 = arith.mulf %108, %106 : vector<8x32xf32>
    %110 = arith.mulf %99, %54 : vector<8x32xf32>
    %111 = arith.addf %109, %110 : vector<8x32xf32>
    %c56_75 = arith.constant 56 : index
    %c0_76 = arith.constant 0 : index
    %112 = vector.load %arg49[%c56_75, %c0_76] : memref<64x32xf32, #tpu.memory_space<vmem>>, vector<8x32xf32>
    tpu.vector_store %arg49[%c56_75, %c0_76], %111 {strides = array<i32>} : memref<64x32xf32, #tpu.memory_space<vmem>>, vector<8x32xf32>,
    %c8 = arith.constant 8 : index
    %c0_77 = arith.constant 0 : index
    %113 = vector.load %arg42[%c8, %c0_77] : memref<64x32xf32, #tpu.memory_space<vmem>>, vector<8x32xf32>
    %cst_78 = arith.constant dense<0.000000e+00> : vector<8x32xf32>
    %114 = tpu.matmul %82, %10, %cst_78 {dimension_numbers = #tpu.dot_dimension_numbers<[1], [0], [0], [1], [0, 0, 1, 1], [], []>} : vector<8x32xf32>, vector<32x32xf32>, vector<8x32xf32> -> vector<8x32xf32>
    %115 = arith.addf %113, %114 : vector<8x32xf32>
    %116 = arith.negf %115 : vector<8x32xf32>
    %117 = math.exp %116 : vector<8x32xf32>
    %cst_79 = arith.constant 1.000000e+00 : f32
    %118 = vector.broadcast %cst_79 : f32 to vector<8x32xf32>
    %119 = arith.addf %118, %117 : vector<8x32xf32>
    %120 = arith.divf %118, %119 : vector<8x32xf32>
    %c8_80 = arith.constant 8 : index
    %c0_81 = arith.constant 0 : index
    %121 = vector.load %arg43[%c8_80, %c0_81] : memref<64x32xf32, #tpu.memory_space<vmem>>, vector<8x32xf32>
    %cst_82 = arith.constant dense<0.000000e+00> : vector<8x32xf32>
    %122 = tpu.matmul %82, %11, %cst_82 {dimension_numbers = #tpu.dot_dimension_numbers<[1], [0], [0], [1], [0, 0, 1, 1], [], []>} : vector<8x32xf32>, vector<32x32xf32>, vector<8x32xf32> -> vector<8x32xf32>
    %123 = arith.addf %121, %122 : vector<8x32xf32>
    %124 = arith.negf %123 : vector<8x32xf32>
    %125 = math.exp %124 : vector<8x32xf32>
    %cst_83 = arith.constant 1.000000e+00 : f32
    %126 = vector.broadcast %cst_83 : f32 to vector<8x32xf32>
    %127 = arith.addf %126, %125 : vector<8x32xf32>
    %128 = arith.divf %126, %127 : vector<8x32xf32>
    %c8_84 = arith.constant 8 : index
    %c0_85 = arith.constant 0 : index
    %129 = vector.load %arg44[%c8_84, %c0_85] : memref<64x32xf32, #tpu.memory_space<vmem>>, vector<8x32xf32>
    %cst_86 = arith.constant dense<0.000000e+00> : vector<8x32xf32>
    %130 = tpu.matmul %82, %12, %cst_86 {dimension_numbers = #tpu.dot_dimension_numbers<[1], [0], [0], [1], [0, 0, 1, 1], [], []>} : vector<8x32xf32>, vector<32x32xf32>, vector<8x32xf32> -> vector<8x32xf32>
    %131 = vector.broadcast %17 : vector<1x32xf32> to vector<8x32xf32>
    %132 = arith.addf %130, %131 : vector<8x32xf32>
    %133 = arith.mulf %120, %132 : vector<8x32xf32>
    %134 = arith.addf %129, %133 : vector<8x32xf32>
    %135 = math.tanh %134 : vector<8x32xf32>
    %cst_87 = arith.constant 1.000000e+00 : f32
    %136 = vector.broadcast %cst_87 : f32 to vector<8x32xf32>
    %137 = arith.subf %136, %128 : vector<8x32xf32>
    %138 = arith.mulf %137, %135 : vector<8x32xf32>
    %139 = arith.mulf %128, %82 : vector<8x32xf32>
    %140 = arith.addf %138, %139 : vector<8x32xf32>
    %c8_88 = arith.constant 8 : index
    %c0_89 = arith.constant 0 : index
    %141 = vector.load %arg48[%c8_88, %c0_89] : memref<64x32xf32, #tpu.memory_space<vmem>>, vector<8x32xf32>
    tpu.vector_store %arg48[%c8_88, %c0_89], %140 {strides = array<i32>} : memref<64x32xf32, #tpu.memory_space<vmem>>, vector<8x32xf32>,
    %c48 = arith.constant 48 : index
    %c0_90 = arith.constant 0 : index
    %142 = vector.load %arg45[%c48, %c0_90] : memref<64x32xf32, #tpu.memory_space<vmem>>, vector<8x32xf32>
    %cst_91 = arith.constant dense<0.000000e+00> : vector<8x32xf32>
    %143 = tpu.matmul %111, %33, %cst_91 {dimension_numbers = #tpu.dot_dimension_numbers<[1], [0], [0], [1], [0, 0, 1, 1], [], []>} : vector<8x32xf32>, vector<32x32xf32>, vector<8x32xf32> -> vector<8x32xf32>
    %144 = arith.addf %142, %143 : vector<8x32xf32>
    %145 = arith.negf %144 : vector<8x32xf32>
    %146 = math.exp %145 : vector<8x32xf32>
    %cst_92 = arith.constant 1.000000e+00 : f32
    %147 = vector.broadcast %cst_92 : f32 to vector<8x32xf32>
    %148 = arith.addf %147, %146 : vector<8x32xf32>
    %149 = arith.divf %147, %148 : vector<8x32xf32>
    %c48_93 = arith.constant 48 : index
    %c0_94 = arith.constant 0 : index
    %150 = vector.load %arg46[%c48_93, %c0_94] : memref<64x32xf32, #tpu.memory_space<vmem>>, vector<8x32xf32>
    %cst_95 = arith.constant dense<0.000000e+00> : vector<8x32xf32>
    %151 = tpu.matmul %111, %34, %cst_95 {dimension_numbers = #tpu.dot_dimension_numbers<[1], [0], [0], [1], [0, 0, 1, 1], [], []>} : vector<8x32xf32>, vector<32x32xf32>, vector<8x32xf32> -> vector<8x32xf32>
    %152 = arith.addf %150, %151 : vector<8x32xf32>
    %153 = arith.negf %152 : vector<8x32xf32>
    %154 = math.exp %153 : vector<8x32xf32>
    %cst_96 = arith.constant 1.000000e+00 : f32
    %155 = vector.broadcast %cst_96 : f32 to vector<8x32xf32>
    %156 = arith.addf %155, %154 : vector<8x32xf32>
    %157 = arith.divf %155, %156 : vector<8x32xf32>
    %c48_97 = arith.constant 48 : index
    %c0_98 = arith.constant 0 : index
    %158 = vector.load %arg47[%c48_97, %c0_98] : memref<64x32xf32, #tpu.memory_space<vmem>>, vector<8x32xf32>
    %cst_99 = arith.constant dense<0.000000e+00> : vector<8x32xf32>
    %159 = tpu.matmul %111, %35, %cst_99 {dimension_numbers = #tpu.dot_dimension_numbers<[1], [0], [0], [1], [0, 0, 1, 1], [], []>} : vector<8x32xf32>, vector<32x32xf32>, vector<8x32xf32> -> vector<8x32xf32>
    %160 = vector.broadcast %40 : vector<1x32xf32> to vector<8x32xf32>
    %161 = arith.addf %159, %160 : vector<8x32xf32>
    %162 = arith.mulf %149, %161 : vector<8x32xf32>
    %163 = arith.addf %158, %162 : vector<8x32xf32>
    %164 = math.tanh %163 : vector<8x32xf32>
    %cst_100 = arith.constant 1.000000e+00 : f32
    %165 = vector.broadcast %cst_100 : f32 to vector<8x32xf32>
    %166 = arith.subf %165, %157 : vector<8x32xf32>
    %167 = arith.mulf %166, %164 : vector<8x32xf32>
    %168 = arith.mulf %157, %111 : vector<8x32xf32>
    %169 = arith.addf %167, %168 : vector<8x32xf32>
    %c48_101 = arith.constant 48 : index
    %c0_102 = arith.constant 0 : index
    %170 = vector.load %arg49[%c48_101, %c0_102] : memref<64x32xf32, #tpu.memory_space<vmem>>, vector<8x32xf32>
    tpu.vector_store %arg49[%c48_101, %c0_102], %169 {strides = array<i32>} : memref<64x32xf32, #tpu.memory_space<vmem>>, vector<8x32xf32>,
    %c16 = arith.constant 16 : index
    %c0_103 = arith.constant 0 : index
    %171 = vector.load %arg42[%c16, %c0_103] : memref<64x32xf32, #tpu.memory_space<vmem>>, vector<8x32xf32>
    %cst_104 = arith.constant dense<0.000000e+00> : vector<8x32xf32>
    %172 = tpu.matmul %140, %10, %cst_104 {dimension_numbers = #tpu.dot_dimension_numbers<[1], [0], [0], [1], [0, 0, 1, 1], [], []>} : vector<8x32xf32>, vector<32x32xf32>, vector<8x32xf32> -> vector<8x32xf32>
    %173 = arith.addf %171, %172 : vector<8x32xf32>
    %174 = arith.negf %173 : vector<8x32xf32>
    %175 = math.exp %174 : vector<8x32xf32>
    %cst_105 = arith.constant 1.000000e+00 : f32
    %176 = vector.broadcast %cst_105 : f32 to vector<8x32xf32>
    %177 = arith.addf %176, %175 : vector<8x32xf32>
    %178 = arith.divf %176, %177 : vector<8x32xf32>
    %c16_106 = arith.constant 16 : index
    %c0_107 = arith.constant 0 : index
    %179 = vector.load %arg43[%c16_106, %c0_107] : memref<64x32xf32, #tpu.memory_space<vmem>>, vector<8x32xf32>
    %cst_108 = arith.constant dense<0.000000e+00> : vector<8x32xf32>
    %180 = tpu.matmul %140, %11, %cst_108 {dimension_numbers = #tpu.dot_dimension_numbers<[1], [0], [0], [1], [0, 0, 1, 1], [], []>} : vector<8x32xf32>, vector<32x32xf32>, vector<8x32xf32> -> vector<8x32xf32>
    %181 = arith.addf %179, %180 : vector<8x32xf32>
    %182 = arith.negf %181 : vector<8x32xf32>
    %183 = math.exp %182 : vector<8x32xf32>
    %cst_109 = arith.constant 1.000000e+00 : f32
    %184 = vector.broadcast %cst_109 : f32 to vector<8x32xf32>
    %185 = arith.addf %184, %183 : vector<8x32xf32>
    %186 = arith.divf %184, %185 : vector<8x32xf32>
    %c16_110 = arith.constant 16 : index
    %c0_111 = arith.constant 0 : index
    %187 = vector.load %arg44[%c16_110, %c0_111] : memref<64x32xf32, #tpu.memory_space<vmem>>, vector<8x32xf32>
    %cst_112 = arith.constant dense<0.000000e+00> : vector<8x32xf32>
    %188 = tpu.matmul %140, %12, %cst_112 {dimension_numbers = #tpu.dot_dimension_numbers<[1], [0], [0], [1], [0, 0, 1, 1], [], []>} : vector<8x32xf32>, vector<32x32xf32>, vector<8x32xf32> -> vector<8x32xf32>
    %189 = vector.broadcast %17 : vector<1x32xf32> to vector<8x32xf32>
    %190 = arith.addf %188, %189 : vector<8x32xf32>
    %191 = arith.mulf %178, %190 : vector<8x32xf32>
    %192 = arith.addf %187, %191 : vector<8x32xf32>
    %193 = math.tanh %192 : vector<8x32xf32>
    %cst_113 = arith.constant 1.000000e+00 : f32
    %194 = vector.broadcast %cst_113 : f32 to vector<8x32xf32>
    %195 = arith.subf %194, %186 : vector<8x32xf32>
    %196 = arith.mulf %195, %193 : vector<8x32xf32>
    %197 = arith.mulf %186, %140 : vector<8x32xf32>
    %198 = arith.addf %196, %197 : vector<8x32xf32>
    %c16_114 = arith.constant 16 : index
    %c0_115 = arith.constant 0 : index
    %199 = vector.load %arg48[%c16_114, %c0_115] : memref<64x32xf32, #tpu.memory_space<vmem>>, vector<8x32xf32>
    tpu.vector_store %arg48[%c16_114, %c0_115], %198 {strides = array<i32>} : memref<64x32xf32, #tpu.memory_space<vmem>>, vector<8x32xf32>,
    %c40 = arith.constant 40 : index
    %c0_116 = arith.constant 0 : index
    %200 = vector.load %arg45[%c40, %c0_116] : memref<64x32xf32, #tpu.memory_space<vmem>>, vector<8x32xf32>
    %cst_117 = arith.constant dense<0.000000e+00> : vector<8x32xf32>
    %201 = tpu.matmul %169, %33, %cst_117 {dimension_numbers = #tpu.dot_dimension_numbers<[1], [0], [0], [1], [0, 0, 1, 1], [], []>} : vector<8x32xf32>, vector<32x32xf32>, vector<8x32xf32> -> vector<8x32xf32>
    %202 = arith.addf %200, %201 : vector<8x32xf32>
    %203 = arith.negf %202 : vector<8x32xf32>
    %204 = math.exp %203 : vector<8x32xf32>
    %cst_118 = arith.constant 1.000000e+00 : f32
    %205 = vector.broadcast %cst_118 : f32 to vector<8x32xf32>
    %206 = arith.addf %205, %204 : vector<8x32xf32>
    %207 = arith.divf %205, %206 : vector<8x32xf32>
    %c40_119 = arith.constant 40 : index
    %c0_120 = arith.constant 0 : index
    %208 = vector.load %arg46[%c40_119, %c0_120] : memref<64x32xf32, #tpu.memory_space<vmem>>, vector<8x32xf32>
    %cst_121 = arith.constant dense<0.000000e+00> : vector<8x32xf32>
    %209 = tpu.matmul %169, %34, %cst_121 {dimension_numbers = #tpu.dot_dimension_numbers<[1], [0], [0], [1], [0, 0, 1, 1], [], []>} : vector<8x32xf32>, vector<32x32xf32>, vector<8x32xf32> -> vector<8x32xf32>
    %210 = arith.addf %208, %209 : vector<8x32xf32>
    %211 = arith.negf %210 : vector<8x32xf32>
    %212 = math.exp %211 : vector<8x32xf32>
    %cst_122 = arith.constant 1.000000e+00 : f32
    %213 = vector.broadcast %cst_122 : f32 to vector<8x32xf32>
    %214 = arith.addf %213, %212 : vector<8x32xf32>
    %215 = arith.divf %213, %214 : vector<8x32xf32>
    %c40_123 = arith.constant 40 : index
    %c0_124 = arith.constant 0 : index
    %216 = vector.load %arg47[%c40_123, %c0_124] : memref<64x32xf32, #tpu.memory_space<vmem>>, vector<8x32xf32>
    %cst_125 = arith.constant dense<0.000000e+00> : vector<8x32xf32>
    %217 = tpu.matmul %169, %35, %cst_125 {dimension_numbers = #tpu.dot_dimension_numbers<[1], [0], [0], [1], [0, 0, 1, 1], [], []>} : vector<8x32xf32>, vector<32x32xf32>, vector<8x32xf32> -> vector<8x32xf32>
    %218 = vector.broadcast %40 : vector<1x32xf32> to vector<8x32xf32>
    %219 = arith.addf %217, %218 : vector<8x32xf32>
    %220 = arith.mulf %207, %219 : vector<8x32xf32>
    %221 = arith.addf %216, %220 : vector<8x32xf32>
    %222 = math.tanh %221 : vector<8x32xf32>
    %cst_126 = arith.constant 1.000000e+00 : f32
    %223 = vector.broadcast %cst_126 : f32 to vector<8x32xf32>
    %224 = arith.subf %223, %215 : vector<8x32xf32>
    %225 = arith.mulf %224, %222 : vector<8x32xf32>
    %226 = arith.mulf %215, %169 : vector<8x32xf32>
    %227 = arith.addf %225, %226 : vector<8x32xf32>
    %c40_127 = arith.constant 40 : index
    %c0_128 = arith.constant 0 : index
    %228 = vector.load %arg49[%c40_127, %c0_128] : memref<64x32xf32, #tpu.memory_space<vmem>>, vector<8x32xf32>
    tpu.vector_store %arg49[%c40_127, %c0_128], %227 {strides = array<i32>} : memref<64x32xf32, #tpu.memory_space<vmem>>, vector<8x32xf32>,
    %c24 = arith.constant 24 : index
    %c0_129 = arith.constant 0 : index
    %229 = vector.load %arg42[%c24, %c0_129] : memref<64x32xf32, #tpu.memory_space<vmem>>, vector<8x32xf32>
    %cst_130 = arith.constant dense<0.000000e+00> : vector<8x32xf32>
    %230 = tpu.matmul %198, %10, %cst_130 {dimension_numbers = #tpu.dot_dimension_numbers<[1], [0], [0], [1], [0, 0, 1, 1], [], []>} : vector<8x32xf32>, vector<32x32xf32>, vector<8x32xf32> -> vector<8x32xf32>
    %231 = arith.addf %229, %230 : vector<8x32xf32>
    %232 = arith.negf %231 : vector<8x32xf32>
    %233 = math.exp %232 : vector<8x32xf32>
    %cst_131 = arith.constant 1.000000e+00 : f32
    %234 = vector.broadcast %cst_131 : f32 to vector<8x32xf32>
    %235 = arith.addf %234, %233 : vector<8x32xf32>
    %236 = arith.divf %234, %235 : vector<8x32xf32>
    %c24_132 = arith.constant 24 : index
    %c0_133 = arith.constant 0 : index
    %237 = vector.load %arg43[%c24_132, %c0_133] : memref<64x32xf32, #tpu.memory_space<vmem>>, vector<8x32xf32>
    %cst_134 = arith.constant dense<0.000000e+00> : vector<8x32xf32>
    %238 = tpu.matmul %198, %11, %cst_134 {dimension_numbers = #tpu.dot_dimension_numbers<[1], [0], [0], [1], [0, 0, 1, 1], [], []>} : vector<8x32xf32>, vector<32x32xf32>, vector<8x32xf32> -> vector<8x32xf32>
    %239 = arith.addf %237, %238 : vector<8x32xf32>
    %240 = arith.negf %239 : vector<8x32xf32>
    %241 = math.exp %240 : vector<8x32xf32>
    %cst_135 = arith.constant 1.000000e+00 : f32
    %242 = vector.broadcast %cst_135 : f32 to vector<8x32xf32>
    %243 = arith.addf %242, %241 : vector<8x32xf32>
    %244 = arith.divf %242, %243 : vector<8x32xf32>
    %c24_136 = arith.constant 24 : index
    %c0_137 = arith.constant 0 : index
    %245 = vector.load %arg44[%c24_136, %c0_137] : memref<64x32xf32, #tpu.memory_space<vmem>>, vector<8x32xf32>
    %cst_138 = arith.constant dense<0.000000e+00> : vector<8x32xf32>
    %246 = tpu.matmul %198, %12, %cst_138 {dimension_numbers = #tpu.dot_dimension_numbers<[1], [0], [0], [1], [0, 0, 1, 1], [], []>} : vector<8x32xf32>, vector<32x32xf32>, vector<8x32xf32> -> vector<8x32xf32>
    %247 = vector.broadcast %17 : vector<1x32xf32> to vector<8x32xf32>
    %248 = arith.addf %246, %247 : vector<8x32xf32>
    %249 = arith.mulf %236, %248 : vector<8x32xf32>
    %250 = arith.addf %245, %249 : vector<8x32xf32>
    %251 = math.tanh %250 : vector<8x32xf32>
    %cst_139 = arith.constant 1.000000e+00 : f32
    %252 = vector.broadcast %cst_139 : f32 to vector<8x32xf32>
    %253 = arith.subf %252, %244 : vector<8x32xf32>
    %254 = arith.mulf %253, %251 : vector<8x32xf32>
    %255 = arith.mulf %244, %198 : vector<8x32xf32>
    %256 = arith.addf %254, %255 : vector<8x32xf32>
    %c24_140 = arith.constant 24 : index
    %c0_141 = arith.constant 0 : index
    %257 = vector.load %arg48[%c24_140, %c0_141] : memref<64x32xf32, #tpu.memory_space<vmem>>, vector<8x32xf32>
    tpu.vector_store %arg48[%c24_140, %c0_141], %256 {strides = array<i32>} : memref<64x32xf32, #tpu.memory_space<vmem>>, vector<8x32xf32>,
    %c32 = arith.constant 32 : index
    %c0_142 = arith.constant 0 : index
    %258 = vector.load %arg45[%c32, %c0_142] : memref<64x32xf32, #tpu.memory_space<vmem>>, vector<8x32xf32>
    %cst_143 = arith.constant dense<0.000000e+00> : vector<8x32xf32>
    %259 = tpu.matmul %227, %33, %cst_143 {dimension_numbers = #tpu.dot_dimension_numbers<[1], [0], [0], [1], [0, 0, 1, 1], [], []>} : vector<8x32xf32>, vector<32x32xf32>, vector<8x32xf32> -> vector<8x32xf32>
    %260 = arith.addf %258, %259 : vector<8x32xf32>
    %261 = arith.negf %260 : vector<8x32xf32>
    %262 = math.exp %261 : vector<8x32xf32>
    %cst_144 = arith.constant 1.000000e+00 : f32
    %263 = vector.broadcast %cst_144 : f32 to vector<8x32xf32>
    %264 = arith.addf %263, %262 : vector<8x32xf32>
    %265 = arith.divf %263, %264 : vector<8x32xf32>
    %c32_145 = arith.constant 32 : index
    %c0_146 = arith.constant 0 : index
    %266 = vector.load %arg46[%c32_145, %c0_146] : memref<64x32xf32, #tpu.memory_space<vmem>>, vector<8x32xf32>
    %cst_147 = arith.constant dense<0.000000e+00> : vector<8x32xf32>
    %267 = tpu.matmul %227, %34, %cst_147 {dimension_numbers = #tpu.dot_dimension_numbers<[1], [0], [0], [1], [0, 0, 1, 1], [], []>} : vector<8x32xf32>, vector<32x32xf32>, vector<8x32xf32> -> vector<8x32xf32>
    %268 = arith.addf %266, %267 : vector<8x32xf32>
    %269 = arith.negf %268 : vector<8x32xf32>
    %270 = math.exp %269 : vector<8x32xf32>
    %cst_148 = arith.constant 1.000000e+00 : f32
    %271 = vector.broadcast %cst_148 : f32 to vector<8x32xf32>
    %272 = arith.addf %271, %270 : vector<8x32xf32>
    %273 = arith.divf %271, %272 : vector<8x32xf32>
    %c32_149 = arith.constant 32 : index
    %c0_150 = arith.constant 0 : index
    %274 = vector.load %arg47[%c32_149, %c0_150] : memref<64x32xf32, #tpu.memory_space<vmem>>, vector<8x32xf32>
    %cst_151 = arith.constant dense<0.000000e+00> : vector<8x32xf32>
    %275 = tpu.matmul %227, %35, %cst_151 {dimension_numbers = #tpu.dot_dimension_numbers<[1], [0], [0], [1], [0, 0, 1, 1], [], []>} : vector<8x32xf32>, vector<32x32xf32>, vector<8x32xf32> -> vector<8x32xf32>
    %276 = vector.broadcast %40 : vector<1x32xf32> to vector<8x32xf32>
    %277 = arith.addf %275, %276 : vector<8x32xf32>
    %278 = arith.mulf %265, %277 : vector<8x32xf32>
    %279 = arith.addf %274, %278 : vector<8x32xf32>
    %280 = math.tanh %279 : vector<8x32xf32>
    %cst_152 = arith.constant 1.000000e+00 : f32
    %281 = vector.broadcast %cst_152 : f32 to vector<8x32xf32>
    %282 = arith.subf %281, %273 : vector<8x32xf32>
    %283 = arith.mulf %282, %280 : vector<8x32xf32>
    %284 = arith.mulf %273, %227 : vector<8x32xf32>
    %285 = arith.addf %283, %284 : vector<8x32xf32>
    %c32_153 = arith.constant 32 : index
    %c0_154 = arith.constant 0 : index
    %286 = vector.load %arg49[%c32_153, %c0_154] : memref<64x32xf32, #tpu.memory_space<vmem>>, vector<8x32xf32>
    tpu.vector_store %arg49[%c32_153, %c0_154], %285 {strides = array<i32>} : memref<64x32xf32, #tpu.memory_space<vmem>>, vector<8x32xf32>,
    %c32_155 = arith.constant 32 : index
    %c0_156 = arith.constant 0 : index
    %287 = vector.load %arg42[%c32_155, %c0_156] : memref<64x32xf32, #tpu.memory_space<vmem>>, vector<8x32xf32>
    %cst_157 = arith.constant dense<0.000000e+00> : vector<8x32xf32>
    %288 = tpu.matmul %256, %10, %cst_157 {dimension_numbers = #tpu.dot_dimension_numbers<[1], [0], [0], [1], [0, 0, 1, 1], [], []>} : vector<8x32xf32>, vector<32x32xf32>, vector<8x32xf32> -> vector<8x32xf32>
    %289 = arith.addf %287, %288 : vector<8x32xf32>
    %290 = arith.negf %289 : vector<8x32xf32>
    %291 = math.exp %290 : vector<8x32xf32>
    %cst_158 = arith.constant 1.000000e+00 : f32
    %292 = vector.broadcast %cst_158 : f32 to vector<8x32xf32>
    %293 = arith.addf %292, %291 : vector<8x32xf32>
    %294 = arith.divf %292, %293 : vector<8x32xf32>
    %c32_159 = arith.constant 32 : index
    %c0_160 = arith.constant 0 : index
    %295 = vector.load %arg43[%c32_159, %c0_160] : memref<64x32xf32, #tpu.memory_space<vmem>>, vector<8x32xf32>
    %cst_161 = arith.constant dense<0.000000e+00> : vector<8x32xf32>
    %296 = tpu.matmul %256, %11, %cst_161 {dimension_numbers = #tpu.dot_dimension_numbers<[1], [0], [0], [1], [0, 0, 1, 1], [], []>} : vector<8x32xf32>, vector<32x32xf32>, vector<8x32xf32> -> vector<8x32xf32>
    %297 = arith.addf %295, %296 : vector<8x32xf32>
    %298 = arith.negf %297 : vector<8x32xf32>
    %299 = math.exp %298 : vector<8x32xf32>
    %cst_162 = arith.constant 1.000000e+00 : f32
    %300 = vector.broadcast %cst_162 : f32 to vector<8x32xf32>
    %301 = arith.addf %300, %299 : vector<8x32xf32>
    %302 = arith.divf %300, %301 : vector<8x32xf32>
    %c32_163 = arith.constant 32 : index
    %c0_164 = arith.constant 0 : index
    %303 = vector.load %arg44[%c32_163, %c0_164] : memref<64x32xf32, #tpu.memory_space<vmem>>, vector<8x32xf32>
    %cst_165 = arith.constant dense<0.000000e+00> : vector<8x32xf32>
    %304 = tpu.matmul %256, %12, %cst_165 {dimension_numbers = #tpu.dot_dimension_numbers<[1], [0], [0], [1], [0, 0, 1, 1], [], []>} : vector<8x32xf32>, vector<32x32xf32>, vector<8x32xf32> -> vector<8x32xf32>
    %305 = vector.broadcast %17 : vector<1x32xf32> to vector<8x32xf32>
    %306 = arith.addf %304, %305 : vector<8x32xf32>
    %307 = arith.mulf %294, %306 : vector<8x32xf32>
    %308 = arith.addf %303, %307 : vector<8x32xf32>
    %309 = math.tanh %308 : vector<8x32xf32>
    %cst_166 = arith.constant 1.000000e+00 : f32
    %310 = vector.broadcast %cst_166 : f32 to vector<8x32xf32>
    %311 = arith.subf %310, %302 : vector<8x32xf32>
    %312 = arith.mulf %311, %309 : vector<8x32xf32>
    %313 = arith.mulf %302, %256 : vector<8x32xf32>
    %314 = arith.addf %312, %313 : vector<8x32xf32>
    %c32_167 = arith.constant 32 : index
    %c0_168 = arith.constant 0 : index
    %315 = vector.load %arg48[%c32_167, %c0_168] : memref<64x32xf32, #tpu.memory_space<vmem>>, vector<8x32xf32>
    tpu.vector_store %arg48[%c32_167, %c0_168], %314 {strides = array<i32>} : memref<64x32xf32, #tpu.memory_space<vmem>>, vector<8x32xf32>,
    %c24_169 = arith.constant 24 : index
    %c0_170 = arith.constant 0 : index
    %316 = vector.load %arg45[%c24_169, %c0_170] : memref<64x32xf32, #tpu.memory_space<vmem>>, vector<8x32xf32>
    %cst_171 = arith.constant dense<0.000000e+00> : vector<8x32xf32>
    %317 = tpu.matmul %285, %33, %cst_171 {dimension_numbers = #tpu.dot_dimension_numbers<[1], [0], [0], [1], [0, 0, 1, 1], [], []>} : vector<8x32xf32>, vector<32x32xf32>, vector<8x32xf32> -> vector<8x32xf32>
    %318 = arith.addf %316, %317 : vector<8x32xf32>
    %319 = arith.negf %318 : vector<8x32xf32>
    %320 = math.exp %319 : vector<8x32xf32>
    %cst_172 = arith.constant 1.000000e+00 : f32
    %321 = vector.broadcast %cst_172 : f32 to vector<8x32xf32>
    %322 = arith.addf %321, %320 : vector<8x32xf32>
    %323 = arith.divf %321, %322 : vector<8x32xf32>
    %c24_173 = arith.constant 24 : index
    %c0_174 = arith.constant 0 : index
    %324 = vector.load %arg46[%c24_173, %c0_174] : memref<64x32xf32, #tpu.memory_space<vmem>>, vector<8x32xf32>
    %cst_175 = arith.constant dense<0.000000e+00> : vector<8x32xf32>
    %325 = tpu.matmul %285, %34, %cst_175 {dimension_numbers = #tpu.dot_dimension_numbers<[1], [0], [0], [1], [0, 0, 1, 1], [], []>} : vector<8x32xf32>, vector<32x32xf32>, vector<8x32xf32> -> vector<8x32xf32>
    %326 = arith.addf %324, %325 : vector<8x32xf32>
    %327 = arith.negf %326 : vector<8x32xf32>
    %328 = math.exp %327 : vector<8x32xf32>
    %cst_176 = arith.constant 1.000000e+00 : f32
    %329 = vector.broadcast %cst_176 : f32 to vector<8x32xf32>
    %330 = arith.addf %329, %328 : vector<8x32xf32>
    %331 = arith.divf %329, %330 : vector<8x32xf32>
    %c24_177 = arith.constant 24 : index
    %c0_178 = arith.constant 0 : index
    %332 = vector.load %arg47[%c24_177, %c0_178] : memref<64x32xf32, #tpu.memory_space<vmem>>, vector<8x32xf32>
    %cst_179 = arith.constant dense<0.000000e+00> : vector<8x32xf32>
    %333 = tpu.matmul %285, %35, %cst_179 {dimension_numbers = #tpu.dot_dimension_numbers<[1], [0], [0], [1], [0, 0, 1, 1], [], []>} : vector<8x32xf32>, vector<32x32xf32>, vector<8x32xf32> -> vector<8x32xf32>
    %334 = vector.broadcast %40 : vector<1x32xf32> to vector<8x32xf32>
    %335 = arith.addf %333, %334 : vector<8x32xf32>
    %336 = arith.mulf %323, %335 : vector<8x32xf32>
    %337 = arith.addf %332, %336 : vector<8x32xf32>
    %338 = math.tanh %337 : vector<8x32xf32>
    %cst_180 = arith.constant 1.000000e+00 : f32
    %339 = vector.broadcast %cst_180 : f32 to vector<8x32xf32>
    %340 = arith.subf %339, %331 : vector<8x32xf32>
    %341 = arith.mulf %340, %338 : vector<8x32xf32>
    %342 = arith.mulf %331, %285 : vector<8x32xf32>
    %343 = arith.addf %341, %342 : vector<8x32xf32>
    %c24_181 = arith.constant 24 : index
    %c0_182 = arith.constant 0 : index
    %344 = vector.load %arg49[%c24_181, %c0_182] : memref<64x32xf32, #tpu.memory_space<vmem>>, vector<8x32xf32>
    tpu.vector_store %arg49[%c24_181, %c0_182], %343 {strides = array<i32>} : memref<64x32xf32, #tpu.memory_space<vmem>>, vector<8x32xf32>,
    %c40_183 = arith.constant 40 : index
    %c0_184 = arith.constant 0 : index
    %345 = vector.load %arg42[%c40_183, %c0_184] : memref<64x32xf32, #tpu.memory_space<vmem>>, vector<8x32xf32>
    %cst_185 = arith.constant dense<0.000000e+00> : vector<8x32xf32>
    %346 = tpu.matmul %314, %10, %cst_185 {dimension_numbers = #tpu.dot_dimension_numbers<[1], [0], [0], [1], [0, 0, 1, 1], [], []>} : vector<8x32xf32>, vector<32x32xf32>, vector<8x32xf32> -> vector<8x32xf32>
    %347 = arith.addf %345, %346 : vector<8x32xf32>
    %348 = arith.negf %347 : vector<8x32xf32>
    %349 = math.exp %348 : vector<8x32xf32>
    %cst_186 = arith.constant 1.000000e+00 : f32
    %350 = vector.broadcast %cst_186 : f32 to vector<8x32xf32>
    %351 = arith.addf %350, %349 : vector<8x32xf32>
    %352 = arith.divf %350, %351 : vector<8x32xf32>
    %c40_187 = arith.constant 40 : index
    %c0_188 = arith.constant 0 : index
    %353 = vector.load %arg43[%c40_187, %c0_188] : memref<64x32xf32, #tpu.memory_space<vmem>>, vector<8x32xf32>
    %cst_189 = arith.constant dense<0.000000e+00> : vector<8x32xf32>
    %354 = tpu.matmul %314, %11, %cst_189 {dimension_numbers = #tpu.dot_dimension_numbers<[1], [0], [0], [1], [0, 0, 1, 1], [], []>} : vector<8x32xf32>, vector<32x32xf32>, vector<8x32xf32> -> vector<8x32xf32>
    %355 = arith.addf %353, %354 : vector<8x32xf32>
    %356 = arith.negf %355 : vector<8x32xf32>
    %357 = math.exp %356 : vector<8x32xf32>
    %cst_190 = arith.constant 1.000000e+00 : f32
    %358 = vector.broadcast %cst_190 : f32 to vector<8x32xf32>
    %359 = arith.addf %358, %357 : vector<8x32xf32>
    %360 = arith.divf %358, %359 : vector<8x32xf32>
    %c40_191 = arith.constant 40 : index
    %c0_192 = arith.constant 0 : index
    %361 = vector.load %arg44[%c40_191, %c0_192] : memref<64x32xf32, #tpu.memory_space<vmem>>, vector<8x32xf32>
    %cst_193 = arith.constant dense<0.000000e+00> : vector<8x32xf32>
    %362 = tpu.matmul %314, %12, %cst_193 {dimension_numbers = #tpu.dot_dimension_numbers<[1], [0], [0], [1], [0, 0, 1, 1], [], []>} : vector<8x32xf32>, vector<32x32xf32>, vector<8x32xf32> -> vector<8x32xf32>
    %363 = vector.broadcast %17 : vector<1x32xf32> to vector<8x32xf32>
    %364 = arith.addf %362, %363 : vector<8x32xf32>
    %365 = arith.mulf %352, %364 : vector<8x32xf32>
    %366 = arith.addf %361, %365 : vector<8x32xf32>
    %367 = math.tanh %366 : vector<8x32xf32>
    %cst_194 = arith.constant 1.000000e+00 : f32
    %368 = vector.broadcast %cst_194 : f32 to vector<8x32xf32>
    %369 = arith.subf %368, %360 : vector<8x32xf32>
    %370 = arith.mulf %369, %367 : vector<8x32xf32>
    %371 = arith.mulf %360, %314 : vector<8x32xf32>
    %372 = arith.addf %370, %371 : vector<8x32xf32>
    %c40_195 = arith.constant 40 : index
    %c0_196 = arith.constant 0 : index
    %373 = vector.load %arg48[%c40_195, %c0_196] : memref<64x32xf32, #tpu.memory_space<vmem>>, vector<8x32xf32>
    tpu.vector_store %arg48[%c40_195, %c0_196], %372 {strides = array<i32>} : memref<64x32xf32, #tpu.memory_space<vmem>>, vector<8x32xf32>,
    %c16_197 = arith.constant 16 : index
    %c0_198 = arith.constant 0 : index
    %374 = vector.load %arg45[%c16_197, %c0_198] : memref<64x32xf32, #tpu.memory_space<vmem>>, vector<8x32xf32>
    %cst_199 = arith.constant dense<0.000000e+00> : vector<8x32xf32>
    %375 = tpu.matmul %343, %33, %cst_199 {dimension_numbers = #tpu.dot_dimension_numbers<[1], [0], [0], [1], [0, 0, 1, 1], [], []>} : vector<8x32xf32>, vector<32x32xf32>, vector<8x32xf32> -> vector<8x32xf32>
    %376 = arith.addf %374, %375 : vector<8x32xf32>
    %377 = arith.negf %376 : vector<8x32xf32>
    %378 = math.exp %377 : vector<8x32xf32>
    %cst_200 = arith.constant 1.000000e+00 : f32
    %379 = vector.broadcast %cst_200 : f32 to vector<8x32xf32>
    %380 = arith.addf %379, %378 : vector<8x32xf32>
    %381 = arith.divf %379, %380 : vector<8x32xf32>
    %c16_201 = arith.constant 16 : index
    %c0_202 = arith.constant 0 : index
    %382 = vector.load %arg46[%c16_201, %c0_202] : memref<64x32xf32, #tpu.memory_space<vmem>>, vector<8x32xf32>
    %cst_203 = arith.constant dense<0.000000e+00> : vector<8x32xf32>
    %383 = tpu.matmul %343, %34, %cst_203 {dimension_numbers = #tpu.dot_dimension_numbers<[1], [0], [0], [1], [0, 0, 1, 1], [], []>} : vector<8x32xf32>, vector<32x32xf32>, vector<8x32xf32> -> vector<8x32xf32>
    %384 = arith.addf %382, %383 : vector<8x32xf32>
    %385 = arith.negf %384 : vector<8x32xf32>
    %386 = math.exp %385 : vector<8x32xf32>
    %cst_204 = arith.constant 1.000000e+00 : f32
    %387 = vector.broadcast %cst_204 : f32 to vector<8x32xf32>
    %388 = arith.addf %387, %386 : vector<8x32xf32>
    %389 = arith.divf %387, %388 : vector<8x32xf32>
    %c16_205 = arith.constant 16 : index
    %c0_206 = arith.constant 0 : index
    %390 = vector.load %arg47[%c16_205, %c0_206] : memref<64x32xf32, #tpu.memory_space<vmem>>, vector<8x32xf32>
    %cst_207 = arith.constant dense<0.000000e+00> : vector<8x32xf32>
    %391 = tpu.matmul %343, %35, %cst_207 {dimension_numbers = #tpu.dot_dimension_numbers<[1], [0], [0], [1], [0, 0, 1, 1], [], []>} : vector<8x32xf32>, vector<32x32xf32>, vector<8x32xf32> -> vector<8x32xf32>
    %392 = vector.broadcast %40 : vector<1x32xf32> to vector<8x32xf32>
    %393 = arith.addf %391, %392 : vector<8x32xf32>
    %394 = arith.mulf %381, %393 : vector<8x32xf32>
    %395 = arith.addf %390, %394 : vector<8x32xf32>
    %396 = math.tanh %395 : vector<8x32xf32>
    %cst_208 = arith.constant 1.000000e+00 : f32
    %397 = vector.broadcast %cst_208 : f32 to vector<8x32xf32>
    %398 = arith.subf %397, %389 : vector<8x32xf32>
    %399 = arith.mulf %398, %396 : vector<8x32xf32>
    %400 = arith.mulf %389, %343 : vector<8x32xf32>
    %401 = arith.addf %399, %400 : vector<8x32xf32>
    %c16_209 = arith.constant 16 : index
    %c0_210 = arith.constant 0 : index
    %402 = vector.load %arg49[%c16_209, %c0_210] : memref<64x32xf32, #tpu.memory_space<vmem>>, vector<8x32xf32>
    tpu.vector_store %arg49[%c16_209, %c0_210], %401 {strides = array<i32>} : memref<64x32xf32, #tpu.memory_space<vmem>>, vector<8x32xf32>,
    %c48_211 = arith.constant 48 : index
    %c0_212 = arith.constant 0 : index
    %403 = vector.load %arg42[%c48_211, %c0_212] : memref<64x32xf32, #tpu.memory_space<vmem>>, vector<8x32xf32>
    %cst_213 = arith.constant dense<0.000000e+00> : vector<8x32xf32>
    %404 = tpu.matmul %372, %10, %cst_213 {dimension_numbers = #tpu.dot_dimension_numbers<[1], [0], [0], [1], [0, 0, 1, 1], [], []>} : vector<8x32xf32>, vector<32x32xf32>, vector<8x32xf32> -> vector<8x32xf32>
    %405 = arith.addf %403, %404 : vector<8x32xf32>
    %406 = arith.negf %405 : vector<8x32xf32>
    %407 = math.exp %406 : vector<8x32xf32>
    %cst_214 = arith.constant 1.000000e+00 : f32
    %408 = vector.broadcast %cst_214 : f32 to vector<8x32xf32>
    %409 = arith.addf %408, %407 : vector<8x32xf32>
    %410 = arith.divf %408, %409 : vector<8x32xf32>
    %c48_215 = arith.constant 48 : index
    %c0_216 = arith.constant 0 : index
    %411 = vector.load %arg43[%c48_215, %c0_216] : memref<64x32xf32, #tpu.memory_space<vmem>>, vector<8x32xf32>
    %cst_217 = arith.constant dense<0.000000e+00> : vector<8x32xf32>
    %412 = tpu.matmul %372, %11, %cst_217 {dimension_numbers = #tpu.dot_dimension_numbers<[1], [0], [0], [1], [0, 0, 1, 1], [], []>} : vector<8x32xf32>, vector<32x32xf32>, vector<8x32xf32> -> vector<8x32xf32>
    %413 = arith.addf %411, %412 : vector<8x32xf32>
    %414 = arith.negf %413 : vector<8x32xf32>
    %415 = math.exp %414 : vector<8x32xf32>
    %cst_218 = arith.constant 1.000000e+00 : f32
    %416 = vector.broadcast %cst_218 : f32 to vector<8x32xf32>
    %417 = arith.addf %416, %415 : vector<8x32xf32>
    %418 = arith.divf %416, %417 : vector<8x32xf32>
    %c48_219 = arith.constant 48 : index
    %c0_220 = arith.constant 0 : index
    %419 = vector.load %arg44[%c48_219, %c0_220] : memref<64x32xf32, #tpu.memory_space<vmem>>, vector<8x32xf32>
    %cst_221 = arith.constant dense<0.000000e+00> : vector<8x32xf32>
    %420 = tpu.matmul %372, %12, %cst_221 {dimension_numbers = #tpu.dot_dimension_numbers<[1], [0], [0], [1], [0, 0, 1, 1], [], []>} : vector<8x32xf32>, vector<32x32xf32>, vector<8x32xf32> -> vector<8x32xf32>
    %421 = vector.broadcast %17 : vector<1x32xf32> to vector<8x32xf32>
    %422 = arith.addf %420, %421 : vector<8x32xf32>
    %423 = arith.mulf %410, %422 : vector<8x32xf32>
    %424 = arith.addf %419, %423 : vector<8x32xf32>
    %425 = math.tanh %424 : vector<8x32xf32>
    %cst_222 = arith.constant 1.000000e+00 : f32
    %426 = vector.broadcast %cst_222 : f32 to vector<8x32xf32>
    %427 = arith.subf %426, %418 : vector<8x32xf32>
    %428 = arith.mulf %427, %425 : vector<8x32xf32>
    %429 = arith.mulf %418, %372 : vector<8x32xf32>
    %430 = arith.addf %428, %429 : vector<8x32xf32>
    %c48_223 = arith.constant 48 : index
    %c0_224 = arith.constant 0 : index
    %431 = vector.load %arg48[%c48_223, %c0_224] : memref<64x32xf32, #tpu.memory_space<vmem>>, vector<8x32xf32>
    tpu.vector_store %arg48[%c48_223, %c0_224], %430 {strides = array<i32>} : memref<64x32xf32, #tpu.memory_space<vmem>>, vector<8x32xf32>,
    %c8_225 = arith.constant 8 : index
    %c0_226 = arith.constant 0 : index
    %432 = vector.load %arg45[%c8_225, %c0_226] : memref<64x32xf32, #tpu.memory_space<vmem>>, vector<8x32xf32>
    %cst_227 = arith.constant dense<0.000000e+00> : vector<8x32xf32>
    %433 = tpu.matmul %401, %33, %cst_227 {dimension_numbers = #tpu.dot_dimension_numbers<[1], [0], [0], [1], [0, 0, 1, 1], [], []>} : vector<8x32xf32>, vector<32x32xf32>, vector<8x32xf32> -> vector<8x32xf32>
    %434 = arith.addf %432, %433 : vector<8x32xf32>
    %435 = arith.negf %434 : vector<8x32xf32>
    %436 = math.exp %435 : vector<8x32xf32>
    %cst_228 = arith.constant 1.000000e+00 : f32
    %437 = vector.broadcast %cst_228 : f32 to vector<8x32xf32>
    %438 = arith.addf %437, %436 : vector<8x32xf32>
    %439 = arith.divf %437, %438 : vector<8x32xf32>
    %c8_229 = arith.constant 8 : index
    %c0_230 = arith.constant 0 : index
    %440 = vector.load %arg46[%c8_229, %c0_230] : memref<64x32xf32, #tpu.memory_space<vmem>>, vector<8x32xf32>
    %cst_231 = arith.constant dense<0.000000e+00> : vector<8x32xf32>
    %441 = tpu.matmul %401, %34, %cst_231 {dimension_numbers = #tpu.dot_dimension_numbers<[1], [0], [0], [1], [0, 0, 1, 1], [], []>} : vector<8x32xf32>, vector<32x32xf32>, vector<8x32xf32> -> vector<8x32xf32>
    %442 = arith.addf %440, %441 : vector<8x32xf32>
    %443 = arith.negf %442 : vector<8x32xf32>
    %444 = math.exp %443 : vector<8x32xf32>
    %cst_232 = arith.constant 1.000000e+00 : f32
    %445 = vector.broadcast %cst_232 : f32 to vector<8x32xf32>
    %446 = arith.addf %445, %444 : vector<8x32xf32>
    %447 = arith.divf %445, %446 : vector<8x32xf32>
    %c8_233 = arith.constant 8 : index
    %c0_234 = arith.constant 0 : index
    %448 = vector.load %arg47[%c8_233, %c0_234] : memref<64x32xf32, #tpu.memory_space<vmem>>, vector<8x32xf32>
    %cst_235 = arith.constant dense<0.000000e+00> : vector<8x32xf32>
    %449 = tpu.matmul %401, %35, %cst_235 {dimension_numbers = #tpu.dot_dimension_numbers<[1], [0], [0], [1], [0, 0, 1, 1], [], []>} : vector<8x32xf32>, vector<32x32xf32>, vector<8x32xf32> -> vector<8x32xf32>
    %450 = vector.broadcast %40 : vector<1x32xf32> to vector<8x32xf32>
    %451 = arith.addf %449, %450 : vector<8x32xf32>
    %452 = arith.mulf %439, %451 : vector<8x32xf32>
    %453 = arith.addf %448, %452 : vector<8x32xf32>
    %454 = math.tanh %453 : vector<8x32xf32>
    %cst_236 = arith.constant 1.000000e+00 : f32
    %455 = vector.broadcast %cst_236 : f32 to vector<8x32xf32>
    %456 = arith.subf %455, %447 : vector<8x32xf32>
    %457 = arith.mulf %456, %454 : vector<8x32xf32>
    %458 = arith.mulf %447, %401 : vector<8x32xf32>
    %459 = arith.addf %457, %458 : vector<8x32xf32>
    %c8_237 = arith.constant 8 : index
    %c0_238 = arith.constant 0 : index
    %460 = vector.load %arg49[%c8_237, %c0_238] : memref<64x32xf32, #tpu.memory_space<vmem>>, vector<8x32xf32>
    tpu.vector_store %arg49[%c8_237, %c0_238], %459 {strides = array<i32>} : memref<64x32xf32, #tpu.memory_space<vmem>>, vector<8x32xf32>,
    %c56_239 = arith.constant 56 : index
    %c0_240 = arith.constant 0 : index
    %461 = vector.load %arg42[%c56_239, %c0_240] : memref<64x32xf32, #tpu.memory_space<vmem>>, vector<8x32xf32>
    %cst_241 = arith.constant dense<0.000000e+00> : vector<8x32xf32>
    %462 = tpu.matmul %430, %10, %cst_241 {dimension_numbers = #tpu.dot_dimension_numbers<[1], [0], [0], [1], [0, 0, 1, 1], [], []>} : vector<8x32xf32>, vector<32x32xf32>, vector<8x32xf32> -> vector<8x32xf32>
    %463 = arith.addf %461, %462 : vector<8x32xf32>
    %464 = arith.negf %463 : vector<8x32xf32>
    %465 = math.exp %464 : vector<8x32xf32>
    %cst_242 = arith.constant 1.000000e+00 : f32
    %466 = vector.broadcast %cst_242 : f32 to vector<8x32xf32>
    %467 = arith.addf %466, %465 : vector<8x32xf32>
    %468 = arith.divf %466, %467 : vector<8x32xf32>
    %c56_243 = arith.constant 56 : index
    %c0_244 = arith.constant 0 : index
    %469 = vector.load %arg43[%c56_243, %c0_244] : memref<64x32xf32, #tpu.memory_space<vmem>>, vector<8x32xf32>
    %cst_245 = arith.constant dense<0.000000e+00> : vector<8x32xf32>
    %470 = tpu.matmul %430, %11, %cst_245 {dimension_numbers = #tpu.dot_dimension_numbers<[1], [0], [0], [1], [0, 0, 1, 1], [], []>} : vector<8x32xf32>, vector<32x32xf32>, vector<8x32xf32> -> vector<8x32xf32>
    %471 = arith.addf %469, %470 : vector<8x32xf32>
    %472 = arith.negf %471 : vector<8x32xf32>
    %473 = math.exp %472 : vector<8x32xf32>
    %cst_246 = arith.constant 1.000000e+00 : f32
    %474 = vector.broadcast %cst_246 : f32 to vector<8x32xf32>
    %475 = arith.addf %474, %473 : vector<8x32xf32>
    %476 = arith.divf %474, %475 : vector<8x32xf32>
    %c56_247 = arith.constant 56 : index
    %c0_248 = arith.constant 0 : index
    %477 = vector.load %arg44[%c56_247, %c0_248] : memref<64x32xf32, #tpu.memory_space<vmem>>, vector<8x32xf32>
    %cst_249 = arith.constant dense<0.000000e+00> : vector<8x32xf32>
    %478 = tpu.matmul %430, %12, %cst_249 {dimension_numbers = #tpu.dot_dimension_numbers<[1], [0], [0], [1], [0, 0, 1, 1], [], []>} : vector<8x32xf32>, vector<32x32xf32>, vector<8x32xf32> -> vector<8x32xf32>
    %479 = vector.broadcast %17 : vector<1x32xf32> to vector<8x32xf32>
    %480 = arith.addf %478, %479 : vector<8x32xf32>
    %481 = arith.mulf %468, %480 : vector<8x32xf32>
    %482 = arith.addf %477, %481 : vector<8x32xf32>
    %483 = math.tanh %482 : vector<8x32xf32>
    %cst_250 = arith.constant 1.000000e+00 : f32
    %484 = vector.broadcast %cst_250 : f32 to vector<8x32xf32>
    %485 = arith.subf %484, %476 : vector<8x32xf32>
    %486 = arith.mulf %485, %483 : vector<8x32xf32>
    %487 = arith.mulf %476, %430 : vector<8x32xf32>
    %488 = arith.addf %486, %487 : vector<8x32xf32>
    %c56_251 = arith.constant 56 : index
    %c0_252 = arith.constant 0 : index
    %489 = vector.load %arg48[%c56_251, %c0_252] : memref<64x32xf32, #tpu.memory_space<vmem>>, vector<8x32xf32>
    tpu.vector_store %arg48[%c56_251, %c0_252], %488 {strides = array<i32>} : memref<64x32xf32, #tpu.memory_space<vmem>>, vector<8x32xf32>,
    %c0_253 = arith.constant 0 : index
    %c0_254 = arith.constant 0 : index
    %490 = vector.load %arg45[%c0_253, %c0_254] : memref<64x32xf32, #tpu.memory_space<vmem>>, vector<8x32xf32>
    %cst_255 = arith.constant dense<0.000000e+00> : vector<8x32xf32>
    %491 = tpu.matmul %459, %33, %cst_255 {dimension_numbers = #tpu.dot_dimension_numbers<[1], [0], [0], [1], [0, 0, 1, 1], [], []>} : vector<8x32xf32>, vector<32x32xf32>, vector<8x32xf32> -> vector<8x32xf32>
    %492 = arith.addf %490, %491 : vector<8x32xf32>
    %493 = arith.negf %492 : vector<8x32xf32>
    %494 = math.exp %493 : vector<8x32xf32>
    %cst_256 = arith.constant 1.000000e+00 : f32
    %495 = vector.broadcast %cst_256 : f32 to vector<8x32xf32>
    %496 = arith.addf %495, %494 : vector<8x32xf32>
    %497 = arith.divf %495, %496 : vector<8x32xf32>
    %c0_257 = arith.constant 0 : index
    %c0_258 = arith.constant 0 : index
    %498 = vector.load %arg46[%c0_257, %c0_258] : memref<64x32xf32, #tpu.memory_space<vmem>>, vector<8x32xf32>
    %cst_259 = arith.constant dense<0.000000e+00> : vector<8x32xf32>
    %499 = tpu.matmul %459, %34, %cst_259 {dimension_numbers = #tpu.dot_dimension_numbers<[1], [0], [0], [1], [0, 0, 1, 1], [], []>} : vector<8x32xf32>, vector<32x32xf32>, vector<8x32xf32> -> vector<8x32xf32>
    %500 = arith.addf %498, %499 : vector<8x32xf32>
    %501 = arith.negf %500 : vector<8x32xf32>
    %502 = math.exp %501 : vector<8x32xf32>
    %cst_260 = arith.constant 1.000000e+00 : f32
    %503 = vector.broadcast %cst_260 : f32 to vector<8x32xf32>
    %504 = arith.addf %503, %502 : vector<8x32xf32>
    %505 = arith.divf %503, %504 : vector<8x32xf32>
    %c0_261 = arith.constant 0 : index
    %c0_262 = arith.constant 0 : index
    %506 = vector.load %arg47[%c0_261, %c0_262] : memref<64x32xf32, #tpu.memory_space<vmem>>, vector<8x32xf32>
    %cst_263 = arith.constant dense<0.000000e+00> : vector<8x32xf32>
    %507 = tpu.matmul %459, %35, %cst_263 {dimension_numbers = #tpu.dot_dimension_numbers<[1], [0], [0], [1], [0, 0, 1, 1], [], []>} : vector<8x32xf32>, vector<32x32xf32>, vector<8x32xf32> -> vector<8x32xf32>
    %508 = vector.broadcast %40 : vector<1x32xf32> to vector<8x32xf32>
    %509 = arith.addf %507, %508 : vector<8x32xf32>
    %510 = arith.mulf %497, %509 : vector<8x32xf32>
    %511 = arith.addf %506, %510 : vector<8x32xf32>
    %512 = math.tanh %511 : vector<8x32xf32>
    %cst_264 = arith.constant 1.000000e+00 : f32
    %513 = vector.broadcast %cst_264 : f32 to vector<8x32xf32>
    %514 = arith.subf %513, %505 : vector<8x32xf32>
    %515 = arith.mulf %514, %512 : vector<8x32xf32>
    %516 = arith.mulf %505, %459 : vector<8x32xf32>
    %517 = arith.addf %515, %516 : vector<8x32xf32>
    %c0_265 = arith.constant 0 : index
    %c0_266 = arith.constant 0 : index
    %518 = vector.load %arg49[%c0_265, %c0_266] : memref<64x32xf32, #tpu.memory_space<vmem>>, vector<8x32xf32>
    tpu.vector_store %arg49[%c0_265, %c0_266], %517 {strides = array<i32>} : memref<64x32xf32, #tpu.memory_space<vmem>>, vector<8x32xf32>,
    %c0_267 = arith.constant 0 : index
    %c0_268 = arith.constant 0 : index
    %519 = vector.load %arg17[%c0_267, %c0_268] : memref<1x32xf32, #tpu.memory_space<vmem>>, vector<1x32xf32>
    %c0_269 = arith.constant 0 : index
    %c0_270 = arith.constant 0 : index
    %520 = vector.load %arg18[%c0_269, %c0_270] : memref<1x32xf32, #tpu.memory_space<vmem>>, vector<1x32xf32>
    %c0_271 = arith.constant 0 : index
    %c0_272 = arith.constant 0 : index
    %521 = vector.load %arg48[%c0_271, %c0_272] : memref<64x32xf32, #tpu.memory_space<vmem>>, vector<64x32xf32>
    %c0_273 = arith.constant 0 : index
    %c0_274 = arith.constant 0 : index
    %522 = vector.load %arg49[%c0_273, %c0_274] : memref<64x32xf32, #tpu.memory_space<vmem>>, vector<64x32xf32>
    %523 = arith.addf %521, %522 : vector<64x32xf32>
    %cst_275 = arith.constant dense<0.000000e+00> : vector<64xf32>
    %524 = vector.multi_reduction <add>, %523, %cst_275 [1] : vector<64x32xf32> to vector<64xf32>
    %525 = vector.shape_cast %524 : vector<64xf32> to vector<64x1xf32>
    %cst_276 = arith.constant 3.200000e+01 : f32
    %526 = vector.broadcast %cst_276 : f32 to vector<64x1xf32>
    %527 = arith.divf %525, %526 : vector<64x1xf32>
    %528 = vector.broadcast %527 : vector<64x1xf32> to vector<64x32xf32>
    %529 = arith.subf %523, %528 : vector<64x32xf32>
    %530 = arith.mulf %529, %529 : vector<64x32xf32>
    %cst_277 = arith.constant dense<0.000000e+00> : vector<64xf32>
    %531 = vector.multi_reduction <add>, %530, %cst_277 [1] : vector<64x32xf32> to vector<64xf32>
    %532 = vector.shape_cast %531 : vector<64xf32> to vector<64x1xf32>
    %cst_278 = arith.constant 3.200000e+01 : f32
    %533 = vector.broadcast %cst_278 : f32 to vector<64x1xf32>
    %534 = arith.divf %532, %533 : vector<64x1xf32>
    %cst_279 = arith.constant 9.99999974E-6 : f32
    %535 = vector.broadcast %cst_279 : f32 to vector<64x1xf32>
    %536 = arith.addf %534, %535 : vector<64x1xf32>
    %537 = math.rsqrt %536 : vector<64x1xf32>
    %538 = vector.broadcast %537 : vector<64x1xf32> to vector<64x32xf32>
    %539 = arith.mulf %529, %538 : vector<64x32xf32>
    %540 = vector.broadcast %519 : vector<1x32xf32> to vector<64x32xf32>
    %541 = arith.mulf %539, %540 : vector<64x32xf32>
    %542 = vector.broadcast %520 : vector<1x32xf32> to vector<64x32xf32>
    %543 = arith.addf %541, %542 : vector<64x32xf32>
    %c0_280 = arith.constant 0 : index
    %c0_281 = arith.constant 0 : index
    %544 = vector.load %arg50[%c0_280, %c0_281] : memref<64x32xf32, #tpu.memory_space<vmem>>, vector<64x32xf32>
    tpu.vector_store %arg50[%c0_280, %c0_281], %543 {strides = array<i32>} : memref<64x32xf32, #tpu.memory_space<vmem>>, vector<64x32xf32>,
    %c0_282 = arith.constant 0 : index
    %c0_283 = arith.constant 0 : index
    %545 = vector.load %arg50[%c0_282, %c0_283] : memref<64x32xf32, #tpu.memory_space<vmem>>, vector<64x32xf32>
    %c0_284 = arith.constant 0 : index
    %c0_285 = arith.constant 0 : index
    %546 = vector.load %arg19[%c0_284, %c0_285] : memref<32x32xf32, #tpu.memory_space<vmem>>, vector<32x32xf32>
    %c0_286 = arith.constant 0 : index
    %c0_287 = arith.constant 0 : index
    %547 = vector.load %arg20[%c0_286, %c0_287] : memref<32x32xf32, #tpu.memory_space<vmem>>, vector<32x32xf32>
    %c0_288 = arith.constant 0 : index
    %c0_289 = arith.constant 0 : index
    %548 = vector.load %arg21[%c0_288, %c0_289] : memref<32x32xf32, #tpu.memory_space<vmem>>, vector<32x32xf32>
    %c0_290 = arith.constant 0 : index
    %c0_291 = arith.constant 0 : index
    %549 = vector.load %arg22[%c0_290, %c0_291] : memref<32x32xf32, #tpu.memory_space<vmem>>, vector<32x32xf32>
    %c0_292 = arith.constant 0 : index
    %c0_293 = arith.constant 0 : index
    %550 = vector.load %arg23[%c0_292, %c0_293] : memref<32x32xf32, #tpu.memory_space<vmem>>, vector<32x32xf32>
    %c0_294 = arith.constant 0 : index
    %c0_295 = arith.constant 0 : index
    %551 = vector.load %arg24[%c0_294, %c0_295] : memref<32x32xf32, #tpu.memory_space<vmem>>, vector<32x32xf32>
    %c0_296 = arith.constant 0 : index
    %c0_297 = arith.constant 0 : index
    %552 = vector.load %arg25[%c0_296, %c0_297] : memref<4x32xf32, #tpu.memory_space<vmem>>, vector<4x32xf32>
    %553 = vector.extract_strided_slice %552 {offsets = [0, 0], sizes = [1, 32], strides = [1, 1]} : vector<4x32xf32> to vector<1x32xf32>
    %554 = vector.extract_strided_slice %552 {offsets = [1, 0], sizes = [1, 32], strides = [1, 1]} : vector<4x32xf32> to vector<1x32xf32>
    %555 = vector.extract_strided_slice %552 {offsets = [2, 0], sizes = [1, 32], strides = [1, 1]} : vector<4x32xf32> to vector<1x32xf32>
    %556 = vector.extract_strided_slice %552 {offsets = [3, 0], sizes = [1, 32], strides = [1, 1]} : vector<4x32xf32> to vector<1x32xf32>
    %cst_298 = arith.constant dense<0.000000e+00> : vector<64x32xf32>
    %557 = tpu.matmul %545, %546, %cst_298 {dimension_numbers = #tpu.dot_dimension_numbers<[1], [0], [0], [1], [0, 0, 1, 1], [], []>} : vector<64x32xf32>, vector<32x32xf32>, vector<64x32xf32> -> vector<64x32xf32>
    %558 = vector.broadcast %553 : vector<1x32xf32> to vector<64x32xf32>
    %559 = arith.addf %557, %558 : vector<64x32xf32>
    %c0_299 = arith.constant 0 : index
    %c0_300 = arith.constant 0 : index
    %560 = vector.load %arg42[%c0_299, %c0_300] : memref<64x32xf32, #tpu.memory_space<vmem>>, vector<64x32xf32>
    tpu.vector_store %arg42[%c0_299, %c0_300], %559 {strides = array<i32>} : memref<64x32xf32, #tpu.memory_space<vmem>>, vector<64x32xf32>,
    %cst_301 = arith.constant dense<0.000000e+00> : vector<64x32xf32>
    %561 = tpu.matmul %545, %547, %cst_301 {dimension_numbers = #tpu.dot_dimension_numbers<[1], [0], [0], [1], [0, 0, 1, 1], [], []>} : vector<64x32xf32>, vector<32x32xf32>, vector<64x32xf32> -> vector<64x32xf32>
    %562 = vector.broadcast %554 : vector<1x32xf32> to vector<64x32xf32>
    %563 = arith.addf %561, %562 : vector<64x32xf32>
    %c0_302 = arith.constant 0 : index
    %c0_303 = arith.constant 0 : index
    %564 = vector.load %arg43[%c0_302, %c0_303] : memref<64x32xf32, #tpu.memory_space<vmem>>, vector<64x32xf32>
    tpu.vector_store %arg43[%c0_302, %c0_303], %563 {strides = array<i32>} : memref<64x32xf32, #tpu.memory_space<vmem>>, vector<64x32xf32>,
    %cst_304 = arith.constant dense<0.000000e+00> : vector<64x32xf32>
    %565 = tpu.matmul %545, %548, %cst_304 {dimension_numbers = #tpu.dot_dimension_numbers<[1], [0], [0], [1], [0, 0, 1, 1], [], []>} : vector<64x32xf32>, vector<32x32xf32>, vector<64x32xf32> -> vector<64x32xf32>
    %566 = vector.broadcast %555 : vector<1x32xf32> to vector<64x32xf32>
    %567 = arith.addf %565, %566 : vector<64x32xf32>
    %c0_305 = arith.constant 0 : index
    %c0_306 = arith.constant 0 : index
    %568 = vector.load %arg44[%c0_305, %c0_306] : memref<64x32xf32, #tpu.memory_space<vmem>>, vector<64x32xf32>
    tpu.vector_store %arg44[%c0_305, %c0_306], %567 {strides = array<i32>} : memref<64x32xf32, #tpu.memory_space<vmem>>, vector<64x32xf32>,
    %c0_307 = arith.constant 0 : index
    %c0_308 = arith.constant 0 : index
    %569 = vector.load %arg26[%c0_307, %c0_308] : memref<32x32xf32, #tpu.memory_space<vmem>>, vector<32x32xf32>
    %c0_309 = arith.constant 0 : index
    %c0_310 = arith.constant 0 : index
    %570 = vector.load %arg27[%c0_309, %c0_310] : memref<32x32xf32, #tpu.memory_space<vmem>>, vector<32x32xf32>
    %c0_311 = arith.constant 0 : index
    %c0_312 = arith.constant 0 : index
    %571 = vector.load %arg28[%c0_311, %c0_312] : memref<32x32xf32, #tpu.memory_space<vmem>>, vector<32x32xf32>
    %c0_313 = arith.constant 0 : index
    %c0_314 = arith.constant 0 : index
    %572 = vector.load %arg29[%c0_313, %c0_314] : memref<32x32xf32, #tpu.memory_space<vmem>>, vector<32x32xf32>
    %c0_315 = arith.constant 0 : index
    %c0_316 = arith.constant 0 : index
    %573 = vector.load %arg30[%c0_315, %c0_316] : memref<32x32xf32, #tpu.memory_space<vmem>>, vector<32x32xf32>
    %c0_317 = arith.constant 0 : index
    %c0_318 = arith.constant 0 : index
    %574 = vector.load %arg31[%c0_317, %c0_318] : memref<32x32xf32, #tpu.memory_space<vmem>>, vector<32x32xf32>
    %c0_319 = arith.constant 0 : index
    %c0_320 = arith.constant 0 : index
    %575 = vector.load %arg32[%c0_319, %c0_320] : memref<4x32xf32, #tpu.memory_space<vmem>>, vector<4x32xf32>
    %576 = vector.extract_strided_slice %575 {offsets = [0, 0], sizes = [1, 32], strides = [1, 1]} : vector<4x32xf32> to vector<1x32xf32>
    %577 = vector.extract_strided_slice %575 {offsets = [1, 0], sizes = [1, 32], strides = [1, 1]} : vector<4x32xf32> to vector<1x32xf32>
    %578 = vector.extract_strided_slice %575 {offsets = [2, 0], sizes = [1, 32], strides = [1, 1]} : vector<4x32xf32> to vector<1x32xf32>
    %579 = vector.extract_strided_slice %575 {offsets = [3, 0], sizes = [1, 32], strides = [1, 1]} : vector<4x32xf32> to vector<1x32xf32>
    %cst_321 = arith.constant dense<0.000000e+00> : vector<64x32xf32>
    %580 = tpu.matmul %545, %569, %cst_321 {dimension_numbers = #tpu.dot_dimension_numbers<[1], [0], [0], [1], [0, 0, 1, 1], [], []>} : vector<64x32xf32>, vector<32x32xf32>, vector<64x32xf32> -> vector<64x32xf32>
    %581 = vector.broadcast %576 : vector<1x32xf32> to vector<64x32xf32>
    %582 = arith.addf %580, %581 : vector<64x32xf32>
    %c0_322 = arith.constant 0 : index
    %c0_323 = arith.constant 0 : index
    %583 = vector.load %arg45[%c0_322, %c0_323] : memref<64x32xf32, #tpu.memory_space<vmem>>, vector<64x32xf32>
    tpu.vector_store %arg45[%c0_322, %c0_323], %582 {strides = array<i32>} : memref<64x32xf32, #tpu.memory_space<vmem>>, vector<64x32xf32>,
    %cst_324 = arith.constant dense<0.000000e+00> : vector<64x32xf32>
    %584 = tpu.matmul %545, %570, %cst_324 {dimension_numbers = #tpu.dot_dimension_numbers<[1], [0], [0], [1], [0, 0, 1, 1], [], []>} : vector<64x32xf32>, vector<32x32xf32>, vector<64x32xf32> -> vector<64x32xf32>
    %585 = vector.broadcast %577 : vector<1x32xf32> to vector<64x32xf32>
    %586 = arith.addf %584, %585 : vector<64x32xf32>
    %c0_325 = arith.constant 0 : index
    %c0_326 = arith.constant 0 : index
    %587 = vector.load %arg46[%c0_325, %c0_326] : memref<64x32xf32, #tpu.memory_space<vmem>>, vector<64x32xf32>
    tpu.vector_store %arg46[%c0_325, %c0_326], %586 {strides = array<i32>} : memref<64x32xf32, #tpu.memory_space<vmem>>, vector<64x32xf32>,
    %cst_327 = arith.constant dense<0.000000e+00> : vector<64x32xf32>
    %588 = tpu.matmul %545, %571, %cst_327 {dimension_numbers = #tpu.dot_dimension_numbers<[1], [0], [0], [1], [0, 0, 1, 1], [], []>} : vector<64x32xf32>, vector<32x32xf32>, vector<64x32xf32> -> vector<64x32xf32>
    %589 = vector.broadcast %578 : vector<1x32xf32> to vector<64x32xf32>
    %590 = arith.addf %588, %589 : vector<64x32xf32>
    %c0_328 = arith.constant 0 : index
    %c0_329 = arith.constant 0 : index
    %591 = vector.load %arg47[%c0_328, %c0_329] : memref<64x32xf32, #tpu.memory_space<vmem>>, vector<64x32xf32>
    tpu.vector_store %arg47[%c0_328, %c0_329], %590 {strides = array<i32>} : memref<64x32xf32, #tpu.memory_space<vmem>>, vector<64x32xf32>,
    %cst_330 = arith.constant 0.000000e+00 : f32
    %592 = vector.broadcast %cst_330 : f32 to vector<8x32xf32>
    %cst_331 = arith.constant 0.000000e+00 : f32
    %593 = vector.broadcast %cst_331 : f32 to vector<8x32xf32>
    %c0_332 = arith.constant 0 : index
    %c0_333 = arith.constant 0 : index
    %594 = vector.load %arg42[%c0_332, %c0_333] : memref<64x32xf32, #tpu.memory_space<vmem>>, vector<8x32xf32>
    %cst_334 = arith.constant dense<0.000000e+00> : vector<8x32xf32>
    %595 = tpu.matmul %592, %549, %cst_334 {dimension_numbers = #tpu.dot_dimension_numbers<[1], [0], [0], [1], [0, 0, 1, 1], [], []>} : vector<8x32xf32>, vector<32x32xf32>, vector<8x32xf32> -> vector<8x32xf32>
    %596 = arith.addf %594, %595 : vector<8x32xf32>
    %597 = arith.negf %596 : vector<8x32xf32>
    %598 = math.exp %597 : vector<8x32xf32>
    %cst_335 = arith.constant 1.000000e+00 : f32
    %599 = vector.broadcast %cst_335 : f32 to vector<8x32xf32>
    %600 = arith.addf %599, %598 : vector<8x32xf32>
    %601 = arith.divf %599, %600 : vector<8x32xf32>
    %c0_336 = arith.constant 0 : index
    %c0_337 = arith.constant 0 : index
    %602 = vector.load %arg43[%c0_336, %c0_337] : memref<64x32xf32, #tpu.memory_space<vmem>>, vector<8x32xf32>
    %cst_338 = arith.constant dense<0.000000e+00> : vector<8x32xf32>
    %603 = tpu.matmul %592, %550, %cst_338 {dimension_numbers = #tpu.dot_dimension_numbers<[1], [0], [0], [1], [0, 0, 1, 1], [], []>} : vector<8x32xf32>, vector<32x32xf32>, vector<8x32xf32> -> vector<8x32xf32>
    %604 = arith.addf %602, %603 : vector<8x32xf32>
    %605 = arith.negf %604 : vector<8x32xf32>
    %606 = math.exp %605 : vector<8x32xf32>
    %cst_339 = arith.constant 1.000000e+00 : f32
    %607 = vector.broadcast %cst_339 : f32 to vector<8x32xf32>
    %608 = arith.addf %607, %606 : vector<8x32xf32>
    %609 = arith.divf %607, %608 : vector<8x32xf32>
    %c0_340 = arith.constant 0 : index
    %c0_341 = arith.constant 0 : index
    %610 = vector.load %arg44[%c0_340, %c0_341] : memref<64x32xf32, #tpu.memory_space<vmem>>, vector<8x32xf32>
    %cst_342 = arith.constant dense<0.000000e+00> : vector<8x32xf32>
    %611 = tpu.matmul %592, %551, %cst_342 {dimension_numbers = #tpu.dot_dimension_numbers<[1], [0], [0], [1], [0, 0, 1, 1], [], []>} : vector<8x32xf32>, vector<32x32xf32>, vector<8x32xf32> -> vector<8x32xf32>
    %612 = vector.broadcast %556 : vector<1x32xf32> to vector<8x32xf32>
    %613 = arith.addf %611, %612 : vector<8x32xf32>
    %614 = arith.mulf %601, %613 : vector<8x32xf32>
    %615 = arith.addf %610, %614 : vector<8x32xf32>
    %616 = math.tanh %615 : vector<8x32xf32>
    %cst_343 = arith.constant 1.000000e+00 : f32
    %617 = vector.broadcast %cst_343 : f32 to vector<8x32xf32>
    %618 = arith.subf %617, %609 : vector<8x32xf32>
    %619 = arith.mulf %618, %616 : vector<8x32xf32>
    %620 = arith.mulf %609, %592 : vector<8x32xf32>
    %621 = arith.addf %619, %620 : vector<8x32xf32>
    %c0_344 = arith.constant 0 : index
    %c0_345 = arith.constant 0 : index
    %622 = vector.load %arg48[%c0_344, %c0_345] : memref<64x32xf32, #tpu.memory_space<vmem>>, vector<8x32xf32>
    tpu.vector_store %arg48[%c0_344, %c0_345], %621 {strides = array<i32>} : memref<64x32xf32, #tpu.memory_space<vmem>>, vector<8x32xf32>,
    %c56_346 = arith.constant 56 : index
    %c0_347 = arith.constant 0 : index
    %623 = vector.load %arg45[%c56_346, %c0_347] : memref<64x32xf32, #tpu.memory_space<vmem>>, vector<8x32xf32>
    %cst_348 = arith.constant dense<0.000000e+00> : vector<8x32xf32>
    %624 = tpu.matmul %593, %572, %cst_348 {dimension_numbers = #tpu.dot_dimension_numbers<[1], [0], [0], [1], [0, 0, 1, 1], [], []>} : vector<8x32xf32>, vector<32x32xf32>, vector<8x32xf32> -> vector<8x32xf32>
    %625 = arith.addf %623, %624 : vector<8x32xf32>
    %626 = arith.negf %625 : vector<8x32xf32>
    %627 = math.exp %626 : vector<8x32xf32>
    %cst_349 = arith.constant 1.000000e+00 : f32
    %628 = vector.broadcast %cst_349 : f32 to vector<8x32xf32>
    %629 = arith.addf %628, %627 : vector<8x32xf32>
    %630 = arith.divf %628, %629 : vector<8x32xf32>
    %c56_350 = arith.constant 56 : index
    %c0_351 = arith.constant 0 : index
    %631 = vector.load %arg46[%c56_350, %c0_351] : memref<64x32xf32, #tpu.memory_space<vmem>>, vector<8x32xf32>
    %cst_352 = arith.constant dense<0.000000e+00> : vector<8x32xf32>
    %632 = tpu.matmul %593, %573, %cst_352 {dimension_numbers = #tpu.dot_dimension_numbers<[1], [0], [0], [1], [0, 0, 1, 1], [], []>} : vector<8x32xf32>, vector<32x32xf32>, vector<8x32xf32> -> vector<8x32xf32>
    %633 = arith.addf %631, %632 : vector<8x32xf32>
    %634 = arith.negf %633 : vector<8x32xf32>
    %635 = math.exp %634 : vector<8x32xf32>
    %cst_353 = arith.constant 1.000000e+00 : f32
    %636 = vector.broadcast %cst_353 : f32 to vector<8x32xf32>
    %637 = arith.addf %636, %635 : vector<8x32xf32>
    %638 = arith.divf %636, %637 : vector<8x32xf32>
    %c56_354 = arith.constant 56 : index
    %c0_355 = arith.constant 0 : index
    %639 = vector.load %arg47[%c56_354, %c0_355] : memref<64x32xf32, #tpu.memory_space<vmem>>, vector<8x32xf32>
    %cst_356 = arith.constant dense<0.000000e+00> : vector<8x32xf32>
    %640 = tpu.matmul %593, %574, %cst_356 {dimension_numbers = #tpu.dot_dimension_numbers<[1], [0], [0], [1], [0, 0, 1, 1], [], []>} : vector<8x32xf32>, vector<32x32xf32>, vector<8x32xf32> -> vector<8x32xf32>
    %641 = vector.broadcast %579 : vector<1x32xf32> to vector<8x32xf32>
    %642 = arith.addf %640, %641 : vector<8x32xf32>
    %643 = arith.mulf %630, %642 : vector<8x32xf32>
    %644 = arith.addf %639, %643 : vector<8x32xf32>
    %645 = math.tanh %644 : vector<8x32xf32>
    %cst_357 = arith.constant 1.000000e+00 : f32
    %646 = vector.broadcast %cst_357 : f32 to vector<8x32xf32>
    %647 = arith.subf %646, %638 : vector<8x32xf32>
    %648 = arith.mulf %647, %645 : vector<8x32xf32>
    %649 = arith.mulf %638, %593 : vector<8x32xf32>
    %650 = arith.addf %648, %649 : vector<8x32xf32>
    %c56_358 = arith.constant 56 : index
    %c0_359 = arith.constant 0 : index
    %651 = vector.load %arg49[%c56_358, %c0_359] : memref<64x32xf32, #tpu.memory_space<vmem>>, vector<8x32xf32>
    tpu.vector_store %arg49[%c56_358, %c0_359], %650 {strides = array<i32>} : memref<64x32xf32, #tpu.memory_space<vmem>>, vector<8x32xf32>,
    %c8_360 = arith.constant 8 : index
    %c0_361 = arith.constant 0 : index
    %652 = vector.load %arg42[%c8_360, %c0_361] : memref<64x32xf32, #tpu.memory_space<vmem>>, vector<8x32xf32>
    %cst_362 = arith.constant dense<0.000000e+00> : vector<8x32xf32>
    %653 = tpu.matmul %621, %549, %cst_362 {dimension_numbers = #tpu.dot_dimension_numbers<[1], [0], [0], [1], [0, 0, 1, 1], [], []>} : vector<8x32xf32>, vector<32x32xf32>, vector<8x32xf32> -> vector<8x32xf32>
    %654 = arith.addf %652, %653 : vector<8x32xf32>
    %655 = arith.negf %654 : vector<8x32xf32>
    %656 = math.exp %655 : vector<8x32xf32>
    %cst_363 = arith.constant 1.000000e+00 : f32
    %657 = vector.broadcast %cst_363 : f32 to vector<8x32xf32>
    %658 = arith.addf %657, %656 : vector<8x32xf32>
    %659 = arith.divf %657, %658 : vector<8x32xf32>
    %c8_364 = arith.constant 8 : index
    %c0_365 = arith.constant 0 : index
    %660 = vector.load %arg43[%c8_364, %c0_365] : memref<64x32xf32, #tpu.memory_space<vmem>>, vector<8x32xf32>
    %cst_366 = arith.constant dense<0.000000e+00> : vector<8x32xf32>
    %661 = tpu.matmul %621, %550, %cst_366 {dimension_numbers = #tpu.dot_dimension_numbers<[1], [0], [0], [1], [0, 0, 1, 1], [], []>} : vector<8x32xf32>, vector<32x32xf32>, vector<8x32xf32> -> vector<8x32xf32>
    %662 = arith.addf %660, %661 : vector<8x32xf32>
    %663 = arith.negf %662 : vector<8x32xf32>
    %664 = math.exp %663 : vector<8x32xf32>
    %cst_367 = arith.constant 1.000000e+00 : f32
    %665 = vector.broadcast %cst_367 : f32 to vector<8x32xf32>
    %666 = arith.addf %665, %664 : vector<8x32xf32>
    %667 = arith.divf %665, %666 : vector<8x32xf32>
    %c8_368 = arith.constant 8 : index
    %c0_369 = arith.constant 0 : index
    %668 = vector.load %arg44[%c8_368, %c0_369] : memref<64x32xf32, #tpu.memory_space<vmem>>, vector<8x32xf32>
    %cst_370 = arith.constant dense<0.000000e+00> : vector<8x32xf32>
    %669 = tpu.matmul %621, %551, %cst_370 {dimension_numbers = #tpu.dot_dimension_numbers<[1], [0], [0], [1], [0, 0, 1, 1], [], []>} : vector<8x32xf32>, vector<32x32xf32>, vector<8x32xf32> -> vector<8x32xf32>
    %670 = vector.broadcast %556 : vector<1x32xf32> to vector<8x32xf32>
    %671 = arith.addf %669, %670 : vector<8x32xf32>
    %672 = arith.mulf %659, %671 : vector<8x32xf32>
    %673 = arith.addf %668, %672 : vector<8x32xf32>
    %674 = math.tanh %673 : vector<8x32xf32>
    %cst_371 = arith.constant 1.000000e+00 : f32
    %675 = vector.broadcast %cst_371 : f32 to vector<8x32xf32>
    %676 = arith.subf %675, %667 : vector<8x32xf32>
    %677 = arith.mulf %676, %674 : vector<8x32xf32>
    %678 = arith.mulf %667, %621 : vector<8x32xf32>
    %679 = arith.addf %677, %678 : vector<8x32xf32>
    %c8_372 = arith.constant 8 : index
    %c0_373 = arith.constant 0 : index
    %680 = vector.load %arg48[%c8_372, %c0_373] : memref<64x32xf32, #tpu.memory_space<vmem>>, vector<8x32xf32>
    tpu.vector_store %arg48[%c8_372, %c0_373], %679 {strides = array<i32>} : memref<64x32xf32, #tpu.memory_space<vmem>>, vector<8x32xf32>,
    %c48_374 = arith.constant 48 : index
    %c0_375 = arith.constant 0 : index
    %681 = vector.load %arg45[%c48_374, %c0_375] : memref<64x32xf32, #tpu.memory_space<vmem>>, vector<8x32xf32>
    %cst_376 = arith.constant dense<0.000000e+00> : vector<8x32xf32>
    %682 = tpu.matmul %650, %572, %cst_376 {dimension_numbers = #tpu.dot_dimension_numbers<[1], [0], [0], [1], [0, 0, 1, 1], [], []>} : vector<8x32xf32>, vector<32x32xf32>, vector<8x32xf32> -> vector<8x32xf32>
    %683 = arith.addf %681, %682 : vector<8x32xf32>
    %684 = arith.negf %683 : vector<8x32xf32>
    %685 = math.exp %684 : vector<8x32xf32>
    %cst_377 = arith.constant 1.000000e+00 : f32
    %686 = vector.broadcast %cst_377 : f32 to vector<8x32xf32>
    %687 = arith.addf %686, %685 : vector<8x32xf32>
    %688 = arith.divf %686, %687 : vector<8x32xf32>
    %c48_378 = arith.constant 48 : index
    %c0_379 = arith.constant 0 : index
    %689 = vector.load %arg46[%c48_378, %c0_379] : memref<64x32xf32, #tpu.memory_space<vmem>>, vector<8x32xf32>
    %cst_380 = arith.constant dense<0.000000e+00> : vector<8x32xf32>
    %690 = tpu.matmul %650, %573, %cst_380 {dimension_numbers = #tpu.dot_dimension_numbers<[1], [0], [0], [1], [0, 0, 1, 1], [], []>} : vector<8x32xf32>, vector<32x32xf32>, vector<8x32xf32> -> vector<8x32xf32>
    %691 = arith.addf %689, %690 : vector<8x32xf32>
    %692 = arith.negf %691 : vector<8x32xf32>
    %693 = math.exp %692 : vector<8x32xf32>
    %cst_381 = arith.constant 1.000000e+00 : f32
    %694 = vector.broadcast %cst_381 : f32 to vector<8x32xf32>
    %695 = arith.addf %694, %693 : vector<8x32xf32>
    %696 = arith.divf %694, %695 : vector<8x32xf32>
    %c48_382 = arith.constant 48 : index
    %c0_383 = arith.constant 0 : index
    %697 = vector.load %arg47[%c48_382, %c0_383] : memref<64x32xf32, #tpu.memory_space<vmem>>, vector<8x32xf32>
    %cst_384 = arith.constant dense<0.000000e+00> : vector<8x32xf32>
    %698 = tpu.matmul %650, %574, %cst_384 {dimension_numbers = #tpu.dot_dimension_numbers<[1], [0], [0], [1], [0, 0, 1, 1], [], []>} : vector<8x32xf32>, vector<32x32xf32>, vector<8x32xf32> -> vector<8x32xf32>
    %699 = vector.broadcast %579 : vector<1x32xf32> to vector<8x32xf32>
    %700 = arith.addf %698, %699 : vector<8x32xf32>
    %701 = arith.mulf %688, %700 : vector<8x32xf32>
    %702 = arith.addf %697, %701 : vector<8x32xf32>
    %703 = math.tanh %702 : vector<8x32xf32>
    %cst_385 = arith.constant 1.000000e+00 : f32
    %704 = vector.broadcast %cst_385 : f32 to vector<8x32xf32>
    %705 = arith.subf %704, %696 : vector<8x32xf32>
    %706 = arith.mulf %705, %703 : vector<8x32xf32>
    %707 = arith.mulf %696, %650 : vector<8x32xf32>
    %708 = arith.addf %706, %707 : vector<8x32xf32>
    %c48_386 = arith.constant 48 : index
    %c0_387 = arith.constant 0 : index
    %709 = vector.load %arg49[%c48_386, %c0_387] : memref<64x32xf32, #tpu.memory_space<vmem>>, vector<8x32xf32>
    tpu.vector_store %arg49[%c48_386, %c0_387], %708 {strides = array<i32>} : memref<64x32xf32, #tpu.memory_space<vmem>>, vector<8x32xf32>,
    %c16_388 = arith.constant 16 : index
    %c0_389 = arith.constant 0 : index
    %710 = vector.load %arg42[%c16_388, %c0_389] : memref<64x32xf32, #tpu.memory_space<vmem>>, vector<8x32xf32>
    %cst_390 = arith.constant dense<0.000000e+00> : vector<8x32xf32>
    %711 = tpu.matmul %679, %549, %cst_390 {dimension_numbers = #tpu.dot_dimension_numbers<[1], [0], [0], [1], [0, 0, 1, 1], [], []>} : vector<8x32xf32>, vector<32x32xf32>, vector<8x32xf32> -> vector<8x32xf32>
    %712 = arith.addf %710, %711 : vector<8x32xf32>
    %713 = arith.negf %712 : vector<8x32xf32>
    %714 = math.exp %713 : vector<8x32xf32>
    %cst_391 = arith.constant 1.000000e+00 : f32
    %715 = vector.broadcast %cst_391 : f32 to vector<8x32xf32>
    %716 = arith.addf %715, %714 : vector<8x32xf32>
    %717 = arith.divf %715, %716 : vector<8x32xf32>
    %c16_392 = arith.constant 16 : index
    %c0_393 = arith.constant 0 : index
    %718 = vector.load %arg43[%c16_392, %c0_393] : memref<64x32xf32, #tpu.memory_space<vmem>>, vector<8x32xf32>
    %cst_394 = arith.constant dense<0.000000e+00> : vector<8x32xf32>
    %719 = tpu.matmul %679, %550, %cst_394 {dimension_numbers = #tpu.dot_dimension_numbers<[1], [0], [0], [1], [0, 0, 1, 1], [], []>} : vector<8x32xf32>, vector<32x32xf32>, vector<8x32xf32> -> vector<8x32xf32>
    %720 = arith.addf %718, %719 : vector<8x32xf32>
    %721 = arith.negf %720 : vector<8x32xf32>
    %722 = math.exp %721 : vector<8x32xf32>
    %cst_395 = arith.constant 1.000000e+00 : f32
    %723 = vector.broadcast %cst_395 : f32 to vector<8x32xf32>
    %724 = arith.addf %723, %722 : vector<8x32xf32>
    %725 = arith.divf %723, %724 : vector<8x32xf32>
    %c16_396 = arith.constant 16 : index
    %c0_397 = arith.constant 0 : index
    %726 = vector.load %arg44[%c16_396, %c0_397] : memref<64x32xf32, #tpu.memory_space<vmem>>, vector<8x32xf32>
    %cst_398 = arith.constant dense<0.000000e+00> : vector<8x32xf32>
    %727 = tpu.matmul %679, %551, %cst_398 {dimension_numbers = #tpu.dot_dimension_numbers<[1], [0], [0], [1], [0, 0, 1, 1], [], []>} : vector<8x32xf32>, vector<32x32xf32>, vector<8x32xf32> -> vector<8x32xf32>
    %728 = vector.broadcast %556 : vector<1x32xf32> to vector<8x32xf32>
    %729 = arith.addf %727, %728 : vector<8x32xf32>
    %730 = arith.mulf %717, %729 : vector<8x32xf32>
    %731 = arith.addf %726, %730 : vector<8x32xf32>
    %732 = math.tanh %731 : vector<8x32xf32>
    %cst_399 = arith.constant 1.000000e+00 : f32
    %733 = vector.broadcast %cst_399 : f32 to vector<8x32xf32>
    %734 = arith.subf %733, %725 : vector<8x32xf32>
    %735 = arith.mulf %734, %732 : vector<8x32xf32>
    %736 = arith.mulf %725, %679 : vector<8x32xf32>
    %737 = arith.addf %735, %736 : vector<8x32xf32>
    %c16_400 = arith.constant 16 : index
    %c0_401 = arith.constant 0 : index
    %738 = vector.load %arg48[%c16_400, %c0_401] : memref<64x32xf32, #tpu.memory_space<vmem>>, vector<8x32xf32>
    tpu.vector_store %arg48[%c16_400, %c0_401], %737 {strides = array<i32>} : memref<64x32xf32, #tpu.memory_space<vmem>>, vector<8x32xf32>,
    %c40_402 = arith.constant 40 : index
    %c0_403 = arith.constant 0 : index
    %739 = vector.load %arg45[%c40_402, %c0_403] : memref<64x32xf32, #tpu.memory_space<vmem>>, vector<8x32xf32>
    %cst_404 = arith.constant dense<0.000000e+00> : vector<8x32xf32>
    %740 = tpu.matmul %708, %572, %cst_404 {dimension_numbers = #tpu.dot_dimension_numbers<[1], [0], [0], [1], [0, 0, 1, 1], [], []>} : vector<8x32xf32>, vector<32x32xf32>, vector<8x32xf32> -> vector<8x32xf32>
    %741 = arith.addf %739, %740 : vector<8x32xf32>
    %742 = arith.negf %741 : vector<8x32xf32>
    %743 = math.exp %742 : vector<8x32xf32>
    %cst_405 = arith.constant 1.000000e+00 : f32
    %744 = vector.broadcast %cst_405 : f32 to vector<8x32xf32>
    %745 = arith.addf %744, %743 : vector<8x32xf32>
    %746 = arith.divf %744, %745 : vector<8x32xf32>
    %c40_406 = arith.constant 40 : index
    %c0_407 = arith.constant 0 : index
    %747 = vector.load %arg46[%c40_406, %c0_407] : memref<64x32xf32, #tpu.memory_space<vmem>>, vector<8x32xf32>
    %cst_408 = arith.constant dense<0.000000e+00> : vector<8x32xf32>
    %748 = tpu.matmul %708, %573, %cst_408 {dimension_numbers = #tpu.dot_dimension_numbers<[1], [0], [0], [1], [0, 0, 1, 1], [], []>} : vector<8x32xf32>, vector<32x32xf32>, vector<8x32xf32> -> vector<8x32xf32>
    %749 = arith.addf %747, %748 : vector<8x32xf32>
    %750 = arith.negf %749 : vector<8x32xf32>
    %751 = math.exp %750 : vector<8x32xf32>
    %cst_409 = arith.constant 1.000000e+00 : f32
    %752 = vector.broadcast %cst_409 : f32 to vector<8x32xf32>
    %753 = arith.addf %752, %751 : vector<8x32xf32>
    %754 = arith.divf %752, %753 : vector<8x32xf32>
    %c40_410 = arith.constant 40 : index
    %c0_411 = arith.constant 0 : index
    %755 = vector.load %arg47[%c40_410, %c0_411] : memref<64x32xf32, #tpu.memory_space<vmem>>, vector<8x32xf32>
    %cst_412 = arith.constant dense<0.000000e+00> : vector<8x32xf32>
    %756 = tpu.matmul %708, %574, %cst_412 {dimension_numbers = #tpu.dot_dimension_numbers<[1], [0], [0], [1], [0, 0, 1, 1], [], []>} : vector<8x32xf32>, vector<32x32xf32>, vector<8x32xf32> -> vector<8x32xf32>
    %757 = vector.broadcast %579 : vector<1x32xf32> to vector<8x32xf32>
    %758 = arith.addf %756, %757 : vector<8x32xf32>
    %759 = arith.mulf %746, %758 : vector<8x32xf32>
    %760 = arith.addf %755, %759 : vector<8x32xf32>
    %761 = math.tanh %760 : vector<8x32xf32>
    %cst_413 = arith.constant 1.000000e+00 : f32
    %762 = vector.broadcast %cst_413 : f32 to vector<8x32xf32>
    %763 = arith.subf %762, %754 : vector<8x32xf32>
    %764 = arith.mulf %763, %761 : vector<8x32xf32>
    %765 = arith.mulf %754, %708 : vector<8x32xf32>
    %766 = arith.addf %764, %765 : vector<8x32xf32>
    %c40_414 = arith.constant 40 : index
    %c0_415 = arith.constant 0 : index
    %767 = vector.load %arg49[%c40_414, %c0_415] : memref<64x32xf32, #tpu.memory_space<vmem>>, vector<8x32xf32>
    tpu.vector_store %arg49[%c40_414, %c0_415], %766 {strides = array<i32>} : memref<64x32xf32, #tpu.memory_space<vmem>>, vector<8x32xf32>,
    %c24_416 = arith.constant 24 : index
    %c0_417 = arith.constant 0 : index
    %768 = vector.load %arg42[%c24_416, %c0_417] : memref<64x32xf32, #tpu.memory_space<vmem>>, vector<8x32xf32>
    %cst_418 = arith.constant dense<0.000000e+00> : vector<8x32xf32>
    %769 = tpu.matmul %737, %549, %cst_418 {dimension_numbers = #tpu.dot_dimension_numbers<[1], [0], [0], [1], [0, 0, 1, 1], [], []>} : vector<8x32xf32>, vector<32x32xf32>, vector<8x32xf32> -> vector<8x32xf32>
    %770 = arith.addf %768, %769 : vector<8x32xf32>
    %771 = arith.negf %770 : vector<8x32xf32>
    %772 = math.exp %771 : vector<8x32xf32>
    %cst_419 = arith.constant 1.000000e+00 : f32
    %773 = vector.broadcast %cst_419 : f32 to vector<8x32xf32>
    %774 = arith.addf %773, %772 : vector<8x32xf32>
    %775 = arith.divf %773, %774 : vector<8x32xf32>
    %c24_420 = arith.constant 24 : index
    %c0_421 = arith.constant 0 : index
    %776 = vector.load %arg43[%c24_420, %c0_421] : memref<64x32xf32, #tpu.memory_space<vmem>>, vector<8x32xf32>
    %cst_422 = arith.constant dense<0.000000e+00> : vector<8x32xf32>
    %777 = tpu.matmul %737, %550, %cst_422 {dimension_numbers = #tpu.dot_dimension_numbers<[1], [0], [0], [1], [0, 0, 1, 1], [], []>} : vector<8x32xf32>, vector<32x32xf32>, vector<8x32xf32> -> vector<8x32xf32>
    %778 = arith.addf %776, %777 : vector<8x32xf32>
    %779 = arith.negf %778 : vector<8x32xf32>
    %780 = math.exp %779 : vector<8x32xf32>
    %cst_423 = arith.constant 1.000000e+00 : f32
    %781 = vector.broadcast %cst_423 : f32 to vector<8x32xf32>
    %782 = arith.addf %781, %780 : vector<8x32xf32>
    %783 = arith.divf %781, %782 : vector<8x32xf32>
    %c24_424 = arith.constant 24 : index
    %c0_425 = arith.constant 0 : index
    %784 = vector.load %arg44[%c24_424, %c0_425] : memref<64x32xf32, #tpu.memory_space<vmem>>, vector<8x32xf32>
    %cst_426 = arith.constant dense<0.000000e+00> : vector<8x32xf32>
    %785 = tpu.matmul %737, %551, %cst_426 {dimension_numbers = #tpu.dot_dimension_numbers<[1], [0], [0], [1], [0, 0, 1, 1], [], []>} : vector<8x32xf32>, vector<32x32xf32>, vector<8x32xf32> -> vector<8x32xf32>
    %786 = vector.broadcast %556 : vector<1x32xf32> to vector<8x32xf32>
    %787 = arith.addf %785, %786 : vector<8x32xf32>
    %788 = arith.mulf %775, %787 : vector<8x32xf32>
    %789 = arith.addf %784, %788 : vector<8x32xf32>
    %790 = math.tanh %789 : vector<8x32xf32>
    %cst_427 = arith.constant 1.000000e+00 : f32
    %791 = vector.broadcast %cst_427 : f32 to vector<8x32xf32>
    %792 = arith.subf %791, %783 : vector<8x32xf32>
    %793 = arith.mulf %792, %790 : vector<8x32xf32>
    %794 = arith.mulf %783, %737 : vector<8x32xf32>
    %795 = arith.addf %793, %794 : vector<8x32xf32>
    %c24_428 = arith.constant 24 : index
    %c0_429 = arith.constant 0 : index
    %796 = vector.load %arg48[%c24_428, %c0_429] : memref<64x32xf32, #tpu.memory_space<vmem>>, vector<8x32xf32>
    tpu.vector_store %arg48[%c24_428, %c0_429], %795 {strides = array<i32>} : memref<64x32xf32, #tpu.memory_space<vmem>>, vector<8x32xf32>,
    %c32_430 = arith.constant 32 : index
    %c0_431 = arith.constant 0 : index
    %797 = vector.load %arg45[%c32_430, %c0_431] : memref<64x32xf32, #tpu.memory_space<vmem>>, vector<8x32xf32>
    %cst_432 = arith.constant dense<0.000000e+00> : vector<8x32xf32>
    %798 = tpu.matmul %766, %572, %cst_432 {dimension_numbers = #tpu.dot_dimension_numbers<[1], [0], [0], [1], [0, 0, 1, 1], [], []>} : vector<8x32xf32>, vector<32x32xf32>, vector<8x32xf32> -> vector<8x32xf32>
    %799 = arith.addf %797, %798 : vector<8x32xf32>
    %800 = arith.negf %799 : vector<8x32xf32>
    %801 = math.exp %800 : vector<8x32xf32>
    %cst_433 = arith.constant 1.000000e+00 : f32
    %802 = vector.broadcast %cst_433 : f32 to vector<8x32xf32>
    %803 = arith.addf %802, %801 : vector<8x32xf32>
    %804 = arith.divf %802, %803 : vector<8x32xf32>
    %c32_434 = arith.constant 32 : index
    %c0_435 = arith.constant 0 : index
    %805 = vector.load %arg46[%c32_434, %c0_435] : memref<64x32xf32, #tpu.memory_space<vmem>>, vector<8x32xf32>
    %cst_436 = arith.constant dense<0.000000e+00> : vector<8x32xf32>
    %806 = tpu.matmul %766, %573, %cst_436 {dimension_numbers = #tpu.dot_dimension_numbers<[1], [0], [0], [1], [0, 0, 1, 1], [], []>} : vector<8x32xf32>, vector<32x32xf32>, vector<8x32xf32> -> vector<8x32xf32>
    %807 = arith.addf %805, %806 : vector<8x32xf32>
    %808 = arith.negf %807 : vector<8x32xf32>
    %809 = math.exp %808 : vector<8x32xf32>
    %cst_437 = arith.constant 1.000000e+00 : f32
    %810 = vector.broadcast %cst_437 : f32 to vector<8x32xf32>
    %811 = arith.addf %810, %809 : vector<8x32xf32>
    %812 = arith.divf %810, %811 : vector<8x32xf32>
    %c32_438 = arith.constant 32 : index
    %c0_439 = arith.constant 0 : index
    %813 = vector.load %arg47[%c32_438, %c0_439] : memref<64x32xf32, #tpu.memory_space<vmem>>, vector<8x32xf32>
    %cst_440 = arith.constant dense<0.000000e+00> : vector<8x32xf32>
    %814 = tpu.matmul %766, %574, %cst_440 {dimension_numbers = #tpu.dot_dimension_numbers<[1], [0], [0], [1], [0, 0, 1, 1], [], []>} : vector<8x32xf32>, vector<32x32xf32>, vector<8x32xf32> -> vector<8x32xf32>
    %815 = vector.broadcast %579 : vector<1x32xf32> to vector<8x32xf32>
    %816 = arith.addf %814, %815 : vector<8x32xf32>
    %817 = arith.mulf %804, %816 : vector<8x32xf32>
    %818 = arith.addf %813, %817 : vector<8x32xf32>
    %819 = math.tanh %818 : vector<8x32xf32>
    %cst_441 = arith.constant 1.000000e+00 : f32
    %820 = vector.broadcast %cst_441 : f32 to vector<8x32xf32>
    %821 = arith.subf %820, %812 : vector<8x32xf32>
    %822 = arith.mulf %821, %819 : vector<8x32xf32>
    %823 = arith.mulf %812, %766 : vector<8x32xf32>
    %824 = arith.addf %822, %823 : vector<8x32xf32>
    %c32_442 = arith.constant 32 : index
    %c0_443 = arith.constant 0 : index
    %825 = vector.load %arg49[%c32_442, %c0_443] : memref<64x32xf32, #tpu.memory_space<vmem>>, vector<8x32xf32>
    tpu.vector_store %arg49[%c32_442, %c0_443], %824 {strides = array<i32>} : memref<64x32xf32, #tpu.memory_space<vmem>>, vector<8x32xf32>,
    %c32_444 = arith.constant 32 : index
    %c0_445 = arith.constant 0 : index
    %826 = vector.load %arg42[%c32_444, %c0_445] : memref<64x32xf32, #tpu.memory_space<vmem>>, vector<8x32xf32>
    %cst_446 = arith.constant dense<0.000000e+00> : vector<8x32xf32>
    %827 = tpu.matmul %795, %549, %cst_446 {dimension_numbers = #tpu.dot_dimension_numbers<[1], [0], [0], [1], [0, 0, 1, 1], [], []>} : vector<8x32xf32>, vector<32x32xf32>, vector<8x32xf32> -> vector<8x32xf32>
    %828 = arith.addf %826, %827 : vector<8x32xf32>
    %829 = arith.negf %828 : vector<8x32xf32>
    %830 = math.exp %829 : vector<8x32xf32>
    %cst_447 = arith.constant 1.000000e+00 : f32
    %831 = vector.broadcast %cst_447 : f32 to vector<8x32xf32>
    %832 = arith.addf %831, %830 : vector<8x32xf32>
    %833 = arith.divf %831, %832 : vector<8x32xf32>
    %c32_448 = arith.constant 32 : index
    %c0_449 = arith.constant 0 : index
    %834 = vector.load %arg43[%c32_448, %c0_449] : memref<64x32xf32, #tpu.memory_space<vmem>>, vector<8x32xf32>
    %cst_450 = arith.constant dense<0.000000e+00> : vector<8x32xf32>
    %835 = tpu.matmul %795, %550, %cst_450 {dimension_numbers = #tpu.dot_dimension_numbers<[1], [0], [0], [1], [0, 0, 1, 1], [], []>} : vector<8x32xf32>, vector<32x32xf32>, vector<8x32xf32> -> vector<8x32xf32>
    %836 = arith.addf %834, %835 : vector<8x32xf32>
    %837 = arith.negf %836 : vector<8x32xf32>
    %838 = math.exp %837 : vector<8x32xf32>
    %cst_451 = arith.constant 1.000000e+00 : f32
    %839 = vector.broadcast %cst_451 : f32 to vector<8x32xf32>
    %840 = arith.addf %839, %838 : vector<8x32xf32>
    %841 = arith.divf %839, %840 : vector<8x32xf32>
    %c32_452 = arith.constant 32 : index
    %c0_453 = arith.constant 0 : index
    %842 = vector.load %arg44[%c32_452, %c0_453] : memref<64x32xf32, #tpu.memory_space<vmem>>, vector<8x32xf32>
    %cst_454 = arith.constant dense<0.000000e+00> : vector<8x32xf32>
    %843 = tpu.matmul %795, %551, %cst_454 {dimension_numbers = #tpu.dot_dimension_numbers<[1], [0], [0], [1], [0, 0, 1, 1], [], []>} : vector<8x32xf32>, vector<32x32xf32>, vector<8x32xf32> -> vector<8x32xf32>
    %844 = vector.broadcast %556 : vector<1x32xf32> to vector<8x32xf32>
    %845 = arith.addf %843, %844 : vector<8x32xf32>
    %846 = arith.mulf %833, %845 : vector<8x32xf32>
    %847 = arith.addf %842, %846 : vector<8x32xf32>
    %848 = math.tanh %847 : vector<8x32xf32>
    %cst_455 = arith.constant 1.000000e+00 : f32
    %849 = vector.broadcast %cst_455 : f32 to vector<8x32xf32>
    %850 = arith.subf %849, %841 : vector<8x32xf32>
    %851 = arith.mulf %850, %848 : vector<8x32xf32>
    %852 = arith.mulf %841, %795 : vector<8x32xf32>
    %853 = arith.addf %851, %852 : vector<8x32xf32>
    %c32_456 = arith.constant 32 : index
    %c0_457 = arith.constant 0 : index
    %854 = vector.load %arg48[%c32_456, %c0_457] : memref<64x32xf32, #tpu.memory_space<vmem>>, vector<8x32xf32>
    tpu.vector_store %arg48[%c32_456, %c0_457], %853 {strides = array<i32>} : memref<64x32xf32, #tpu.memory_space<vmem>>, vector<8x32xf32>,
    %c24_458 = arith.constant 24 : index
    %c0_459 = arith.constant 0 : index
    %855 = vector.load %arg45[%c24_458, %c0_459] : memref<64x32xf32, #tpu.memory_space<vmem>>, vector<8x32xf32>
    %cst_460 = arith.constant dense<0.000000e+00> : vector<8x32xf32>
    %856 = tpu.matmul %824, %572, %cst_460 {dimension_numbers = #tpu.dot_dimension_numbers<[1], [0], [0], [1], [0, 0, 1, 1], [], []>} : vector<8x32xf32>, vector<32x32xf32>, vector<8x32xf32> -> vector<8x32xf32>
    %857 = arith.addf %855, %856 : vector<8x32xf32>
    %858 = arith.negf %857 : vector<8x32xf32>
    %859 = math.exp %858 : vector<8x32xf32>
    %cst_461 = arith.constant 1.000000e+00 : f32
    %860 = vector.broadcast %cst_461 : f32 to vector<8x32xf32>
    %861 = arith.addf %860, %859 : vector<8x32xf32>
    %862 = arith.divf %860, %861 : vector<8x32xf32>
    %c24_462 = arith.constant 24 : index
    %c0_463 = arith.constant 0 : index
    %863 = vector.load %arg46[%c24_462, %c0_463] : memref<64x32xf32, #tpu.memory_space<vmem>>, vector<8x32xf32>
    %cst_464 = arith.constant dense<0.000000e+00> : vector<8x32xf32>
    %864 = tpu.matmul %824, %573, %cst_464 {dimension_numbers = #tpu.dot_dimension_numbers<[1], [0], [0], [1], [0, 0, 1, 1], [], []>} : vector<8x32xf32>, vector<32x32xf32>, vector<8x32xf32> -> vector<8x32xf32>
    %865 = arith.addf %863, %864 : vector<8x32xf32>
    %866 = arith.negf %865 : vector<8x32xf32>
    %867 = math.exp %866 : vector<8x32xf32>
    %cst_465 = arith.constant 1.000000e+00 : f32
    %868 = vector.broadcast %cst_465 : f32 to vector<8x32xf32>
    %869 = arith.addf %868, %867 : vector<8x32xf32>
    %870 = arith.divf %868, %869 : vector<8x32xf32>
    %c24_466 = arith.constant 24 : index
    %c0_467 = arith.constant 0 : index
    %871 = vector.load %arg47[%c24_466, %c0_467] : memref<64x32xf32, #tpu.memory_space<vmem>>, vector<8x32xf32>
    %cst_468 = arith.constant dense<0.000000e+00> : vector<8x32xf32>
    %872 = tpu.matmul %824, %574, %cst_468 {dimension_numbers = #tpu.dot_dimension_numbers<[1], [0], [0], [1], [0, 0, 1, 1], [], []>} : vector<8x32xf32>, vector<32x32xf32>, vector<8x32xf32> -> vector<8x32xf32>
    %873 = vector.broadcast %579 : vector<1x32xf32> to vector<8x32xf32>
    %874 = arith.addf %872, %873 : vector<8x32xf32>
    %875 = arith.mulf %862, %874 : vector<8x32xf32>
    %876 = arith.addf %871, %875 : vector<8x32xf32>
    %877 = math.tanh %876 : vector<8x32xf32>
    %cst_469 = arith.constant 1.000000e+00 : f32
    %878 = vector.broadcast %cst_469 : f32 to vector<8x32xf32>
    %879 = arith.subf %878, %870 : vector<8x32xf32>
    %880 = arith.mulf %879, %877 : vector<8x32xf32>
    %881 = arith.mulf %870, %824 : vector<8x32xf32>
    %882 = arith.addf %880, %881 : vector<8x32xf32>
    %c24_470 = arith.constant 24 : index
    %c0_471 = arith.constant 0 : index
    %883 = vector.load %arg49[%c24_470, %c0_471] : memref<64x32xf32, #tpu.memory_space<vmem>>, vector<8x32xf32>
    tpu.vector_store %arg49[%c24_470, %c0_471], %882 {strides = array<i32>} : memref<64x32xf32, #tpu.memory_space<vmem>>, vector<8x32xf32>,
    %c40_472 = arith.constant 40 : index
    %c0_473 = arith.constant 0 : index
    %884 = vector.load %arg42[%c40_472, %c0_473] : memref<64x32xf32, #tpu.memory_space<vmem>>, vector<8x32xf32>
    %cst_474 = arith.constant dense<0.000000e+00> : vector<8x32xf32>
    %885 = tpu.matmul %853, %549, %cst_474 {dimension_numbers = #tpu.dot_dimension_numbers<[1], [0], [0], [1], [0, 0, 1, 1], [], []>} : vector<8x32xf32>, vector<32x32xf32>, vector<8x32xf32> -> vector<8x32xf32>
    %886 = arith.addf %884, %885 : vector<8x32xf32>
    %887 = arith.negf %886 : vector<8x32xf32>
    %888 = math.exp %887 : vector<8x32xf32>
    %cst_475 = arith.constant 1.000000e+00 : f32
    %889 = vector.broadcast %cst_475 : f32 to vector<8x32xf32>
    %890 = arith.addf %889, %888 : vector<8x32xf32>
    %891 = arith.divf %889, %890 : vector<8x32xf32>
    %c40_476 = arith.constant 40 : index
    %c0_477 = arith.constant 0 : index
    %892 = vector.load %arg43[%c40_476, %c0_477] : memref<64x32xf32, #tpu.memory_space<vmem>>, vector<8x32xf32>
    %cst_478 = arith.constant dense<0.000000e+00> : vector<8x32xf32>
    %893 = tpu.matmul %853, %550, %cst_478 {dimension_numbers = #tpu.dot_dimension_numbers<[1], [0], [0], [1], [0, 0, 1, 1], [], []>} : vector<8x32xf32>, vector<32x32xf32>, vector<8x32xf32> -> vector<8x32xf32>
    %894 = arith.addf %892, %893 : vector<8x32xf32>
    %895 = arith.negf %894 : vector<8x32xf32>
    %896 = math.exp %895 : vector<8x32xf32>
    %cst_479 = arith.constant 1.000000e+00 : f32
    %897 = vector.broadcast %cst_479 : f32 to vector<8x32xf32>
    %898 = arith.addf %897, %896 : vector<8x32xf32>
    %899 = arith.divf %897, %898 : vector<8x32xf32>
    %c40_480 = arith.constant 40 : index
    %c0_481 = arith.constant 0 : index
    %900 = vector.load %arg44[%c40_480, %c0_481] : memref<64x32xf32, #tpu.memory_space<vmem>>, vector<8x32xf32>
    %cst_482 = arith.constant dense<0.000000e+00> : vector<8x32xf32>
    %901 = tpu.matmul %853, %551, %cst_482 {dimension_numbers = #tpu.dot_dimension_numbers<[1], [0], [0], [1], [0, 0, 1, 1], [], []>} : vector<8x32xf32>, vector<32x32xf32>, vector<8x32xf32> -> vector<8x32xf32>
    %902 = vector.broadcast %556 : vector<1x32xf32> to vector<8x32xf32>
    %903 = arith.addf %901, %902 : vector<8x32xf32>
    %904 = arith.mulf %891, %903 : vector<8x32xf32>
    %905 = arith.addf %900, %904 : vector<8x32xf32>
    %906 = math.tanh %905 : vector<8x32xf32>
    %cst_483 = arith.constant 1.000000e+00 : f32
    %907 = vector.broadcast %cst_483 : f32 to vector<8x32xf32>
    %908 = arith.subf %907, %899 : vector<8x32xf32>
    %909 = arith.mulf %908, %906 : vector<8x32xf32>
    %910 = arith.mulf %899, %853 : vector<8x32xf32>
    %911 = arith.addf %909, %910 : vector<8x32xf32>
    %c40_484 = arith.constant 40 : index
    %c0_485 = arith.constant 0 : index
    %912 = vector.load %arg48[%c40_484, %c0_485] : memref<64x32xf32, #tpu.memory_space<vmem>>, vector<8x32xf32>
    tpu.vector_store %arg48[%c40_484, %c0_485], %911 {strides = array<i32>} : memref<64x32xf32, #tpu.memory_space<vmem>>, vector<8x32xf32>,
    %c16_486 = arith.constant 16 : index
    %c0_487 = arith.constant 0 : index
    %913 = vector.load %arg45[%c16_486, %c0_487] : memref<64x32xf32, #tpu.memory_space<vmem>>, vector<8x32xf32>
    %cst_488 = arith.constant dense<0.000000e+00> : vector<8x32xf32>
    %914 = tpu.matmul %882, %572, %cst_488 {dimension_numbers = #tpu.dot_dimension_numbers<[1], [0], [0], [1], [0, 0, 1, 1], [], []>} : vector<8x32xf32>, vector<32x32xf32>, vector<8x32xf32> -> vector<8x32xf32>
    %915 = arith.addf %913, %914 : vector<8x32xf32>
    %916 = arith.negf %915 : vector<8x32xf32>
    %917 = math.exp %916 : vector<8x32xf32>
    %cst_489 = arith.constant 1.000000e+00 : f32
    %918 = vector.broadcast %cst_489 : f32 to vector<8x32xf32>
    %919 = arith.addf %918, %917 : vector<8x32xf32>
    %920 = arith.divf %918, %919 : vector<8x32xf32>
    %c16_490 = arith.constant 16 : index
    %c0_491 = arith.constant 0 : index
    %921 = vector.load %arg46[%c16_490, %c0_491] : memref<64x32xf32, #tpu.memory_space<vmem>>, vector<8x32xf32>
    %cst_492 = arith.constant dense<0.000000e+00> : vector<8x32xf32>
    %922 = tpu.matmul %882, %573, %cst_492 {dimension_numbers = #tpu.dot_dimension_numbers<[1], [0], [0], [1], [0, 0, 1, 1], [], []>} : vector<8x32xf32>, vector<32x32xf32>, vector<8x32xf32> -> vector<8x32xf32>
    %923 = arith.addf %921, %922 : vector<8x32xf32>
    %924 = arith.negf %923 : vector<8x32xf32>
    %925 = math.exp %924 : vector<8x32xf32>
    %cst_493 = arith.constant 1.000000e+00 : f32
    %926 = vector.broadcast %cst_493 : f32 to vector<8x32xf32>
    %927 = arith.addf %926, %925 : vector<8x32xf32>
    %928 = arith.divf %926, %927 : vector<8x32xf32>
    %c16_494 = arith.constant 16 : index
    %c0_495 = arith.constant 0 : index
    %929 = vector.load %arg47[%c16_494, %c0_495] : memref<64x32xf32, #tpu.memory_space<vmem>>, vector<8x32xf32>
    %cst_496 = arith.constant dense<0.000000e+00> : vector<8x32xf32>
    %930 = tpu.matmul %882, %574, %cst_496 {dimension_numbers = #tpu.dot_dimension_numbers<[1], [0], [0], [1], [0, 0, 1, 1], [], []>} : vector<8x32xf32>, vector<32x32xf32>, vector<8x32xf32> -> vector<8x32xf32>
    %931 = vector.broadcast %579 : vector<1x32xf32> to vector<8x32xf32>
    %932 = arith.addf %930, %931 : vector<8x32xf32>
    %933 = arith.mulf %920, %932 : vector<8x32xf32>
    %934 = arith.addf %929, %933 : vector<8x32xf32>
    %935 = math.tanh %934 : vector<8x32xf32>
    %cst_497 = arith.constant 1.000000e+00 : f32
    %936 = vector.broadcast %cst_497 : f32 to vector<8x32xf32>
    %937 = arith.subf %936, %928 : vector<8x32xf32>
    %938 = arith.mulf %937, %935 : vector<8x32xf32>
    %939 = arith.mulf %928, %882 : vector<8x32xf32>
    %940 = arith.addf %938, %939 : vector<8x32xf32>
    %c16_498 = arith.constant 16 : index
    %c0_499 = arith.constant 0 : index
    %941 = vector.load %arg49[%c16_498, %c0_499] : memref<64x32xf32, #tpu.memory_space<vmem>>, vector<8x32xf32>
    tpu.vector_store %arg49[%c16_498, %c0_499], %940 {strides = array<i32>} : memref<64x32xf32, #tpu.memory_space<vmem>>, vector<8x32xf32>,
    %c48_500 = arith.constant 48 : index
    %c0_501 = arith.constant 0 : index
    %942 = vector.load %arg42[%c48_500, %c0_501] : memref<64x32xf32, #tpu.memory_space<vmem>>, vector<8x32xf32>
    %cst_502 = arith.constant dense<0.000000e+00> : vector<8x32xf32>
    %943 = tpu.matmul %911, %549, %cst_502 {dimension_numbers = #tpu.dot_dimension_numbers<[1], [0], [0], [1], [0, 0, 1, 1], [], []>} : vector<8x32xf32>, vector<32x32xf32>, vector<8x32xf32> -> vector<8x32xf32>
    %944 = arith.addf %942, %943 : vector<8x32xf32>
    %945 = arith.negf %944 : vector<8x32xf32>
    %946 = math.exp %945 : vector<8x32xf32>
    %cst_503 = arith.constant 1.000000e+00 : f32
    %947 = vector.broadcast %cst_503 : f32 to vector<8x32xf32>
    %948 = arith.addf %947, %946 : vector<8x32xf32>
    %949 = arith.divf %947, %948 : vector<8x32xf32>
    %c48_504 = arith.constant 48 : index
    %c0_505 = arith.constant 0 : index
    %950 = vector.load %arg43[%c48_504, %c0_505] : memref<64x32xf32, #tpu.memory_space<vmem>>, vector<8x32xf32>
    %cst_506 = arith.constant dense<0.000000e+00> : vector<8x32xf32>
    %951 = tpu.matmul %911, %550, %cst_506 {dimension_numbers = #tpu.dot_dimension_numbers<[1], [0], [0], [1], [0, 0, 1, 1], [], []>} : vector<8x32xf32>, vector<32x32xf32>, vector<8x32xf32> -> vector<8x32xf32>
    %952 = arith.addf %950, %951 : vector<8x32xf32>
    %953 = arith.negf %952 : vector<8x32xf32>
    %954 = math.exp %953 : vector<8x32xf32>
    %cst_507 = arith.constant 1.000000e+00 : f32
    %955 = vector.broadcast %cst_507 : f32 to vector<8x32xf32>
    %956 = arith.addf %955, %954 : vector<8x32xf32>
    %957 = arith.divf %955, %956 : vector<8x32xf32>
    %c48_508 = arith.constant 48 : index
    %c0_509 = arith.constant 0 : index
    %958 = vector.load %arg44[%c48_508, %c0_509] : memref<64x32xf32, #tpu.memory_space<vmem>>, vector<8x32xf32>
    %cst_510 = arith.constant dense<0.000000e+00> : vector<8x32xf32>
    %959 = tpu.matmul %911, %551, %cst_510 {dimension_numbers = #tpu.dot_dimension_numbers<[1], [0], [0], [1], [0, 0, 1, 1], [], []>} : vector<8x32xf32>, vector<32x32xf32>, vector<8x32xf32> -> vector<8x32xf32>
    %960 = vector.broadcast %556 : vector<1x32xf32> to vector<8x32xf32>
    %961 = arith.addf %959, %960 : vector<8x32xf32>
    %962 = arith.mulf %949, %961 : vector<8x32xf32>
    %963 = arith.addf %958, %962 : vector<8x32xf32>
    %964 = math.tanh %963 : vector<8x32xf32>
    %cst_511 = arith.constant 1.000000e+00 : f32
    %965 = vector.broadcast %cst_511 : f32 to vector<8x32xf32>
    %966 = arith.subf %965, %957 : vector<8x32xf32>
    %967 = arith.mulf %966, %964 : vector<8x32xf32>
    %968 = arith.mulf %957, %911 : vector<8x32xf32>
    %969 = arith.addf %967, %968 : vector<8x32xf32>
    %c48_512 = arith.constant 48 : index
    %c0_513 = arith.constant 0 : index
    %970 = vector.load %arg48[%c48_512, %c0_513] : memref<64x32xf32, #tpu.memory_space<vmem>>, vector<8x32xf32>
    tpu.vector_store %arg48[%c48_512, %c0_513], %969 {strides = array<i32>} : memref<64x32xf32, #tpu.memory_space<vmem>>, vector<8x32xf32>,
    %c8_514 = arith.constant 8 : index
    %c0_515 = arith.constant 0 : index
    %971 = vector.load %arg45[%c8_514, %c0_515] : memref<64x32xf32, #tpu.memory_space<vmem>>, vector<8x32xf32>
    %cst_516 = arith.constant dense<0.000000e+00> : vector<8x32xf32>
    %972 = tpu.matmul %940, %572, %cst_516 {dimension_numbers = #tpu.dot_dimension_numbers<[1], [0], [0], [1], [0, 0, 1, 1], [], []>} : vector<8x32xf32>, vector<32x32xf32>, vector<8x32xf32> -> vector<8x32xf32>
    %973 = arith.addf %971, %972 : vector<8x32xf32>
    %974 = arith.negf %973 : vector<8x32xf32>
    %975 = math.exp %974 : vector<8x32xf32>
    %cst_517 = arith.constant 1.000000e+00 : f32
    %976 = vector.broadcast %cst_517 : f32 to vector<8x32xf32>
    %977 = arith.addf %976, %975 : vector<8x32xf32>
    %978 = arith.divf %976, %977 : vector<8x32xf32>
    %c8_518 = arith.constant 8 : index
    %c0_519 = arith.constant 0 : index
    %979 = vector.load %arg46[%c8_518, %c0_519] : memref<64x32xf32, #tpu.memory_space<vmem>>, vector<8x32xf32>
    %cst_520 = arith.constant dense<0.000000e+00> : vector<8x32xf32>
    %980 = tpu.matmul %940, %573, %cst_520 {dimension_numbers = #tpu.dot_dimension_numbers<[1], [0], [0], [1], [0, 0, 1, 1], [], []>} : vector<8x32xf32>, vector<32x32xf32>, vector<8x32xf32> -> vector<8x32xf32>
    %981 = arith.addf %979, %980 : vector<8x32xf32>
    %982 = arith.negf %981 : vector<8x32xf32>
    %983 = math.exp %982 : vector<8x32xf32>
    %cst_521 = arith.constant 1.000000e+00 : f32
    %984 = vector.broadcast %cst_521 : f32 to vector<8x32xf32>
    %985 = arith.addf %984, %983 : vector<8x32xf32>
    %986 = arith.divf %984, %985 : vector<8x32xf32>
    %c8_522 = arith.constant 8 : index
    %c0_523 = arith.constant 0 : index
    %987 = vector.load %arg47[%c8_522, %c0_523] : memref<64x32xf32, #tpu.memory_space<vmem>>, vector<8x32xf32>
    %cst_524 = arith.constant dense<0.000000e+00> : vector<8x32xf32>
    %988 = tpu.matmul %940, %574, %cst_524 {dimension_numbers = #tpu.dot_dimension_numbers<[1], [0], [0], [1], [0, 0, 1, 1], [], []>} : vector<8x32xf32>, vector<32x32xf32>, vector<8x32xf32> -> vector<8x32xf32>
    %989 = vector.broadcast %579 : vector<1x32xf32> to vector<8x32xf32>
    %990 = arith.addf %988, %989 : vector<8x32xf32>
    %991 = arith.mulf %978, %990 : vector<8x32xf32>
    %992 = arith.addf %987, %991 : vector<8x32xf32>
    %993 = math.tanh %992 : vector<8x32xf32>
    %cst_525 = arith.constant 1.000000e+00 : f32
    %994 = vector.broadcast %cst_525 : f32 to vector<8x32xf32>
    %995 = arith.subf %994, %986 : vector<8x32xf32>
    %996 = arith.mulf %995, %993 : vector<8x32xf32>
    %997 = arith.mulf %986, %940 : vector<8x32xf32>
    %998 = arith.addf %996, %997 : vector<8x32xf32>
    %c8_526 = arith.constant 8 : index
    %c0_527 = arith.constant 0 : index
    %999 = vector.load %arg49[%c8_526, %c0_527] : memref<64x32xf32, #tpu.memory_space<vmem>>, vector<8x32xf32>
    tpu.vector_store %arg49[%c8_526, %c0_527], %998 {strides = array<i32>} : memref<64x32xf32, #tpu.memory_space<vmem>>, vector<8x32xf32>,
    %c56_528 = arith.constant 56 : index
    %c0_529 = arith.constant 0 : index
    %1000 = vector.load %arg42[%c56_528, %c0_529] : memref<64x32xf32, #tpu.memory_space<vmem>>, vector<8x32xf32>
    %cst_530 = arith.constant dense<0.000000e+00> : vector<8x32xf32>
    %1001 = tpu.matmul %969, %549, %cst_530 {dimension_numbers = #tpu.dot_dimension_numbers<[1], [0], [0], [1], [0, 0, 1, 1], [], []>} : vector<8x32xf32>, vector<32x32xf32>, vector<8x32xf32> -> vector<8x32xf32>
    %1002 = arith.addf %1000, %1001 : vector<8x32xf32>
    %1003 = arith.negf %1002 : vector<8x32xf32>
    %1004 = math.exp %1003 : vector<8x32xf32>
    %cst_531 = arith.constant 1.000000e+00 : f32
    %1005 = vector.broadcast %cst_531 : f32 to vector<8x32xf32>
    %1006 = arith.addf %1005, %1004 : vector<8x32xf32>
    %1007 = arith.divf %1005, %1006 : vector<8x32xf32>
    %c56_532 = arith.constant 56 : index
    %c0_533 = arith.constant 0 : index
    %1008 = vector.load %arg43[%c56_532, %c0_533] : memref<64x32xf32, #tpu.memory_space<vmem>>, vector<8x32xf32>
    %cst_534 = arith.constant dense<0.000000e+00> : vector<8x32xf32>
    %1009 = tpu.matmul %969, %550, %cst_534 {dimension_numbers = #tpu.dot_dimension_numbers<[1], [0], [0], [1], [0, 0, 1, 1], [], []>} : vector<8x32xf32>, vector<32x32xf32>, vector<8x32xf32> -> vector<8x32xf32>
    %1010 = arith.addf %1008, %1009 : vector<8x32xf32>
    %1011 = arith.negf %1010 : vector<8x32xf32>
    %1012 = math.exp %1011 : vector<8x32xf32>
    %cst_535 = arith.constant 1.000000e+00 : f32
    %1013 = vector.broadcast %cst_535 : f32 to vector<8x32xf32>
    %1014 = arith.addf %1013, %1012 : vector<8x32xf32>
    %1015 = arith.divf %1013, %1014 : vector<8x32xf32>
    %c56_536 = arith.constant 56 : index
    %c0_537 = arith.constant 0 : index
    %1016 = vector.load %arg44[%c56_536, %c0_537] : memref<64x32xf32, #tpu.memory_space<vmem>>, vector<8x32xf32>
    %cst_538 = arith.constant dense<0.000000e+00> : vector<8x32xf32>
    %1017 = tpu.matmul %969, %551, %cst_538 {dimension_numbers = #tpu.dot_dimension_numbers<[1], [0], [0], [1], [0, 0, 1, 1], [], []>} : vector<8x32xf32>, vector<32x32xf32>, vector<8x32xf32> -> vector<8x32xf32>
    %1018 = vector.broadcast %556 : vector<1x32xf32> to vector<8x32xf32>
    %1019 = arith.addf %1017, %1018 : vector<8x32xf32>
    %1020 = arith.mulf %1007, %1019 : vector<8x32xf32>
    %1021 = arith.addf %1016, %1020 : vector<8x32xf32>
    %1022 = math.tanh %1021 : vector<8x32xf32>
    %cst_539 = arith.constant 1.000000e+00 : f32
    %1023 = vector.broadcast %cst_539 : f32 to vector<8x32xf32>
    %1024 = arith.subf %1023, %1015 : vector<8x32xf32>
    %1025 = arith.mulf %1024, %1022 : vector<8x32xf32>
    %1026 = arith.mulf %1015, %969 : vector<8x32xf32>
    %1027 = arith.addf %1025, %1026 : vector<8x32xf32>
    %c56_540 = arith.constant 56 : index
    %c0_541 = arith.constant 0 : index
    %1028 = vector.load %arg48[%c56_540, %c0_541] : memref<64x32xf32, #tpu.memory_space<vmem>>, vector<8x32xf32>
    tpu.vector_store %arg48[%c56_540, %c0_541], %1027 {strides = array<i32>} : memref<64x32xf32, #tpu.memory_space<vmem>>, vector<8x32xf32>,
    %c0_542 = arith.constant 0 : index
    %c0_543 = arith.constant 0 : index
    %1029 = vector.load %arg45[%c0_542, %c0_543] : memref<64x32xf32, #tpu.memory_space<vmem>>, vector<8x32xf32>
    %cst_544 = arith.constant dense<0.000000e+00> : vector<8x32xf32>
    %1030 = tpu.matmul %998, %572, %cst_544 {dimension_numbers = #tpu.dot_dimension_numbers<[1], [0], [0], [1], [0, 0, 1, 1], [], []>} : vector<8x32xf32>, vector<32x32xf32>, vector<8x32xf32> -> vector<8x32xf32>
    %1031 = arith.addf %1029, %1030 : vector<8x32xf32>
    %1032 = arith.negf %1031 : vector<8x32xf32>
    %1033 = math.exp %1032 : vector<8x32xf32>
    %cst_545 = arith.constant 1.000000e+00 : f32
    %1034 = vector.broadcast %cst_545 : f32 to vector<8x32xf32>
    %1035 = arith.addf %1034, %1033 : vector<8x32xf32>
    %1036 = arith.divf %1034, %1035 : vector<8x32xf32>
    %c0_546 = arith.constant 0 : index
    %c0_547 = arith.constant 0 : index
    %1037 = vector.load %arg46[%c0_546, %c0_547] : memref<64x32xf32, #tpu.memory_space<vmem>>, vector<8x32xf32>
    %cst_548 = arith.constant dense<0.000000e+00> : vector<8x32xf32>
    %1038 = tpu.matmul %998, %573, %cst_548 {dimension_numbers = #tpu.dot_dimension_numbers<[1], [0], [0], [1], [0, 0, 1, 1], [], []>} : vector<8x32xf32>, vector<32x32xf32>, vector<8x32xf32> -> vector<8x32xf32>
    %1039 = arith.addf %1037, %1038 : vector<8x32xf32>
    %1040 = arith.negf %1039 : vector<8x32xf32>
    %1041 = math.exp %1040 : vector<8x32xf32>
    %cst_549 = arith.constant 1.000000e+00 : f32
    %1042 = vector.broadcast %cst_549 : f32 to vector<8x32xf32>
    %1043 = arith.addf %1042, %1041 : vector<8x32xf32>
    %1044 = arith.divf %1042, %1043 : vector<8x32xf32>
    %c0_550 = arith.constant 0 : index
    %c0_551 = arith.constant 0 : index
    %1045 = vector.load %arg47[%c0_550, %c0_551] : memref<64x32xf32, #tpu.memory_space<vmem>>, vector<8x32xf32>
    %cst_552 = arith.constant dense<0.000000e+00> : vector<8x32xf32>
    %1046 = tpu.matmul %998, %574, %cst_552 {dimension_numbers = #tpu.dot_dimension_numbers<[1], [0], [0], [1], [0, 0, 1, 1], [], []>} : vector<8x32xf32>, vector<32x32xf32>, vector<8x32xf32> -> vector<8x32xf32>
    %1047 = vector.broadcast %579 : vector<1x32xf32> to vector<8x32xf32>
    %1048 = arith.addf %1046, %1047 : vector<8x32xf32>
    %1049 = arith.mulf %1036, %1048 : vector<8x32xf32>
    %1050 = arith.addf %1045, %1049 : vector<8x32xf32>
    %1051 = math.tanh %1050 : vector<8x32xf32>
    %cst_553 = arith.constant 1.000000e+00 : f32
    %1052 = vector.broadcast %cst_553 : f32 to vector<8x32xf32>
    %1053 = arith.subf %1052, %1044 : vector<8x32xf32>
    %1054 = arith.mulf %1053, %1051 : vector<8x32xf32>
    %1055 = arith.mulf %1044, %998 : vector<8x32xf32>
    %1056 = arith.addf %1054, %1055 : vector<8x32xf32>
    %c0_554 = arith.constant 0 : index
    %c0_555 = arith.constant 0 : index
    %1057 = vector.load %arg49[%c0_554, %c0_555] : memref<64x32xf32, #tpu.memory_space<vmem>>, vector<8x32xf32>
    tpu.vector_store %arg49[%c0_554, %c0_555], %1056 {strides = array<i32>} : memref<64x32xf32, #tpu.memory_space<vmem>>, vector<8x32xf32>,
    %c0_556 = arith.constant 0 : index
    %c0_557 = arith.constant 0 : index
    %1058 = vector.load %arg33[%c0_556, %c0_557] : memref<1x32xf32, #tpu.memory_space<vmem>>, vector<1x32xf32>
    %c0_558 = arith.constant 0 : index
    %c0_559 = arith.constant 0 : index
    %1059 = vector.load %arg34[%c0_558, %c0_559] : memref<1x32xf32, #tpu.memory_space<vmem>>, vector<1x32xf32>
    %c0_560 = arith.constant 0 : index
    %c0_561 = arith.constant 0 : index
    %1060 = vector.load %arg48[%c0_560, %c0_561] : memref<64x32xf32, #tpu.memory_space<vmem>>, vector<64x32xf32>
    %c0_562 = arith.constant 0 : index
    %c0_563 = arith.constant 0 : index
    %1061 = vector.load %arg49[%c0_562, %c0_563] : memref<64x32xf32, #tpu.memory_space<vmem>>, vector<64x32xf32>
    %1062 = arith.addf %1060, %1061 : vector<64x32xf32>
    %cst_564 = arith.constant dense<0.000000e+00> : vector<64xf32>
    %1063 = vector.multi_reduction <add>, %1062, %cst_564 [1] : vector<64x32xf32> to vector<64xf32>
    %1064 = vector.shape_cast %1063 : vector<64xf32> to vector<64x1xf32>
    %cst_565 = arith.constant 3.200000e+01 : f32
    %1065 = vector.broadcast %cst_565 : f32 to vector<64x1xf32>
    %1066 = arith.divf %1064, %1065 : vector<64x1xf32>
    %1067 = vector.broadcast %1066 : vector<64x1xf32> to vector<64x32xf32>
    %1068 = arith.subf %1062, %1067 : vector<64x32xf32>
    %1069 = arith.mulf %1068, %1068 : vector<64x32xf32>
    %cst_566 = arith.constant dense<0.000000e+00> : vector<64xf32>
    %1070 = vector.multi_reduction <add>, %1069, %cst_566 [1] : vector<64x32xf32> to vector<64xf32>
    %1071 = vector.shape_cast %1070 : vector<64xf32> to vector<64x1xf32>
    %cst_567 = arith.constant 3.200000e+01 : f32
    %1072 = vector.broadcast %cst_567 : f32 to vector<64x1xf32>
    %1073 = arith.divf %1071, %1072 : vector<64x1xf32>
    %cst_568 = arith.constant 9.99999974E-6 : f32
    %1074 = vector.broadcast %cst_568 : f32 to vector<64x1xf32>
    %1075 = arith.addf %1073, %1074 : vector<64x1xf32>
    %1076 = math.rsqrt %1075 : vector<64x1xf32>
    %1077 = vector.broadcast %1076 : vector<64x1xf32> to vector<64x32xf32>
    %1078 = arith.mulf %1068, %1077 : vector<64x32xf32>
    %1079 = vector.broadcast %1058 : vector<1x32xf32> to vector<64x32xf32>
    %1080 = arith.mulf %1078, %1079 : vector<64x32xf32>
    %1081 = vector.broadcast %1059 : vector<1x32xf32> to vector<64x32xf32>
    %1082 = arith.addf %1080, %1081 : vector<64x32xf32>
    %c0_569 = arith.constant 0 : index
    %c0_570 = arith.constant 0 : index
    %1083 = vector.load %arg50[%c0_569, %c0_570] : memref<64x32xf32, #tpu.memory_space<vmem>>, vector<64x32xf32>
    tpu.vector_store %arg50[%c0_569, %c0_570], %1082 {strides = array<i32>} : memref<64x32xf32, #tpu.memory_space<vmem>>, vector<64x32xf32>,
    %c0_571 = arith.constant 0 : index
    %c0_572 = arith.constant 0 : index
    %1084 = vector.load %arg35[%c0_571, %c0_572] : memref<32x32xf32, #tpu.memory_space<vmem>>, vector<32x32xf32>
    %c0_573 = arith.constant 0 : index
    %c0_574 = arith.constant 0 : index
    %1085 = vector.load %arg36[%c0_573, %c0_574] : memref<1x32xf32, #tpu.memory_space<vmem>>, vector<1x32xf32>
    %c0_575 = arith.constant 0 : index
    %c0_576 = arith.constant 0 : index
    %1086 = vector.load %arg37[%c0_575, %c0_576] : memref<32x32xf32, #tpu.memory_space<vmem>>, vector<32x32xf32>
    %c0_577 = arith.constant 0 : index
    %c0_578 = arith.constant 0 : index
    %1087 = vector.load %arg38[%c0_577, %c0_578] : memref<1x32xf32, #tpu.memory_space<vmem>>, vector<1x32xf32>
    %c0_579 = arith.constant 0 : index
    %c0_580 = arith.constant 0 : index
    %1088 = vector.load %arg39[%c0_579, %c0_580] : memref<32x2xf32, #tpu.memory_space<vmem>>, vector<32x2xf32>
    %c0_581 = arith.constant 0 : index
    %c0_582 = arith.constant 0 : index
    %1089 = vector.load %arg40[%c0_581, %c0_582] : memref<1x2xf32, #tpu.memory_space<vmem>>, vector<1x2xf32>
    %c0_583 = arith.constant 0 : index
    %c0_584 = arith.constant 0 : index
    %1090 = vector.load %arg50[%c0_583, %c0_584] : memref<64x32xf32, #tpu.memory_space<vmem>>, vector<64x32xf32>
    %cst_585 = arith.constant dense<0.000000e+00> : vector<64x32xf32>
    %1091 = tpu.matmul %1090, %1084, %cst_585 {dimension_numbers = #tpu.dot_dimension_numbers<[1], [0], [0], [1], [0, 0, 1, 1], [], []>} : vector<64x32xf32>, vector<32x32xf32>, vector<64x32xf32> -> vector<64x32xf32>
    %1092 = vector.broadcast %1085 : vector<1x32xf32> to vector<64x32xf32>
    %1093 = arith.addf %1091, %1092 : vector<64x32xf32>
    %cst_586 = arith.constant dense<0.000000e+00> : vector<64x32xf32>
    %1094 = tpu.matmul %1090, %1086, %cst_586 {dimension_numbers = #tpu.dot_dimension_numbers<[1], [0], [0], [1], [0, 0, 1, 1], [], []>} : vector<64x32xf32>, vector<32x32xf32>, vector<64x32xf32> -> vector<64x32xf32>
    %1095 = vector.broadcast %1087 : vector<1x32xf32> to vector<64x32xf32>
    %1096 = arith.addf %1094, %1095 : vector<64x32xf32>
    %cst_587 = arith.constant 5.000000e-01 : f32
    %1097 = vector.broadcast %cst_587 : f32 to vector<64x32xf32>
    %1098 = arith.mulf %1097, %1096 : vector<64x32xf32>
    %1099 = math.exp %1098 : vector<64x32xf32>
    %c0_588 = arith.constant 0 : index
    %c0_589 = arith.constant 0 : index
    %1100 = vector.load %arg1[%c0_588, %c0_589] : memref<64x32xf32, #tpu.memory_space<vmem>>, vector<64x32xf32>
    %1101 = arith.mulf %1099, %1100 : vector<64x32xf32>
    %1102 = arith.addf %1093, %1101 : vector<64x32xf32>
    %1103 = vector.broadcast %6 : vector<64x1xf32> to vector<64x32xf32>
    %1104 = arith.mulf %1102, %1103 : vector<64x32xf32>
    %c0_590 = arith.constant 0 : index
    %c0_591 = arith.constant 0 : index
    %1105 = vector.load %arg2[%c0_590, %c0_591] : memref<8x64xf32, #tpu.memory_space<vmem>>, vector<8x64xf32>
    %cst_592 = arith.constant dense<0.000000e+00> : vector<8x32xf32>
    %1106 = tpu.matmul %1105, %1104, %cst_592 {dimension_numbers = #tpu.dot_dimension_numbers<[1], [0], [0], [1], [0, 0, 1, 1], [], []>} : vector<8x64xf32>, vector<64x32xf32>, vector<8x32xf32> -> vector<8x32xf32>
    %cst_593 = arith.constant dense<0.000000e+00> : vector<8x2xf32>
    %1107 = tpu.matmul %1106, %1088, %cst_593 {dimension_numbers = #tpu.dot_dimension_numbers<[1], [0], [0], [1], [0, 0, 1, 1], [], []>} : vector<8x32xf32>, vector<32x2xf32>, vector<8x2xf32> -> vector<8x2xf32>
    %1108 = vector.broadcast %1089 : vector<1x2xf32> to vector<8x2xf32>
    %1109 = arith.addf %1107, %1108 : vector<8x2xf32>
    %c0_594 = arith.constant 0 : index
    %c0_595 = arith.constant 0 : index
    %1110 = vector.load %arg41[%c0_594, %c0_595] : memref<8x2xf32, #tpu.memory_space<vmem>>, vector<8x2xf32>
    tpu.vector_store %arg41[%c0_594, %c0_595], %1109 {strides = array<i32>} : memref<8x2xf32, #tpu.memory_space<vmem>>, vector<8x2xf32>,
    return
  }
}

</mosaic_0001>

<bundles_post_ra>
// kernel: vae_forward.1
= control target key start
LH: loop header
LB: loop body
LE: loop exit
PB: predicated region body
PF: predicated region fallthrough
CT: control target
= control target key end

     0   :  { %s14004_s6 = smov 1   ;;  %s14005_s10 = smov 2   ;;  %s16596_s0 = inlined_call_operand.smem [shape: u32[42], index: -1, kind: input, shape index: {}] }
   0x1   :  { %s14085_s5 = sld [smem:[%s16596_s0]]   ;;  %s14006_s14 = smov 3  }
   0x2   :  { %s14090_s9 = sld [smem:[%s16596_s0 + %s14004_s6]]   ;;  %s14007_s18 = smov 4  }
   0x3   :  { %s14095_s13 = sld [smem:[%s16596_s0 + %s14005_s10]]   ;;  %s14008_s22 = smov 5  }
   0x4   :  { %s14100_s17 = sld [smem:[%s16596_s0 + %s14006_s14]]   ;;  %s14009_s26 = smov 6  }
   0x5   :  { %s14105_s21 = sld [smem:[%s16596_s0 + %s14007_s18]]   ;;  %s14010_s30 = smov 7  }
   0x6   :  { %s14110_s25 = sld [smem:[%s16596_s0 + %s14008_s22]]   ;;  %s14011_s4 = smov 8  }
   0x7   :  { %16608 = sst [smem:[#allocation69_spill]] %s14085_s5  ;;  %s14012_s10 = smov 9  }
   0x8   :  { %16609 = sst [smem:[#allocation70_spill]] %s14090_s9  ;;  %s14013_s15 = smov 10  }
   0x9   :  { %16610 = sst [smem:[#allocation71_spill]] %s14095_s13  ;;  %s14014_s20 = smov 11  }
   0xa   :  { %s14115_s29 = sld [smem:[%s16596_s0 + %s14009_s26]]   ;;  %s14015_s26 = smov 12  }
   0xb   :  { %s14120_s3 = sld [smem:[%s16596_s0 + %s14010_s30]]   ;;  %s14016_s1 = smov 13  }
   0xc   :  { %16611 = sst [smem:[#allocation72_spill]] %s14110_s25  ;;  %s14017_s7 = smov 14  }
   0xd   :  { %s14125_s8 = sld [smem:[%s16596_s0 + %s14011_s4]]   ;;  %s14019_s22 = smov 16  }
   0xe   :  { %s14130_s14 = sld [smem:[%s16596_s0 + %s14012_s10]]   ;;  %s14020_s28 = smov 17  }
   0xf   :  { %s14135_s19 = sld [smem:[%s16596_s0 + %s14013_s15]]   ;;  %s14018_s15 = smov 15  }
  0x10   :  { %16612 = sst [smem:[#allocation73_spill]] %s14115_s29 }
  0x11   :  { %16613 = sst [smem:[#allocation74_spill]] %s14120_s3 }
  0x12   :  { %s14140_s24 = sld [smem:[%s16596_s0 + %s14014_s20]]  }
  0x13   :  { %16614 = sst [smem:[#allocation75_spill]] %s14125_s8 }
  0x14   :  { %s14145_s30 = sld [smem:[%s16596_s0 + %s14015_s26]]  }
  0x15   :  { %16615 = sst [smem:[#allocation76_spill]] %s14135_s19 }
  0x16   :  { %s14150_s6 = sld [smem:[%s16596_s0 + %s14016_s1]]  }
  0x17   :  { %s14155_s12 = sld [smem:[%s16596_s0 + %s14017_s7]]   ;;  %s14021_s7 = smov 18  }
  0x18   :  { %s14160_s20 = sld [smem:[%s16596_s0 + %s14018_s15]]   ;;  %s14022_s15 = smov 19  }
  0x19   :  { %s14165_s27 = sld [smem:[%s16596_s0 + %s14019_s22]]   ;;  %s14023_s22 = smov 20  }
  0x1a   :  { %16616 = sst [smem:[#allocation77_spill]] %s14145_s30 }
  0x1b   :  { %s14170_s4 = sld [smem:[%s16596_s0 + %s14020_s28]]   ;;  %s14024_s28 = smov 21  }
  0x1c   :  { %16617 = sst [smem:[#allocation78_spill]] %s14150_s6 }
  0x1d   :  { %16618 = sst [smem:[#allocation79_spill]] %s14155_s12 }
  0x1e   :  { %16619 = sst [smem:[#allocation80_spill]] %s14160_s20 }
  0x1f   :  { %s14175_s13 = sld [smem:[%s16596_s0 + %s14021_s7]]   ;;  %s14025_s7 = smov 22  }
  0x20   :  { %s14180_s9 = sld [smem:[%s16596_s0 + %s14022_s15]]   ;;  %s14026_s15 = smov 23  }
  0x21   :  { %16620 = sst [smem:[#allocation81_spill]] %s14170_s4 }
  0x22   :  { %s14185_s20 = sld [smem:[%s16596_s0 + %s14023_s22]]   ;;  %s14027_s22 = smov 24  }
  0x23   :  { %s14190_s12 = sld [smem:[%s16596_s0 + %s14024_s28]]   ;;  %s14028_s28 = smov 25  }
  0x24   :  { %s14195_s6 = sld [smem:[%s16596_s0 + %s14025_s7]]   ;;  %s14029_s7 = smov 26  }
  0x25   :  { %s14215_s8 = sld [smem:[%s16596_s0 + %s14029_s7]]   ;;  %s14033_s7 = smov 30  }
  0x26   :  { %16621 = sst [smem:[#allocation82_spill]] %s14180_s9 }
  0x27   :  { %s14200_s9 = sld [smem:[%s16596_s0 + %s14026_s15]]   ;;  %s14030_s15 = smov 27  }
  0x28   :  { %16622 = sst [smem:[#allocation83_spill]] %s14185_s20 }
  0x29   :  { %16623 = sst [smem:[#allocation84_spill]] %s14190_s12 }
  0x2a   :  { %16624 = sst [smem:[#allocation85_spill]] %s14195_s6 }
  0x2b   :  { %s14205_s20 = sld [smem:[%s16596_s0 + %s14027_s22]]   ;;  %s14031_s22 = smov 28  }
  0x2c   :  { %s14210_s12 = sld [smem:[%s16596_s0 + %s14028_s28]]   ;;  %s14032_s28 = smov 29  }
  0x2d   :  { %16626 = sst [smem:[#allocation87_spill]] %s14215_s8 }
  0x2e   :  { %s14220_s3 = sld [smem:[%s16596_s0 + %s14030_s15]]   ;;  %s14034_s15 = smov 31  }
  0x2f   :  { %s14225_s29 = sld [smem:[%s16596_s0 + %s14031_s22]]   ;;  %s14035_s22 = smov 32  }
  0x30   :  { %s14230_s5 = sld [smem:[%s16596_s0 + %s14032_s28]]   ;;  %s14036_s28 = smov 33  }
  0x31   :  { %16625 = sst [smem:[#allocation86_spill]] %s14205_s20 }
  0x32   :  { %s14235_s8 = sld [smem:[%s16596_s0 + %s14033_s7]]   ;;  %s14037_s7 = smov 34  }
  0x33   :  { %s14240_s20 = sld [smem:[%s16596_s0 + %s14034_s15]]   ;;  %s14038_s15 = smov 35  }
  0x34   :  { %s14250_s6 = sld [smem:[%s16596_s0 + %s14036_s28]]   ;;  %s14040_s28 = smov 37  }
  0x35   :  { %16627 = sst [smem:[#allocation88_spill]] %s14225_s29 }
  0x36   :  { %s14245_s29 = sld [smem:[%s16596_s0 + %s14035_s22]]   ;;  %s14039_s22 = smov 36  }
  0x37   :  { %s14260_s4 = sld [smem:[%s16596_s0 + %s14038_s15]]   ;;  %s14042_s15 = smov 39  }
  0x38   :  { %16628 = sst [smem:[#allocation89_spill]] %s14235_s8 }
  0x39   :  { %s14255_s8 = sld [smem:[%s16596_s0 + %s14037_s7]]   ;;  %s14041_s7 = smov 38  }
  0x3a   :  { %s14270_s30 = sld [smem:[%s16596_s0 + %s14040_s28]]   ;;  %s14044_s28 = smov 41  }
  0x3b   :  { %s14280_s19 = sld [smem:[%s16596_s0 + %s14042_s15]]  }
  0x3c   :  { %16629 = sst [smem:[#allocation90_spill]] %s14245_s29 }
  0x3d   :  { %s14265_s29 = sld [smem:[%s16596_s0 + %s14039_s22]]   ;;  %s14043_s22 = smov 40  }
  0x3e   :  { %s14290_s25 = sld [smem:[%s16596_s0 + %s14044_s28]]  }
  0x3f   :  { %16630 = sst [smem:[#allocation91_spill]] %s14255_s8 }
  0x40   :  { %s14275_s8 = sld [smem:[%s16596_s0 + %s14041_s7]]  }
  0x43   :  { %16631 = sst [smem:[#allocation92_spill]] %s14265_s29 }
  0x44   :  { %s14285_s29 = sld [smem:[%s16596_s0 + %s14043_s22]]  }
  0x45   :  { %88 = vsyncpa [#allocation12], 0 }
  0x46   :  { %89 = vsyncpa [#allocation14], 0 }
  0x47   :  { %90 = vsyncpa [#allocation17], 0 }
  0x48   :  { %91 = vsyncpa [#allocation20], 0 }
  0x49   :  { %92 = vsyncpa [#allocation23], 0 }
  0x4a   :  { %93 = vsyncpa [#allocation26], 0 }
  0x4b   :  { %94 = vsyncpa [#allocation29], 0 }
  0x4c   :  { %95 = vsyncpa [#allocation32], 0 }
  0x4d   :  { %96 = vsyncpa [#allocation35], 0 }
  0x4e   :  { %97 = vsyncpa [#allocation38], 0 }
  0x4f   :  { %98 = vsyncpa [#allocation41], 0 }
  0x50   :  { %99 = vsyncpa [#allocation44], 0 }
  0x51   :  { %100 = vsyncpa [#allocation47], 0 }
  0x52   :  { %101 = vsyncpa [#allocation50], 0 }
  0x53   :  { %102 = vsyncpa [#allocation53], 0  ;;  %s14045_s7 = smov [#allocation13]   ;;  %s14046_s11 = smov [#allocation16]  }
  0x54   :  { %s126_s10 = sshll.u32 %s14045_s7, 4  ;;  %s157_s0 = sshll.u32 %s14046_s11, 4  ;;  %s127_s10 = int_to_ptr.vmem [resolvable:$true] %s126_s10  ;;  %s158_s0 = int_to_ptr.vmem [resolvable:$true] %s157_s0 }
  0x55   :  { %s13422_s15 = scalar_lea.vmem %s127_s10, 256  ;;  %p13427_p1 = scmp.lt.s32.totalorder %s127_s10, %s127_s10 }
  0x56   :  { %p13423_p0 = scmp.ne.s32.totalorder %s127_s10, %s13422_s15  ;;  %p13428_p2 = scmp.lt.s32.totalorder %s13422_s15, %s13422_s15 }
  0x58   :  { %p13429_p3 = por %p13428_p2, %p13427_p1 }
  0x5a   :  { %p13430_p4 = pnand %p13429_p3, %p13423_p0 }
  0x5c   :  { %13433 = shalt.err (!%p13430_p4)
}
  0x5d   :  { %s14047_s16 = smov 128   ;;  %s14048_s18 = smov 8  }
  0x5e   :  { %132 = dma.hbm_to_vmem [thread:$0]  %s14105_s21, 256, %s127_s10, [#allocation14], %s14047_s16, %s14047_s16, %s14048_s18  }
  0x5f   :  { %s13442_s22 = scalar_lea.vmem %s158_s0, 64  ;;  %p13447_p6 = scmp.lt.s32.totalorder %s158_s0, %s158_s0 }
  0x60   :  { %p13443_p5 = scmp.ne.s32.totalorder %s158_s0, %s13442_s22  ;;  %p13448_p7 = scmp.lt.s32.totalorder %s13442_s22, %s13442_s22 }
  0x62   :  { %p13449_p8 = por %p13448_p7, %p13447_p6 }
  0x64   :  { %p13450_p9 = pnand %p13449_p8, %p13443_p5 }
  0x66   :  { %13453 = shalt.err (!%p13450_p9)
}
  0x67   :  { %160 = dma.hbm_to_vmem [thread:$0]  %s14130_s14, 64, %s158_s0, [#allocation17]  }
  0x68   :  { %s14049_s23 = smov [#allocation19]   ;;  %s14050_s28 = smov [#allocation22]  }
  0x69   :  { %s178_s26 = sshll.u32 %s14049_s23, 4  ;;  %s209_s1 = sshll.u32 %s14050_s28, 4  ;;  %s179_s26 = int_to_ptr.vmem [resolvable:$true] %s178_s26  ;;  %s210_s1 = int_to_ptr.vmem [resolvable:$true] %s209_s1 }
  0x6a   :  { %s13462_s2 = scalar_lea.vmem %s179_s26, 256  ;;  %p13467_p11 = scmp.lt.s32.totalorder %s179_s26, %s179_s26 }
  0x6b   :  { %p13463_p10 = scmp.ne.s32.totalorder %s179_s26, %s13462_s2  ;;  %p13468_p12 = scmp.lt.s32.totalorder %s13462_s2, %s13462_s2 }
  0x6d   :  { %p13469_p13 = por %p13468_p12, %p13467_p11 }
  0x6f   :  { %p13470_p0 = pnand %p13469_p13, %p13463_p10 }
  0x71   :  { %13473 = shalt.err (!%p13470_p0)
}
  0x72   :  { %184 = dma.hbm_to_vmem [thread:$0]  %s14140_s24, 256, %s179_s26, [#allocation20], %s14047_s16, %s14047_s16, %s14048_s18  }
  0x73   :  { %s13482_s21 = scalar_lea.vmem %s210_s1, 64  ;;  %p13487_p2 = scmp.lt.s32.totalorder %s210_s1, %s210_s1 }
  0x74   :  { %p13483_p1 = scmp.ne.s32.totalorder %s210_s1, %s13482_s21  ;;  %p13488_p3 = scmp.lt.s32.totalorder %s13482_s21, %s13482_s21 }
  0x76   :  { %p13489_p4 = por %p13488_p3, %p13487_p2 }
  0x78   :  { %p13490_p5 = pnand %p13489_p4, %p13483_p1 }
  0x7a   :  { %13493 = shalt.err (!%p13490_p5)
}
  0x7b   :  { %212 = dma.hbm_to_vmem [thread:$0]  %s14165_s27, 64, %s210_s1, [#allocation23]  }
  0x7c   :  { %s14051_s14 = smov [#allocation25]   ;;  %s14052_s10 = smov [#allocation28]  }
  0x7d   :  { %s229_s7 = sshll.u32 %s14051_s14, 4  ;;  %s256_s11 = sshll.u32 %s14052_s10, 4  ;;  %s230_s7 = int_to_ptr.vmem [resolvable:$true] %s229_s7  ;;  %s257_s11 = int_to_ptr.vmem [resolvable:$true] %s256_s11 }
  0x7e   :  { %s13502_s0 = scalar_lea.vmem %s230_s7, 16  ;;  %s13506_s15 = scalar_lea.vmem %s230_s7, 32 }
  0x7f   :  { %p13503_p6 = scmp.ne.s32.totalorder %s230_s7, %s13502_s0  ;;  %p13507_p7 = scmp.lt.s32.totalorder %s230_s7, %s230_s7 }
  0x80   :  { %p13508_p8 = scmp.lt.s32.totalorder %s13506_s15, %s13502_s0 }
  0x82   :  { %p13509_p9 = por %p13508_p8, %p13507_p7 }
  0x84   :  { %p13510_p10 = pnand %p13509_p9, %p13503_p6 }
  0x86   :  { %13513 = shalt.err (!%p13510_p10)
}
  0x87   :  { %232 = dma.hbm_to_vmem [thread:$0]  %s14175_s13, 16, %s230_s7, [#allocation26]  }
  0x88   :  { %s13522_s24 = scalar_lea.vmem %s257_s11, 512  ;;  %p13527_p12 = scmp.lt.s32.totalorder %s257_s11, %s257_s11 }
  0x89   :  { %p13523_p11 = scmp.ne.s32.totalorder %s257_s11, %s13522_s24  ;;  %p13528_p13 = scmp.lt.s32.totalorder %s13522_s24, %s13522_s24 }
  0x8b   :  { %p13529_p0 = por %p13528_p13, %p13527_p12 }
  0x8d   :  { %p13530_p1 = pnand %p13529_p0, %p13523_p11 }
  0x8f   :  { %13533 = shalt.err (!%p13530_p1)
}
  0x90   :  { %262 = dma.hbm_to_vmem [thread:$0]  %s14200_s9, 512, %s257_s11, [#allocation29], %s14047_s16, %s14047_s16, %s14048_s18  }
  0x91   :  { %s14053_s27 = smov [#allocation31]   ;;  %s14054_s23 = smov [#allocation34]  }
  0x92   :  { %s281_s22 = sshll.u32 %s14053_s27, 4  ;;  %s302_s26 = sshll.u32 %s14054_s23, 4  ;;  %s282_s22 = int_to_ptr.vmem [resolvable:$true] %s281_s22  ;;  %s303_s26 = int_to_ptr.vmem [resolvable:$true] %s302_s26 }
  0x93   :  { %s13542_s28 = scalar_lea.vmem %s282_s22, 64  ;;  %p13547_p3 = scmp.lt.s32.totalorder %s282_s22, %s282_s22 }
  0x94   :  { %p13543_p2 = scmp.ne.s32.totalorder %s282_s22, %s13542_s28  ;;  %p13548_p4 = scmp.lt.s32.totalorder %s13542_s28, %s13542_s28 }
  0x96   :  { %p13549_p5 = por %p13548_p4, %p13547_p3 }
  0x98   :  { %p13550_p6 = pnand %p13549_p5, %p13543_p2 }
  0x9a   :  { %13553 = shalt.err (!%p13550_p6)
}
  0x9b   :  { %284 = dma.hbm_to_vmem [thread:$0]  %s14210_s12, 64, %s282_s22, [#allocation32]  }
  0x9c   :  { %s13562_s13 = scalar_lea.vmem %s303_s26, 512  ;;  %p13567_p8 = scmp.lt.s32.totalorder %s303_s26, %s303_s26 }
  0x9d   :  { %p13563_p7 = scmp.ne.s32.totalorder %s303_s26, %s13562_s13  ;;  %p13568_p9 = scmp.lt.s32.totalorder %s13562_s13, %s13562_s13 }
  0x9f   :  { %p13569_p10 = por %p13568_p9, %p13567_p8 }
  0xa1   :  { %p13570_p11 = pnand %p13569_p10, %p13563_p7 }
  0xa3   :  { %13573 = shalt.err (!%p13570_p11)
}
  0xa4   :  { %308 = dma.hbm_to_vmem [thread:$0]  %s14220_s3, 512, %s303_s26, [#allocation35], %s14047_s16, %s14047_s16, %s14048_s18  }
  0xa5   :  { %s14055_s9 = smov [#allocation37]   ;;  %s14056_s2 = smov [#allocation40]  }
  0xa6   :  { %s326_s1 = sshll.u32 %s14055_s9, 4  ;;  %s350_s21 = sshll.u32 %s14056_s2, 4  ;;  %s327_s1 = int_to_ptr.vmem [resolvable:$true] %s326_s1  ;;  %s351_s21 = int_to_ptr.vmem [resolvable:$true] %s350_s21 }
  0xa7   :  { %s13582_s14 = scalar_lea.vmem %s327_s1, 512  ;;  %p13587_p13 = scmp.lt.s32.totalorder %s327_s1, %s327_s1 }
  0xa8   :  { %p13583_p12 = scmp.ne.s32.totalorder %s327_s1, %s13582_s14  ;;  %p13588_p0 = scmp.lt.s32.totalorder %s13582_s14, %s13582_s14 }
  0xaa   :  { %p13589_p1 = por %p13588_p0, %p13587_p13 }
  0xac   :  { %p13590_p2 = pnand %p13589_p1, %p13583_p12 }
  0xae   :  { %13593 = shalt.err (!%p13590_p2)
}
  0xaf   :  { %332 = dma.hbm_to_vmem [thread:$0]  %s14230_s5, 512, %s327_s1, [#allocation38], %s14047_s16, %s14047_s16, %s14048_s18  }
  0xb0   :  { %s13602_s12 = scalar_lea.vmem %s351_s21, 512  ;;  %p13607_p4 = scmp.lt.s32.totalorder %s351_s21, %s351_s21 }
  0xb1   :  { %p13603_p3 = scmp.ne.s32.totalorder %s351_s21, %s13602_s12  ;;  %p13608_p5 = scmp.lt.s32.totalorder %s13602_s12, %s13602_s12 }
  0xb3   :  { %p13609_p6 = por %p13608_p5, %p13607_p4 }
  0xb5   :  { %p13610_p7 = pnand %p13609_p6, %p13603_p3 }
  0xb7   :  { %13613 = shalt.err (!%p13610_p7)
}
  0xb8   :  { %356 = dma.hbm_to_vmem [thread:$0]  %s14240_s20, 512, %s351_s21, [#allocation41], %s14047_s16, %s14047_s16, %s14048_s18  }
  0xb9   :  { %s14057_s3 = smov [#allocation43]   ;;  %s14058_s10 = smov [#allocation46]  }
  0xba   :  { %s373_s7 = sshll.u32 %s14057_s3, 4  ;;  %s392_s11 = sshll.u32 %s14058_s10, 4  ;;  %s374_s7 = int_to_ptr.vmem [resolvable:$true] %s373_s7  ;;  %s393_s11 = int_to_ptr.vmem [resolvable:$true] %s392_s11 }
  0xbb   :  { %s13622_s0 = scalar_lea.vmem %s374_s7, 16  ;;  %s13626_s5 = scalar_lea.vmem %s374_s7, 32 }
  0xbc   :  { %p13623_p8 = scmp.ne.s32.totalorder %s374_s7, %s13622_s0  ;;  %p13627_p9 = scmp.lt.s32.totalorder %s374_s7, %s374_s7 }
  0xbd   :  { %p13628_p10 = scmp.lt.s32.totalorder %s13626_s5, %s13622_s0 }
  0xbf   :  { %p13629_p11 = por %p13628_p10, %p13627_p9 }
  0xc1   :  { %p13630_p12 = pnand %p13629_p11, %p13623_p8 }
  0xc3   :  { %13633 = shalt.err (!%p13630_p12)
}
  0xc4   :  { %376 = dma.hbm_to_vmem [thread:$0]  %s14250_s6, 16, %s374_s7, [#allocation44]  }
  0xc5   :  { %s13642_s15 = scalar_lea.vmem %s393_s11, 512  ;;  %p13647_p0 = scmp.lt.s32.totalorder %s393_s11, %s393_s11 }
  0xc6   :  { %p13643_p13 = scmp.ne.s32.totalorder %s393_s11, %s13642_s15  ;;  %p13648_p1 = scmp.lt.s32.totalorder %s13642_s15, %s13642_s15 }
  0xc8   :  { %p13649_p2 = por %p13648_p1, %p13647_p0 }
  0xca   :  { %p13650_p3 = pnand %p13649_p2, %p13643_p13 }
  0xcc   :  { %13653 = shalt.err (!%p13650_p3)
}
  0xcd   :  { %398 = dma.hbm_to_vmem [thread:$0]  %s14260_s4, 512, %s393_s11, [#allocation47], %s14047_s16, %s14047_s16, %s14048_s18  }
  0xce   :  { %s14059_s20 = smov [#allocation49]   ;;  %s14060_s27 = smov [#allocation11]  }
  0xcf   :  { %s414_s24 = sshll.u32 %s14059_s20, 4  ;;  %s114_s22 = sshll.u32 %s14060_s27, 4  ;;  %s415_s24 = int_to_ptr.vmem [resolvable:$true] %s414_s24  ;;  %s115_s22 = int_to_ptr.vmem [resolvable:$true] %s114_s22 }
  0xd0   :  { %s13662_s23 = scalar_lea.vmem %s415_s24, 512  ;;  %p13667_p5 = scmp.lt.s32.totalorder %s415_s24, %s415_s24 }
  0xd1   :  { %p13663_p4 = scmp.ne.s32.totalorder %s415_s24, %s13662_s23  ;;  %p13668_p6 = scmp.lt.s32.totalorder %s13662_s23, %s13662_s23 }
  0xd3   :  { %p13669_p7 = por %p13668_p6, %p13667_p5 }
  0xd5   :  { %p13670_p8 = pnand %p13669_p7, %p13663_p4 }
  0xd7   :  { %13673 = shalt.err (!%p13670_p8)
}
  0xd8   :  { %420 = dma.hbm_to_vmem [thread:$0]  %s14270_s30, 512, %s415_s24, [#allocation50], %s14047_s16, %s14047_s16, %s14048_s18  }
  0xd9   :  { %s13682_s6 = scalar_lea.vmem %s115_s22, 256  ;;  %p13687_p10 = scmp.lt.s32.totalorder %s115_s22, %s115_s22 }
  0xda   :  { %p13683_p9 = scmp.ne.s32.totalorder %s115_s22, %s13682_s6  ;;  %p13688_p11 = scmp.lt.s32.totalorder %s13682_s6, %s13682_s6 }
  0xdc   :  { %p13689_p12 = por %p13688_p11, %p13687_p10 }
  0xde   :  { %p13690_p13 = pnand %p13689_p12, %p13683_p9 }
  0xe0   :  { %13693 = shalt.err (!%p13690_p13)
}
  0xe1   :  { %120 = dma.hbm_to_vmem [thread:$0]  %s14100_s17, 256, %s115_s22, [#allocation12], %s14047_s16, %s14047_s16, %s14048_s18  }
  0xe2   :  { %s14061_s4 = smov [#allocation15]   ;;  %s14062_s28 = smov [#allocation18]  }
  0xe3   :  { %s138_s26 = sshll.u32 %s14061_s4, 4  ;;  %s166_s13 = sshll.u32 %s14062_s28, 4  ;;  %s139_s26 = int_to_ptr.vmem [resolvable:$true] %s138_s26  ;;  %s167_s13 = int_to_ptr.vmem [resolvable:$true] %s166_s13 }
  0xe4   :  { %s13702_s9 = scalar_lea.vmem %s139_s26, 256  ;;  %p13707_p1 = scmp.lt.s32.totalorder %s139_s26, %s139_s26 }
  0xe5   :  { %p13703_p0 = scmp.ne.s32.totalorder %s139_s26, %s13702_s9  ;;  %p13708_p2 = scmp.lt.s32.totalorder %s13702_s9, %s13702_s9 }
  0xe7   :  { %p13709_p3 = por %p13708_p2, %p13707_p1 }
  0xe9   :  { %p13710_p4 = pnand %p13709_p3, %p13703_p0 }
  0xeb   :  { %13713 = shalt.err (!%p13710_p4)
}
  0xec   :  { %s16632_s30 = sld [smem:[#allocation72_spill]]  ;;  %s13722_s1 = scalar_lea.vmem %s167_s13, 256 }
  0xed   :  { %p13723_p5 = scmp.ne.s32.totalorder %s167_s13, %s13722_s1  ;;  %p13727_p6 = scmp.lt.s32.totalorder %s167_s13, %s167_s13 }
  0xee   :  { %p13728_p7 = scmp.lt.s32.totalorder %s13722_s1, %s13722_s1 }
  0xf0   :  { %p13729_p8 = por %p13728_p7, %p13727_p6 }
  0xf2   :  { %144 = dma.hbm_to_vmem [thread:$0]  %s16632_s30, 256, %s139_s26, [#allocation14], %s14047_s16, %s14047_s16, %s14048_s18  }
  0xf3   :  { %p13730_p9 = pnand %p13729_p8, %p13723_p5 }
  0xf5   :  { %13733 = shalt.err (!%p13730_p9)
}
  0xf6   :  { %s16633_s17 = sld [smem:[#allocation76_spill]]  ;;  %s14063_s2 = smov [#allocation21]  }
  0xf7   :  { %s190_s21 = sshll.u32 %s14063_s2, 4  ;;  %s14064_s14 = smov [#allocation24]   ;;  %s191_s21 = int_to_ptr.vmem [resolvable:$true] %s190_s21 }
  0xf8   :  { %s219_s12 = sshll.u32 %s14064_s14, 4  ;;  %s13742_s3 = scalar_lea.vmem %s191_s21, 256  ;;  %s220_s12 = int_to_ptr.vmem [resolvable:$true] %s219_s12 }
  0xf9   :  { %p13743_p10 = scmp.ne.s32.totalorder %s191_s21, %s13742_s3  ;;  %p13747_p11 = scmp.lt.s32.totalorder %s191_s21, %s191_s21 }
  0xfa   :  { %p13748_p12 = scmp.lt.s32.totalorder %s13742_s3, %s13742_s3 }
  0xfc   :  { %172 = dma.hbm_to_vmem [thread:$0]  %s16633_s17, 256, %s167_s13, [#allocation17], %s14047_s16, %s14047_s16, %s14048_s18  }
  0xfd   :  { %p13749_p13 = por %p13748_p12, %p13747_p11 }
  0xff   :  { %p13750_p0 = pnand %p13749_p13, %p13743_p10 }
 0x101   :  { %13753 = shalt.err (!%p13750_p0)
}
 0x102   :  { %s16634_s7 = sld [smem:[#allocation77_spill]]  ;;  %s13762_s10 = scalar_lea.vmem %s220_s12, 16 }
 0x103   :  { %p13763_p1 = scmp.ne.s32.totalorder %s220_s12, %s13762_s10  ;;  %s13766_s11 = scalar_lea.vmem %s220_s12, 32 }
 0x104   :  { %p13767_p2 = scmp.lt.s32.totalorder %s220_s12, %s220_s12  ;;  %p13768_p3 = scmp.lt.s32.totalorder %s13766_s11, %s13762_s10 }
 0x106   :  { %p13769_p4 = por %p13768_p3, %p13767_p2 }
 0x108   :  { %196 = dma.hbm_to_vmem [thread:$0]  %s16634_s7, 256, %s191_s21, [#allocation20], %s14047_s16, %s14047_s16, %s14048_s18  }
 0x109   :  { %p13770_p5 = pnand %p13769_p4, %p13763_p1 }
 0x10b   :  { %13773 = shalt.err (!%p13770_p5)
}
 0x10c   :  { %s16635_s0 = sld [smem:[#allocation81_spill]]  ;;  %s14065_s5 = smov [#allocation27]  }
 0x10d   :  { %s244_s15 = sshll.u32 %s14065_s5, 4  ;;  %s14066_s20 = smov [#allocation30]   ;;  %s245_s15 = int_to_ptr.vmem [resolvable:$true] %s244_s15 }
 0x10e   :  { %s268_s24 = sshll.u32 %s14066_s20, 4  ;;  %s13782_s27 = scalar_lea.vmem %s245_s15, 512  ;;  %s269_s24 = int_to_ptr.vmem [resolvable:$true] %s268_s24 }
 0x10f   :  { %p13783_p6 = scmp.ne.s32.totalorder %s245_s15, %s13782_s27  ;;  %p13787_p7 = scmp.lt.s32.totalorder %s245_s15, %s245_s15 }
 0x110   :  { %p13788_p8 = scmp.lt.s32.totalorder %s13782_s27, %s13782_s27 }
 0x112   :  { %222 = dma.hbm_to_vmem [thread:$0]  %s16635_s0, 16, %s220_s12, [#allocation23]  }
 0x113   :  { %p13789_p9 = por %p13788_p8, %p13787_p7 }
 0x115   :  { %p13790_p10 = pnand %p13789_p9, %p13783_p6 }
 0x117   :  { %13793 = shalt.err (!%p13790_p10)
}
 0x118   :  { %s16636_s22 = sld [smem:[#allocation85_spill]]  ;;  %s13802_s23 = scalar_lea.vmem %s269_s24, 512 }
 0x119   :  { %p13803_p11 = scmp.ne.s32.totalorder %s269_s24, %s13802_s23  ;;  %p13807_p12 = scmp.lt.s32.totalorder %s269_s24, %s269_s24 }
 0x11a   :  { %p13808_p13 = scmp.lt.s32.totalorder %s13802_s23, %s13802_s23 }
 0x11c   :  { %p13809_p0 = por %p13808_p13, %p13807_p12 }
 0x11e   :  { %250 = dma.hbm_to_vmem [thread:$0]  %s16636_s22, 512, %s245_s15, [#allocation26], %s14047_s16, %s14047_s16, %s14048_s18  }
 0x11f   :  { %p13810_p1 = pnand %p13809_p0, %p13803_p11 }
 0x121   :  { %13813 = shalt.err (!%p13810_p1)
}
 0x122   :  { %s16637_s6 = sld [smem:[#allocation86_spill]]  ;;  %s14067_s4 = smov [#allocation33]  }
 0x123   :  { %s290_s26 = sshll.u32 %s14067_s4, 4  ;;  %s14068_s28 = smov [#allocation36]   ;;  %s291_s26 = int_to_ptr.vmem [resolvable:$true] %s290_s26 }
 0x124   :  { %s314_s13 = sshll.u32 %s14068_s28, 4  ;;  %s13822_s9 = scalar_lea.vmem %s291_s26, 512  ;;  %s315_s13 = int_to_ptr.vmem [resolvable:$true] %s314_s13 }
 0x125   :  { %p13823_p2 = scmp.ne.s32.totalorder %s291_s26, %s13822_s9  ;;  %p13827_p3 = scmp.lt.s32.totalorder %s291_s26, %s291_s26 }
 0x126   :  { %p13828_p4 = scmp.lt.s32.totalorder %s13822_s9, %s13822_s9 }
 0x128   :  { %274 = dma.hbm_to_vmem [thread:$0]  %s16637_s6, 512, %s269_s24, [#allocation29], %s14047_s16, %s14047_s16, %s14048_s18  }
 0x129   :  { %p13829_p5 = por %p13828_p4, %p13827_p3 }
 0x12b   :  { %p13830_p6 = pnand %p13829_p5, %p13823_p2 }
 0x12d   :  { %13833 = shalt.err (!%p13830_p6)
}
 0x12e   :  { %s16638_s30 = sld [smem:[#allocation87_spill]]  ;;  %s13842_s1 = scalar_lea.vmem %s315_s13, 512 }
 0x12f   :  { %p13843_p7 = scmp.ne.s32.totalorder %s315_s13, %s13842_s1  ;;  %p13847_p8 = scmp.lt.s32.totalorder %s315_s13, %s315_s13 }
 0x130   :  { %p13848_p9 = scmp.lt.s32.totalorder %s13842_s1, %s13842_s1 }
 0x132   :  { %p13849_p10 = por %p13848_p9, %p13847_p8 }
 0x134   :  { %296 = dma.hbm_to_vmem [thread:$0]  %s16638_s30, 512, %s291_s26, [#allocation32], %s14047_s16, %s14047_s16, %s14048_s18  }
 0x135   :  { %p13850_p11 = pnand %p13849_p10, %p13843_p7 }
 0x137   :  { %13853 = shalt.err (!%p13850_p11)
}
 0x138   :  { %s16639_s17 = sld [smem:[#allocation88_spill]]  ;;  %s14069_s2 = smov [#allocation39]  }
 0x139   :  { %s338_s21 = sshll.u32 %s14069_s2, 4  ;;  %s14070_s14 = smov [#allocation42]   ;;  %s339_s21 = int_to_ptr.vmem [resolvable:$true] %s338_s21 }
 0x13a   :  { %s363_s12 = sshll.u32 %s14070_s14, 4  ;;  %s13862_s3 = scalar_lea.vmem %s339_s21, 512  ;;  %s364_s12 = int_to_ptr.vmem [resolvable:$true] %s363_s12 }
 0x13b   :  { %p13863_p12 = scmp.ne.s32.totalorder %s339_s21, %s13862_s3  ;;  %p13867_p13 = scmp.lt.s32.totalorder %s339_s21, %s339_s21 }
 0x13c   :  { %p13868_p0 = scmp.lt.s32.totalorder %s13862_s3, %s13862_s3 }
 0x13e   :  { %320 = dma.hbm_to_vmem [thread:$0]  %s16639_s17, 512, %s315_s13, [#allocation35], %s14047_s16, %s14047_s16, %s14048_s18  }
 0x13f   :  { %p13869_p1 = por %p13868_p0, %p13867_p13 }
 0x141   :  { %p13870_p2 = pnand %p13869_p1, %p13863_p12 }
 0x143   :  { %13873 = shalt.err (!%p13870_p2)
}
 0x144   :  { %s16640_s7 = sld [smem:[#allocation89_spill]]  ;;  %s13882_s10 = scalar_lea.vmem %s364_s12, 64 }
 0x145   :  { %p13883_p3 = scmp.ne.s32.totalorder %s364_s12, %s13882_s10  ;;  %p13887_p4 = scmp.lt.s32.totalorder %s364_s12, %s364_s12 }
 0x146   :  { %p13888_p5 = scmp.lt.s32.totalorder %s13882_s10, %s13882_s10 }
 0x148   :  { %p13889_p6 = por %p13888_p5, %p13887_p4 }
 0x14a   :  { %344 = dma.hbm_to_vmem [thread:$0]  %s16640_s7, 512, %s339_s21, [#allocation38], %s14047_s16, %s14047_s16, %s14048_s18  }
 0x14b   :  { %p13890_p7 = pnand %p13889_p6, %p13883_p3 }
 0x14d   :  { %13893 = shalt.err (!%p13890_p7)
}
 0x14e   :  { %s16641_s11 = sld [smem:[#allocation90_spill]]  ;;  %s14071_s0 = smov [#allocation45]  }
 0x14f   :  { %s383_s5 = sshll.u32 %s14071_s0, 4  ;;  %s14072_s15 = smov [#allocation48]   ;;  %s384_s5 = int_to_ptr.vmem [resolvable:$true] %s383_s5 }
 0x150   :  { %s405_s20 = sshll.u32 %s14072_s15, 4  ;;  %s13902_s24 = scalar_lea.vmem %s384_s5, 16  ;;  %s406_s20 = int_to_ptr.vmem [resolvable:$true] %s405_s20 }
 0x151   :  { %p13903_p8 = scmp.ne.s32.totalorder %s384_s5, %s13902_s24  ;;  %s13906_s27 = scalar_lea.vmem %s384_s5, 32 }
 0x152   :  { %p13907_p9 = scmp.lt.s32.totalorder %s384_s5, %s384_s5  ;;  %p13908_p10 = scmp.lt.s32.totalorder %s13906_s27, %s13902_s24 }
 0x154   :  { %366 = dma.hbm_to_vmem [thread:$0]  %s16641_s11, 64, %s364_s12, [#allocation41]  }
 0x155   :  { %p13909_p11 = por %p13908_p10, %p13907_p9 }
 0x157   :  { %p13910_p12 = pnand %p13909_p11, %p13903_p8 }
 0x159   :  { %13913 = shalt.err (!%p13910_p12)
}
 0x15a   :  { %s16642_s16 = sld [smem:[#allocation91_spill]]  ;;  %s13922_s18 = scalar_lea.vmem %s406_s20, 16 }
 0x15b   :  { %p13923_p13 = scmp.ne.s32.totalorder %s406_s20, %s13922_s18  ;;  %s13926_s22 = scalar_lea.vmem %s406_s20, 32 }
 0x15c   :  { %p13927_p0 = scmp.lt.s32.totalorder %s406_s20, %s406_s20  ;;  %p13928_p1 = scmp.lt.s32.totalorder %s13926_s22, %s13922_s18 }
 0x15e   :  { %p13929_p2 = por %p13928_p1, %p13927_p0 }
 0x160   :  { %386 = dma.hbm_to_vmem [thread:$0]  %s16642_s16, 16, %s384_s5, [#allocation44]  }
 0x161   :  { %p13930_p3 = pnand %p13929_p2, %p13923_p13 }
 0x163   :  { %13933 = shalt.err (!%p13930_p3)
}
 0x164   :  { %s16643_s23 = sld [smem:[#allocation92_spill]]  ;;  %s14073_s6 = smov [#allocation51]  }
 0x165   :  { %s427_s4 = sshll.u32 %s14073_s6, 4  ;;  %s14074_s26 = smov [#allocation52]   ;;  %s428_s4 = int_to_ptr.vmem [resolvable:$true] %s427_s4 }
 0x166   :  { %s439_s28 = sshll.u32 %s14074_s26, 4  ;;  %s13942_s13 = scalar_lea.vmem %s428_s4, 16  ;;  %s440_s28 = int_to_ptr.vmem [resolvable:$true] %s439_s28 }
 0x167   :  { %p13943_p4 = scmp.ne.s32.totalorder %s428_s4, %s13942_s13  ;;  %s13946_s9 = scalar_lea.vmem %s428_s4, 32 }
 0x168   :  { %p13947_p5 = scmp.lt.s32.totalorder %s428_s4, %s428_s4  ;;  %p13948_p6 = scmp.lt.s32.totalorder %s13946_s9, %s13942_s13 }
 0x16a   :  { %408 = dma.hbm_to_vmem [thread:$0]  %s16643_s23, 16, %s406_s20, [#allocation47]  }
 0x16b   :  { %p13949_p7 = por %p13948_p6, %p13947_p5 }
 0x16d   :  { %p13950_p8 = pnand %p13949_p7, %p13943_p4 }
 0x16f   :  { %13953 = shalt.err (!%p13950_p8)
}
 0x170   :  { %430 = dma.hbm_to_vmem [thread:$0]  %s14275_s8, 16, %s428_s4, [#allocation50]  }
 0x171   :  { %s13962_s30 = scalar_lea.vmem %s440_s28, 16  ;;  %s13966_s1 = scalar_lea.vmem %s440_s28, 32 }
 0x172   :  { %p13963_p9 = scmp.ne.s32.totalorder %s440_s28, %s13962_s30  ;;  %p13967_p10 = scmp.lt.s32.totalorder %s440_s28, %s440_s28 }
 0x173   :  { %p13968_p11 = scmp.lt.s32.totalorder %s13966_s1, %s13962_s30 }
 0x175   :  { %p13969_p12 = por %p13968_p11, %p13967_p10 }
 0x177   :  { %p13970_p13 = pnand %p13969_p12, %p13963_p9 }
 0x179   :  { %13973 = shalt.err (!%p13970_p13)
}
 0x17a   :  { %442 = dma.hbm_to_vmem [thread:$0]  %s14285_s29, 16, %s440_s28, [#allocation53]  }
 0x17b   :  { %13974 = dma.done.wait [#allocation12], 256  }
 0x17c   :  { %13975 = vsyncadd [#allocation12], 4294967040 }
 0x17d   :  { %13976 = dma.done.wait [#allocation14], 512  }
 0x17e   :  { %13977 = vsyncadd [#allocation14], 4294966784 }
 0x17f   :  { %13978 = dma.done.wait [#allocation17], 320  }
 0x180   :  { %13979 = vsyncadd [#allocation17], 4294966976 }
 0x181   :  { %13980 = dma.done.wait [#allocation20], 512  }
 0x182   :  { %13981 = vsyncadd [#allocation20], 4294966784 }
 0x183   :  { %13982 = dma.done.wait [#allocation23], 80  }
 0x184   :  { %13983 = vsyncadd [#allocation23], 4294967216 }
 0x185   :  { %13984 = dma.done.wait [#allocation26], 528  }
 0x186   :  { %13985 = vsyncadd [#allocation26], 4294966768 }
 0x187   :  { %13986 = dma.done.wait [#allocation29], 1024  }
 0x188   :  { %13987 = vsyncadd [#allocation29], 4294966272 }
 0x189   :  { %13988 = dma.done.wait [#allocation32], 576  }
 0x18a   :  { %13989 = vsyncadd [#allocation32], 4294966720 }
 0x18b   :  { %13990 = dma.done.wait [#allocation35], 1024  }
 0x18c   :  { %13991 = vsyncadd [#allocation35], 4294966272 }
 0x18d   :  { %13992 = dma.done.wait [#allocation38], 1024  }
 0x18e   :  { %13993 = vsyncadd [#allocation38], 4294966272 }
 0x18f   :  { %13994 = dma.done.wait [#allocation41], 576  }
 0x190   :  { %13995 = vsyncadd [#allocation41], 4294966720 }
 0x191   :  { %13996 = dma.done.wait [#allocation44], 32  }
 0x192   :  { %13997 = vsyncadd [#allocation44], 4294967264 }
 0x193   :  { %13998 = dma.done.wait [#allocation47], 528  }
 0x194   :  { %13999 = vsyncadd [#allocation47], 4294966768 }
 0x195   :  { %14000 = dma.done.wait [#allocation50], 528  }
 0x196   :  { %14001 = vsyncadd [#allocation50], 4294966768 }
 0x197   :  { %14002 = dma.done.wait [#allocation53], 16  }
 0x198   :  { %14003 = vsyncadd [#allocation53], 4294967280  ;;  %s16644_s29 = sld [smem:[#allocation69_spill]]  ;;  %v585_v0 = vld [vmem:[#allocation11 + $0x8] sm:$0xff]  ;;  %v587_v1 = vld [vmem:[#allocation13 + $0x8] sm:$0xff]  ;;  %vm535_vm0 = vcmask 130048   ;;  %v603_v45 = vlaneseq }
 0x199   :  { %v584_v2 = vld [vmem:[#allocation11] sm:$0xff]  ;;  %11557 = vmatprep.subr.mxu0 %v585_v0  ;;  %11573 = vmatprep.subr.mxu1 %v587_v1  ;;  %v586_v3 = vld [vmem:[#allocation13] sm:$0xff]  ;;  %v589_v6 = vld [vmem:[#allocation15 + $0x8] sm:$0xff]  ;;  %s16645_s8 = sld [smem:[#allocation73_spill]]  ;;  %v14075_v20 = vmov 0.0   ;;  %vm14076_vm1 = vmmov 0  }
 0x19a   :  { %11558 = vmatpush3.msra.mxu0 %v585_v0  ;;  %11574 = vmatpush3.msra.mxu1 %v587_v1  ;;  %v980_v7 = vld [vmem:[#allocation18 + $0x8] sm:$0xff]  ;;  %v979_v12 = vld [vmem:[#allocation18] sm:$0xff]  ;;  %v982_v15 = vld [vmem:[#allocation19 + $0x8] sm:$0xff]  ;;  %s16646_s17 = sld [smem:[#allocation74_spill]]  ;;  %v14651_v46 = vshrl.u32 %v603_v45, 7  ;;  %vm736_vm2 = vcmask 261120  }
 0x19b   :  { %11559 = vmatprep.subr.mxu0 %v584_v2  ;;  %11575 = vmatprep.subr.mxu1 %v586_v3  ;;  %v588_v11 = vld [vmem:[#allocation15] sm:$0xff]  ;;  %v983_v19 = vld [vmem:[#allocation21] sm:$0xff]  ;;  %s16647_s2 = sld [smem:[#allocation75_spill]]  ;;  %v14659_v49 = vld [vmem:[#allocation16] sm:$0xf]  ;;  %vm10415_vm11 = vcmask 523264  }
 0x19c   :  { %11560 = vmatpush3.msra.mxu0 %v584_v2  ;;  %11576 = vmatpush3.msra.mxu1 %v586_v3  ;;  %v984_v16 = vld [vmem:[#allocation21 + $0x8] sm:$0xff]  ;;  %v981_v18 = vld [vmem:[#allocation19] sm:$0xff]  ;;  %s16648_s21 = sld [smem:[#allocation78_spill]]  ;;  %v14654_v47 = vsub.s32 0, %v14651_v46  ;;  %v14657_v48 = vsub.s32 1, %v14651_v46  ;;  %vm10568_vm12 = vcmask 15360  }
 0x19d   :  { %11589 = vmatprep.subr.mxu0 %v589_v6  ;;  %11605 = vmatprep.subr.mxu1 %v980_v7  ;;  %s16649_s14 = sld [smem:[#allocation79_spill]] }
 0x19e   :  { %v14372_v4 = vld [vmem:[%s16644_s29] sm:$0xff]  ;;  %v14375_v5 = vld [vmem:[%s16644_s29 + $0x8] sm:$0xff]  ;;  %v14386_v8 = vld [vmem:[%s16644_s29 + $0x10] sm:$0xff]  ;;  %s16650_s12 = sld [smem:[#allocation80_spill]]  ;;  %v606_v50 = vrot.slane %v14659_v49, %v14654_v47  ;;  %v748_v51 = vrot.slane %v14659_v49, %v14657_v48 }
 0x19f   :  { %11561 = vmatprep.mubr.msk.f32.mxu0 %vm535_vm0, %v14372_v4  ;;  %11577 = vmatprep.mubr.msk.f32.mxu1 %vm535_vm0, %v14372_v4  ;;  %v14389_v9 = vld [vmem:[%s16644_s29 + $0x18] sm:$0xff]  ;;  %v14392_v10 = vld [vmem:[%s16644_s29 + $0x20] sm:$0xff]  ;;  %v14407_v13 = vld [vmem:[%s16644_s29 + $0x28] sm:$0xff]  ;;  %s16651_s3 = sld [smem:[#allocation82_spill]] }
 0x1a0   :  { %11562 = vmatmul.mubr.msk.f32.vlgmr.msra.gmra.mxu0 %vm535_vm0, %v14375_v5  ;;  %11578 = vmatmul.mubr.msk.f32.vlgmr.msra.gmra.mxu1 %vm535_vm0, %v14375_v5  ;;  %v14410_v14 = vld [vmem:[%s16644_s29 + $0x30] sm:$0xff]  ;;  %v14421_v17 = vld [vmem:[%s16644_s29 + $0x38] sm:$0xff]  ;;  %v14500_v25 = vld [vmem:[%s16645_s8 + $0x8] sm:$0xff]  ;;  %s16652_s7 = sld [smem:[#allocation83_spill]] }
 0x1a1   :  { %11590 = vmatpush3.msra.mxu0 %v589_v6  ;;  %11606 = vmatpush3.msra.mxu1 %v980_v7  ;;  %v14466_v21 = vld [vmem:[%s16645_s8 + $0x18] sm:$0xff]  ;;  %v14482_v23 = vld [vmem:[%s16645_s8 + $0x10] sm:$0xff]  ;;  %v14503_v26 = vld [vmem:[%s16646_s17 + $0x8] sm:$0xff]  ;;  %s16653_s10 = sld [smem:[#allocation84_spill]] }
 0x1a2   :  { %11564 = vmatprep.mubr.msk.f32.mxu0 %vm535_vm0, %v14386_v8  ;;  %11580 = vmatprep.mubr.msk.f32.mxu1 %vm535_vm0, %v14386_v8  ;;  %v14469_v22 = vld [vmem:[%s16646_s17 + $0x18] sm:$0xff]  ;;  %v14485_v24 = vld [vmem:[%s16646_s17 + $0x10] sm:$0xff]  ;;  %v14518_v27 = vld [vmem:[%s16645_s8] sm:$0xff]  ;;  %s16655_s11 = sld [smem:[#allocation71_spill]] }
 0x1a3   :  { %11591 = vmatprep.subr.mxu0 %v588_v11  ;;  %11607 = vmatprep.subr.mxu1 %v979_v12  ;;  %v14521_v28 = vld [vmem:[%s16646_s17] sm:$0xff]  ;;  %v14536_v29 = vld [vmem:[%s16647_s2 + $0x18] sm:$0xff]  ;;  %v14546_v31 = vld [vmem:[%s16647_s2 + $0x10] sm:$0xff] }
 0x1a4   :  { %11565 = vmatmul.mubr.msk.f32.gmra.mxu0 %vm535_vm0, %v14389_v9  ;;  %11581 = vmatmul.mubr.msk.f32.gmra.mxu1 %vm535_vm0, %v14389_v9  ;;  %v14539_v30 = vld [vmem:[%s16648_s21 + $0x18] sm:$0xff]  ;;  %v14549_v32 = vld [vmem:[%s16648_s21 + $0x10] sm:$0xff]  ;;  %v14556_v33 = vld [vmem:[%s16647_s2 + $0x8] sm:$0xff] }
 0x1a5   :  { %11567 = vmatprep.mubr.msk.f32.mxu0 %vm535_vm0, %v14392_v10  ;;  %11583 = vmatprep.mubr.msk.f32.mxu1 %vm535_vm0, %v14392_v10  ;;  %v14559_v34 = vld [vmem:[%s16648_s21 + $0x8] sm:$0xff]  ;;  %v14566_v35 = vld [vmem:[%s16647_s2] sm:$0xff]  ;;  %v14582_v37 = vld [vmem:[%s16649_s14 + $0x18] sm:$0xff] }
 0x1a6   :  { %11592 = vmatpush3.msra.mxu0 %v588_v11  ;;  %11608 = vmatpush3.msra.mxu1 %v979_v12  ;;  %v14569_v36 = vld [vmem:[%s16648_s21] sm:$0xff]  ;;  %v14587_v38 = vld [vmem:[%s16650_s12 + $0x18] sm:$0xff]  ;;  %v14591_v39 = vld [vmem:[%s16649_s14 + $0x10] sm:$0xff] }
 0x1a7   :  { %11621 = vmatprep.subr.mxu0 %v982_v15  ;;  %11637 = vmatprep.subr.mxu1 %v984_v16  ;;  %v14598_v40 = vld [vmem:[%s16650_s12 + $0x10] sm:$0xff]  ;;  %v14602_v41 = vld [vmem:[%s16649_s14 + $0x8] sm:$0xff]  ;;  %v14612_v43 = vld [vmem:[%s16649_s14] sm:$0xff] }
 0x1a8   :  { %11568 = vmatmul.mubr.msk.f32.gmra.mxu0 %vm535_vm0, %v14407_v13  ;;  %11584 = vmatmul.mubr.msk.f32.gmra.mxu1 %vm535_vm0, %v14407_v13  ;;  %v14608_v42 = vld [vmem:[%s16650_s12 + $0x8] sm:$0xff]  ;;  %v14618_v44 = vld [vmem:[%s16650_s12] sm:$0xff] }
 0x1a9   :  { %11570 = vmatprep.mubr.msk.f32.mxu0 %vm535_vm0, %v14410_v14  ;;  %11586 = vmatprep.mubr.msk.f32.mxu1 %vm535_vm0, %v14410_v14  ;;  %v14676_v11 = vld [vmem:[#allocation22] sm:$0xf] }
 0x1ac   :  { %11571 = vmatmul.mubr.msk.f32.gmra.mxu0 %vm535_vm0, %v14421_v17  ;;  %11587 = vmatmul.mubr.msk.f32.gmra.mxu1 %vm535_vm0, %v14421_v17 }
 0x1ad   :  { %11593 = vmatprep.mubr.msk.f32.mxu0 %vm535_vm0, %v14372_v4  ;;  %11609 = vmatprep.mubr.msk.f32.mxu1 %vm535_vm0, %v14372_v4 }
 0x1b0   :  { %11594 = vmatmul.mubr.msk.f32.vlgmr.msra.gmra.mxu0 %vm535_vm0, %v14375_v5  ;;  %11610 = vmatmul.mubr.msk.f32.vlgmr.msra.gmra.mxu1 %vm535_vm0, %v14375_v5 }
 0x1b1   :  { %11622 = vmatpush3.msra.mxu0 %v982_v15  ;;  %11638 = vmatpush3.msra.mxu1 %v984_v16 }
 0x1b2   :  { %11596 = vmatprep.mubr.msk.f32.mxu0 %vm535_vm0, %v14386_v8  ;;  %11612 = vmatprep.mubr.msk.f32.mxu1 %vm535_vm0, %v14386_v8 }
 0x1b3   :  { %11623 = vmatprep.subr.mxu0 %v981_v18  ;;  %11639 = vmatprep.subr.mxu1 %v983_v19 }
 0x1b4   :  { %11597 = vmatmul.mubr.msk.f32.gmra.mxu0 %vm535_vm0, %v14389_v9  ;;  %11613 = vmatmul.mubr.msk.f32.gmra.mxu1 %vm535_vm0, %v14389_v9 }
 0x1b5   :  { %11599 = vmatprep.mubr.msk.f32.mxu0 %vm535_vm0, %v14392_v10  ;;  %11615 = vmatprep.mubr.msk.f32.mxu1 %vm535_vm0, %v14392_v10 }
 0x1b6   :  { %11624 = vmatpush3.msra.mxu0 %v981_v18  ;;  %11640 = vmatpush3.msra.mxu1 %v983_v19  ;;  %v1001_v19 = vrot.slane %v14676_v11, %v14654_v47 }
 0x1b7   :  { %11653 = vmatprep.subr.mxu0 %v14075_v20  ;;  %11664 = vmatprep.subr.mxu1 %v14075_v20 }
 0x1b8   :  { %11600 = vmatmul.mubr.msk.f32.gmra.mxu0 %vm535_vm0, %v14407_v13  ;;  %11616 = vmatmul.mubr.msk.f32.gmra.mxu1 %vm535_vm0, %v14407_v13 }
 0x1b9   :  { %11602 = vmatprep.mubr.msk.f32.mxu0 %vm535_vm0, %v14410_v14  ;;  %11618 = vmatprep.mubr.msk.f32.mxu1 %vm535_vm0, %v14410_v14 }
 0x1bc   :  { %11603 = vmatmul.mubr.msk.f32.gmra.mxu0 %vm535_vm0, %v14421_v17  ;;  %11619 = vmatmul.mubr.msk.f32.gmra.mxu1 %vm535_vm0, %v14421_v17 }
 0x1bd   :  { %11625 = vmatprep.mubr.msk.f32.mxu0 %vm535_vm0, %v14372_v4  ;;  %11641 = vmatprep.mubr.msk.f32.mxu1 %vm535_vm0, %v14372_v4 }
 0x1c0   :  { %11626 = vmatmul.mubr.msk.f32.vlgmr.msra.gmra.mxu0 %vm535_vm0, %v14375_v5  ;;  %11642 = vmatmul.mubr.msk.f32.vlgmr.msra.gmra.mxu1 %vm535_vm0, %v14375_v5 }
 0x1c1   :  { %11654 = vmatpush3.msra.mxu0 %v14466_v21  ;;  %11665 = vmatpush3.msra.mxu1 %v14469_v22 }
 0x1c2   :  { %11628 = vmatprep.mubr.msk.f32.mxu0 %vm535_vm0, %v14386_v8  ;;  %11644 = vmatprep.mubr.msk.f32.mxu1 %vm535_vm0, %v14386_v8  ;;  %v14674_v8 = vsub.s32 2, %v14651_v46 }
 0x1c3   :  { %11655 = vmatprep.subr.mxu0 %v14075_v20  ;;  %11666 = vmatprep.subr.mxu1 %v14075_v20 }
 0x1c4   :  { %11629 = vmatmul.mubr.msk.f32.gmra.mxu0 %vm535_vm0, %v14389_v9  ;;  %11645 = vmatmul.mubr.msk.f32.gmra.mxu1 %vm535_vm0, %v14389_v9  ;;  %v865_v18 = vrot.slane %v14659_v49, %v14674_v8 }
 0x1c5   :  { %11656 = vmatpush3.msra.mxu0 %v14482_v23  ;;  %11667 = vmatpush3.msra.mxu1 %v14485_v24 }
 0x1c6   :  { %11631 = vmatprep.mubr.msk.f32.mxu0 %vm535_vm0, %v14392_v10  ;;  %11647 = vmatprep.mubr.msk.f32.mxu1 %vm535_vm0, %v14392_v10 }
 0x1c7   :  { %11657 = vmatprep.subr.mxu0 %v14075_v20  ;;  %11668 = vmatprep.subr.mxu1 %v14075_v20 }
 0x1c8   :  { %11632 = vmatmul.mubr.msk.f32.gmra.mxu0 %vm535_vm0, %v14407_v13  ;;  %11648 = vmatmul.mubr.msk.f32.gmra.mxu1 %vm535_vm0, %v14407_v13 }
 0x1c9   :  { %11658 = vmatpush3.msra.mxu0 %v14500_v25  ;;  %11669 = vmatpush3.msra.mxu1 %v14503_v26 }
 0x1ca   :  { %11634 = vmatprep.mubr.msk.f32.mxu0 %vm535_vm0, %v14410_v14  ;;  %11650 = vmatprep.mubr.msk.f32.mxu1 %vm535_vm0, %v14410_v14 }
 0x1cb   :  { %11659 = vmatprep.subr.mxu0 %v14075_v20  ;;  %11670 = vmatprep.subr.mxu1 %v14075_v20 }
 0x1cc   :  { %11635 = vmatmul.mubr.msk.f32.gmra.mxu0 %vm535_vm0, %v14421_v17  ;;  %11651 = vmatmul.mubr.msk.f32.gmra.mxu1 %vm535_vm0, %v14421_v17 }
 0x1cd   :  { %11660 = vmatpush3.msra.mxu0 %v14518_v27  ;;  %11671 = vmatpush3.msra.mxu1 %v14521_v28 }
 0x1ce   :  { %11661 = vmatprep.mubr.msk.f32.mxu0 %vm14076_vm1, %v14075_v20  ;;  %11672 = vmatprep.mubr.msk.f32.mxu1 %vm14076_vm1, %v14075_v20 }
 0x1cf   :  { %11675 = vmatprep.subr.mxu0 %v14075_v20  ;;  %11686 = vmatprep.subr.mxu1 %v14075_v20 }
 0x1d0   :  { %11662 = vmatmul.mubr.f32.vlgmr.msra.gmra.mxu0 %v14075_v20  ;;  %11673 = vmatmul.mubr.f32.vlgmr.msra.gmra.mxu1 %v14075_v20 }
 0x1d1   :  { %11676 = vmatpush3.msra.mxu0 %v14536_v29  ;;  %11687 = vmatpush3.msra.mxu1 %v14539_v30 }
 0x1d2   :  { %11677 = vmatprep.subr.mxu0 %v14075_v20  ;;  %11688 = vmatprep.subr.mxu1 %v14075_v20 }
 0x1d3   :  { %11678 = vmatpush3.msra.mxu0 %v14546_v31  ;;  %11689 = vmatpush3.msra.mxu1 %v14549_v32 }
 0x1d4   :  { %11679 = vmatprep.subr.mxu0 %v14075_v20  ;;  %11690 = vmatprep.subr.mxu1 %v14075_v20 }
 0x1d5   :  { %11680 = vmatpush3.msra.mxu0 %v14556_v33  ;;  %11691 = vmatpush3.msra.mxu1 %v14559_v34 }
 0x1d6   :  { %11681 = vmatprep.subr.mxu0 %v14075_v20  ;;  %11692 = vmatprep.subr.mxu1 %v14075_v20 }
 0x1d7   :  { %11682 = vmatpush3.msra.mxu0 %v14566_v35  ;;  %11693 = vmatpush3.msra.mxu1 %v14569_v36 }
 0x1d8   :  { %11694 = vmatprep.mubr.msk.f32.mxu1 %vm14076_vm1, %v14075_v20  ;;  %11683 = vmatprep.mubr.msk.f32.mxu0 %vm14076_vm1, %v14075_v20 }
 0x1d9   :  { %11695 = vmatmul.mubr.f32.vlgmr.msra.gmra.mxu1 %v14075_v20  ;;  %11697 = vmatprep.subr.mxu0 %v14075_v20 }
 0x1da   :  { %11684 = vmatmul.mubr.f32.vlgmr.msra.gmra.mxu0 %v14075_v20  ;;  %11708 = vmatprep.subr.mxu1 %v14075_v20 }
 0x1db   :  { %11698 = vmatpush3.msra.mxu0 %v14582_v37  ;;  %11705 = vmatprep.mubr.msk.f32.mxu0 %vm14076_vm1, %v14075_v20 }
 0x1dc   :  { %11699 = vmatprep.subr.mxu0 %v14075_v20  ;;  %11709 = vmatpush3.msra.mxu1 %v14587_v38 }
 0x1dd   :  { %11700 = vmatpush3.msra.mxu0 %v14591_v39  ;;  %11710 = vmatprep.subr.mxu1 %v14075_v20 }
 0x1de   :  { %11701 = vmatprep.subr.mxu0 %v14075_v20  ;;  %11711 = vmatpush3.msra.mxu1 %v14598_v40 }
 0x1df   :  { %11702 = vmatpush3.msra.mxu0 %v14602_v41  ;;  %11712 = vmatprep.subr.mxu1 %v14075_v20 }
 0x1e0   :  { %11703 = vmatprep.subr.mxu0 %v14075_v20  ;;  %11713 = vmatpush3.msra.mxu1 %v14608_v42 }
 0x1e1   :  { %11704 = vmatpush3.msra.mxu0 %v14612_v43  ;;  %11714 = vmatprep.subr.mxu1 %v14075_v20 }
 0x1e2   :  { %11706 = vmatmul.mubr.f32.vlgmr.msra.gmra.mxu0 %v14075_v20  ;;  %11715 = vmatpush3.msra.mxu1 %v14618_v44 }
 0x1e3   :  { %11716 = vmatprep.mubr.msk.f32.mxu1 %vm14076_vm1, %v14075_v20  ;;  %11719 = vmatprep.subr.mxu0 %v14075_v20 }
 0x1e4   :  { %11717 = vmatmul.mubr.f32.vlgmr.msra.gmra.mxu1 %v14075_v20  ;;  %11730 = vmatprep.subr.mxu1 %v14075_v20 }
 0x1e5   :  { %11720 = vmatpush3.msra.mxu0 %v14466_v21  ;;  %11731 = vmatpush3.msra.mxu1 %v14469_v22 }
 0x1e6   :  { %11721 = vmatprep.subr.mxu0 %v14075_v20  ;;  %11732 = vmatprep.subr.mxu1 %v14075_v20 }
 0x1e7   :  { %11722 = vmatpush3.msra.mxu0 %v14482_v23  ;;  %11733 = vmatpush3.msra.mxu1 %v14485_v24 }
 0x1e8   :  { %11723 = vmatprep.subr.mxu0 %v14075_v20  ;;  %11734 = vmatprep.subr.mxu1 %v14075_v20 }
 0x1e9   :  { %11724 = vmatpush3.msra.mxu0 %v14500_v25  ;;  %11735 = vmatpush3.msra.mxu1 %v14503_v26 }
 0x1ea   :  { %11725 = vmatprep.subr.mxu0 %v14075_v20  ;;  %11736 = vmatprep.subr.mxu1 %v14075_v20 }
 0x1eb   :  { %11726 = vmatpush3.msra.mxu0 %v14518_v27  ;;  %11737 = vmatpush3.msra.mxu1 %v14521_v28 }
 0x1ec   :  { %11727 = vmatprep.mubr.msk.f32.mxu0 %vm14076_vm1, %v14075_v20  ;;  %11738 = vmatprep.mubr.msk.f32.mxu1 %vm14076_vm1, %v14075_v20 }
 0x1ed   :  { %11741 = vmatprep.subr.mxu0 %v14075_v20  ;;  %11752 = vmatprep.subr.mxu1 %v14075_v20 }
 0x260   :  { %v11563_v52 = vpop.f32.mrf.mxu0  ;;  %v11579_v53 = vpop.f32.mrf.mxu1 }
 0x261   :  { %v703_v54 = vadd.f32 %v11563_v52, %v606_v50  ;;  %v821_v55 = vadd.f32 %v11579_v53, %v748_v51 }
 0x262   :  { %v697_v56 = vpop.f32.mrf.mxu0  ;;  %v815_v57 = vpop.f32.mrf.mxu1 }
 0x263   :  { %738 = vst.msk [vmem:[#allocation2 + $0x8] sm:$0xff] %vm736_vm2, %v703_v54  ;;  %855 = vst.msk [vmem:[#allocation3 + $0x8] sm:$0xff] %vm736_vm2, %v821_v55  ;;  %v698_v58 = vadd.f32 %v697_v56, %v606_v50  ;;  %v816_v59 = vadd.f32 %v815_v57, %v748_v51 }
 0x264   :  { %v11566_v60 = vpop.f32.mrf.mxu0  ;;  %v11582_v61 = vpop.f32.mrf.mxu1 }
 0x265   :  { %737 = vst.msk [vmem:[#allocation2] sm:$0xff] %vm736_vm2, %v698_v58  ;;  %854 = vst.msk [vmem:[#allocation3] sm:$0xff] %vm736_vm2, %v816_v59  ;;  %v713_v62 = vadd.f32 %v11566_v60, %v606_v50  ;;  %v831_v63 = vadd.f32 %v11582_v61, %v748_v51 }
 0x266   :  { %v707_v0 = vpop.f32.mrf.mxu0  ;;  %v825_v1 = vpop.f32.mrf.mxu1 }
 0x267   :  { %740 = vst.msk [vmem:[#allocation2 + $0x18] sm:$0xff] %vm736_vm2, %v713_v62  ;;  %857 = vst.msk [vmem:[#allocation3 + $0x18] sm:$0xff] %vm736_vm2, %v831_v63  ;;  %v708_v2 = vadd.f32 %v707_v0, %v606_v50  ;;  %v826_v3 = vadd.f32 %v825_v1, %v748_v51 }
 0x268   :  { %v11569_v4 = vpop.f32.mrf.mxu0  ;;  %v11585_v5 = vpop.f32.mrf.mxu1 }
 0x269   :  { %739 = vst.msk [vmem:[#allocation2 + $0x10] sm:$0xff] %vm736_vm2, %v708_v2  ;;  %856 = vst.msk [vmem:[#allocation3 + $0x10] sm:$0xff] %vm736_vm2, %v826_v3  ;;  %v723_v6 = vadd.f32 %v11569_v4, %v606_v50  ;;  %v841_v7 = vadd.f32 %v11585_v5, %v748_v51 }
 0x26a   :  { %v717_v9 = vpop.f32.mrf.mxu0  ;;  %v835_v10 = vpop.f32.mrf.mxu1 }
 0x26b   :  { %742 = vst.msk [vmem:[#allocation2 + $0x28] sm:$0xff] %vm736_vm2, %v723_v6  ;;  %859 = vst.msk [vmem:[#allocation3 + $0x28] sm:$0xff] %vm736_vm2, %v841_v7  ;;  %v718_v12 = vadd.f32 %v717_v9, %v606_v50  ;;  %v836_v13 = vadd.f32 %v835_v10, %v748_v51 }
 0x26c   :  { %v11572_v14 = vpop.f32.mrf.mxu0  ;;  %v11588_v15 = vpop.f32.mrf.mxu1 }
 0x26d   :  { %741 = vst.msk [vmem:[#allocation2 + $0x20] sm:$0xff] %vm736_vm2, %v718_v12  ;;  %858 = vst.msk [vmem:[#allocation3 + $0x20] sm:$0xff] %vm736_vm2, %v836_v13  ;;  %v733_v16 = vadd.f32 %v11572_v14, %v606_v50  ;;  %v851_v17 = vadd.f32 %v11588_v15, %v748_v51 }
 0x26e   :  { %v727_v45 = vpop.f32.mrf.mxu0  ;;  %v845_v52 = vpop.f32.mrf.mxu1 }
 0x26f   :  { %744 = vst.msk [vmem:[#allocation2 + $0x38] sm:$0xff] %vm736_vm2, %v733_v16  ;;  %861 = vst.msk [vmem:[#allocation3 + $0x38] sm:$0xff] %vm736_vm2, %v851_v17  ;;  %v728_v53 = vadd.f32 %v727_v45, %v606_v50  ;;  %v846_v54 = vadd.f32 %v845_v52, %v748_v51  ;;  %v1118_v52 = vrot.slane %v14676_v11, %v14657_v48 }
 0x270   :  { %v11595_v55 = vpop.f32.mrf.mxu0  ;;  %v11611_v56 = vpop.f32.mrf.mxu1 }
 0x271   :  { %743 = vst.msk [vmem:[#allocation2 + $0x30] sm:$0xff] %vm736_vm2, %v728_v53  ;;  %860 = vst.msk [vmem:[#allocation3 + $0x30] sm:$0xff] %vm736_vm2, %v846_v54  ;;  %v938_v57 = vadd.f32 %v11595_v55, %v865_v18  ;;  %v1074_v58 = vadd.f32 %v11611_v56, %v1001_v19  ;;  %v1235_v53 = vrot.slane %v14676_v11, %v14674_v8 }
 0x272   :  { %v932_v59 = vpop.f32.mrf.mxu0  ;;  %v1068_v60 = vpop.f32.mrf.mxu1 }
 0x273   :  { %972 = vst.msk [vmem:[#allocation4 + $0x8] sm:$0xff] %vm736_vm2, %v938_v57  ;;  %1108 = vst.msk [vmem:[#allocation5 + $0x8] sm:$0xff] %vm736_vm2, %v1074_v58  ;;  %v933_v61 = vadd.f32 %v932_v59, %v865_v18  ;;  %v1069_v62 = vadd.f32 %v1068_v60, %v1001_v19 }
 0x274   :  { %v11598_v63 = vpop.f32.mrf.mxu0  ;;  %v11614_v0 = vpop.f32.mrf.mxu1 }
 0x275   :  { %971 = vst.msk [vmem:[#allocation4] sm:$0xff] %vm736_vm2, %v933_v61  ;;  %1107 = vst.msk [vmem:[#allocation5] sm:$0xff] %vm736_vm2, %v1069_v62  ;;  %v948_v50 = vadd.f32 %v11598_v63, %v865_v18  ;;  %v1084_v51 = vadd.f32 %v11614_v0, %v1001_v19 }
 0x276   :  { %v942_v1 = vpop.f32.mrf.mxu0  ;;  %v1078_v2 = vpop.f32.mrf.mxu1 }
 0x277   :  { %974 = vst.msk [vmem:[#allocation4 + $0x18] sm:$0xff] %vm736_vm2, %v948_v50  ;;  %1110 = vst.msk [vmem:[#allocation5 + $0x18] sm:$0xff] %vm736_vm2, %v1084_v51  ;;  %v943_v3 = vadd.f32 %v942_v1, %v865_v18  ;;  %v1079_v4 = vadd.f32 %v1078_v2, %v1001_v19 }
 0x278   :  { %v11601_v5 = vpop.f32.mrf.mxu0  ;;  %v11617_v6 = vpop.f32.mrf.mxu1 }
 0x279   :  { %973 = vst.msk [vmem:[#allocation4 + $0x10] sm:$0xff] %vm736_vm2, %v943_v3  ;;  %1109 = vst.msk [vmem:[#allocation5 + $0x10] sm:$0xff] %vm736_vm2, %v1079_v4  ;;  %v958_v7 = vadd.f32 %v11601_v5, %v865_v18  ;;  %v1094_v9 = vadd.f32 %v11617_v6, %v1001_v19 }
 0x27a   :  { %v952_v10 = vpop.f32.mrf.mxu0  ;;  %v1088_v12 = vpop.f32.mrf.mxu1 }
 0x27b   :  { %976 = vst.msk [vmem:[#allocation4 + $0x28] sm:$0xff] %vm736_vm2, %v958_v7  ;;  %1112 = vst.msk [vmem:[#allocation5 + $0x28] sm:$0xff] %vm736_vm2, %v1094_v9  ;;  %v953_v13 = vadd.f32 %v952_v10, %v865_v18  ;;  %v1089_v14 = vadd.f32 %v1088_v12, %v1001_v19 }
 0x27c   :  { %v11604_v15 = vpop.f32.mrf.mxu0  ;;  %v11620_v16 = vpop.f32.mrf.mxu1 }
 0x27d   :  { %975 = vst.msk [vmem:[#allocation4 + $0x20] sm:$0xff] %vm736_vm2, %v953_v13  ;;  %1111 = vst.msk [vmem:[#allocation5 + $0x20] sm:$0xff] %vm736_vm2, %v1089_v14  ;;  %v968_v17 = vadd.f32 %v11604_v15, %v865_v18  ;;  %v1104_v45 = vadd.f32 %v11620_v16, %v1001_v19 }
 0x27e   :  { %v962_v54 = vpop.f32.mrf.mxu0  ;;  %v1098_v55 = vpop.f32.mrf.mxu1 }
 0x27f   :  { %978 = vst.msk [vmem:[#allocation4 + $0x38] sm:$0xff] %vm736_vm2, %v968_v17  ;;  %1114 = vst.msk [vmem:[#allocation5 + $0x38] sm:$0xff] %vm736_vm2, %v1104_v45  ;;  %v963_v56 = vadd.f32 %v962_v54, %v865_v18  ;;  %v1099_v57 = vadd.f32 %v1098_v55, %v1001_v19 }
 0x280   :  { %v11627_v58 = vpop.f32.mrf.mxu0  ;;  %v11643_v59 = vpop.f32.mrf.mxu1 }
 0x281   :  { %977 = vst.msk [vmem:[#allocation4 + $0x30] sm:$0xff] %vm736_vm2, %v963_v56  ;;  %1113 = vst.msk [vmem:[#allocation5 + $0x30] sm:$0xff] %vm736_vm2, %v1099_v57  ;;  %v1191_v60 = vadd.f32 %v11627_v58, %v1118_v52  ;;  %v1308_v61 = vadd.f32 %v11643_v59, %v1235_v53  ;;  %v1349_v59 = vld [vmem:[#allocation2] sm:$0xff] }
 0x282   :  { %v1185_v62 = vpop.f32.mrf.mxu0  ;;  %v1302_v63 = vpop.f32.mrf.mxu1 }
 0x283   :  { %1225 = vst.msk [vmem:[#allocation6 + $0x8] sm:$0xff] %vm736_vm2, %v1191_v60  ;;  %1342 = vst.msk [vmem:[#allocation7 + $0x8] sm:$0xff] %vm736_vm2, %v1308_v61  ;;  %v1186_v0 = vadd.f32 %v1185_v62, %v1118_v52  ;;  %v1303_v50 = vadd.f32 %v1302_v63, %v1235_v53 }
 0x284   :  { %v11630_v51 = vpop.f32.mrf.mxu0  ;;  %v11646_v1 = vpop.f32.mrf.mxu1 }
 0x285   :  { %1224 = vst.msk [vmem:[#allocation6] sm:$0xff] %vm736_vm2, %v1186_v0  ;;  %1341 = vst.msk [vmem:[#allocation7] sm:$0xff] %vm736_vm2, %v1303_v50  ;;  %v1201_v18 = vadd.f32 %v11630_v51, %v1118_v52  ;;  %v1318_v19 = vadd.f32 %v11646_v1, %v1235_v53  ;;  %v1430_v51 = vld [vmem:[#allocation3] sm:$0xff] }
 0x286   :  { %v1195_v2 = vpop.f32.mrf.mxu0  ;;  %v1312_v3 = vpop.f32.mrf.mxu1 }
 0x287   :  { %1227 = vst.msk [vmem:[#allocation6 + $0x18] sm:$0xff] %vm736_vm2, %v1201_v18  ;;  %1344 = vst.msk [vmem:[#allocation7 + $0x18] sm:$0xff] %vm736_vm2, %v1318_v19  ;;  %v1196_v4 = vadd.f32 %v1195_v2, %v1118_v52  ;;  %v1313_v5 = vadd.f32 %v1312_v3, %v1235_v53  ;;  %v1591_v18 = vld [vmem:[#allocation5 + $0x38] sm:$0xff] }
 0x288   :  { %v11633_v6 = vpop.f32.mrf.mxu0  ;;  %v11649_v7 = vpop.f32.mrf.mxu1 }
 0x289   :  { %1226 = vst.msk [vmem:[#allocation6 + $0x10] sm:$0xff] %vm736_vm2, %v1196_v4  ;;  %1343 = vst.msk [vmem:[#allocation7 + $0x10] sm:$0xff] %vm736_vm2, %v1313_v5  ;;  %v1211_v9 = vadd.f32 %v11633_v6, %v1118_v52  ;;  %v1328_v10 = vadd.f32 %v11649_v7, %v1235_v53 }
 0x28a   :  { %v1205_v12 = vpop.f32.mrf.mxu0  ;;  %v1322_v13 = vpop.f32.mrf.mxu1 }
 0x28b   :  { %1229 = vst.msk [vmem:[#allocation6 + $0x28] sm:$0xff] %vm736_vm2, %v1211_v9  ;;  %1346 = vst.msk [vmem:[#allocation7 + $0x28] sm:$0xff] %vm736_vm2, %v1328_v10  ;;  %v1206_v14 = vadd.f32 %v1205_v12, %v1118_v52  ;;  %v1323_v15 = vadd.f32 %v1322_v13, %v1235_v53 }
 0x28c   :  { %v11636_v16 = vpop.f32.mrf.mxu0  ;;  %v11652_v17 = vpop.f32.mrf.mxu1 }
 0x28d   :  { %1228 = vst.msk [vmem:[#allocation6 + $0x20] sm:$0xff] %vm736_vm2, %v1206_v14  ;;  %1345 = vst.msk [vmem:[#allocation7 + $0x20] sm:$0xff] %vm736_vm2, %v1323_v15  ;;  %v1221_v45 = vadd.f32 %v11636_v16, %v1118_v52  ;;  %v1338_v54 = vadd.f32 %v11652_v17, %v1235_v53  ;;  %v14727_v17 = vsub.s32 3, %v14651_v46 }
 0x28e   :  { %v1215_v55 = vpop.f32.mrf.mxu0  ;;  %v1332_v56 = vpop.f32.mrf.mxu1 }
 0x28f   :  { %1231 = vst.msk [vmem:[#allocation6 + $0x38] sm:$0xff] %vm736_vm2, %v1221_v45  ;;  %1348 = vst.msk [vmem:[#allocation7 + $0x38] sm:$0xff] %vm736_vm2, %v1338_v54  ;;  %v1216_v57 = vadd.f32 %v1215_v55, %v1118_v52  ;;  %v1333_v58 = vadd.f32 %v1332_v56, %v1235_v53  ;;  %v14731_v56 = vrot.slane %v14659_v49, %v14727_v17 }
 0x290   :  { %v1419_v60 = vpop.f32.mrf.mxu0  ;;  %v1497_v61 = vpop.f32.mrf.mxu1 }
 0x291   :  { %1230 = vst.msk [vmem:[#allocation6 + $0x30] sm:$0xff] %vm736_vm2, %v1216_v57  ;;  %1347 = vst.msk [vmem:[#allocation7 + $0x30] sm:$0xff] %vm736_vm2, %v1333_v58  ;;  %v1423_v62 = vadd.f32 %v1419_v60, %v1349_v59  ;;  %v1501_v1 = vadd.f32 %v1497_v61, %v1430_v51  ;;  %v1508_v61 = vld [vmem:[#allocation4] sm:$0xff] }
 0x292   :  { %v11663_v63 = vpop.f32.mrf.mxu0  ;;  %v11674_v0 = vpop.f32.mrf.mxu1 }
 0x293   :  { %v10686_v50 = vmul.f32 -1.442695, %v1423_v62  ;;  %v10687_v52 = vmul.f32 -1.442695, %v1501_v1  ;;  %v14736_v62 = vrot.slane %v14676_v11, %v14727_v17 }
 0x295   :  { %12972 = vpow2.f32 %v10686_v50 }
 0x296   :  { %v1669_v7 = vld [vmem:[#allocation6 + $0x38] sm:$0xff] }
 0x297   :  { %v1747_v1 = vld [vmem:[#allocation7 + $0x38] sm:$0xff] }
 0x299   :  { %v1658_v19 = vpop.f32.mrf.mxu1 }
 0x29a   :  { %v1662_v2 = vadd.f32 %v1658_v19, %v1591_v18  ;;  %v1579_v3 = vpop.f32.mrf.mxu0 }
 0x29b   :  { %v11696_v53 = vpop.f32.mrf.mxu1  ;;  %v1580_v58 = vadd.f32 %v1579_v3, %v14731_v56 }
 0x29c   :  { %v10688_v4 = vmul.f32 -1.442695, %v1662_v2  ;;  %v11685_v5 = vpop.f32.mrf.mxu0 }
 0x29e   :  { %12974 = vpow2.f32 %v10688_v4 }
 0x29f   :  { %12976 = vpow2.f32 %v10687_v52 }
 0x2a2   :  { %v12973_v6 = vpop.eup %12972  ;;  %v1736_v9 = vpop.f32.mrf.mxu0 }
 0x2a3   :  { %v1427_v10 = vadd.f32 1.0, %v12973_v6  ;;  %v1740_v12 = vadd.f32 %v1736_v9, %v1669_v7 }
 0x2a4   :  { %v11707_v13 = vpop.f32.mrf.mxu0  ;;  %v1818_v14 = vpop.f32.mrf.mxu1 }
 0x2a5   :  { %12978 = vrcp.f32 %v1427_v10  ;;  %v10689_v15 = vmul.f32 -1.442695, %v1740_v12  ;;  %v1819_v50 = vadd.f32 %v1818_v14, %v14736_v62 }
 0x2a6   :  { %v11718_v16 = vpop.f32.mrf.mxu1 }
 0x2a7   :  { %12980 = vpow2.f32 %v10689_v15 }
 0x2ab   :  { %v12975_v45 = vpop.eup %12974 }
 0x2ac   :  { %v12977_v54 = vpop.eup %12976  ;;  %v1666_v55 = vadd.f32 1.0, %v12975_v45  ;;  %v1911_v45 = vld [vmem:[#allocation3 + $0x8] sm:$0xff] }
 0x2ad   :  { %v1505_v57 = vadd.f32 1.0, %v12977_v54 }
 0x2ae   :  { %12982 = vrcp.f32 %v1666_v55 }
 0x2af   :  { %12984 = vrcp.f32 %v1505_v57  ;;  %v2068_v57 = vld [vmem:[#allocation5 + $0x30] sm:$0xff] }
 0x2b2   :  { %v12979_v59 = vpop.eup %12978 }
 0x2b3   :  { %v1583_v60 = vmul.f32 %v12979_v59, %v1580_v58 }
 0x2b4   :  { %v12981_v46 = vpop.eup %12980 }
 0x2b5   :  { %v1584_v63 = vadd.f32 %v1583_v60, %v1508_v61  ;;  %v1744_v0 = vadd.f32 1.0, %v12981_v46 }
 0x2b7   :  { %12986 = vtanh.f32 %v1584_v63 }
 0x2b8   :  { %12988 = vrcp.f32 %v1744_v0 }
 0x2bb   :  { %v12983_v49 = vpop.eup %12982 }
 0x2bc   :  { %v1822_v51 = vmul.f32 %v12983_v49, %v1819_v50  ;;  %v12985_v19 = vpop.eup %12984  ;;  %v2149_v49 = vld [vmem:[#allocation6 + $0x30] sm:$0xff] }
 0x2bd   :  { %v1586_v2 = vsub.f32 1.0, %v12985_v19  ;;  %v1588_v53 = vmul.f32 0.0, %v12985_v19 }
 0x2be   :  { %v1823_v18 = vadd.f32 %v1822_v51, %v1747_v1 }
 0x2c0   :  { %12990 = vtanh.f32 %v1823_v18 }
 0x2c4   :  { %v12987_v3 = vpop.eup %12986 }
 0x2c5   :  { %v1587_v52 = vmul.f32 %v12987_v3, %v1586_v2  ;;  %v12989_v11 = vpop.eup %12988 }
 0x2c6   :  { %v1825_v5 = vsub.f32 1.0, %v12989_v11  ;;  %v1827_v9 = vmul.f32 0.0, %v12989_v11 }
 0x2c7   :  { %v14739_v4 = vadd.f32 %v1588_v53, %v1587_v52 }
 0x2c9   :  { %1590 = vst.msk [vmem:[#allocation8] sm:$0xff] %vm736_vm2, %v14739_v4  ;;  %11728 = vmatmul.mubr.msk.f32.vlgmr.msra.gmra.mxu0 %vm736_vm2, %v14739_v4  ;;  %11739 = vmatmul.mubr.msk.f32.vlgmr.msra.gmra.mxu1 %vm736_vm2, %v14739_v4 }
 0x2ca   :  { %11742 = vmatpush3.msra.mxu0 %v14536_v29  ;;  %11753 = vmatpush3.msra.mxu1 %v14539_v30 }
 0x2cb   :  { %11743 = vmatprep.subr.mxu0 %v14075_v20  ;;  %11754 = vmatprep.subr.mxu1 %v14075_v20 }
 0x2cc   :  { %11744 = vmatpush3.msra.mxu0 %v14546_v31  ;;  %11755 = vmatpush3.msra.mxu1 %v14549_v32 }
 0x2cd   :  { %v12991_v6 = vpop.eup %12990  ;;  %11745 = vmatprep.subr.mxu0 %v14075_v20  ;;  %11756 = vmatprep.subr.mxu1 %v14075_v20 }
 0x2ce   :  { %11746 = vmatpush3.msra.mxu0 %v14556_v33  ;;  %11757 = vmatpush3.msra.mxu1 %v14559_v34  ;;  %v1826_v7 = vmul.f32 %v12991_v6, %v1825_v5 }
 0x2cf   :  { %11747 = vmatprep.subr.mxu0 %v14075_v20  ;;  %11758 = vmatprep.subr.mxu1 %v14075_v20 }
 0x2d0   :  { %11748 = vmatpush3.msra.mxu0 %v14566_v35  ;;  %11749 = vmatprep.mubr.msk.f32.mxu0 %vm14076_vm1, %v14075_v20  ;;  %v14762_v10 = vadd.f32 %v1827_v9, %v1826_v7 }
 0x2d1   :  { %11759 = vmatpush3.msra.mxu1 %v14569_v36  ;;  %11760 = vmatprep.mubr.msk.f32.mxu1 %vm14076_vm1, %v14075_v20 }
 0x2d2   :  { %11750 = vmatmul.mubr.msk.f32.vlgmr.msra.gmra.mxu0 %vm736_vm2, %v14739_v4  ;;  %1829 = vst.msk [vmem:[#allocation9 + $0x38] sm:$0xff] %vm736_vm2, %v14762_v10  ;;  %11761 = vmatmul.mubr.msk.f32.vlgmr.msra.gmra.mxu1 %vm736_vm2, %v14762_v10 }
 0x2d3   :  { %11763 = vmatprep.subr.mxu0 %v14075_v20  ;;  %11774 = vmatprep.subr.mxu1 %v14075_v20 }
 0x2d4   :  { %11764 = vmatpush3.msra.mxu0 %v14582_v37  ;;  %11775 = vmatpush3.msra.mxu1 %v14587_v38 }
 0x2d5   :  { %11765 = vmatprep.subr.mxu0 %v14075_v20  ;;  %11776 = vmatprep.subr.mxu1 %v14075_v20 }
 0x2d6   :  { %11766 = vmatpush3.msra.mxu0 %v14591_v39  ;;  %11777 = vmatpush3.msra.mxu1 %v14598_v40 }
 0x2d7   :  { %11767 = vmatprep.subr.mxu0 %v14075_v20  ;;  %11778 = vmatprep.subr.mxu1 %v14075_v20 }
 0x2d8   :  { %11768 = vmatpush3.msra.mxu0 %v14602_v41  ;;  %11779 = vmatpush3.msra.mxu1 %v14608_v42 }
 0x2d9   :  { %11769 = vmatprep.subr.mxu0 %v14075_v20  ;;  %11780 = vmatprep.subr.mxu1 %v14075_v20 }
 0x2da   :  { %11770 = vmatpush3.msra.mxu0 %v14612_v43  ;;  %11771 = vmatprep.mubr.msk.f32.mxu0 %vm14076_vm1, %v14075_v20 }
 0x2db   :  { %11781 = vmatpush3.msra.mxu1 %v14618_v44  ;;  %11782 = vmatprep.mubr.msk.f32.mxu1 %vm14076_vm1, %v14075_v20 }
 0x2dc   :  { %11772 = vmatmul.mubr.msk.f32.vlgmr.msra.gmra.mxu0 %vm736_vm2, %v14762_v10  ;;  %11783 = vmatmul.mubr.msk.f32.vlgmr.msra.gmra.mxu1 %vm736_vm2, %v14762_v10 }
 0x2dd   :  { %11785 = vmatprep.subr.mxu0 %v14075_v20  ;;  %11796 = vmatprep.subr.mxu1 %v14075_v20 }
 0x2de   :  { %11786 = vmatpush3.msra.mxu0 %v14466_v21  ;;  %11797 = vmatpush3.msra.mxu1 %v14469_v22  ;;  %v1830_v21 = vld [vmem:[#allocation2 + $0x8] sm:$0xff] }
 0x2df   :  { %11787 = vmatprep.subr.mxu0 %v14075_v20  ;;  %11798 = vmatprep.subr.mxu1 %v14075_v20 }
 0x2e0   :  { %11788 = vmatpush3.msra.mxu0 %v14482_v23  ;;  %11799 = vmatpush3.msra.mxu1 %v14485_v24 }
 0x2e1   :  { %11789 = vmatprep.subr.mxu0 %v14075_v20  ;;  %11800 = vmatprep.subr.mxu1 %v14075_v20 }
 0x2e2   :  { %11790 = vmatpush3.msra.mxu0 %v14500_v25  ;;  %11801 = vmatpush3.msra.mxu1 %v14503_v26 }
 0x2e3   :  { %11791 = vmatprep.subr.mxu0 %v14075_v20  ;;  %11802 = vmatprep.subr.mxu1 %v14075_v20 }
 0x2e4   :  { %11792 = vmatpush3.msra.mxu0 %v14518_v27  ;;  %11803 = vmatpush3.msra.mxu1 %v14521_v28 }
 0x2e5   :  { %11793 = vmatprep.mubr.msk.f32.mxu0 %vm14076_vm1, %v14075_v20  ;;  %11804 = vmatprep.mubr.msk.f32.mxu1 %vm14076_vm1, %v14075_v20 }
 0x2e6   :  { %11807 = vmatprep.subr.mxu0 %v14075_v20  ;;  %11818 = vmatprep.subr.mxu1 %v14075_v20 }
 0x389   :  { %v1900_v22 = vpop.f32.mrf.mxu0  ;;  %v1978_v12 = vpop.f32.mrf.mxu1 }
 0x38a   :  { %v1904_v13 = vadd.f32 %v1900_v22, %v1830_v21  ;;  %v1982_v54 = vadd.f32 %v1978_v12, %v1911_v45  ;;  %v1989_v21 = vld [vmem:[#allocation4 + $0x8] sm:$0xff]  ;;  %v2227_v45 = vld [vmem:[#allocation7 + $0x30] sm:$0xff] }
 0x38b   :  { %v11729_v14 = vpop.f32.mrf.mxu0  ;;  %v11740_v15 = vpop.f32.mrf.mxu1 }
 0x38c   :  { %v10691_v16 = vmul.f32 -1.442695, %v1904_v13  ;;  %v10693_v60 = vmul.f32 -1.442695, %v1982_v54 }
 0x38e   :  { %12992 = vpow2.f32 %v10691_v16 }
 0x392   :  { %v2056_v55 = vpop.f32.mrf.mxu0  ;;  %v2138_v58 = vpop.f32.mrf.mxu1 }
 0x393   :  { %v2142_v59 = vadd.f32 %v2138_v58, %v2068_v57  ;;  %v2057_v6 = vadd.f32 %v2056_v55, %v14731_v56 }
 0x394   :  { %v11751_v61 = vpop.f32.mrf.mxu0  ;;  %v11762_v46 = vpop.f32.mrf.mxu1 }
 0x395   :  { %v10696_v63 = vmul.f32 -1.442695, %v2142_v59 }
 0x397   :  { %12994 = vpow2.f32 %v10696_v63 }
 0x398   :  { %12996 = vpow2.f32 %v10693_v60 }
 0x39b   :  { %v12993_v0 = vpop.eup %12992 }
 0x39c   :  { %v1908_v50 = vadd.f32 1.0, %v12993_v0  ;;  %v2216_v51 = vpop.f32.mrf.mxu0  ;;  %v2294_v1 = vpop.f32.mrf.mxu1 }
 0x39d   :  { %v2220_v18 = vadd.f32 %v2216_v51, %v2149_v49  ;;  %v2295_v14 = vadd.f32 %v2294_v1, %v14736_v62 }
 0x39e   :  { %12998 = vrcp.f32 %v1908_v50  ;;  %v11773_v19 = vpop.f32.mrf.mxu0  ;;  %v11784_v2 = vpop.f32.mrf.mxu1  ;;  %v2625_v50 = vld [vmem:[#allocation6 + $0x28] sm:$0xff] }
 0x39f   :  { %v10698_v3 = vmul.f32 -1.442695, %v2220_v18 }
 0x3a1   :  { %13000 = vpow2.f32 %v10698_v3 }
 0x3a4   :  { %v12995_v52 = vpop.eup %12994 }
 0x3a5   :  { %v12997_v53 = vpop.eup %12996  ;;  %v2146_v11 = vadd.f32 1.0, %v12995_v52 }
 0x3a6   :  { %v1986_v5 = vadd.f32 1.0, %v12997_v53 }
 0x3a7   :  { %13002 = vrcp.f32 %v2146_v11 }
 0x3a8   :  { %13004 = vrcp.f32 %v1986_v5 }
 0x3ab   :  { %v12999_v7 = vpop.eup %12998 }
 0x3ac   :  { %v2060_v9 = vmul.f32 %v12999_v7, %v2057_v6 }
 0x3ae   :  { %v13001_v22 = vpop.eup %13000  ;;  %v2061_v12 = vadd.f32 %v2060_v9, %v1989_v21  ;;  %v2465_v9 = vld [vmem:[#allocation4 + $0x10] sm:$0xff] }
 0x3af   :  { %v2224_v13 = vadd.f32 1.0, %v13001_v22 }
 0x3b0   :  { %13006 = vtanh.f32 %v2061_v12 }
 0x3b1   :  { %13008 = vrcp.f32 %v2224_v13 }
 0x3b4   :  { %v13003_v15 = vpop.eup %13002 }
 0x3b5   :  { %v2298_v16 = vmul.f32 %v13003_v15, %v2295_v14  ;;  %v13005_v57 = vpop.eup %13004 }
 0x3b6   :  { %v2063_v58 = vsub.f32 1.0, %v13005_v57  ;;  %v2065_v60 = vmul.f32 %v13005_v57, %v14739_v4 }
 0x3b7   :  { %v2299_v54 = vadd.f32 %v2298_v16, %v2227_v45  ;;  %v2703_v16 = vld [vmem:[#allocation7 + $0x28] sm:$0xff] }
 0x3b9   :  { %13010 = vtanh.f32 %v2299_v54 }
 0x3bd   :  { %v13007_v59 = vpop.eup %13006 }
 0x3be   :  { %v2064_v55 = vmul.f32 %v13007_v59, %v2063_v58  ;;  %v13009_v46 = vpop.eup %13008 }
 0x3bf   :  { %v2301_v4 = vsub.f32 1.0, %v13009_v46 }
 0x3c0   :  { %v14822_v61 = vadd.f32 %v2065_v60, %v2064_v55 }
 0x3c2   :  { %2067 = vst.msk [vmem:[#allocation8 + $0x8] sm:$0xff] %vm736_vm2, %v14822_v61  ;;  %11794 = vmatmul.mubr.msk.f32.vlgmr.msra.gmra.mxu0 %vm736_vm2, %v14822_v61  ;;  %11805 = vmatmul.mubr.msk.f32.vlgmr.msra.gmra.mxu1 %vm736_vm2, %v14822_v61 }
 0x3c3   :  { %11808 = vmatpush3.msra.mxu0 %v14536_v29  ;;  %11819 = vmatpush3.msra.mxu1 %v14539_v30  ;;  %v2303_v30 = vmul.f32 %v13009_v46, %v14762_v10 }
 0x3c4   :  { %11809 = vmatprep.subr.mxu0 %v14075_v20  ;;  %11820 = vmatprep.subr.mxu1 %v14075_v20 }
 0x3c5   :  { %11810 = vmatpush3.msra.mxu0 %v14546_v31  ;;  %11821 = vmatpush3.msra.mxu1 %v14549_v32  ;;  %v14884_v32 = vld [vmem:[%s16645_s8 + $0x18] sm:$0xff] }
 0x3c6   :  { %v13011_v63 = vpop.eup %13010  ;;  %11811 = vmatprep.subr.mxu0 %v14075_v20  ;;  %11822 = vmatprep.subr.mxu1 %v14075_v20 }
 0x3c7   :  { %11812 = vmatpush3.msra.mxu0 %v14556_v33  ;;  %11823 = vmatpush3.msra.mxu1 %v14559_v34  ;;  %v2302_v29 = vmul.f32 %v13011_v63, %v2301_v4  ;;  %v14888_v33 = vld [vmem:[%s16646_s17 + $0x18] sm:$0xff] }
 0x3c8   :  { %11813 = vmatprep.subr.mxu0 %v14075_v20  ;;  %11824 = vmatprep.subr.mxu1 %v14075_v20  ;;  %v14921_v4 = vld [vmem:[%s16647_s2 + $0x18] sm:$0xff] }
 0x3c9   :  { %11814 = vmatpush3.msra.mxu0 %v14566_v35  ;;  %11815 = vmatprep.mubr.msk.f32.mxu0 %vm14076_vm1, %v14075_v20  ;;  %v14846_v31 = vadd.f32 %v2303_v30, %v2302_v29  ;;  %v14925_v63 = vld [vmem:[%s16648_s21 + $0x18] sm:$0xff]  ;;  %v14935_v29 = vld [vmem:[%s16648_s21 + $0x10] sm:$0xff] }
 0x3ca   :  { %11825 = vmatpush3.msra.mxu1 %v14569_v36  ;;  %11826 = vmatprep.mubr.msk.f32.mxu1 %vm14076_vm1, %v14075_v20 }
 0x3cb   :  { %11816 = vmatmul.mubr.msk.f32.vlgmr.msra.gmra.mxu0 %vm736_vm2, %v14822_v61  ;;  %2305 = vst.msk [vmem:[#allocation9 + $0x30] sm:$0xff] %vm736_vm2, %v14846_v31  ;;  %11827 = vmatmul.mubr.msk.f32.vlgmr.msra.gmra.mxu1 %vm736_vm2, %v14846_v31 }
 0x3cc   :  { %11829 = vmatprep.subr.mxu0 %v14075_v20  ;;  %11840 = vmatprep.subr.mxu1 %v14075_v20 }
 0x3cd   :  { %11830 = vmatpush3.msra.mxu0 %v14582_v37  ;;  %11841 = vmatpush3.msra.mxu1 %v14587_v38  ;;  %v2544_v38 = vld [vmem:[#allocation5 + $0x28] sm:$0xff] }
 0x3ce   :  { %11831 = vmatprep.subr.mxu0 %v14075_v20  ;;  %11842 = vmatprep.subr.mxu1 %v14075_v20 }
 0x3cf   :  { %11832 = vmatpush3.msra.mxu0 %v14591_v39  ;;  %11843 = vmatpush3.msra.mxu1 %v14598_v40 }
 0x3d0   :  { %11833 = vmatprep.subr.mxu0 %v14075_v20  ;;  %11844 = vmatprep.subr.mxu1 %v14075_v20 }
 0x3d1   :  { %11834 = vmatpush3.msra.mxu0 %v14602_v41  ;;  %11845 = vmatpush3.msra.mxu1 %v14608_v42 }
 0x3d2   :  { %11835 = vmatprep.subr.mxu0 %v14075_v20  ;;  %11846 = vmatprep.subr.mxu1 %v14075_v20 }
 0x3d3   :  { %11836 = vmatpush3.msra.mxu0 %v14612_v43  ;;  %11837 = vmatprep.mubr.msk.f32.mxu0 %vm14076_vm1, %v14075_v20 }
 0x3d4   :  { %11847 = vmatpush3.msra.mxu1 %v14618_v44  ;;  %11848 = vmatprep.mubr.msk.f32.mxu1 %vm14076_vm1, %v14075_v20 }
 0x3d5   :  { %11838 = vmatmul.mubr.msk.f32.vlgmr.msra.gmra.mxu0 %vm736_vm2, %v14846_v31  ;;  %11849 = vmatmul.mubr.msk.f32.vlgmr.msra.gmra.mxu1 %vm736_vm2, %v14846_v31 }
 0x3d6   :  { %11851 = vmatprep.subr.mxu0 %v14075_v20  ;;  %11862 = vmatprep.subr.mxu1 %v14075_v20 }
 0x3d7   :  { %11852 = vmatpush3.msra.mxu0 %v14884_v32  ;;  %11863 = vmatpush3.msra.mxu1 %v14888_v33 }
 0x3d8   :  { %11853 = vmatprep.subr.mxu0 %v14075_v20  ;;  %11864 = vmatprep.subr.mxu1 %v14075_v20 }
 0x3d9   :  { %11854 = vmatpush3.msra.mxu0 %v14482_v23  ;;  %11865 = vmatpush3.msra.mxu1 %v14485_v24  ;;  %v2306_v23 = vld [vmem:[#allocation2 + $0x10] sm:$0xff] }
 0x3da   :  { %11855 = vmatprep.subr.mxu0 %v14075_v20  ;;  %11866 = vmatprep.subr.mxu1 %v14075_v20 }
 0x3db   :  { %11856 = vmatpush3.msra.mxu0 %v14500_v25  ;;  %11867 = vmatpush3.msra.mxu1 %v14503_v26 }
 0x3dc   :  { %11857 = vmatprep.subr.mxu0 %v14075_v20  ;;  %11868 = vmatprep.subr.mxu1 %v14075_v20 }
 0x3dd   :  { %11858 = vmatpush3.msra.mxu0 %v14518_v27  ;;  %11869 = vmatpush3.msra.mxu1 %v14521_v28  ;;  %v2387_v27 = vld [vmem:[#allocation3 + $0x10] sm:$0xff] }
 0x3de   :  { %11859 = vmatprep.mubr.msk.f32.mxu0 %vm14076_vm1, %v14075_v20  ;;  %11870 = vmatprep.mubr.msk.f32.mxu1 %vm14076_vm1, %v14075_v20 }
 0x3df   :  { %11873 = vmatprep.subr.mxu0 %v14075_v20  ;;  %11884 = vmatprep.subr.mxu1 %v14075_v20 }
 0x482   :  { %v2376_v24 = vpop.f32.mrf.mxu0  ;;  %v2454_v25 = vpop.f32.mrf.mxu1 }
 0x483   :  { %v2380_v26 = vadd.f32 %v2376_v24, %v2306_v23  ;;  %v2458_v28 = vadd.f32 %v2454_v25, %v2387_v27  ;;  %v14941_v24 = vld [vmem:[%s16647_s2 + $0x8] sm:$0xff]  ;;  %v14960_v27 = vld [vmem:[%s16648_s21] sm:$0xff] }
 0x484   :  { %v11795_v34 = vpop.f32.mrf.mxu0  ;;  %v11806_v35 = vpop.f32.mrf.mxu1  ;;  %v14945_v25 = vld [vmem:[%s16648_s21 + $0x8] sm:$0xff] }
 0x485   :  { %v10701_v36 = vmul.f32 -1.442695, %v2380_v26  ;;  %v10703_v41 = vmul.f32 -1.442695, %v2458_v28  ;;  %v14952_v35 = vld [vmem:[%s16647_s2] sm:$0xff]  ;;  %v14978_v28 = vld [vmem:[%s16650_s12 + $0x18] sm:$0xff] }
 0x487   :  { %13012 = vpow2.f32 %v10701_v36 }
 0x48b   :  { %v2532_v37 = vpop.f32.mrf.mxu0  ;;  %v2614_v39 = vpop.f32.mrf.mxu1 }
 0x48c   :  { %v2618_v40 = vadd.f32 %v2614_v39, %v2544_v38  ;;  %v2533_v5 = vadd.f32 %v2532_v37, %v14731_v56  ;;  %v14984_v37 = vld [vmem:[%s16649_s14 + $0x10] sm:$0xff]  ;;  %v14994_v39 = vld [vmem:[%s16649_s14 + $0x8] sm:$0xff] }
 0x48d   :  { %v11817_v42 = vpop.f32.mrf.mxu0  ;;  %v11828_v43 = vpop.f32.mrf.mxu1  ;;  %v14988_v38 = vld [vmem:[%s16650_s12 + $0x10] sm:$0xff] }
 0x48e   :  { %v10706_v44 = vmul.f32 -1.442695, %v2618_v40  ;;  %v14998_v40 = vld [vmem:[%s16650_s12 + $0x8] sm:$0xff]  ;;  %v15010_v42 = vld [vmem:[%s16650_s12] sm:$0xff]  ;;  %v15026_v43 = vld [vmem:[%s16645_s8 + $0x10] sm:$0xff] }
 0x490   :  { %13014 = vpow2.f32 %v10706_v44  ;;  %v15030_v44 = vld [vmem:[%s16646_s17 + $0x10] sm:$0xff] }
 0x491   :  { %13016 = vpow2.f32 %v10703_v41  ;;  %v15004_v41 = vld [vmem:[%s16649_s14] sm:$0xff] }
 0x494   :  { %v13013_v10 = vpop.eup %13012 }
 0x495   :  { %v2384_v0 = vadd.f32 1.0, %v13013_v10  ;;  %v2692_v49 = vpop.f32.mrf.mxu0  ;;  %v2770_v51 = vpop.f32.mrf.mxu1  ;;  %v15036_v10 = vld [vmem:[%s16645_s8 + $0x8] sm:$0xff] }
 0x496   :  { %v2696_v1 = vadd.f32 %v2692_v49, %v2625_v50  ;;  %v2771_v13 = vadd.f32 %v2770_v51, %v14736_v62  ;;  %v15046_v50 = vld [vmem:[%s16645_s8] sm:$0xff]  ;;  %v2782_v51 = vld [vmem:[#allocation2 + $0x18] sm:$0xff] }
 0x497   :  { %13018 = vrcp.f32 %v2384_v0  ;;  %v11839_v18 = vpop.f32.mrf.mxu0  ;;  %v11850_v19 = vpop.f32.mrf.mxu1  ;;  %v15040_v0 = vld [vmem:[%s16646_s17 + $0x8] sm:$0xff]  ;;  %v15050_v49 = vld [vmem:[%s16646_s17] sm:$0xff] }
 0x498   :  { %v10708_v2 = vmul.f32 -1.442695, %v2696_v1 }
 0x49a   :  { %13020 = vpow2.f32 %v10708_v2 }
 0x49d   :  { %v13015_v3 = vpop.eup %13014 }
 0x49e   :  { %v13017_v52 = vpop.eup %13016  ;;  %v2622_v53 = vadd.f32 1.0, %v13015_v3 }
 0x49f   :  { %v2462_v11 = vadd.f32 1.0, %v13017_v52 }
 0x4a0   :  { %13022 = vrcp.f32 %v2622_v53  ;;  %v2863_v53 = vld [vmem:[#allocation3 + $0x18] sm:$0xff] }
 0x4a1   :  { %13024 = vrcp.f32 %v2462_v11 }
 0x4a4   :  { %v13019_v6 = vpop.eup %13018 }
 0x4a5   :  { %v2536_v7 = vmul.f32 %v13019_v6, %v2533_v5  ;;  %v3020_v6 = vld [vmem:[#allocation5 + $0x20] sm:$0xff] }
 0x4a7   :  { %v13021_v21 = vpop.eup %13020  ;;  %v2537_v22 = vadd.f32 %v2536_v7, %v2465_v9 }
 0x4a8   :  { %v2700_v12 = vadd.f32 1.0, %v13021_v21 }
 0x4a9   :  { %13026 = vtanh.f32 %v2537_v22 }
 0x4aa   :  { %13028 = vrcp.f32 %v2700_v12 }
 0x4ad   :  { %v13023_v14 = vpop.eup %13022 }
 0x4ae   :  { %v2774_v15 = vmul.f32 %v13023_v14, %v2771_v13  ;;  %v13025_v54 = vpop.eup %13024 }
 0x4af   :  { %v2539_v57 = vsub.f32 1.0, %v13025_v54  ;;  %v2541_v55 = vmul.f32 %v13025_v54, %v14822_v61  ;;  %v14931_v61 = vld [vmem:[%s16647_s2 + $0x10] sm:$0xff] }
 0x4b0   :  { %v2775_v45 = vadd.f32 %v2774_v15, %v2703_v16  ;;  %v3101_v16 = vld [vmem:[#allocation6 + $0x20] sm:$0xff] }
 0x4b2   :  { %13030 = vtanh.f32 %v2775_v45 }
 0x4b6   :  { %v13027_v58 = vpop.eup %13026 }
 0x4b7   :  { %v2540_v59 = vmul.f32 %v13027_v58, %v2539_v57  ;;  %v13029_v46 = vpop.eup %13028 }
 0x4b8   :  { %v2777_v30 = vsub.f32 1.0, %v13029_v46  ;;  %v2779_v34 = vmul.f32 %v13029_v46, %v14846_v31  ;;  %v14974_v31 = vld [vmem:[%s16649_s14 + $0x18] sm:$0xff] }
 0x4b9   :  { %v14912_v60 = vadd.f32 %v2541_v55, %v2540_v59 }
 0x4bb   :  { %2543 = vst.msk [vmem:[#allocation8 + $0x10] sm:$0xff] %vm736_vm2, %v14912_v60  ;;  %11860 = vmatmul.mubr.msk.f32.vlgmr.msra.gmra.mxu0 %vm736_vm2, %v14912_v60  ;;  %11871 = vmatmul.mubr.msk.f32.vlgmr.msra.gmra.mxu1 %vm736_vm2, %v14912_v60 }
 0x4bc   :  { %11874 = vmatpush3.msra.mxu0 %v14921_v4  ;;  %11885 = vmatpush3.msra.mxu1 %v14925_v63 }
 0x4bd   :  { %11875 = vmatprep.subr.mxu0 %v14075_v20  ;;  %11886 = vmatprep.subr.mxu1 %v14075_v20 }
 0x4be   :  { %11876 = vmatpush3.msra.mxu0 %v14931_v61  ;;  %11887 = vmatpush3.msra.mxu1 %v14935_v29 }
 0x4bf   :  { %v13031_v23 = vpop.eup %13030  ;;  %11877 = vmatprep.subr.mxu0 %v14075_v20  ;;  %11888 = vmatprep.subr.mxu1 %v14075_v20 }
 0x4c0   :  { %11878 = vmatpush3.msra.mxu0 %v14941_v24  ;;  %11889 = vmatpush3.msra.mxu1 %v14945_v25  ;;  %v2778_v26 = vmul.f32 %v13031_v23, %v2777_v30 }
 0x4c1   :  { %11879 = vmatprep.subr.mxu0 %v14075_v20  ;;  %11890 = vmatprep.subr.mxu1 %v14075_v20 }
 0x4c2   :  { %11880 = vmatpush3.msra.mxu0 %v14952_v35  ;;  %11881 = vmatprep.mubr.msk.f32.mxu0 %vm14076_vm1, %v14075_v20  ;;  %v14957_v36 = vadd.f32 %v2779_v34, %v2778_v26 }
 0x4c3   :  { %11891 = vmatpush3.msra.mxu1 %v14960_v27  ;;  %11892 = vmatprep.mubr.msk.f32.mxu1 %vm14076_vm1, %v14075_v20 }
 0x4c4   :  { %11882 = vmatmul.mubr.msk.f32.vlgmr.msra.gmra.mxu0 %vm736_vm2, %v14912_v60  ;;  %2781 = vst.msk [vmem:[#allocation9 + $0x28] sm:$0xff] %vm736_vm2, %v14957_v36  ;;  %11893 = vmatmul.mubr.msk.f32.vlgmr.msra.gmra.mxu1 %vm736_vm2, %v14957_v36 }
 0x4c5   :  { %11895 = vmatprep.subr.mxu0 %v14075_v20  ;;  %11906 = vmatprep.subr.mxu1 %v14075_v20 }
 0x4c6   :  { %11896 = vmatpush3.msra.mxu0 %v14974_v31  ;;  %11907 = vmatpush3.msra.mxu1 %v14978_v28 }
 0x4c7   :  { %11897 = vmatprep.subr.mxu0 %v14075_v20  ;;  %11908 = vmatprep.subr.mxu1 %v14075_v20 }
 0x4c8   :  { %11898 = vmatpush3.msra.mxu0 %v14984_v37  ;;  %11909 = vmatpush3.msra.mxu1 %v14988_v38 }
 0x4c9   :  { %11899 = vmatprep.subr.mxu0 %v14075_v20  ;;  %11910 = vmatprep.subr.mxu1 %v14075_v20 }
 0x4ca   :  { %11900 = vmatpush3.msra.mxu0 %v14994_v39  ;;  %11911 = vmatpush3.msra.mxu1 %v14998_v40 }
 0x4cb   :  { %11901 = vmatprep.subr.mxu0 %v14075_v20  ;;  %11912 = vmatprep.subr.mxu1 %v14075_v20 }
 0x4cc   :  { %11902 = vmatpush3.msra.mxu0 %v15004_v41  ;;  %11903 = vmatprep.mubr.msk.f32.mxu0 %vm14076_vm1, %v14075_v20 }
 0x4cd   :  { %11913 = vmatpush3.msra.mxu1 %v15010_v42  ;;  %11914 = vmatprep.mubr.msk.f32.mxu1 %vm14076_vm1, %v14075_v20 }
 0x4ce   :  { %11904 = vmatmul.mubr.msk.f32.vlgmr.msra.gmra.mxu0 %vm736_vm2, %v14957_v36  ;;  %11915 = vmatmul.mubr.msk.f32.vlgmr.msra.gmra.mxu1 %vm736_vm2, %v14957_v36 }
 0x4cf   :  { %11917 = vmatprep.subr.mxu0 %v14075_v20  ;;  %11928 = vmatprep.subr.mxu1 %v14075_v20 }
 0x4d0   :  { %11918 = vmatpush3.msra.mxu0 %v14884_v32  ;;  %11929 = vmatpush3.msra.mxu1 %v14888_v33 }
 0x4d1   :  { %11919 = vmatprep.subr.mxu0 %v14075_v20  ;;  %11930 = vmatprep.subr.mxu1 %v14075_v20 }
 0x4d2   :  { %11920 = vmatpush3.msra.mxu0 %v15026_v43  ;;  %11931 = vmatpush3.msra.mxu1 %v15030_v44 }
 0x4d3   :  { %11921 = vmatprep.subr.mxu0 %v14075_v20  ;;  %11932 = vmatprep.subr.mxu1 %v14075_v20 }
 0x4d4   :  { %11922 = vmatpush3.msra.mxu0 %v15036_v10  ;;  %11933 = vmatpush3.msra.mxu1 %v15040_v0 }
 0x4d5   :  { %11923 = vmatprep.subr.mxu0 %v14075_v20  ;;  %11934 = vmatprep.subr.mxu1 %v14075_v20 }
 0x4d6   :  { %11924 = vmatpush3.msra.mxu0 %v15046_v50  ;;  %11935 = vmatpush3.msra.mxu1 %v15050_v49 }
 0x4d7   :  { %11925 = vmatprep.mubr.msk.f32.mxu0 %vm14076_vm1, %v14075_v20  ;;  %11936 = vmatprep.mubr.msk.f32.mxu1 %vm14076_vm1, %v14075_v20 }
 0x4d8   :  { %11939 = vmatprep.subr.mxu0 %v14075_v20  ;;  %11950 = vmatprep.subr.mxu1 %v14075_v20 }
 0x57b   :  { %v2852_v1 = vpop.f32.mrf.mxu0  ;;  %v2930_v18 = vpop.f32.mrf.mxu1 }
 0x57c   :  { %v2856_v19 = vadd.f32 %v2852_v1, %v2782_v51  ;;  %v2934_v11 = vadd.f32 %v2930_v18, %v2863_v53  ;;  %v2941_v18 = vld [vmem:[#allocation4 + $0x18] sm:$0xff] }
 0x57d   :  { %v11861_v2 = vpop.f32.mrf.mxu0  ;;  %v11872_v3 = vpop.f32.mrf.mxu1 }
 0x57e   :  { %v10711_v52 = vmul.f32 -1.442695, %v2856_v19  ;;  %v10713_v21 = vmul.f32 -1.442695, %v2934_v11 }
 0x580   :  { %13032 = vpow2.f32 %v10711_v52 }
 0x584   :  { %v3008_v5 = vpop.f32.mrf.mxu0  ;;  %v3090_v7 = vpop.f32.mrf.mxu1 }
 0x585   :  { %v3094_v9 = vadd.f32 %v3090_v7, %v3020_v6  ;;  %v3009_v34 = vadd.f32 %v3008_v5, %v14731_v56  ;;  %v3179_v6 = vld [vmem:[#allocation7 + $0x20] sm:$0xff] }
 0x586   :  { %v11883_v22 = vpop.f32.mrf.mxu0  ;;  %v11894_v12 = vpop.f32.mrf.mxu1 }
 0x587   :  { %v10716_v13 = vmul.f32 -1.442695, %v3094_v9 }
 0x589   :  { %13034 = vpow2.f32 %v10716_v13 }
 0x58a   :  { %13036 = vpow2.f32 %v10713_v21 }
 0x58d   :  { %v13033_v14 = vpop.eup %13032 }
 0x58e   :  { %v2860_v15 = vadd.f32 1.0, %v13033_v14  ;;  %v3168_v45 = vpop.f32.mrf.mxu0  ;;  %v3246_v54 = vpop.f32.mrf.mxu1 }
 0x58f   :  { %v3172_v57 = vadd.f32 %v3168_v45, %v3101_v16  ;;  %v3247_v52 = vadd.f32 %v3246_v54, %v14736_v62 }
 0x590   :  { %13038 = vrcp.f32 %v2860_v15  ;;  %v11905_v58 = vpop.f32.mrf.mxu0  ;;  %v11916_v59 = vpop.f32.mrf.mxu1 }
 0x591   :  { %v10718_v55 = vmul.f32 -1.442695, %v3172_v57 }
 0x593   :  { %13040 = vpow2.f32 %v10718_v55 }
 0x596   :  { %v13035_v46 = vpop.eup %13034 }
 0x597   :  { %v13037_v30 = vpop.eup %13036  ;;  %v3098_v23 = vadd.f32 1.0, %v13035_v46 }
 0x598   :  { %v2938_v26 = vadd.f32 1.0, %v13037_v30 }
 0x599   :  { %13042 = vrcp.f32 %v3098_v23  ;;  %v3339_v23 = vld [vmem:[#allocation3 + $0x20] sm:$0xff] }
 0x59a   :  { %13044 = vrcp.f32 %v2938_v26 }
 0x59d   :  { %v13039_v51 = vpop.eup %13038 }
 0x59e   :  { %v3012_v1 = vmul.f32 %v13039_v51, %v3009_v34  ;;  %v3496_v51 = vld [vmem:[#allocation5 + $0x18] sm:$0xff] }
 0x5a0   :  { %v13041_v19 = vpop.eup %13040  ;;  %v3013_v2 = vadd.f32 %v3012_v1, %v2941_v18 }
 0x5a1   :  { %v3176_v3 = vadd.f32 1.0, %v13041_v19 }
 0x5a2   :  { %13046 = vtanh.f32 %v3013_v2 }
 0x5a3   :  { %13048 = vrcp.f32 %v3176_v3 }
 0x5a6   :  { %v13043_v53 = vpop.eup %13042 }
 0x5a7   :  { %v3250_v11 = vmul.f32 %v13043_v53, %v3247_v52  ;;  %v13045_v9 = vpop.eup %13044 }
 0x5a8   :  { %v3015_v21 = vsub.f32 1.0, %v13045_v9  ;;  %v3017_v12 = vmul.f32 %v13045_v9, %v14912_v60 }
 0x5a9   :  { %v3251_v7 = vadd.f32 %v3250_v11, %v3179_v6  ;;  %v3577_v6 = vld [vmem:[#allocation6 + $0x18] sm:$0xff] }
 0x5ab   :  { %13050 = vtanh.f32 %v3251_v7 }
 0x5af   :  { %v13047_v22 = vpop.eup %13046 }
 0x5b0   :  { %v3016_v5 = vmul.f32 %v13047_v22, %v3015_v21  ;;  %v13049_v14 = vpop.eup %13048 }
 0x5b1   :  { %v3253_v60 = vsub.f32 1.0, %v13049_v14  ;;  %v3255_v45 = vmul.f32 %v13049_v14, %v14957_v36  ;;  %v3258_v36 = vld [vmem:[#allocation2 + $0x20] sm:$0xff] }
 0x5b2   :  { %v15062_v13 = vadd.f32 %v3017_v12, %v3016_v5 }
 0x5b4   :  { %3019 = vst.msk [vmem:[#allocation8 + $0x18] sm:$0xff] %vm736_vm2, %v15062_v13  ;;  %11926 = vmatmul.mubr.msk.f32.vlgmr.msra.gmra.mxu0 %vm736_vm2, %v15062_v13  ;;  %11937 = vmatmul.mubr.msk.f32.vlgmr.msra.gmra.mxu1 %vm736_vm2, %v15062_v13 }
 0x5b5   :  { %11940 = vmatpush3.msra.mxu0 %v14921_v4  ;;  %11951 = vmatpush3.msra.mxu1 %v14925_v63 }
 0x5b6   :  { %11941 = vmatprep.subr.mxu0 %v14075_v20  ;;  %11952 = vmatprep.subr.mxu1 %v14075_v20 }
 0x5b7   :  { %11942 = vmatpush3.msra.mxu0 %v14931_v61  ;;  %11953 = vmatpush3.msra.mxu1 %v14935_v29 }
 0x5b8   :  { %v13051_v15 = vpop.eup %13050  ;;  %11943 = vmatprep.subr.mxu0 %v14075_v20  ;;  %11954 = vmatprep.subr.mxu1 %v14075_v20 }
 0x5b9   :  { %11944 = vmatpush3.msra.mxu0 %v14941_v24  ;;  %11955 = vmatpush3.msra.mxu1 %v14945_v25  ;;  %v3254_v16 = vmul.f32 %v13051_v15, %v3253_v60 }
 0x5ba   :  { %11945 = vmatprep.subr.mxu0 %v14075_v20  ;;  %11956 = vmatprep.subr.mxu1 %v14075_v20 }
 0x5bb   :  { %11946 = vmatpush3.msra.mxu0 %v14952_v35  ;;  %11947 = vmatprep.mubr.msk.f32.mxu0 %vm14076_vm1, %v14075_v20  ;;  %v15086_v54 = vadd.f32 %v3255_v45, %v3254_v16 }
 0x5bc   :  { %11957 = vmatpush3.msra.mxu1 %v14960_v27  ;;  %11958 = vmatprep.mubr.msk.f32.mxu1 %vm14076_vm1, %v14075_v20 }
 0x5bd   :  { %11948 = vmatmul.mubr.msk.f32.vlgmr.msra.gmra.mxu0 %vm736_vm2, %v15062_v13  ;;  %3257 = vst.msk [vmem:[#allocation9 + $0x20] sm:$0xff] %vm736_vm2, %v15086_v54  ;;  %11959 = vmatmul.mubr.msk.f32.vlgmr.msra.gmra.mxu1 %vm736_vm2, %v15086_v54 }
 0x5be   :  { %11961 = vmatprep.subr.mxu0 %v14075_v20  ;;  %11972 = vmatprep.subr.mxu1 %v14075_v20 }
 0x5bf   :  { %11962 = vmatpush3.msra.mxu0 %v14974_v31  ;;  %11973 = vmatpush3.msra.mxu1 %v14978_v28 }
 0x5c0   :  { %11963 = vmatprep.subr.mxu0 %v14075_v20  ;;  %11974 = vmatprep.subr.mxu1 %v14075_v20 }
 0x5c1   :  { %11964 = vmatpush3.msra.mxu0 %v14984_v37  ;;  %11975 = vmatpush3.msra.mxu1 %v14988_v38 }
 0x5c2   :  { %11965 = vmatprep.subr.mxu0 %v14075_v20  ;;  %11976 = vmatprep.subr.mxu1 %v14075_v20 }
 0x5c3   :  { %11966 = vmatpush3.msra.mxu0 %v14994_v39  ;;  %11977 = vmatpush3.msra.mxu1 %v14998_v40 }
 0x5c4   :  { %11967 = vmatprep.subr.mxu0 %v14075_v20  ;;  %11978 = vmatprep.subr.mxu1 %v14075_v20 }
 0x5c5   :  { %11968 = vmatpush3.msra.mxu0 %v15004_v41  ;;  %11969 = vmatprep.mubr.msk.f32.mxu0 %vm14076_vm1, %v14075_v20 }
 0x5c6   :  { %11979 = vmatpush3.msra.mxu1 %v15010_v42  ;;  %11980 = vmatprep.mubr.msk.f32.mxu1 %vm14076_vm1, %v14075_v20 }
 0x5c7   :  { %11970 = vmatmul.mubr.msk.f32.vlgmr.msra.gmra.mxu0 %vm736_vm2, %v15086_v54  ;;  %11981 = vmatmul.mubr.msk.f32.vlgmr.msra.gmra.mxu1 %vm736_vm2, %v15086_v54 }
 0x5c8   :  { %11983 = vmatprep.subr.mxu0 %v14075_v20  ;;  %11994 = vmatprep.subr.mxu1 %v14075_v20 }
 0x5c9   :  { %11984 = vmatpush3.msra.mxu0 %v14884_v32  ;;  %11995 = vmatpush3.msra.mxu1 %v14888_v33 }
 0x5ca   :  { %11985 = vmatprep.subr.mxu0 %v14075_v20  ;;  %11996 = vmatprep.subr.mxu1 %v14075_v20 }
 0x5cb   :  { %11986 = vmatpush3.msra.mxu0 %v15026_v43  ;;  %11997 = vmatpush3.msra.mxu1 %v15030_v44 }
 0x5cc   :  { %11987 = vmatprep.subr.mxu0 %v14075_v20  ;;  %11998 = vmatprep.subr.mxu1 %v14075_v20 }
 0x5cd   :  { %11988 = vmatpush3.msra.mxu0 %v15036_v10  ;;  %11999 = vmatpush3.msra.mxu1 %v15040_v0 }
 0x5ce   :  { %11989 = vmatprep.subr.mxu0 %v14075_v20  ;;  %12000 = vmatprep.subr.mxu1 %v14075_v20 }
 0x5cf   :  { %11990 = vmatpush3.msra.mxu0 %v15046_v50  ;;  %12001 = vmatpush3.msra.mxu1 %v15050_v49 }
 0x5d0   :  { %11991 = vmatprep.mubr.msk.f32.mxu0 %vm14076_vm1, %v14075_v20  ;;  %12002 = vmatprep.mubr.msk.f32.mxu1 %vm14076_vm1, %v14075_v20 }
 0x5d1   :  { %12005 = vmatprep.subr.mxu0 %v14075_v20  ;;  %12016 = vmatprep.subr.mxu1 %v14075_v20 }
 0x674   :  { %v3328_v57 = vpop.f32.mrf.mxu0  ;;  %v3406_v58 = vpop.f32.mrf.mxu1 }
 0x675   :  { %v3332_v59 = vadd.f32 %v3328_v57, %v3258_v36  ;;  %v3410_v26 = vadd.f32 %v3406_v58, %v3339_v23  ;;  %v3417_v58 = vld [vmem:[#allocation4 + $0x20] sm:$0xff] }
 0x676   :  { %v11927_v55 = vpop.f32.mrf.mxu0  ;;  %v11938_v46 = vpop.f32.mrf.mxu1 }
 0x677   :  { %v10721_v30 = vmul.f32 -1.442695, %v3332_v59  ;;  %v10723_v19 = vmul.f32 -1.442695, %v3410_v26 }
 0x679   :  { %13052 = vpow2.f32 %v10721_v30 }
 0x67d   :  { %v3484_v34 = vpop.f32.mrf.mxu0  ;;  %v3566_v1 = vpop.f32.mrf.mxu1 }
 0x67e   :  { %v3570_v18 = vadd.f32 %v3566_v1, %v3496_v51  ;;  %v3485_v45 = vadd.f32 %v3484_v34, %v14731_v56  ;;  %v3655_v51 = vld [vmem:[#allocation7 + $0x18] sm:$0xff] }
 0x67f   :  { %v11949_v2 = vpop.f32.mrf.mxu0  ;;  %v11960_v3 = vpop.f32.mrf.mxu1 }
 0x680   :  { %v10726_v52 = vmul.f32 -1.442695, %v3570_v18 }
 0x682   :  { %13054 = vpow2.f32 %v10726_v52 }
 0x683   :  { %13056 = vpow2.f32 %v10723_v19 }
 0x686   :  { %v13053_v53 = vpop.eup %13052 }
 0x687   :  { %v3336_v11 = vadd.f32 1.0, %v13053_v53  ;;  %v3644_v7 = vpop.f32.mrf.mxu0  ;;  %v3722_v9 = vpop.f32.mrf.mxu1 }
 0x688   :  { %v3648_v21 = vadd.f32 %v3644_v7, %v3577_v6  ;;  %v3723_v30 = vadd.f32 %v3722_v9, %v14736_v62 }
 0x689   :  { %13058 = vrcp.f32 %v3336_v11  ;;  %v11971_v22 = vpop.f32.mrf.mxu0  ;;  %v11982_v5 = vpop.f32.mrf.mxu1 }
 0x68a   :  { %v10728_v12 = vmul.f32 -1.442695, %v3648_v21 }
 0x68c   :  { %13060 = vpow2.f32 %v10728_v12 }
 0x68f   :  { %v13055_v14 = vpop.eup %13054 }
 0x690   :  { %v13057_v60 = vpop.eup %13056  ;;  %v3574_v15 = vadd.f32 1.0, %v13055_v14  ;;  %v3815_v14 = vld [vmem:[#allocation3 + $0x28] sm:$0xff] }
 0x691   :  { %v3414_v16 = vadd.f32 1.0, %v13057_v60 }
 0x692   :  { %13062 = vrcp.f32 %v3574_v15 }
 0x693   :  { %13064 = vrcp.f32 %v3414_v16  ;;  %v3972_v16 = vld [vmem:[#allocation5 + $0x10] sm:$0xff] }
 0x696   :  { %v13059_v36 = vpop.eup %13058 }
 0x697   :  { %v3488_v57 = vmul.f32 %v13059_v36, %v3485_v45 }
 0x699   :  { %v13061_v59 = vpop.eup %13060  ;;  %v3489_v55 = vadd.f32 %v3488_v57, %v3417_v58 }
 0x69a   :  { %v3652_v46 = vadd.f32 1.0, %v13061_v59 }
 0x69b   :  { %13066 = vtanh.f32 %v3489_v55 }
 0x69c   :  { %13068 = vrcp.f32 %v3652_v46 }
 0x69f   :  { %v13063_v23 = vpop.eup %13062 }
 0x6a0   :  { %v3726_v26 = vmul.f32 %v13063_v23, %v3723_v30  ;;  %v13065_v18 = vpop.eup %13064  ;;  %v4053_v23 = vld [vmem:[#allocation6 + $0x10] sm:$0xff] }
 0x6a1   :  { %v3491_v19 = vsub.f32 1.0, %v13065_v18  ;;  %v3493_v3 = vmul.f32 %v13065_v18, %v15062_v13 }
 0x6a2   :  { %v3727_v1 = vadd.f32 %v3726_v26, %v3655_v51 }
 0x6a4   :  { %13070 = vtanh.f32 %v3727_v1 }
 0x6a8   :  { %v13067_v2 = vpop.eup %13066 }
 0x6a9   :  { %v3492_v34 = vmul.f32 %v13067_v2, %v3491_v19  ;;  %v13069_v53 = vpop.eup %13068 }
 0x6aa   :  { %v3729_v13 = vsub.f32 1.0, %v13069_v53  ;;  %v3731_v7 = vmul.f32 %v13069_v53, %v15086_v54 }
 0x6ab   :  { %v15146_v52 = vadd.f32 %v3493_v3, %v3492_v34 }
 0x6ad   :  { %3495 = vst.msk [vmem:[#allocation8 + $0x20] sm:$0xff] %vm736_vm2, %v15146_v52  ;;  %11992 = vmatmul.mubr.msk.f32.vlgmr.msra.gmra.mxu0 %vm736_vm2, %v15146_v52  ;;  %12003 = vmatmul.mubr.msk.f32.vlgmr.msra.gmra.mxu1 %vm736_vm2, %v15146_v52 }
 0x6ae   :  { %12006 = vmatpush3.msra.mxu0 %v14921_v4  ;;  %12017 = vmatpush3.msra.mxu1 %v14925_v63 }
 0x6af   :  { %12007 = vmatprep.subr.mxu0 %v14075_v20  ;;  %12018 = vmatprep.subr.mxu1 %v14075_v20 }
 0x6b0   :  { %12008 = vmatpush3.msra.mxu0 %v14931_v61  ;;  %12019 = vmatpush3.msra.mxu1 %v14935_v29 }
 0x6b1   :  { %v13071_v11 = vpop.eup %13070  ;;  %12009 = vmatprep.subr.mxu0 %v14075_v20  ;;  %12020 = vmatprep.subr.mxu1 %v14075_v20 }
 0x6b2   :  { %12010 = vmatpush3.msra.mxu0 %v14941_v24  ;;  %12021 = vmatpush3.msra.mxu1 %v14945_v25  ;;  %v3730_v6 = vmul.f32 %v13071_v11, %v3729_v13 }
 0x6b3   :  { %12011 = vmatprep.subr.mxu0 %v14075_v20  ;;  %12022 = vmatprep.subr.mxu1 %v14075_v20 }
 0x6b4   :  { %12012 = vmatpush3.msra.mxu0 %v14952_v35  ;;  %12013 = vmatprep.mubr.msk.f32.mxu0 %vm14076_vm1, %v14075_v20  ;;  %v15170_v9 = vadd.f32 %v3731_v7, %v3730_v6 }
 0x6b5   :  { %12023 = vmatpush3.msra.mxu1 %v14960_v27  ;;  %12024 = vmatprep.mubr.msk.f32.mxu1 %vm14076_vm1, %v14075_v20 }
 0x6b6   :  { %12014 = vmatmul.mubr.msk.f32.vlgmr.msra.gmra.mxu0 %vm736_vm2, %v15146_v52  ;;  %3733 = vst.msk [vmem:[#allocation9 + $0x18] sm:$0xff] %vm736_vm2, %v15170_v9  ;;  %12025 = vmatmul.mubr.msk.f32.vlgmr.msra.gmra.mxu1 %vm736_vm2, %v15170_v9 }
 0x6b7   :  { %12027 = vmatprep.subr.mxu0 %v14075_v20  ;;  %12038 = vmatprep.subr.mxu1 %v14075_v20 }
 0x6b8   :  { %12028 = vmatpush3.msra.mxu0 %v14974_v31  ;;  %12039 = vmatpush3.msra.mxu1 %v14978_v28 }
 0x6b9   :  { %12029 = vmatprep.subr.mxu0 %v14075_v20  ;;  %12040 = vmatprep.subr.mxu1 %v14075_v20 }
 0x6ba   :  { %12030 = vmatpush3.msra.mxu0 %v14984_v37  ;;  %12041 = vmatpush3.msra.mxu1 %v14988_v38 }
 0x6bb   :  { %12031 = vmatprep.subr.mxu0 %v14075_v20  ;;  %12042 = vmatprep.subr.mxu1 %v14075_v20 }
 0x6bc   :  { %12032 = vmatpush3.msra.mxu0 %v14994_v39  ;;  %12043 = vmatpush3.msra.mxu1 %v14998_v40 }
 0x6bd   :  { %12033 = vmatprep.subr.mxu0 %v14075_v20  ;;  %12044 = vmatprep.subr.mxu1 %v14075_v20 }
 0x6be   :  { %12034 = vmatpush3.msra.mxu0 %v15004_v41  ;;  %12035 = vmatprep.mubr.msk.f32.mxu0 %vm14076_vm1, %v14075_v20 }
 0x6bf   :  { %12045 = vmatpush3.msra.mxu1 %v15010_v42  ;;  %12046 = vmatprep.mubr.msk.f32.mxu1 %vm14076_vm1, %v14075_v20 }
 0x6c0   :  { %12036 = vmatmul.mubr.msk.f32.vlgmr.msra.gmra.mxu0 %vm736_vm2, %v15170_v9  ;;  %12047 = vmatmul.mubr.msk.f32.vlgmr.msra.gmra.mxu1 %vm736_vm2, %v15170_v9 }
 0x6c1   :  { %12049 = vmatprep.subr.mxu0 %v14075_v20  ;;  %12060 = vmatprep.subr.mxu1 %v14075_v20 }
 0x6c2   :  { %12050 = vmatpush3.msra.mxu0 %v14884_v32  ;;  %12061 = vmatpush3.msra.mxu1 %v14888_v33  ;;  %v3734_v32 = vld [vmem:[#allocation2 + $0x28] sm:$0xff] }
 0x6c3   :  { %12051 = vmatprep.subr.mxu0 %v14075_v20  ;;  %12062 = vmatprep.subr.mxu1 %v14075_v20 }
 0x6c4   :  { %12052 = vmatpush3.msra.mxu0 %v15026_v43  ;;  %12063 = vmatpush3.msra.mxu1 %v15030_v44 }
 0x6c5   :  { %12053 = vmatprep.subr.mxu0 %v14075_v20  ;;  %12064 = vmatprep.subr.mxu1 %v14075_v20 }
 0x6c6   :  { %12054 = vmatpush3.msra.mxu0 %v15036_v10  ;;  %12065 = vmatpush3.msra.mxu1 %v15040_v0 }
 0x6c7   :  { %12055 = vmatprep.subr.mxu0 %v14075_v20  ;;  %12066 = vmatprep.subr.mxu1 %v14075_v20 }
 0x6c8   :  { %12056 = vmatpush3.msra.mxu0 %v15046_v50  ;;  %12067 = vmatpush3.msra.mxu1 %v15050_v49 }
 0x6c9   :  { %12057 = vmatprep.mubr.msk.f32.mxu0 %vm14076_vm1, %v14075_v20  ;;  %12068 = vmatprep.mubr.msk.f32.mxu1 %vm14076_vm1, %v14075_v20 }
 0x6ca   :  { %12071 = vmatprep.subr.mxu0 %v14075_v20  ;;  %12082 = vmatprep.subr.mxu1 %v14075_v20 }
 0x76d   :  { %v3804_v33 = vpop.f32.mrf.mxu0  ;;  %v3882_v54 = vpop.f32.mrf.mxu1 }
 0x76e   :  { %v3808_v21 = vadd.f32 %v3804_v33, %v3734_v32  ;;  %v3886_v60 = vadd.f32 %v3882_v54, %v3815_v14  ;;  %v3893_v32 = vld [vmem:[#allocation4 + $0x28] sm:$0xff]  ;;  %v4131_v14 = vld [vmem:[#allocation7 + $0x10] sm:$0xff] }
 0x76f   :  { %v11993_v22 = vpop.f32.mrf.mxu0  ;;  %v12004_v5 = vpop.f32.mrf.mxu1 }
 0x770   :  { %v10731_v12 = vmul.f32 -1.442695, %v3808_v21  ;;  %v10733_v57 = vmul.f32 -1.442695, %v3886_v60 }
 0x772   :  { %13072 = vpow2.f32 %v10731_v12 }
 0x776   :  { %v3960_v15 = vpop.f32.mrf.mxu0  ;;  %v4042_v45 = vpop.f32.mrf.mxu1 }
 0x777   :  { %v4046_v36 = vadd.f32 %v4042_v45, %v3972_v16  ;;  %v3961_v11 = vadd.f32 %v3960_v15, %v14731_v56 }
 0x778   :  { %v12015_v58 = vpop.f32.mrf.mxu0  ;;  %v12026_v59 = vpop.f32.mrf.mxu1 }
 0x779   :  { %v10736_v55 = vmul.f32 -1.442695, %v4046_v36 }
 0x77b   :  { %13074 = vpow2.f32 %v10736_v55 }
 0x77c   :  { %13076 = vpow2.f32 %v10733_v57 }
 0x77f   :  { %v13073_v46 = vpop.eup %13072 }
 0x780   :  { %v3812_v30 = vadd.f32 1.0, %v13073_v46  ;;  %v4120_v26 = vpop.f32.mrf.mxu0  ;;  %v4198_v51 = vpop.f32.mrf.mxu1 }
 0x781   :  { %v4124_v1 = vadd.f32 %v4120_v26, %v4053_v23  ;;  %v4199_v22 = vadd.f32 %v4198_v51, %v14736_v62  ;;  %v4448_v51 = vld [vmem:[#allocation5 + $0x8] sm:$0xff] }
 0x782   :  { %13078 = vrcp.f32 %v3812_v30  ;;  %v12037_v18 = vpop.f32.mrf.mxu0  ;;  %v12048_v19 = vpop.f32.mrf.mxu1 }
 0x783   :  { %v10738_v2 = vmul.f32 -1.442695, %v4124_v1 }
 0x785   :  { %13080 = vpow2.f32 %v10738_v2 }
 0x788   :  { %v13075_v34 = vpop.eup %13074 }
 0x789   :  { %v13077_v3 = vpop.eup %13076  ;;  %v4050_v53 = vadd.f32 1.0, %v13075_v34 }
 0x78a   :  { %v3890_v13 = vadd.f32 1.0, %v13077_v3 }
 0x78b   :  { %13082 = vrcp.f32 %v4050_v53 }
 0x78c   :  { %13084 = vrcp.f32 %v3890_v13 }
 0x78f   :  { %v13079_v6 = vpop.eup %13078 }
 0x790   :  { %v3964_v7 = vmul.f32 %v13079_v6, %v3961_v11  ;;  %v4529_v11 = vld [vmem:[#allocation6 + $0x8] sm:$0xff] }
 0x792   :  { %v13081_v33 = vpop.eup %13080  ;;  %v3965_v54 = vadd.f32 %v3964_v7, %v3893_v32 }
 0x793   :  { %v4128_v21 = vadd.f32 1.0, %v13081_v33 }
 0x794   :  { %13086 = vtanh.f32 %v3965_v54 }
 0x795   :  { %13088 = vrcp.f32 %v4128_v21 }
 0x798   :  { %v13083_v5 = vpop.eup %13082 }
 0x799   :  { %v4202_v12 = vmul.f32 %v13083_v5, %v4199_v22  ;;  %v13085_v16 = vpop.eup %13084 }
 0x79a   :  { %v3967_v45 = vsub.f32 1.0, %v13085_v16  ;;  %v3969_v57 = vmul.f32 %v13085_v16, %v15146_v52 }
 0x79b   :  { %v4203_v60 = vadd.f32 %v4202_v12, %v4131_v14 }
 0x79d   :  { %13090 = vtanh.f32 %v4203_v60 }
 0x7a1   :  { %v13087_v36 = vpop.eup %13086 }
 0x7a2   :  { %v3968_v15 = vmul.f32 %v13087_v36, %v3967_v45  ;;  %v13089_v59 = vpop.eup %13088  ;;  %v4369_v36 = vld [vmem:[#allocation4 + $0x30] sm:$0xff] }
 0x7a3   :  { %v4205_v52 = vsub.f32 1.0, %v13089_v59 }
 0x7a4   :  { %v15230_v58 = vadd.f32 %v3969_v57, %v3968_v15 }
 0x7a6   :  { %3971 = vst.msk [vmem:[#allocation8 + $0x28] sm:$0xff] %vm736_vm2, %v15230_v58  ;;  %12058 = vmatmul.mubr.msk.f32.vlgmr.msra.gmra.mxu0 %vm736_vm2, %v15230_v58  ;;  %12069 = vmatmul.mubr.msk.f32.vlgmr.msra.gmra.mxu1 %vm736_vm2, %v15230_v58 }
 0x7a7   :  { %12072 = vmatpush3.msra.mxu0 %v14921_v4  ;;  %12083 = vmatpush3.msra.mxu1 %v14925_v63  ;;  %v4207_v63 = vmul.f32 %v13089_v59, %v15170_v9 }
 0x7a8   :  { %12073 = vmatprep.subr.mxu0 %v14075_v20  ;;  %12084 = vmatprep.subr.mxu1 %v14075_v20 }
 0x7a9   :  { %12074 = vmatpush3.msra.mxu0 %v14931_v61  ;;  %12085 = vmatpush3.msra.mxu1 %v14935_v29  ;;  %v5166_v29 = vld [vmem:[#allocation8 + $0x10] sm:$0xff] }
 0x7aa   :  { %v13091_v55 = vpop.eup %13090  ;;  %12075 = vmatprep.subr.mxu0 %v14075_v20  ;;  %12086 = vmatprep.subr.mxu1 %v14075_v20 }
 0x7ab   :  { %12076 = vmatpush3.msra.mxu0 %v14941_v24  ;;  %12087 = vmatpush3.msra.mxu1 %v14945_v25  ;;  %v4206_v4 = vmul.f32 %v13091_v55, %v4205_v52  ;;  %v5175_v25 = vld [vmem:[#allocation9 + $0x18] sm:$0xff] }
 0x7ac   :  { %12077 = vmatprep.subr.mxu0 %v14075_v20  ;;  %12088 = vmatprep.subr.mxu1 %v14075_v20 }
 0x7ad   :  { %12078 = vmatpush3.msra.mxu0 %v14952_v35  ;;  %12079 = vmatprep.mubr.msk.f32.mxu0 %vm14076_vm1, %v14075_v20  ;;  %v15254_v61 = vadd.f32 %v4207_v63, %v4206_v4  ;;  %v4607_v63 = vld [vmem:[#allocation7 + $0x8] sm:$0xff] }
 0x7ae   :  { %12089 = vmatpush3.msra.mxu1 %v14960_v27  ;;  %12090 = vmatprep.mubr.msk.f32.mxu1 %vm14076_vm1, %v14075_v20  ;;  %v5167_v27 = vld [vmem:[#allocation8 + $0x18] sm:$0xff] }
 0x7af   :  { %12080 = vmatmul.mubr.msk.f32.vlgmr.msra.gmra.mxu0 %vm736_vm2, %v15230_v58  ;;  %4209 = vst.msk [vmem:[#allocation9 + $0x10] sm:$0xff] %vm736_vm2, %v15254_v61  ;;  %12091 = vmatmul.mubr.msk.f32.vlgmr.msra.gmra.mxu1 %vm736_vm2, %v15254_v61 }
 0x7b0   :  { %12093 = vmatprep.subr.mxu0 %v14075_v20  ;;  %12104 = vmatprep.subr.mxu1 %v14075_v20 }
 0x7b1   :  { %12094 = vmatpush3.msra.mxu0 %v14974_v31  ;;  %12105 = vmatpush3.msra.mxu1 %v14978_v28  ;;  %v15293_v28 = vadd.f32 %v5175_v25, %v5167_v27 }
 0x7b2   :  { %12095 = vmatprep.subr.mxu0 %v14075_v20  ;;  %12106 = vmatprep.subr.mxu1 %v14075_v20 }
 0x7b3   :  { %12096 = vmatpush3.msra.mxu0 %v14984_v37  ;;  %12107 = vmatpush3.msra.mxu1 %v14988_v38  ;;  %v5169_v37 = vld [vmem:[#allocation8 + $0x28] sm:$0xff]  ;;  %v13364_v38 = vld [vmem:[%s16645_s8 + $0x18] sm:$0xff] }
 0x7b4   :  { %12097 = vmatprep.subr.mxu0 %v14075_v20  ;;  %12108 = vmatprep.subr.mxu1 %v14075_v20 }
 0x7b5   :  { %12098 = vmatpush3.msra.mxu0 %v14994_v39  ;;  %12109 = vmatpush3.msra.mxu1 %v14998_v40  ;;  %v5177_v39 = vld [vmem:[#allocation9 + $0x28] sm:$0xff]  ;;  %v13365_v40 = vld [vmem:[%s16646_s17 + $0x18] sm:$0xff] }
 0x7b6   :  { %12099 = vmatprep.subr.mxu0 %v14075_v20  ;;  %12110 = vmatprep.subr.mxu1 %v14075_v20  ;;  %v5174_v24 = vld [vmem:[#allocation9 + $0x10] sm:$0xff] }
 0x7b7   :  { %12100 = vmatpush3.msra.mxu0 %v15004_v41  ;;  %12101 = vmatprep.mubr.msk.f32.mxu0 %vm14076_vm1, %v14075_v20  ;;  %v15282_v35 = vadd.f32 %v5174_v24, %v5166_v29  ;;  %v5197_v41 = vsel %vm736_vm2, %v15293_v28, 0.0 }
 0x7b8   :  { %12111 = vmatpush3.msra.mxu1 %v15010_v42  ;;  %12112 = vmatprep.mubr.msk.f32.mxu1 %vm14076_vm1, %v14075_v20  ;;  %v15302_v42 = vadd.f32 %v5177_v39, %v5169_v37 }
 0x7b9   :  { %12102 = vmatmul.mubr.msk.f32.vlgmr.msra.gmra.mxu0 %vm736_vm2, %v15254_v61  ;;  %12113 = vmatmul.mubr.msk.f32.vlgmr.msra.gmra.mxu1 %vm736_vm2, %v15254_v61  ;;  %v5194_v31 = vsel %vm736_vm2, %v15282_v35, 0.0 }
 0x7ba   :  { %5195 = vadd.xlane.f32.xlu1 %v5194_v31  ;;  %12115 = vmatprep.subr.mxu0 %v14075_v20  ;;  %v5203_v9 = vsel %vm736_vm2, %v15302_v42, 0.0 }
 0x7bb   :  { %12126 = vmatprep.subr.mxu1 %v14075_v20  ;;  %12116 = vmatpush3.msra.mxu0 %v13364_v38 }
 0x7bc   :  { %12127 = vmatpush3.msra.mxu1 %v13365_v40  ;;  %12117 = vmatprep.subr.mxu0 %v14075_v20  ;;  %v13366_v40 = vld [vmem:[%s16647_s2 + $0x18] sm:$0xff] }
 0x7bd   :  { %12128 = vmatprep.subr.mxu1 %v14075_v20  ;;  %12118 = vmatpush3.msra.mxu0 %v15026_v43  ;;  %v4210_v43 = vld [vmem:[#allocation2 + $0x30] sm:$0xff] }
 0x7be   :  { %5198 = vadd.xlane.f32.xlu1 %v5197_v41  ;;  %12129 = vmatpush3.msra.mxu1 %v15030_v44  ;;  %v13367_v41 = vld [vmem:[%s16648_s21 + $0x18] sm:$0xff] }
 0x7bf   :  { %12119 = vmatprep.subr.mxu0 %v14075_v20  ;;  %12130 = vmatprep.subr.mxu1 %v14075_v20 }
 0x7c0   :  { %12120 = vmatpush3.msra.mxu0 %v15036_v10  ;;  %12131 = vmatpush3.msra.mxu1 %v15040_v0 }
 0x7c1   :  { %12121 = vmatprep.subr.mxu0 %v14075_v20  ;;  %12132 = vmatprep.subr.mxu1 %v14075_v20 }
 0x7c2   :  { %5204 = vadd.xlane.f32.xlu1 %v5203_v9  ;;  %12122 = vmatpush3.msra.mxu0 %v15046_v50  ;;  %v4291_v50 = vld [vmem:[#allocation3 + $0x30] sm:$0xff] }
 0x7c3   :  { %12133 = vmatpush3.msra.mxu1 %v15050_v49  ;;  %12123 = vmatprep.mubr.msk.f32.mxu0 %vm14076_vm1, %v14075_v20  ;;  %v13369_v9 = vld [vmem:[%s16648_s21 + $0x10] sm:$0xff] }
 0x7c4   :  { %12134 = vmatprep.mubr.msk.f32.mxu1 %vm14076_vm1, %v14075_v20  ;;  %12137 = vmatprep.subr.mxu0 %v14075_v20 }
 0x7c5   :  { %12148 = vmatprep.subr.mxu1 %v14075_v20 }
 0x866   :  { %v4280_v44 = vpop.f32.mrf.mxu0  ;;  %v4358_v10 = vpop.f32.mrf.mxu1 }
 0x867   :  { %v4284_v0 = vadd.f32 %v4280_v44, %v4210_v43  ;;  %v4362_v49 = vadd.f32 %v4358_v10, %v4291_v50  ;;  %v13370_v10 = vld [vmem:[%s16647_s2 + $0x8] sm:$0xff] }
 0x868   :  { %v12059_v46 = vpop.f32.mrf.mxu0  ;;  %v12070_v30 = vpop.f32.mrf.mxu1 }
 0x869   :  { %v10741_v23 = vmul.f32 -1.442695, %v4284_v0  ;;  %v10743_v19 = vmul.f32 -1.442695, %v4362_v49  ;;  %v13371_v0 = vld [vmem:[%s16648_s21 + $0x8] sm:$0xff]  ;;  %v13373_v49 = vld [vmem:[%s16648_s21] sm:$0xff] }
 0x86b   :  { %13092 = vpow2.f32 %v10741_v23  ;;  %v13372_v23 = vld [vmem:[%s16647_s2] sm:$0xff] }
 0x86f   :  { %v4436_v26 = vpop.f32.mrf.mxu0  ;;  %v4518_v1 = vpop.f32.mrf.mxu1 }
 0x870   :  { %v4522_v18 = vadd.f32 %v4518_v1, %v4448_v51  ;;  %v4437_v60 = vadd.f32 %v4436_v26, %v14731_v56  ;;  %v13375_v26 = vld [vmem:[%s16650_s12 + $0x18] sm:$0xff]  ;;  %v13376_v51 = vld [vmem:[%s16649_s14 + $0x10] sm:$0xff] }
 0x871   :  { %v12081_v2 = vpop.f32.mrf.mxu0  ;;  %v12092_v34 = vpop.f32.mrf.mxu1  ;;  %v13377_v1 = vld [vmem:[%s16650_s12 + $0x10] sm:$0xff] }
 0x872   :  { %v10746_v3 = vmul.f32 -1.442695, %v4522_v18  ;;  %v13378_v18 = vld [vmem:[%s16649_s14 + $0x8] sm:$0xff]  ;;  %v13380_v2 = vld [vmem:[%s16649_s14] sm:$0xff] }
 0x873   :  { %v13381_v34 = vld [vmem:[%s16650_s12] sm:$0xff] }
 0x874   :  { %13094 = vpow2.f32 %v10746_v3  ;;  %v4686_v3 = vld [vmem:[#allocation2 + $0x38] sm:$0xff] }
 0x875   :  { %13096 = vpow2.f32 %v10743_v19  ;;  %v13379_v19 = vld [vmem:[%s16650_s12 + $0x8] sm:$0xff] }
 0x878   :  { %v13093_v53 = vpop.eup %13092 }
 0x879   :  { %v4288_v13 = vadd.f32 1.0, %v13093_v53  ;;  %v4596_v6 = vpop.f32.mrf.mxu0  ;;  %v4674_v7 = vpop.f32.mrf.mxu1 }
 0x87a   :  { %v4600_v32 = vadd.f32 %v4596_v6, %v4529_v11  ;;  %v4675_v52 = vadd.f32 %v4674_v7, %v14736_v62 }
 0x87b   :  { %13098 = vrcp.f32 %v4288_v13  ;;  %v12103_v33 = vpop.f32.mrf.mxu0  ;;  %v12114_v54 = vpop.f32.mrf.mxu1 }
 0x87c   :  { %v10748_v21 = vmul.f32 -1.442695, %v4600_v32  ;;  %v4767_v33 = vld [vmem:[#allocation3 + $0x38] sm:$0xff] }
 0x87e   :  { %13100 = vpow2.f32 %v10748_v21 }
 0x881   :  { %v13095_v22 = vpop.eup %13094 }
 0x882   :  { %v13097_v5 = vpop.eup %13096  ;;  %v4526_v12 = vadd.f32 1.0, %v13095_v22  ;;  %v4924_v22 = vld [vmem:[#allocation5] sm:$0xff] }
 0x883   :  { %v4366_v14 = vadd.f32 1.0, %v13097_v5 }
 0x884   :  { %13102 = vrcp.f32 %v4526_v12 }
 0x885   :  { %13104 = vrcp.f32 %v4366_v14 }
 0x888   :  { %v13099_v16 = vpop.eup %13098 }
 0x889   :  { %v4440_v45 = vmul.f32 %v13099_v16, %v4437_v60 }
 0x88b   :  { %v13101_v15 = vpop.eup %13100  ;;  %v4441_v57 = vadd.f32 %v4440_v45, %v4369_v36 }
 0x88c   :  { %v4604_v59 = vadd.f32 1.0, %v13101_v15 }
 0x88d   :  { %13106 = vtanh.f32 %v4441_v57  ;;  %v5005_v57 = vld [vmem:[#allocation6] sm:$0xff] }
 0x88e   :  { %13108 = vrcp.f32 %v4604_v59 }
 0x891   :  { %v13103_v55 = vpop.eup %13102 }
 0x892   :  { %v4678_v4 = vmul.f32 %v13103_v55, %v4675_v52  ;;  %v13105_v24 = vpop.eup %13104 }
 0x893   :  { %v4443_v25 = vsub.f32 1.0, %v13105_v24  ;;  %v4445_v37 = vmul.f32 %v13105_v24, %v15230_v58  ;;  %v13368_v58 = vld [vmem:[%s16647_s2 + $0x10] sm:$0xff] }
 0x894   :  { %v4679_v29 = vadd.f32 %v4678_v4, %v4607_v63 }
 0x896   :  { %13110 = vtanh.f32 %v4679_v29 }
 0x89a   :  { %v13107_v27 = vpop.eup %13106 }
 0x89b   :  { %v4444_v31 = vmul.f32 %v13107_v27, %v4443_v25  ;;  %v13109_v39 = vpop.eup %13108 }
 0x89c   :  { %v4681_v43 = vsub.f32 1.0, %v13109_v39  ;;  %v4683_v30 = vmul.f32 %v13109_v39, %v15254_v61  ;;  %v13374_v61 = vld [vmem:[%s16649_s14 + $0x18] sm:$0xff] }
 0x89d   :  { %v15326_v38 = vadd.f32 %v4445_v37, %v4444_v31 }
 0x89f   :  { %4447 = vst.msk [vmem:[#allocation8 + $0x30] sm:$0xff] %vm736_vm2, %v15326_v38  ;;  %12124 = vmatmul.mubr.msk.f32.vlgmr.msra.gmra.mxu0 %vm736_vm2, %v15326_v38  ;;  %12135 = vmatmul.mubr.msk.f32.vlgmr.msra.gmra.mxu1 %vm736_vm2, %v15326_v38 }
 0x8a0   :  { %12138 = vmatpush3.msra.mxu0 %v13366_v40  ;;  %12149 = vmatpush3.msra.mxu1 %v13367_v41  ;;  %v4845_v41 = vld [vmem:[#allocation4 + $0x38] sm:$0xff] }
 0x8a1   :  { %12139 = vmatprep.subr.mxu0 %v14075_v20  ;;  %12150 = vmatprep.subr.mxu1 %v14075_v20 }
 0x8a2   :  { %12140 = vmatpush3.msra.mxu0 %v13368_v58  ;;  %12151 = vmatpush3.msra.mxu1 %v13369_v9 }
 0x8a3   :  { %v13111_v44 = vpop.eup %13110  ;;  %12141 = vmatprep.subr.mxu0 %v14075_v20  ;;  %12152 = vmatprep.subr.mxu1 %v14075_v20 }
 0x8a4   :  { %12142 = vmatpush3.msra.mxu0 %v13370_v10  ;;  %12153 = vmatpush3.msra.mxu1 %v13371_v0  ;;  %v4682_v46 = vmul.f32 %v13111_v44, %v4681_v43 }
 0x8a5   :  { %12143 = vmatprep.subr.mxu0 %v14075_v20  ;;  %12154 = vmatprep.subr.mxu1 %v14075_v20 }
 0x8a6   :  { %12144 = vmatpush3.msra.mxu0 %v13372_v23  ;;  %12145 = vmatprep.mubr.msk.f32.mxu0 %vm14076_vm1, %v14075_v20  ;;  %v15350_v50 = vadd.f32 %v4683_v30, %v4682_v46  ;;  %v5083_v46 = vld [vmem:[#allocation7] sm:$0xff] }
 0x8a7   :  { %12155 = vmatpush3.msra.mxu1 %v13373_v49  ;;  %12156 = vmatprep.mubr.msk.f32.mxu1 %vm14076_vm1, %v14075_v20 }
 0x8a8   :  { %12146 = vmatmul.mubr.msk.f32.vlgmr.msra.gmra.mxu0 %vm736_vm2, %v15326_v38  ;;  %4685 = vst.msk [vmem:[#allocation9 + $0x8] sm:$0xff] %vm736_vm2, %v15350_v50  ;;  %12157 = vmatmul.mubr.msk.f32.vlgmr.msra.gmra.mxu1 %vm736_vm2, %v15350_v50 }
 0x8a9   :  { %12159 = vmatprep.subr.mxu0 %v14075_v20  ;;  %12170 = vmatprep.subr.mxu1 %v14075_v20 }
 0x8aa   :  { %12160 = vmatpush3.msra.mxu0 %v13374_v61  ;;  %12171 = vmatpush3.msra.mxu1 %v13375_v26 }
 0x8ab   :  { %12161 = vmatprep.subr.mxu0 %v14075_v20  ;;  %12172 = vmatprep.subr.mxu1 %v14075_v20 }
 0x8ac   :  { %12162 = vmatpush3.msra.mxu0 %v13376_v51  ;;  %12173 = vmatpush3.msra.mxu1 %v13377_v1 }
 0x8ad   :  { %12163 = vmatprep.subr.mxu0 %v14075_v20  ;;  %12174 = vmatprep.subr.mxu1 %v14075_v20 }
 0x8ae   :  { %12164 = vmatpush3.msra.mxu0 %v13378_v18  ;;  %12175 = vmatpush3.msra.mxu1 %v13379_v19 }
 0x8af   :  { %12165 = vmatprep.subr.mxu0 %v14075_v20  ;;  %12176 = vmatprep.subr.mxu1 %v14075_v20 }
 0x8b0   :  { %12166 = vmatpush3.msra.mxu0 %v13380_v2  ;;  %12167 = vmatprep.mubr.msk.f32.mxu0 %vm14076_vm1, %v14075_v20 }
 0x8b1   :  { %12177 = vmatpush3.msra.mxu1 %v13381_v34  ;;  %12178 = vmatprep.mubr.msk.f32.mxu1 %vm14076_vm1, %v14075_v20 }
 0x8b2   :  { %12168 = vmatmul.mubr.msk.f32.vlgmr.msra.gmra.mxu0 %vm736_vm2, %v15350_v50  ;;  %12179 = vmatmul.mubr.msk.f32.vlgmr.msra.gmra.mxu1 %vm736_vm2, %v15350_v50 }
 0x95f   :  { %v4756_v53 = vpop.f32.mrf.mxu0  ;;  %v4834_v13 = vpop.f32.mrf.mxu1 }
 0x960   :  { %v4760_v11 = vadd.f32 %v4756_v53, %v4686_v3  ;;  %v4838_v54 = vadd.f32 %v4834_v13, %v4767_v33  ;;  %v5179_v53 = vld [vmem:[#allocation9 + $0x38] sm:$0xff]  ;;  %v5165_v33 = vld [vmem:[#allocation8 + $0x8] sm:$0xff] }
 0x961   :  { %v12125_v6 = vpop.f32.mrf.mxu0  ;;  %v12136_v7 = vpop.f32.mrf.mxu1 }
 0x962   :  { %v10751_v32 = vmul.f32 -1.442695, %v4760_v11  ;;  %v10753_v14 = vmul.f32 -1.442695, %v4838_v54  ;;  %v5173_v7 = vld [vmem:[#allocation9 + $0x8] sm:$0xff] }
 0x964   :  { %13112 = vpow2.f32 %v10751_v32 }
 0x968   :  { %v4912_v21 = vpop.f32.mrf.mxu0  ;;  %v4994_v5 = vpop.f32.mrf.mxu1 }
 0x969   :  { %v4998_v12 = vadd.f32 %v4994_v5, %v4924_v22  ;;  %v4913_v37 = vadd.f32 %v4912_v21, %v14731_v56  ;;  %v5181_v21 = vadd.f32 %v5173_v7, %v5165_v33  ;;  %v5176_v22 = vld [vmem:[#allocation9 + $0x20] sm:$0xff]  ;;  %v5342_v7 = vld [vmem:[%s16652_s7 + $0x8] sm:$0xff] }
 0x96a   :  { %v12147_v60 = vpop.f32.mrf.mxu0  ;;  %v12158_v16 = vpop.f32.mrf.mxu1  ;;  %v5341_v33 = vld [vmem:[%s16652_s7] sm:$0xff] }
 0x96b   :  { %v10756_v45 = vmul.f32 -1.442695, %v4998_v12  ;;  %v5191_v5 = vsel %vm736_vm2, %v5181_v21, 0.0  ;;  %v5178_v60 = vld [vmem:[#allocation9 + $0x30] sm:$0xff] }
 0x96d   :  { %13114 = vpow2.f32 %v10756_v45 }
 0x96e   :  { %13116 = vpow2.f32 %v10753_v14  ;;  %v5170_v14 = vld [vmem:[#allocation8 + $0x30] sm:$0xff] }
 0x96f   :  { %v5186_v45 = vadd.f32 %v5178_v60, %v5170_v14 }
 0x971   :  { %v13113_v36 = vpop.eup %13112 }
 0x972   :  { %v4764_v15 = vadd.f32 1.0, %v13113_v36  ;;  %v5072_v59 = vpop.f32.mrf.mxu0  ;;  %v5150_v52 = vpop.f32.mrf.mxu1  ;;  %v5206_v36 = vsel %vm736_vm2, %v5186_v45, 0.0 }
 0x973   :  { %v5076_v55 = vadd.f32 %v5072_v59, %v5005_v57  ;;  %v5151_v44 = vadd.f32 %v5150_v52, %v14736_v62 }
 0x974   :  { %13118 = vrcp.f32 %v4764_v15  ;;  %v12169_v4 = vpop.f32.mrf.mxu0  ;;  %v12180_v63 = vpop.f32.mrf.mxu1 }
 0x975   :  { %v10758_v29 = vmul.f32 -1.442695, %v5076_v55  ;;  %v5196_v15 = vpop.xlane.xlu1 %5195 }
 0x976   :  { %v5215_v57 = vmul.f32 0.03125, %v5196_v15 }
 0x977   :  { %13120 = vpow2.f32 %v10758_v29 }
 0x978   :  { %v15397_v4 = vsub.f32 %v15282_v35, %v5215_v57 }
 0x979   :  { %v5199_v59 = vpop.xlane.xlu1 %5198 }
 0x97a   :  { %v13115_v24 = vpop.eup %13114  ;;  %v5216_v63 = vmul.f32 0.03125, %v5199_v59 }
 0x97b   :  { %v13117_v25 = vpop.eup %13116  ;;  %v5002_v27 = vadd.f32 1.0, %v13115_v24 }
 0x97c   :  { %v4842_v31 = vadd.f32 1.0, %v13117_v25 }
 0x97d   :  { %13122 = vrcp.f32 %v5002_v27  ;;  %v5205_v24 = vpop.xlane.xlu1 %5204 }
 0x97e   :  { %13124 = vrcp.f32 %v4842_v31 }
 0x981   :  { %v13119_v39 = vpop.eup %13118 }
 0x982   :  { %v4916_v40 = vmul.f32 %v13119_v39, %v4913_v37  ;;  %v15404_v37 = vsub.f32 %v15293_v28, %v5216_v63  ;;  %v5231_v39 = vmul.f32 %v15397_v4, %v15397_v4 }
 0x984   :  { %v13121_v58 = vpop.eup %13120  ;;  %v4917_v9 = vadd.f32 %v4916_v40, %v4845_v41  ;;  %v5218_v40 = vmul.f32 0.03125, %v5205_v24  ;;  %v5232_v28 = vmul.f32 %v15404_v37, %v15404_v37 }
 0x985   :  { %v5080_v43 = vadd.f32 1.0, %v13121_v58 }
 0x986   :  { %13126 = vtanh.f32 %v4917_v9 }
 0x987   :  { %13128 = vrcp.f32 %v5080_v43 }
 0x98a   :  { %v13123_v10 = vpop.eup %13122 }
 0x98b   :  { %v5154_v0 = vmul.f32 %v13123_v10, %v5151_v44  ;;  %v13125_v23 = vpop.eup %13124  ;;  %v5243_v10 = vsel %vm736_vm2, %v5231_v39, 0.0 }
 0x98c   :  { %v4919_v49 = vsub.f32 1.0, %v13125_v23  ;;  %v4921_v56 = vmul.f32 %v13125_v23, %v15326_v38  ;;  %v5164_v38 = vld [vmem:[#allocation8] sm:$0xff] }
 0x98d   :  { %v5155_v30 = vadd.f32 %v5154_v0, %v5083_v46  ;;  %v15417_v0 = vsub.f32 %v15302_v42, %v5218_v40 }
 0x98f   :  { %13130 = vtanh.f32 %v5155_v30 }
 0x993   :  { %v13127_v61 = vpop.eup %13126 }
 0x994   :  { %v4920_v26 = vmul.f32 %v13127_v61, %v4919_v49  ;;  %v13129_v1 = vpop.eup %13128 }
 0x995   :  { %v5157_v18 = vsub.f32 1.0, %v13129_v1  ;;  %v5159_v62 = vmul.f32 %v13129_v1, %v15350_v50  ;;  %v5168_v50 = vld [vmem:[#allocation8 + $0x20] sm:$0xff] }
 0x996   :  { %v4922_v51 = vadd.f32 %v4921_v56, %v4920_v26  ;;  %v5184_v12 = vadd.f32 %v5176_v22, %v5168_v50  ;;  %v5246_v26 = vsel %vm736_vm2, %v5232_v28, 0.0  ;;  %v10761_v28 = vld [vmem:[#allocation25] ss:$0 sm:$0xff] }
 0x998   :  { %4923 = vst.msk [vmem:[#allocation8 + $0x38] sm:$0xff] %vm736_vm2, %v4922_v51  ;;  %v5200_v16 = vsel %vm736_vm2, %v5184_v12, 0.0 }
 0x99c   :  { %v13131_v19 = vpop.eup %13130 }
 0x99d   :  { %v5158_v2 = vmul.f32 %v13131_v19, %v5157_v18  ;;  %v5234_v18 = vmul.f32 %v15417_v0, %v15417_v0 }
 0x99f   :  { %v5160_v34 = vadd.f32 %v5159_v62, %v5158_v2  ;;  %v5171_v3 = vld [vmem:[#allocation8 + $0x38] sm:$0xff]  ;;  %v5252_v62 = vsel %vm736_vm2, %v5234_v18, 0.0 }
 0x9a0   :  { %v5187_v13 = vadd.f32 %v5179_v53, %v5171_v3  ;;  %v5340_v53 = vld [vmem:[%s16651_s3 + $0x18] sm:$0xff] }
 0x9a1   :  { %5161 = vst.msk [vmem:[#allocation9] sm:$0xff] %vm736_vm2, %v5160_v34  ;;  %12181 = vmatprep.subr.mxu0 %v5340_v53 }
 0x9a2   :  { %v5209_v11 = vsel %vm736_vm2, %v5187_v13, 0.0  ;;  %12182 = vmatpush3.msra.mxu0 %v5340_v53 }
 0x9a3   :  { %5210 = vadd.xlane.f32.xlu1 %v5209_v11  ;;  %v5339_v11 = vld [vmem:[%s16651_s3 + $0x10] sm:$0xff] }
 0x9a4   :  { %12183 = vmatprep.subr.mxu0 %v5339_v11 }
 0x9a5   :  { %12184 = vmatpush3.msra.mxu0 %v5339_v11 }
 0x9a8   :  { %v5172_v6 = vld [vmem:[#allocation9] sm:$0xff] }
 0x9a9   :  { %v5180_v32 = vadd.f32 %v5172_v6, %v5164_v38  ;;  %v5343_v38 = vld [vmem:[%s16652_s7 + $0x10] sm:$0xff]  ;;  %v5338_v6 = vld [vmem:[%s16651_s3 + $0x8] sm:$0xff] }
 0x9aa   :  { %12185 = vmatprep.subr.mxu0 %v5338_v6 }
 0x9ab   :  { %v5188_v54 = vsel %vm736_vm2, %v5180_v32, 0.0  ;;  %12186 = vmatpush3.msra.mxu0 %v5338_v6 }
 0x9ac   :  { %5189 = vadd.xlane.f32.xlu0 %v5188_v54  ;;  %v15448_v54 = vld [vmem:[%s16653_s10 + $0x18] sm:$0xff] }
 0x9b0   :  { %5192 = vadd.xlane.f32.xlu0 %v5191_v5 }
 0x9b4   :  { %5201 = vadd.xlane.f32.xlu0 %v5200_v16 }
 0x9b8   :  { %5207 = vadd.xlane.f32.xlu0 %v5206_v36 }
 0xa2c   :  { %v5211_v58 = vpop.xlane.xlu1 %5210 }
 0xa2d   :  { %v5220_v46 = vmul.f32 0.03125, %v5211_v58 }
 0xa2f   :  { %v15425_v51 = vsub.f32 %v5187_v13, %v5220_v46  ;;  %v5344_v13 = vld [vmem:[%s16652_s7 + $0x18] sm:$0xff] }
 0xa30   :  { %12201 = vmatprep.subr.mxu1 %v5344_v13 }
 0xa31   :  { %v5236_v34 = vmul.f32 %v15425_v51, %v15425_v51  ;;  %12202 = vmatpush3.msra.mxu1 %v5344_v13 }
 0xa32   :  { %12203 = vmatprep.subr.mxu1 %v5343_v38 }
 0xa33   :  { %v5258_v3 = vsel %vm736_vm2, %v5236_v34, 0.0  ;;  %12204 = vmatpush3.msra.mxu1 %v5343_v38 }
 0xa34   :  { %12205 = vmatprep.subr.mxu1 %v5342_v7 }
 0xa35   :  { %v5190_v52 = vpop.xlane.xlu0 %5189  ;;  %12206 = vmatpush3.msra.mxu1 %v5342_v7 }
 0xa36   :  { %v5213_v55 = vmul.f32 0.03125, %v5190_v52  ;;  %12207 = vmatprep.subr.mxu1 %v5341_v33 }
 0xa37   :  { %12208 = vmatpush3.msra.mxu1 %v5341_v33 }
 0xa38   :  { %v15399_v29 = vsub.f32 %v5180_v32, %v5213_v55  ;;  %v5337_v32 = vld [vmem:[%s16651_s3] sm:$0xff] }
 0xa39   :  { %v5193_v25 = vpop.xlane.xlu0 %5192  ;;  %12187 = vmatprep.subr.mxu0 %v5337_v32 }
 0xa3a   :  { %v5214_v27 = vmul.f32 0.03125, %v5193_v25  ;;  %v5229_v31 = vmul.f32 %v15399_v29, %v15399_v29  ;;  %12188 = vmatpush3.msra.mxu0 %v5337_v32 }
 0xa3b   :  { %12221 = vmatprep.subr.mxu0 %v15448_v54 }
 0xa3c   :  { %v15408_v41 = vsub.f32 %v5181_v21, %v5214_v27  ;;  %v5237_v35 = vsel %vm736_vm2, %v5229_v31, 0.0  ;;  %v15450_v21 = vld [vmem:[#allocation33 + $0x18] sm:$0xff] }
 0xa3d   :  { %5238 = vadd.xlane.f32.xlu0 %v5237_v35  ;;  %v5202_v9 = vpop.xlane.xlu0 %5201  ;;  %12241 = vmatprep.subr.mxu1 %v15450_v21 }
 0xa3e   :  { %v5217_v43 = vmul.f32 0.03125, %v5202_v9  ;;  %v5230_v44 = vmul.f32 %v15408_v41, %v15408_v41 }
 0xa40   :  { %v15419_v30 = vsub.f32 %v5184_v12, %v5217_v43  ;;  %v5240_v23 = vsel %vm736_vm2, %v5230_v44, 0.0  ;;  %v10760_v43 = vld [vmem:[#allocation24] ss:$0 sm:$0xff] }
 0xa41   :  { %5244 = vadd.xlane.f32.xlu0 %v5243_v10  ;;  %5241 = vadd.xlane.f32.xlu1 %v5240_v23  ;;  %v5208_v49 = vpop.xlane.xlu0 %5207 }
 0xa42   :  { %v5219_v61 = vmul.f32 0.03125, %v5208_v49  ;;  %v5233_v56 = vmul.f32 %v15419_v30, %v15419_v30 }
 0xa44   :  { %v15427_v42 = vsub.f32 %v5186_v45, %v5219_v61  ;;  %v5249_v1 = vsel %vm736_vm2, %v5233_v56, 0.0 }
 0xa45   :  { %5247 = vadd.xlane.f32.xlu1 %v5246_v26  ;;  %5250 = vadd.xlane.f32.xlu0 %v5249_v1 }
 0xa46   :  { %v5235_v19 = vmul.f32 %v15427_v42, %v15427_v42 }
 0xa48   :  { %v5255_v2 = vsel %vm736_vm2, %v5235_v19, 0.0 }
 0xa49   :  { %5253 = vadd.xlane.f32.xlu1 %v5252_v62  ;;  %5256 = vadd.xlane.f32.xlu0 %v5255_v2 }
 0xa4d   :  { %5259 = vadd.xlane.f32.xlu1 %v5258_v3 }
 0xac6   :  { %v5239_v50 = vpop.xlane.xlu0 %5238 }
 0xac7   :  { %v5261_v22 = vmul.f32 0.03125, %v5239_v50 }
 0xac9   :  { %v5269_v5 = vadd.f32 1e-05, %v5261_v22 }
 0xaca   :  { %v5242_v12 = vpop.xlane.xlu1 %5241  ;;  %v5245_v14 = vpop.xlane.xlu0 %5244 }
 0xacb   :  { %13132 = vrsqrt.f32 %v5269_v5  ;;  %v5262_v60 = vmul.f32 0.03125, %v5242_v12  ;;  %v5263_v16 = vmul.f32 0.03125, %v5245_v14  ;;  %v5347_v14 = vld [vmem:[%s16653_s10 + $0x10] sm:$0xff] }
 0xacd   :  { %v5270_v45 = vadd.f32 1e-05, %v5262_v60  ;;  %v5271_v36 = vadd.f32 1e-05, %v5263_v16  ;;  %v5739_v60 = vld [vmem:[#allocation33 + $0x10] sm:$0xff] }
 0xace   :  { %v5248_v15 = vpop.xlane.xlu1 %5247  ;;  %v5251_v57 = vpop.xlane.xlu0 %5250 }
 0xacf   :  { %13134 = vrsqrt.f32 %v5270_v45  ;;  %v5264_v59 = vmul.f32 0.03125, %v5248_v15  ;;  %v5265_v52 = vmul.f32 0.03125, %v5251_v57  ;;  %v5738_v15 = vld [vmem:[#allocation33 + $0x8] sm:$0xff]  ;;  %v5345_v57 = vld [vmem:[%s16653_s10] sm:$0xff] }
 0xad0   :  { %13136 = vrsqrt.f32 %v5271_v36  ;;  %v5346_v36 = vld [vmem:[%s16653_s10 + $0x8] sm:$0xff] }
 0xad1   :  { %v5272_v55 = vadd.f32 1e-05, %v5264_v59  ;;  %v5273_v63 = vadd.f32 1e-05, %v5265_v52  ;;  %v5737_v59 = vld [vmem:[#allocation33] sm:$0xff] }
 0xad2   :  { %v5254_v24 = vpop.xlane.xlu1 %5253  ;;  %v5257_v25 = vpop.xlane.xlu0 %5256 }
 0xad3   :  { %13138 = vrsqrt.f32 %v5272_v55  ;;  %v5266_v27 = vmul.f32 0.03125, %v5254_v24  ;;  %v5267_v31 = vmul.f32 0.03125, %v5257_v25  ;;  %v5744_v55 = vld [vmem:[#allocation34 + $0x18] sm:$0xff]  ;;  %v5743_v24 = vld [vmem:[#allocation34 + $0x10] sm:$0xff] }
 0xad4   :  { %13140 = vrsqrt.f32 %v5273_v63  ;;  %v5748_v63 = vld [vmem:[#allocation36 + $0x18] sm:$0xff]  ;;  %v5747_v25 = vld [vmem:[#allocation36 + $0x10] sm:$0xff] }
 0xad5   :  { %v5274_v39 = vadd.f32 1e-05, %v5266_v27  ;;  %v5275_v40 = vadd.f32 1e-05, %v5267_v31  ;;  %v5742_v27 = vld [vmem:[#allocation34 + $0x8] sm:$0xff] }
 0xad6   :  { %v5260_v35 = vpop.xlane.xlu1 %5259  ;;  %v5746_v31 = vld [vmem:[#allocation36 + $0x8] sm:$0xff] }
 0xad7   :  { %13142 = vrsqrt.f32 %v5274_v39  ;;  %v5268_v58 = vmul.f32 0.03125, %v5260_v35  ;;  %v5741_v39 = vld [vmem:[#allocation34] sm:$0xff]  ;;  %v15561_v35 = vld [vmem:[#allocation27 + $0x18] sm:$0xff] }
 0xad8   :  { %v13133_v9 = vpop.eup %13132  ;;  %13144 = vrsqrt.f32 %v5275_v40  ;;  %v5745_v40 = vld [vmem:[#allocation36] sm:$0xff] }
 0xad9   :  { %v5285_v44 = vmul.f32 %v13133_v9, %v15399_v29  ;;  %v5276_v10 = vadd.f32 1e-05, %v5268_v58  ;;  %v15563_v58 = vld [vmem:[#allocation28 + $0x18] sm:$0xff]  ;;  %v15577_v9 = vld [vmem:[#allocation27 + $0x10] sm:$0xff] }
 0xadb   :  { %v5299_v46 = vmul.f32 %v10760_v43, %v5285_v44  ;;  %13146 = vrsqrt.f32 %v5276_v10  ;;  %v15593_v44 = vld [vmem:[#allocation27 + $0x8] sm:$0xff] }
 0xadc   :  { %v13135_v23 = vpop.eup %13134  ;;  %v15595_v10 = vld [vmem:[#allocation28 + $0x8] sm:$0xff] }
 0xadd   :  { %v13137_v49 = vpop.eup %13136  ;;  %v5313_v61 = vadd.f32 %v10761_v28, %v5299_v46  ;;  %v5286_v56 = vmul.f32 %v13135_v23, %v15408_v41  ;;  %v15609_v46 = vld [vmem:[#allocation28] sm:$0xff]  ;;  %v15623_v23 = vld [vmem:[#allocation30 + $0x18] sm:$0xff] }
 0xade   :  { %v5287_v26 = vmul.f32 %v13137_v49, %v15397_v4  ;;  %v15625_v49 = vld [vmem:[#allocation37 + $0x18] sm:$0xff] }
 0xadf   :  { %5321 = vst.msk [vmem:[#allocation10] sm:$0xff] %vm736_vm2, %v5313_v61  ;;  %v5300_v1 = vmul.f32 %v10760_v43, %v5286_v56  ;;  %v15631_v61 = vld [vmem:[#allocation30 + $0x10] sm:$0xff] }
 0xae0   :  { %v13139_v18 = vpop.eup %13138  ;;  %v5301_v19 = vmul.f32 %v10760_v43, %v5287_v26  ;;  %v15633_v56 = vld [vmem:[#allocation37 + $0x10] sm:$0xff]  ;;  %v15639_v26 = vld [vmem:[#allocation30 + $0x8] sm:$0xff] }
 0xae1   :  { %v13141_v62 = vpop.eup %13140  ;;  %v5314_v2 = vadd.f32 %v10761_v28, %v5300_v1  ;;  %v5288_v29 = vmul.f32 %v13139_v18, %v15404_v37  ;;  %v15641_v1 = vld [vmem:[#allocation37 + $0x8] sm:$0xff]  ;;  %v15647_v18 = vld [vmem:[#allocation30] sm:$0xff] }
 0xae2   :  { %v5315_v34 = vadd.f32 %v10761_v28, %v5301_v19  ;;  %v5289_v3 = vmul.f32 %v13141_v62, %v15419_v30  ;;  %v15649_v19 = vld [vmem:[#allocation37] sm:$0xff]  ;;  %v15661_v62 = vld [vmem:[#allocation39 + $0x18] sm:$0xff] }
 0xae3   :  { %5322 = vst.msk [vmem:[#allocation10 + $0x8] sm:$0xff] %vm736_vm2, %v5314_v2  ;;  %v5302_v53 = vmul.f32 %v10760_v43, %v5288_v29  ;;  %v15665_v2 = vld [vmem:[#allocation40 + $0x18] sm:$0xff]  ;;  %v15668_v29 = vld [vmem:[#allocation39 + $0x10] sm:$0xff] }
 0xae4   :  { %v13143_v13 = vpop.eup %13142  ;;  %5323 = vst.msk [vmem:[#allocation10 + $0x10] sm:$0xff] %vm736_vm2, %v5315_v34  ;;  %v5303_v41 = vmul.f32 %v10760_v43, %v5289_v3  ;;  %v15674_v34 = vld [vmem:[#allocation40 + $0x10] sm:$0xff]  ;;  %v15677_v3 = vld [vmem:[#allocation39 + $0x8] sm:$0xff] }
 0xae5   :  { %v13145_v4 = vpop.eup %13144  ;;  %v5316_v11 = vadd.f32 %v10761_v28, %v5302_v53  ;;  %v5290_v38 = vmul.f32 %v13143_v13, %v15417_v0  ;;  %v15682_v53 = vld [vmem:[#allocation40 + $0x8] sm:$0xff]  ;;  %v15685_v13 = vld [vmem:[#allocation39] sm:$0xff] }
 0xae6   :  { %v5317_v6 = vadd.f32 %v10761_v28, %v5303_v41  ;;  %v5291_v7 = vmul.f32 %v13145_v4, %v15427_v42  ;;  %v15464_v32 = vld [vmem:[#allocation10] sm:$0xff]  ;;  %v15690_v41 = vld [vmem:[#allocation40] sm:$0xff]  ;;  %v15723_v4 = vld [vmem:[#allocation31] sm:$0xf] }
 0xae7   :  { %5324 = vst.msk [vmem:[#allocation10 + $0x18] sm:$0xff] %vm736_vm2, %v5316_v11  ;;  %v5304_v37 = vmul.f32 %v10760_v43, %v5290_v38  ;;  %12189 = vmatprep.mubr.msk.f32.mxu0 %vm736_vm2, %v15464_v32  ;;  %12209 = vmatprep.mubr.msk.f32.mxu1 %vm736_vm2, %v15464_v32  ;;  %v5365_v11 = vrot.slane %v15723_v4, %v14654_v47 }
 0xae8   :  { %v13147_v30 = vpop.eup %13146  ;;  %5325 = vst.msk [vmem:[#allocation10 + $0x20] sm:$0xff] %vm736_vm2, %v5317_v6  ;;  %v5305_v33 = vmul.f32 %v10760_v43, %v5291_v7  ;;  %v5506_v38 = vrot.slane %v15723_v4, %v14657_v48 }
 0xae9   :  { %v5318_v0 = vadd.f32 %v10761_v28, %v5304_v37  ;;  %v5292_v50 = vmul.f32 %v13147_v30, %v15425_v51 }
 0xaea   :  { %v5319_v42 = vadd.f32 %v10761_v28, %v5305_v33  ;;  %v15473_v22 = vld [vmem:[#allocation10 + $0x8] sm:$0xff] }
 0xaeb   :  { %5326 = vst.msk [vmem:[#allocation10 + $0x28] sm:$0xff] %vm736_vm2, %v5318_v0  ;;  %v5306_v5 = vmul.f32 %v10760_v43, %v5292_v50  ;;  %12190 = vmatmul.mubr.msk.f32.vlgmr.msra.gmra.mxu0 %vm736_vm2, %v15473_v22  ;;  %12210 = vmatmul.mubr.msk.f32.vlgmr.msra.gmra.mxu1 %vm736_vm2, %v15473_v22  ;;  %v15480_v12 = vld [vmem:[#allocation10 + $0x10] sm:$0xff]  ;;  %v15579_v43 = vld [vmem:[#allocation28 + $0x10] sm:$0xff] }
 0xaec   :  { %5327 = vst.msk [vmem:[#allocation10 + $0x30] sm:$0xff] %vm736_vm2, %v5319_v42  ;;  %12192 = vmatprep.mubr.msk.f32.mxu0 %vm736_vm2, %v15480_v12  ;;  %12212 = vmatprep.mubr.msk.f32.mxu1 %vm736_vm2, %v15480_v12 }
 0xaed   :  { %v5320_v51 = vadd.f32 %v10761_v28, %v5306_v5  ;;  %12222 = vmatpush3.msra.mxu0 %v15448_v54  ;;  %12242 = vmatpush3.msra.mxu1 %v15450_v21  ;;  %v15607_v28 = vld [vmem:[#allocation27] sm:$0xff] }
 0xaee   :  { %v15490_v16 = vld [vmem:[#allocation10 + $0x18] sm:$0xff]  ;;  %12223 = vmatprep.subr.mxu0 %v5347_v14  ;;  %12243 = vmatprep.subr.mxu1 %v5739_v60 }
 0xaef   :  { %5328 = vst.msk [vmem:[#allocation10 + $0x38] sm:$0xff] %vm736_vm2, %v5320_v51  ;;  %12193 = vmatmul.mubr.msk.f32.gmra.mxu0 %vm736_vm2, %v15490_v16  ;;  %12213 = vmatmul.mubr.msk.f32.gmra.mxu1 %vm736_vm2, %v15490_v16  ;;  %v15497_v45 = vld [vmem:[#allocation10 + $0x20] sm:$0xff] }
 0xaf0   :  { %12195 = vmatprep.mubr.msk.f32.mxu0 %vm736_vm2, %v15497_v45  ;;  %12215 = vmatprep.mubr.msk.f32.mxu1 %vm736_vm2, %v15497_v45 }
 0xaf1   :  { %12224 = vmatpush3.msra.mxu0 %v5347_v14  ;;  %12244 = vmatpush3.msra.mxu1 %v5739_v60 }
 0xaf2   :  { %v15504_v54 = vld [vmem:[#allocation10 + $0x28] sm:$0xff]  ;;  %12225 = vmatprep.subr.mxu0 %v5346_v36  ;;  %12245 = vmatprep.subr.mxu1 %v5738_v15 }
 0xaf3   :  { %12196 = vmatmul.mubr.msk.f32.gmra.mxu0 %vm736_vm2, %v15504_v54  ;;  %12216 = vmatmul.mubr.msk.f32.gmra.mxu1 %vm736_vm2, %v15504_v54  ;;  %v15510_v21 = vld [vmem:[#allocation10 + $0x30] sm:$0xff] }
 0xaf4   :  { %12198 = vmatprep.mubr.msk.f32.mxu0 %vm736_vm2, %v15510_v21  ;;  %12218 = vmatprep.mubr.msk.f32.mxu1 %vm736_vm2, %v15510_v21 }
 0xaf5   :  { %12226 = vmatpush3.msra.mxu0 %v5346_v36  ;;  %12246 = vmatpush3.msra.mxu1 %v5738_v15 }
 0xaf6   :  { %v15517_v52 = vld [vmem:[#allocation10 + $0x38] sm:$0xff]  ;;  %12227 = vmatprep.subr.mxu0 %v5345_v57  ;;  %12247 = vmatprep.subr.mxu1 %v5737_v59 }
 0xaf7   :  { %12199 = vmatmul.mubr.msk.f32.gmra.mxu0 %vm736_vm2, %v15517_v52  ;;  %12219 = vmatmul.mubr.msk.f32.gmra.mxu1 %vm736_vm2, %v15517_v52 }
 0xaf8   :  { %12228 = vmatpush3.msra.mxu0 %v5345_v57  ;;  %12229 = vmatprep.mubr.msk.f32.mxu0 %vm736_vm2, %v15464_v32 }
 0xaf9   :  { %12248 = vmatpush3.msra.mxu1 %v5737_v59  ;;  %12249 = vmatprep.mubr.msk.f32.mxu1 %vm736_vm2, %v15464_v32  ;;  %v15737_v59 = vld [vmem:[#allocation42] sm:$0xf] }
 0xafa   :  { %12261 = vmatprep.subr.mxu0 %v5744_v55  ;;  %12281 = vmatprep.subr.mxu1 %v5748_v63 }
 0xafb   :  { %12230 = vmatmul.mubr.msk.f32.vlgmr.msra.gmra.mxu0 %vm736_vm2, %v15473_v22  ;;  %12250 = vmatmul.mubr.msk.f32.vlgmr.msra.gmra.mxu1 %vm736_vm2, %v15473_v22 }
 0xafc   :  { %12232 = vmatprep.mubr.msk.f32.mxu0 %vm736_vm2, %v15480_v12  ;;  %12252 = vmatprep.mubr.msk.f32.mxu1 %vm736_vm2, %v15480_v12 }
 0xafd   :  { %12262 = vmatpush3.msra.mxu0 %v5744_v55  ;;  %12282 = vmatpush3.msra.mxu1 %v5748_v63 }
 0xafe   :  { %12263 = vmatprep.subr.mxu0 %v5743_v24  ;;  %12283 = vmatprep.subr.mxu1 %v5747_v25 }
 0xaff   :  { %12233 = vmatmul.mubr.msk.f32.gmra.mxu0 %vm736_vm2, %v15490_v16  ;;  %12253 = vmatmul.mubr.msk.f32.gmra.mxu1 %vm736_vm2, %v15490_v16 }
 0xb00   :  { %12235 = vmatprep.mubr.msk.f32.mxu0 %vm736_vm2, %v15497_v45  ;;  %12255 = vmatprep.mubr.msk.f32.mxu1 %vm736_vm2, %v15497_v45 }
 0xb01   :  { %12264 = vmatpush3.msra.mxu0 %v5743_v24  ;;  %12284 = vmatpush3.msra.mxu1 %v5747_v25 }
 0xb02   :  { %12265 = vmatprep.subr.mxu0 %v5742_v27  ;;  %12285 = vmatprep.subr.mxu1 %v5746_v31 }
 0xb03   :  { %12236 = vmatmul.mubr.msk.f32.gmra.mxu0 %vm736_vm2, %v15504_v54  ;;  %12256 = vmatmul.mubr.msk.f32.gmra.mxu1 %vm736_vm2, %v15504_v54 }
 0xb04   :  { %12238 = vmatprep.mubr.msk.f32.mxu0 %vm736_vm2, %v15510_v21  ;;  %12258 = vmatprep.mubr.msk.f32.mxu1 %vm736_vm2, %v15510_v21 }
 0xb05   :  { %12266 = vmatpush3.msra.mxu0 %v5742_v27  ;;  %12286 = vmatpush3.msra.mxu1 %v5746_v31  ;;  %v5623_v31 = vrot.slane %v15723_v4, %v14674_v8 }
 0xb06   :  { %12267 = vmatprep.subr.mxu0 %v5741_v39  ;;  %12287 = vmatprep.subr.mxu1 %v5745_v40 }
 0xb07   :  { %12239 = vmatmul.mubr.msk.f32.gmra.mxu0 %vm736_vm2, %v15517_v52  ;;  %12259 = vmatmul.mubr.msk.f32.gmra.mxu1 %vm736_vm2, %v15517_v52 }
 0xb08   :  { %12268 = vmatpush3.msra.mxu0 %v5741_v39  ;;  %12269 = vmatprep.mubr.msk.f32.mxu0 %vm736_vm2, %v15464_v32  ;;  %v5765_v39 = vrot.slane %v15737_v59, %v14654_v47 }
 0xb09   :  { %12288 = vmatpush3.msra.mxu1 %v5745_v40  ;;  %12289 = vmatprep.mubr.msk.f32.mxu1 %vm736_vm2, %v15464_v32 }
 0xb0a   :  { %12301 = vmatprep.subr.mxu0 %v14075_v20  ;;  %12312 = vmatprep.subr.mxu1 %v14075_v20 }
 0xb0b   :  { %12270 = vmatmul.mubr.msk.f32.vlgmr.msra.gmra.mxu0 %vm736_vm2, %v15473_v22  ;;  %12290 = vmatmul.mubr.msk.f32.vlgmr.msra.gmra.mxu1 %vm736_vm2, %v15473_v22 }
 0xb0c   :  { %12272 = vmatprep.mubr.msk.f32.mxu0 %vm736_vm2, %v15480_v12  ;;  %12292 = vmatprep.mubr.msk.f32.mxu1 %vm736_vm2, %v15480_v12 }
 0xb0d   :  { %12302 = vmatpush3.msra.mxu0 %v15561_v35  ;;  %12313 = vmatpush3.msra.mxu1 %v15563_v58 }
 0xb0e   :  { %12303 = vmatprep.subr.mxu0 %v14075_v20  ;;  %12314 = vmatprep.subr.mxu1 %v14075_v20 }
 0xb0f   :  { %12273 = vmatmul.mubr.msk.f32.gmra.mxu0 %vm736_vm2, %v15490_v16  ;;  %12293 = vmatmul.mubr.msk.f32.gmra.mxu1 %vm736_vm2, %v15490_v16 }
 0xb10   :  { %12275 = vmatprep.mubr.msk.f32.mxu0 %vm736_vm2, %v15497_v45  ;;  %12295 = vmatprep.mubr.msk.f32.mxu1 %vm736_vm2, %v15497_v45 }
 0xb11   :  { %12304 = vmatpush3.msra.mxu0 %v15577_v9  ;;  %12315 = vmatpush3.msra.mxu1 %v15579_v43 }
 0xb12   :  { %12305 = vmatprep.subr.mxu0 %v14075_v20  ;;  %12316 = vmatprep.subr.mxu1 %v14075_v20 }
 0xb13   :  { %12276 = vmatmul.mubr.msk.f32.gmra.mxu0 %vm736_vm2, %v15504_v54  ;;  %12296 = vmatmul.mubr.msk.f32.gmra.mxu1 %vm736_vm2, %v15504_v54 }
 0xb14   :  { %12278 = vmatprep.mubr.msk.f32.mxu0 %vm736_vm2, %v15510_v21  ;;  %12298 = vmatprep.mubr.msk.f32.mxu1 %vm736_vm2, %v15510_v21 }
 0xb15   :  { %12306 = vmatpush3.msra.mxu0 %v15593_v44  ;;  %12317 = vmatpush3.msra.mxu1 %v15595_v10 }
 0xb16   :  { %12307 = vmatprep.subr.mxu0 %v14075_v20  ;;  %12318 = vmatprep.subr.mxu1 %v14075_v20 }
 0xb17   :  { %12279 = vmatmul.mubr.msk.f32.gmra.mxu0 %vm736_vm2, %v15517_v52  ;;  %12299 = vmatmul.mubr.msk.f32.gmra.mxu1 %vm736_vm2, %v15517_v52 }
 0xb18   :  { %12308 = vmatpush3.msra.mxu0 %v15607_v28  ;;  %12319 = vmatpush3.msra.mxu1 %v15609_v46 }
 0xb19   :  { %12309 = vmatprep.mubr.msk.f32.mxu0 %vm14076_vm1, %v14075_v20  ;;  %12320 = vmatprep.mubr.msk.f32.mxu1 %vm14076_vm1, %v14075_v20 }
 0xb1a   :  { %12323 = vmatprep.subr.mxu0 %v14075_v20  ;;  %12334 = vmatprep.subr.mxu1 %v14075_v20 }
 0xb1b   :  { %12310 = vmatmul.mubr.f32.vlgmr.msra.gmra.mxu0 %v14075_v20  ;;  %12321 = vmatmul.mubr.f32.vlgmr.msra.gmra.mxu1 %v14075_v20 }
 0xb1c   :  { %12324 = vmatpush3.msra.mxu0 %v15623_v23  ;;  %12335 = vmatpush3.msra.mxu1 %v15625_v49 }
 0xb1d   :  { %12325 = vmatprep.subr.mxu0 %v14075_v20  ;;  %12336 = vmatprep.subr.mxu1 %v14075_v20 }
 0xb1e   :  { %12326 = vmatpush3.msra.mxu0 %v15631_v61  ;;  %12337 = vmatpush3.msra.mxu1 %v15633_v56 }
 0xb1f   :  { %12327 = vmatprep.subr.mxu0 %v14075_v20  ;;  %12338 = vmatprep.subr.mxu1 %v14075_v20 }
 0xb20   :  { %12328 = vmatpush3.msra.mxu0 %v15639_v26  ;;  %12339 = vmatpush3.msra.mxu1 %v15641_v1 }
 0xb21   :  { %12329 = vmatprep.subr.mxu0 %v14075_v20  ;;  %12340 = vmatprep.subr.mxu1 %v14075_v20 }
 0xb22   :  { %12330 = vmatpush3.msra.mxu0 %v15647_v18  ;;  %12341 = vmatpush3.msra.mxu1 %v15649_v19 }
 0xb23   :  { %12342 = vmatprep.mubr.msk.f32.mxu1 %vm14076_vm1, %v14075_v20  ;;  %12331 = vmatprep.mubr.msk.f32.mxu0 %vm14076_vm1, %v14075_v20 }
 0xb24   :  { %12343 = vmatmul.mubr.f32.vlgmr.msra.gmra.mxu1 %v14075_v20  ;;  %12345 = vmatprep.subr.mxu0 %v14075_v20 }
 0xb25   :  { %12332 = vmatmul.mubr.f32.vlgmr.msra.gmra.mxu0 %v14075_v20  ;;  %12356 = vmatprep.subr.mxu1 %v14075_v20 }
 0xb26   :  { %12346 = vmatpush3.msra.mxu0 %v15661_v62  ;;  %12353 = vmatprep.mubr.msk.f32.mxu0 %vm14076_vm1, %v14075_v20 }
 0xb27   :  { %12347 = vmatprep.subr.mxu0 %v14075_v20  ;;  %12357 = vmatpush3.msra.mxu1 %v15665_v2 }
 0xb28   :  { %12348 = vmatpush3.msra.mxu0 %v15668_v29  ;;  %12358 = vmatprep.subr.mxu1 %v14075_v20 }
 0xb29   :  { %12349 = vmatprep.subr.mxu0 %v14075_v20  ;;  %12359 = vmatpush3.msra.mxu1 %v15674_v34 }
 0xb2a   :  { %12350 = vmatpush3.msra.mxu0 %v15677_v3  ;;  %12360 = vmatprep.subr.mxu1 %v14075_v20 }
 0xb2b   :  { %12351 = vmatprep.subr.mxu0 %v14075_v20  ;;  %12361 = vmatpush3.msra.mxu1 %v15682_v53 }
 0xb2c   :  { %12352 = vmatpush3.msra.mxu0 %v15685_v13  ;;  %12362 = vmatprep.subr.mxu1 %v14075_v20 }
 0xb2d   :  { %12354 = vmatmul.mubr.f32.vlgmr.msra.gmra.mxu0 %v14075_v20  ;;  %12363 = vmatpush3.msra.mxu1 %v15690_v41 }
 0xb2e   :  { %12364 = vmatprep.mubr.msk.f32.mxu1 %vm14076_vm1, %v14075_v20  ;;  %12367 = vmatprep.subr.mxu0 %v14075_v20 }
 0xb2f   :  { %12365 = vmatmul.mubr.f32.vlgmr.msra.gmra.mxu1 %v14075_v20  ;;  %12378 = vmatprep.subr.mxu1 %v14075_v20 }
 0xb30   :  { %12368 = vmatpush3.msra.mxu0 %v15561_v35  ;;  %12379 = vmatpush3.msra.mxu1 %v15563_v58 }
 0xb31   :  { %12369 = vmatprep.subr.mxu0 %v14075_v20  ;;  %12380 = vmatprep.subr.mxu1 %v14075_v20 }
 0xb32   :  { %12370 = vmatpush3.msra.mxu0 %v15577_v9  ;;  %12381 = vmatpush3.msra.mxu1 %v15579_v43 }
 0xb33   :  { %12371 = vmatprep.subr.mxu0 %v14075_v20  ;;  %12382 = vmatprep.subr.mxu1 %v14075_v20 }
 0xb34   :  { %12372 = vmatpush3.msra.mxu0 %v15593_v44  ;;  %12383 = vmatpush3.msra.mxu1 %v15595_v10 }
 0xb35   :  { %12373 = vmatprep.subr.mxu0 %v14075_v20  ;;  %12384 = vmatprep.subr.mxu1 %v14075_v20 }
 0xb36   :  { %12374 = vmatpush3.msra.mxu0 %v15607_v28  ;;  %12385 = vmatpush3.msra.mxu1 %v15609_v46 }
 0xb37   :  { %12375 = vmatprep.mubr.msk.f32.mxu0 %vm14076_vm1, %v14075_v20  ;;  %12386 = vmatprep.mubr.msk.f32.mxu1 %vm14076_vm1, %v14075_v20 }
 0xb38   :  { %12389 = vmatprep.subr.mxu0 %v14075_v20  ;;  %12400 = vmatprep.subr.mxu1 %v14075_v20 }
 0xbab   :  { %v12191_v6 = vpop.f32.mrf.mxu0  ;;  %v12211_v7 = vpop.f32.mrf.mxu1 }
 0xbac   :  { %v5462_v32 = vadd.f32 %v12191_v6, %v5365_v11  ;;  %v5579_v37 = vadd.f32 %v12211_v7, %v5506_v38 }
 0xbad   :  { %v5456_v30 = vpop.f32.mrf.mxu0  ;;  %v5573_v33 = vpop.f32.mrf.mxu1 }
 0xbae   :  { %5496 = vst.msk [vmem:[#allocation2 + $0x8] sm:$0xff] %vm736_vm2, %v5462_v32  ;;  %5613 = vst.msk [vmem:[#allocation3 + $0x8] sm:$0xff] %vm736_vm2, %v5579_v37  ;;  %v5457_v0 = vadd.f32 %v5456_v30, %v5365_v11  ;;  %v5574_v50 = vadd.f32 %v5573_v33, %v5506_v38 }
 0xbaf   :  { %v12194_v42 = vpop.f32.mrf.mxu0  ;;  %v12214_v22 = vpop.f32.mrf.mxu1 }
 0xbb0   :  { %5495 = vst.msk [vmem:[#allocation2] sm:$0xff] %vm736_vm2, %v5457_v0  ;;  %5612 = vst.msk [vmem:[#allocation3] sm:$0xff] %vm736_vm2, %v5574_v50  ;;  %v5472_v5 = vadd.f32 %v12194_v42, %v5365_v11  ;;  %v5589_v12 = vadd.f32 %v12214_v22, %v5506_v38 }
 0xbb1   :  { %v5466_v14 = vpop.f32.mrf.mxu0  ;;  %v5583_v60 = vpop.f32.mrf.mxu1 }
 0xbb2   :  { %5498 = vst.msk [vmem:[#allocation2 + $0x18] sm:$0xff] %vm736_vm2, %v5472_v5  ;;  %5615 = vst.msk [vmem:[#allocation3 + $0x18] sm:$0xff] %vm736_vm2, %v5589_v12  ;;  %v5467_v51 = vadd.f32 %v5466_v14, %v5365_v11  ;;  %v5584_v16 = vadd.f32 %v5583_v60, %v5506_v38 }
 0xbb3   :  { %v12197_v45 = vpop.f32.mrf.mxu0  ;;  %v12217_v36 = vpop.f32.mrf.mxu1 }
 0xbb4   :  { %5497 = vst.msk [vmem:[#allocation2 + $0x10] sm:$0xff] %vm736_vm2, %v5467_v51  ;;  %5614 = vst.msk [vmem:[#allocation3 + $0x10] sm:$0xff] %vm736_vm2, %v5584_v16  ;;  %v5482_v15 = vadd.f32 %v12197_v45, %v5365_v11  ;;  %v5599_v54 = vadd.f32 %v12217_v36, %v5506_v38 }
 0xbb5   :  { %v5476_v21 = vpop.f32.mrf.mxu0  ;;  %v5593_v57 = vpop.f32.mrf.mxu1 }
 0xbb6   :  { %5500 = vst.msk [vmem:[#allocation2 + $0x28] sm:$0xff] %vm736_vm2, %v5482_v15  ;;  %5617 = vst.msk [vmem:[#allocation3 + $0x28] sm:$0xff] %vm736_vm2, %v5599_v54  ;;  %v5477_v52 = vadd.f32 %v5476_v21, %v5365_v11  ;;  %v5594_v55 = vadd.f32 %v5593_v57, %v5506_v38 }
 0xbb7   :  { %v12200_v63 = vpop.f32.mrf.mxu0  ;;  %v12220_v24 = vpop.f32.mrf.mxu1 }
 0xbb8   :  { %5499 = vst.msk [vmem:[#allocation2 + $0x20] sm:$0xff] %vm736_vm2, %v5477_v52  ;;  %5616 = vst.msk [vmem:[#allocation3 + $0x20] sm:$0xff] %vm736_vm2, %v5594_v55  ;;  %v5492_v25 = vadd.f32 %v12200_v63, %v5365_v11  ;;  %v5609_v27 = vadd.f32 %v12220_v24, %v5506_v38 }
 0xbb9   :  { %v5486_v40 = vpop.f32.mrf.mxu0  ;;  %v5603_v6 = vpop.f32.mrf.mxu1 }
 0xbba   :  { %5502 = vst.msk [vmem:[#allocation2 + $0x38] sm:$0xff] %vm736_vm2, %v5492_v25  ;;  %5619 = vst.msk [vmem:[#allocation3 + $0x38] sm:$0xff] %vm736_vm2, %v5609_v27  ;;  %v5487_v7 = vadd.f32 %v5486_v40, %v5365_v11  ;;  %v5604_v32 = vadd.f32 %v5603_v6, %v5506_v38  ;;  %v5882_v40 = vrot.slane %v15737_v59, %v14657_v48 }
 0xbbb   :  { %v12231_v37 = vpop.f32.mrf.mxu0  ;;  %v12251_v30 = vpop.f32.mrf.mxu1  ;;  %v5999_v6 = vrot.slane %v15737_v59, %v14674_v8 }
 0xbbc   :  { %5501 = vst.msk [vmem:[#allocation2 + $0x30] sm:$0xff] %vm736_vm2, %v5487_v7  ;;  %5618 = vst.msk [vmem:[#allocation3 + $0x30] sm:$0xff] %vm736_vm2, %v5604_v32  ;;  %v5696_v33 = vadd.f32 %v12231_v37, %v5623_v31  ;;  %v5838_v0 = vadd.f32 %v12251_v30, %v5765_v39 }
 0xbbd   :  { %v5690_v50 = vpop.f32.mrf.mxu0  ;;  %v5832_v42 = vpop.f32.mrf.mxu1 }
 0xbbe   :  { %5730 = vst.msk [vmem:[#allocation4 + $0x8] sm:$0xff] %vm736_vm2, %v5696_v33  ;;  %5872 = vst.msk [vmem:[#allocation5 + $0x8] sm:$0xff] %vm736_vm2, %v5838_v0  ;;  %v5691_v47 = vadd.f32 %v5690_v50, %v5623_v31  ;;  %v5833_v22 = vadd.f32 %v5832_v42, %v5765_v39 }
 0xbbf   :  { %v12234_v5 = vpop.f32.mrf.mxu0  ;;  %v12254_v12 = vpop.f32.mrf.mxu1 }
 0xbc0   :  { %5729 = vst.msk [vmem:[#allocation4] sm:$0xff] %vm736_vm2, %v5691_v47  ;;  %5871 = vst.msk [vmem:[#allocation5] sm:$0xff] %vm736_vm2, %v5833_v22  ;;  %v5706_v11 = vadd.f32 %v12234_v5, %v5623_v31  ;;  %v5848_v38 = vadd.f32 %v12254_v12, %v5765_v39 }
 0xbc1   :  { %v5700_v14 = vpop.f32.mrf.mxu0  ;;  %v5842_v60 = vpop.f32.mrf.mxu1 }
 0xbc2   :  { %5732 = vst.msk [vmem:[#allocation4 + $0x18] sm:$0xff] %vm736_vm2, %v5706_v11  ;;  %5874 = vst.msk [vmem:[#allocation5 + $0x18] sm:$0xff] %vm736_vm2, %v5848_v38  ;;  %v5701_v51 = vadd.f32 %v5700_v14, %v5623_v31  ;;  %v5843_v16 = vadd.f32 %v5842_v60, %v5765_v39 }
 0xbc3   :  { %v12237_v45 = vpop.f32.mrf.mxu0  ;;  %v12257_v36 = vpop.f32.mrf.mxu1 }
 0xbc4   :  { %5731 = vst.msk [vmem:[#allocation4 + $0x10] sm:$0xff] %vm736_vm2, %v5701_v51  ;;  %5873 = vst.msk [vmem:[#allocation5 + $0x10] sm:$0xff] %vm736_vm2, %v5843_v16  ;;  %v5716_v15 = vadd.f32 %v12237_v45, %v5623_v31  ;;  %v5858_v54 = vadd.f32 %v12257_v36, %v5765_v39 }
 0xbc5   :  { %v5710_v21 = vpop.f32.mrf.mxu0  ;;  %v5852_v57 = vpop.f32.mrf.mxu1 }
 0xbc6   :  { %5734 = vst.msk [vmem:[#allocation4 + $0x28] sm:$0xff] %vm736_vm2, %v5716_v15  ;;  %5876 = vst.msk [vmem:[#allocation5 + $0x28] sm:$0xff] %vm736_vm2, %v5858_v54  ;;  %v5711_v52 = vadd.f32 %v5710_v21, %v5623_v31  ;;  %v5853_v55 = vadd.f32 %v5852_v57, %v5765_v39 }
 0xbc7   :  { %v12240_v63 = vpop.f32.mrf.mxu0  ;;  %v12260_v24 = vpop.f32.mrf.mxu1 }
 0xbc8   :  { %5733 = vst.msk [vmem:[#allocation4 + $0x20] sm:$0xff] %vm736_vm2, %v5711_v52  ;;  %5875 = vst.msk [vmem:[#allocation5 + $0x20] sm:$0xff] %vm736_vm2, %v5853_v55  ;;  %v5726_v25 = vadd.f32 %v12240_v63, %v5623_v31  ;;  %v5868_v27 = vadd.f32 %v12260_v24, %v5765_v39 }
 0xbc9   :  { %v5720_v7 = vpop.f32.mrf.mxu0  ;;  %v5862_v32 = vpop.f32.mrf.mxu1 }
 0xbca   :  { %5736 = vst.msk [vmem:[#allocation4 + $0x38] sm:$0xff] %vm736_vm2, %v5726_v25  ;;  %5878 = vst.msk [vmem:[#allocation5 + $0x38] sm:$0xff] %vm736_vm2, %v5868_v27  ;;  %v5721_v37 = vadd.f32 %v5720_v7, %v5623_v31  ;;  %v5863_v30 = vadd.f32 %v5862_v32, %v5765_v39 }
 0xbcb   :  { %v12271_v33 = vpop.f32.mrf.mxu0  ;;  %v12291_v0 = vpop.f32.mrf.mxu1 }
 0xbcc   :  { %5735 = vst.msk [vmem:[#allocation4 + $0x30] sm:$0xff] %vm736_vm2, %v5721_v37  ;;  %5877 = vst.msk [vmem:[#allocation5 + $0x30] sm:$0xff] %vm736_vm2, %v5863_v30  ;;  %v5955_v50 = vadd.f32 %v12271_v33, %v5882_v40  ;;  %v6072_v42 = vadd.f32 %v12291_v0, %v5999_v6  ;;  %v6113_v37 = vld [vmem:[#allocation2] sm:$0xff] }
 0xbcd   :  { %v5949_v48 = vpop.f32.mrf.mxu0  ;;  %v6066_v47 = vpop.f32.mrf.mxu1 }
 0xbce   :  { %5989 = vst.msk [vmem:[#allocation6 + $0x8] sm:$0xff] %vm736_vm2, %v5955_v50  ;;  %6106 = vst.msk [vmem:[#allocation7 + $0x8] sm:$0xff] %vm736_vm2, %v6072_v42  ;;  %v5950_v8 = vadd.f32 %v5949_v48, %v5882_v40  ;;  %v6067_v22 = vadd.f32 %v6066_v47, %v5999_v6  ;;  %v6191_v47 = vld [vmem:[#allocation3] sm:$0xff] }
 0xbcf   :  { %v12274_v5 = vpop.f32.mrf.mxu0  ;;  %v12294_v12 = vpop.f32.mrf.mxu1 }
 0xbd0   :  { %5988 = vst.msk [vmem:[#allocation6] sm:$0xff] %vm736_vm2, %v5950_v8  ;;  %6105 = vst.msk [vmem:[#allocation7] sm:$0xff] %vm736_vm2, %v6067_v22  ;;  %v5965_v31 = vadd.f32 %v12274_v5, %v5882_v40  ;;  %v6082_v39 = vadd.f32 %v12294_v12, %v5999_v6 }
 0xbd1   :  { %v5959_v11 = vpop.f32.mrf.mxu0  ;;  %v6076_v38 = vpop.f32.mrf.mxu1  ;;  %v6352_v22 = vld [vmem:[#allocation5 + $0x38] sm:$0xff] }
 0xbd2   :  { %5991 = vst.msk [vmem:[#allocation6 + $0x18] sm:$0xff] %vm736_vm2, %v5965_v31  ;;  %6108 = vst.msk [vmem:[#allocation7 + $0x18] sm:$0xff] %vm736_vm2, %v6082_v39  ;;  %v5960_v14 = vadd.f32 %v5959_v11, %v5882_v40  ;;  %v6077_v60 = vadd.f32 %v6076_v38, %v5999_v6 }
 0xbd3   :  { %v12277_v51 = vpop.f32.mrf.mxu0  ;;  %v12297_v16 = vpop.f32.mrf.mxu1 }
 0xbd4   :  { %5990 = vst.msk [vmem:[#allocation6 + $0x10] sm:$0xff] %vm736_vm2, %v5960_v14  ;;  %6107 = vst.msk [vmem:[#allocation7 + $0x10] sm:$0xff] %vm736_vm2, %v6077_v60  ;;  %v5975_v45 = vadd.f32 %v12277_v51, %v5882_v40  ;;  %v6092_v36 = vadd.f32 %v12297_v16, %v5999_v6 }
 0xbd5   :  { %v5969_v15 = vpop.f32.mrf.mxu0  ;;  %v6086_v54 = vpop.f32.mrf.mxu1 }
 0xbd6   :  { %5993 = vst.msk [vmem:[#allocation6 + $0x28] sm:$0xff] %vm736_vm2, %v5975_v45  ;;  %6110 = vst.msk [vmem:[#allocation7 + $0x28] sm:$0xff] %vm736_vm2, %v6092_v36  ;;  %v5970_v21 = vadd.f32 %v5969_v15, %v5882_v40  ;;  %v6087_v57 = vadd.f32 %v6086_v54, %v5999_v6 }
 0xbd7   :  { %v12280_v52 = vpop.f32.mrf.mxu0  ;;  %v12300_v55 = vpop.f32.mrf.mxu1 }
 0xbd8   :  { %5992 = vst.msk [vmem:[#allocation6 + $0x20] sm:$0xff] %vm736_vm2, %v5970_v21  ;;  %6109 = vst.msk [vmem:[#allocation7 + $0x20] sm:$0xff] %vm736_vm2, %v6087_v57  ;;  %v5985_v63 = vadd.f32 %v12280_v52, %v5882_v40  ;;  %v6102_v24 = vadd.f32 %v12300_v55, %v5999_v6  ;;  %v15789_v55 = vrot.slane %v15723_v4, %v14727_v17 }
 0xbd9   :  { %v5979_v25 = vpop.f32.mrf.mxu0  ;;  %v6096_v27 = vpop.f32.mrf.mxu1 }
 0xbda   :  { %5995 = vst.msk [vmem:[#allocation6 + $0x38] sm:$0xff] %vm736_vm2, %v5985_v63  ;;  %6112 = vst.msk [vmem:[#allocation7 + $0x38] sm:$0xff] %vm736_vm2, %v6102_v24  ;;  %v5980_v7 = vadd.f32 %v5979_v25, %v5882_v40  ;;  %v6097_v32 = vadd.f32 %v6096_v27, %v5999_v6 }
 0xbdb   :  { %v6180_v30 = vpop.f32.mrf.mxu0  ;;  %v6258_v33 = vpop.f32.mrf.mxu1 }
 0xbdc   :  { %5994 = vst.msk [vmem:[#allocation6 + $0x30] sm:$0xff] %vm736_vm2, %v5980_v7  ;;  %6111 = vst.msk [vmem:[#allocation7 + $0x30] sm:$0xff] %vm736_vm2, %v6097_v32  ;;  %v6184_v0 = vadd.f32 %v6180_v30, %v6113_v37  ;;  %v6262_v8 = vadd.f32 %v6258_v33, %v6191_v47  ;;  %v6269_v7 = vld [vmem:[#allocation4] sm:$0xff]  ;;  %v15794_v32 = vrot.slane %v15737_v59, %v14727_v17 }
 0xbdd   :  { %v12311_v50 = vpop.f32.mrf.mxu0  ;;  %v12322_v42 = vpop.f32.mrf.mxu1 }
 0xbde   :  { %v10810_v48 = vmul.f32 -1.442695, %v6184_v0  ;;  %v10811_v40 = vmul.f32 -1.442695, %v6262_v8 }
 0xbe0   :  { %13148 = vpow2.f32 %v10810_v48 }
 0xbe1   :  { %v6430_v14 = vld [vmem:[#allocation6 + $0x38] sm:$0xff] }
 0xbe2   :  { %v6508_v42 = vld [vmem:[#allocation7 + $0x38] sm:$0xff] }
 0xbe4   :  { %v6419_v5 = vpop.f32.mrf.mxu1 }
 0xbe5   :  { %v6423_v12 = vadd.f32 %v6419_v5, %v6352_v22  ;;  %v6340_v31 = vpop.f32.mrf.mxu0 }
 0xbe6   :  { %v12344_v6 = vpop.f32.mrf.mxu1  ;;  %v6341_v24 = vadd.f32 %v6340_v31, %v15789_v55 }
 0xbe7   :  { %v10812_v39 = vmul.f32 -1.442695, %v6423_v12  ;;  %v12333_v11 = vpop.f32.mrf.mxu0 }
 0xbe9   :  { %13150 = vpow2.f32 %v10812_v39 }
 0xbea   :  { %13152 = vpow2.f32 %v10811_v40 }
 0xbed   :  { %v13149_v38 = vpop.eup %13148  ;;  %v6497_v60 = vpop.f32.mrf.mxu0 }
 0xbee   :  { %v6188_v51 = vadd.f32 1.0, %v13149_v38  ;;  %v6501_v16 = vadd.f32 %v6497_v60, %v6430_v14  ;;  %v6591_v38 = vld [vmem:[#allocation2 + $0x8] sm:$0xff] }
 0xbef   :  { %v12355_v45 = vpop.f32.mrf.mxu0  ;;  %v6579_v36 = vpop.f32.mrf.mxu1 }
 0xbf0   :  { %13154 = vrcp.f32 %v6188_v51  ;;  %v10813_v15 = vmul.f32 -1.442695, %v6501_v16  ;;  %v6580_v0 = vadd.f32 %v6579_v36, %v15794_v32 }
 0xbf1   :  { %v12366_v54 = vpop.f32.mrf.mxu1 }
 0xbf2   :  { %13156 = vpow2.f32 %v10813_v15  ;;  %v6672_v15 = vld [vmem:[#allocation3 + $0x8] sm:$0xff] }
 0xbf6   :  { %v13151_v21 = vpop.eup %13150 }
 0xbf7   :  { %v13153_v57 = vpop.eup %13152  ;;  %v6427_v52 = vadd.f32 1.0, %v13151_v21 }
 0xbf8   :  { %v6266_v63 = vadd.f32 1.0, %v13153_v57  ;;  %v6829_v57 = vld [vmem:[#allocation5 + $0x30] sm:$0xff] }
 0xbf9   :  { %13158 = vrcp.f32 %v6427_v52 }
 0xbfa   :  { %13160 = vrcp.f32 %v6266_v63 }
 0xbfd   :  { %v13155_v25 = vpop.eup %13154 }
 0xbfe   :  { %v6344_v27 = vmul.f32 %v13155_v25, %v6341_v24 }
 0xbff   :  { %v13157_v37 = vpop.eup %13156 }
 0xc00   :  { %v6345_v30 = vadd.f32 %v6344_v27, %v6269_v7  ;;  %v6505_v33 = vadd.f32 1.0, %v13157_v37 }
 0xc02   :  { %13162 = vtanh.f32 %v6345_v30 }
 0xc03   :  { %13164 = vrcp.f32 %v6505_v33  ;;  %v6910_v33 = vld [vmem:[#allocation6 + $0x30] sm:$0xff] }
 0xc06   :  { %v13159_v4 = vpop.eup %13158 }
 0xc07   :  { %v6583_v50 = vmul.f32 %v13159_v4, %v6580_v0  ;;  %v13161_v47 = vpop.eup %13160 }
 0xc08   :  { %v6347_v8 = vsub.f32 1.0, %v13161_v47  ;;  %v6349_v12 = vmul.f32 0.0, %v13161_v47 }
 0xc09   :  { %v6584_v48 = vadd.f32 %v6583_v50, %v6508_v42 }
 0xc0b   :  { %13166 = vtanh.f32 %v6584_v48 }
 0xc0f   :  { %v13163_v22 = vpop.eup %13162 }
 0xc10   :  { %v6348_v5 = vmul.f32 %v13163_v22, %v6347_v8  ;;  %v13165_v17 = vpop.eup %13164 }
 0xc11   :  { %v6586_v59 = vsub.f32 1.0, %v13165_v17  ;;  %v6588_v39 = vmul.f32 0.0, %v13165_v17 }
 0xc12   :  { %v15797_v31 = vadd.f32 %v6349_v12, %v6348_v5 }
 0xc14   :  { %6351 = vst.msk [vmem:[#allocation8] sm:$0xff] %vm736_vm2, %v15797_v31  ;;  %12376 = vmatmul.mubr.msk.f32.vlgmr.msra.gmra.mxu0 %vm736_vm2, %v15797_v31  ;;  %12387 = vmatmul.mubr.msk.f32.vlgmr.msra.gmra.mxu1 %vm736_vm2, %v15797_v31 }
 0xc15   :  { %12390 = vmatpush3.msra.mxu0 %v15623_v23  ;;  %12401 = vmatpush3.msra.mxu1 %v15625_v49 }
 0xc16   :  { %12391 = vmatprep.subr.mxu0 %v14075_v20  ;;  %12402 = vmatprep.subr.mxu1 %v14075_v20 }
 0xc17   :  { %12392 = vmatpush3.msra.mxu0 %v15631_v61  ;;  %12403 = vmatpush3.msra.mxu1 %v15633_v56 }
 0xc18   :  { %v13167_v40 = vpop.eup %13166  ;;  %12393 = vmatprep.subr.mxu0 %v14075_v20  ;;  %12404 = vmatprep.subr.mxu1 %v14075_v20 }
 0xc19   :  { %12394 = vmatpush3.msra.mxu0 %v15639_v26  ;;  %12405 = vmatpush3.msra.mxu1 %v15641_v1  ;;  %v6587_v6 = vmul.f32 %v13167_v40, %v6586_v59 }
 0xc1a   :  { %12395 = vmatprep.subr.mxu0 %v14075_v20  ;;  %12406 = vmatprep.subr.mxu1 %v14075_v20 }
 0xc1b   :  { %12396 = vmatpush3.msra.mxu0 %v15647_v18  ;;  %12397 = vmatprep.mubr.msk.f32.mxu0 %vm14076_vm1, %v14075_v20  ;;  %v15820_v11 = vadd.f32 %v6588_v39, %v6587_v6  ;;  %v6750_v6 = vld [vmem:[#allocation4 + $0x8] sm:$0xff] }
 0xc1c   :  { %12407 = vmatpush3.msra.mxu1 %v15649_v19  ;;  %12408 = vmatprep.mubr.msk.f32.mxu1 %vm14076_vm1, %v14075_v20 }
 0xc1d   :  { %12398 = vmatmul.mubr.msk.f32.vlgmr.msra.gmra.mxu0 %vm736_vm2, %v15797_v31  ;;  %6590 = vst.msk [vmem:[#allocation9 + $0x38] sm:$0xff] %vm736_vm2, %v15820_v11  ;;  %12409 = vmatmul.mubr.msk.f32.vlgmr.msra.gmra.mxu1 %vm736_vm2, %v15820_v11 }
 0xc1e   :  { %12411 = vmatprep.subr.mxu0 %v14075_v20  ;;  %12422 = vmatprep.subr.mxu1 %v14075_v20 }
 0xc1f   :  { %12412 = vmatpush3.msra.mxu0 %v15661_v62  ;;  %12423 = vmatpush3.msra.mxu1 %v15665_v2 }
 0xc20   :  { %12413 = vmatprep.subr.mxu0 %v14075_v20  ;;  %12424 = vmatprep.subr.mxu1 %v14075_v20 }
 0xc21   :  { %12414 = vmatpush3.msra.mxu0 %v15668_v29  ;;  %12425 = vmatpush3.msra.mxu1 %v15674_v34 }
 0xc22   :  { %12415 = vmatprep.subr.mxu0 %v14075_v20  ;;  %12426 = vmatprep.subr.mxu1 %v14075_v20 }
 0xc23   :  { %12416 = vmatpush3.msra.mxu0 %v15677_v3  ;;  %12427 = vmatpush3.msra.mxu1 %v15682_v53 }
 0xc24   :  { %12417 = vmatprep.subr.mxu0 %v14075_v20  ;;  %12428 = vmatprep.subr.mxu1 %v14075_v20 }
 0xc25   :  { %12418 = vmatpush3.msra.mxu0 %v15685_v13  ;;  %12419 = vmatprep.mubr.msk.f32.mxu0 %vm14076_vm1, %v14075_v20 }
 0xc26   :  { %12429 = vmatpush3.msra.mxu1 %v15690_v41  ;;  %12430 = vmatprep.mubr.msk.f32.mxu1 %vm14076_vm1, %v14075_v20 }
 0xc27   :  { %12420 = vmatmul.mubr.msk.f32.vlgmr.msra.gmra.mxu0 %vm736_vm2, %v15820_v11  ;;  %12431 = vmatmul.mubr.msk.f32.vlgmr.msra.gmra.mxu1 %vm736_vm2, %v15820_v11 }
 0xc28   :  { %12433 = vmatprep.subr.mxu0 %v14075_v20  ;;  %12444 = vmatprep.subr.mxu1 %v14075_v20 }
 0xc29   :  { %12434 = vmatpush3.msra.mxu0 %v15561_v35  ;;  %12445 = vmatpush3.msra.mxu1 %v15563_v58 }
 0xc2a   :  { %12435 = vmatprep.subr.mxu0 %v14075_v20  ;;  %12446 = vmatprep.subr.mxu1 %v14075_v20 }
 0xc2b   :  { %12436 = vmatpush3.msra.mxu0 %v15577_v9  ;;  %12447 = vmatpush3.msra.mxu1 %v15579_v43 }
 0xc2c   :  { %12437 = vmatprep.subr.mxu0 %v14075_v20  ;;  %12448 = vmatprep.subr.mxu1 %v14075_v20 }
 0xc2d   :  { %12438 = vmatpush3.msra.mxu0 %v15593_v44  ;;  %12449 = vmatpush3.msra.mxu1 %v15595_v10 }
 0xc2e   :  { %12439 = vmatprep.subr.mxu0 %v14075_v20  ;;  %12450 = vmatprep.subr.mxu1 %v14075_v20 }
 0xc2f   :  { %12440 = vmatpush3.msra.mxu0 %v15607_v28  ;;  %12451 = vmatpush3.msra.mxu1 %v15609_v46 }
 0xc30   :  { %12441 = vmatprep.mubr.msk.f32.mxu0 %vm14076_vm1, %v14075_v20  ;;  %12452 = vmatprep.mubr.msk.f32.mxu1 %vm14076_vm1, %v14075_v20 }
 0xc31   :  { %12455 = vmatprep.subr.mxu0 %v14075_v20  ;;  %12466 = vmatprep.subr.mxu1 %v14075_v20 }
 0xcd4   :  { %v6661_v14 = vpop.f32.mrf.mxu0  ;;  %v6739_v60 = vpop.f32.mrf.mxu1 }
 0xcd5   :  { %v6665_v51 = vadd.f32 %v6661_v14, %v6591_v38  ;;  %v6743_v54 = vadd.f32 %v6739_v60, %v6672_v15 }
 0xcd6   :  { %v12377_v16 = vpop.f32.mrf.mxu0  ;;  %v12388_v45 = vpop.f32.mrf.mxu1 }
 0xcd7   :  { %v10815_v36 = vmul.f32 -1.442695, %v6665_v51  ;;  %v10817_v24 = vmul.f32 -1.442695, %v6743_v54  ;;  %v6988_v45 = vld [vmem:[#allocation7 + $0x30] sm:$0xff] }
 0xcd9   :  { %13168 = vpow2.f32 %v10815_v36 }
 0xcdd   :  { %v6817_v21 = vpop.f32.mrf.mxu0  ;;  %v6899_v52 = vpop.f32.mrf.mxu1 }
 0xcde   :  { %v6903_v63 = vadd.f32 %v6899_v52, %v6829_v57  ;;  %v6818_v17 = vadd.f32 %v6817_v21, %v15789_v55 }
 0xcdf   :  { %v12399_v25 = vpop.f32.mrf.mxu0  ;;  %v12410_v27 = vpop.f32.mrf.mxu1 }
 0xce0   :  { %v10820_v7 = vmul.f32 -1.442695, %v6903_v63 }
 0xce2   :  { %13170 = vpow2.f32 %v10820_v7 }
 0xce3   :  { %13172 = vpow2.f32 %v10817_v24 }
 0xce6   :  { %v13169_v37 = vpop.eup %13168 }
 0xce7   :  { %v6669_v30 = vadd.f32 1.0, %v13169_v37  ;;  %v6977_v0 = vpop.f32.mrf.mxu0  ;;  %v7055_v4 = vpop.f32.mrf.mxu1 }
 0xce8   :  { %v6981_v50 = vadd.f32 %v6977_v0, %v6910_v33  ;;  %v7056_v60 = vadd.f32 %v7055_v4, %v15794_v32 }
 0xce9   :  { %13174 = vrcp.f32 %v6669_v30  ;;  %v12421_v42 = vpop.f32.mrf.mxu0  ;;  %v12432_v48 = vpop.f32.mrf.mxu1 }
 0xcea   :  { %v10822_v47 = vmul.f32 -1.442695, %v6981_v50 }
 0xcec   :  { %13176 = vpow2.f32 %v10822_v47 }
 0xcef   :  { %v13171_v8 = vpop.eup %13170 }
 0xcf0   :  { %v13173_v22 = vpop.eup %13172  ;;  %v6907_v5 = vadd.f32 1.0, %v13171_v8  ;;  %v7226_v8 = vld [vmem:[#allocation4 + $0x10] sm:$0xff] }
 0xcf1   :  { %v6747_v12 = vadd.f32 1.0, %v13173_v22 }
 0xcf2   :  { %13178 = vrcp.f32 %v6907_v5 }
 0xcf3   :  { %13180 = vrcp.f32 %v6747_v12 }
 0xcf6   :  { %v13175_v59 = vpop.eup %13174 }
 0xcf7   :  { %v6821_v40 = vmul.f32 %v13175_v59, %v6818_v17 }
 0xcf9   :  { %v13177_v39 = vpop.eup %13176  ;;  %v6822_v38 = vadd.f32 %v6821_v40, %v6750_v6  ;;  %v7464_v6 = vld [vmem:[#allocation7 + $0x28] sm:$0xff] }
 0xcfa   :  { %v6985_v14 = vadd.f32 1.0, %v13177_v39 }
 0xcfb   :  { %13182 = vtanh.f32 %v6822_v38 }
 0xcfc   :  { %13184 = vrcp.f32 %v6985_v14 }
 0xcff   :  { %v13179_v51 = vpop.eup %13178 }
 0xd00   :  { %v7059_v16 = vmul.f32 %v13179_v51, %v7056_v60  ;;  %v13181_v15 = vpop.eup %13180 }
 0xd01   :  { %v6824_v54 = vsub.f32 1.0, %v13181_v15  ;;  %v6826_v52 = vmul.f32 %v13181_v15, %v15797_v31  ;;  %v15972_v15 = vld [vmem:[#allocation30 + $0x18] sm:$0xff] }
 0xd02   :  { %v7060_v36 = vadd.f32 %v7059_v16, %v6988_v45 }
 0xd04   :  { %13186 = vtanh.f32 %v7060_v36 }
 0xd08   :  { %v13183_v57 = vpop.eup %13182 }
 0xd09   :  { %v6825_v21 = vmul.f32 %v13183_v57, %v6824_v54  ;;  %v13185_v24 = vpop.eup %13184  ;;  %v15975_v54 = vld [vmem:[#allocation37 + $0x18] sm:$0xff] }
 0xd0a   :  { %v7062_v31 = vsub.f32 1.0, %v13185_v24 }
 0xd0b   :  { %v15880_v63 = vadd.f32 %v6826_v52, %v6825_v21  ;;  %v15980_v21 = vld [vmem:[#allocation30 + $0x10] sm:$0xff] }
 0xd0c   :  { %v15983_v52 = vld [vmem:[#allocation37 + $0x10] sm:$0xff] }
 0xd0d   :  { %6828 = vst.msk [vmem:[#allocation8 + $0x8] sm:$0xff] %vm736_vm2, %v15880_v63  ;;  %12442 = vmatmul.mubr.msk.f32.vlgmr.msra.gmra.mxu0 %vm736_vm2, %v15880_v63  ;;  %12453 = vmatmul.mubr.msk.f32.vlgmr.msra.gmra.mxu1 %vm736_vm2, %v15880_v63 }
 0xd0e   :  { %12456 = vmatpush3.msra.mxu0 %v15623_v23  ;;  %12467 = vmatpush3.msra.mxu1 %v15625_v49  ;;  %v7064_v49 = vmul.f32 %v13185_v24, %v15820_v11 }
 0xd0f   :  { %12457 = vmatprep.subr.mxu0 %v14075_v20  ;;  %12468 = vmatprep.subr.mxu1 %v14075_v20 }
 0xd10   :  { %12458 = vmatpush3.msra.mxu0 %v15631_v61  ;;  %12469 = vmatpush3.msra.mxu1 %v15633_v56 }
 0xd11   :  { %v13187_v25 = vpop.eup %13186  ;;  %12459 = vmatprep.subr.mxu0 %v14075_v20  ;;  %12470 = vmatprep.subr.mxu1 %v14075_v20 }
 0xd12   :  { %12460 = vmatpush3.msra.mxu0 %v15639_v26  ;;  %12471 = vmatpush3.msra.mxu1 %v15641_v1  ;;  %v7063_v23 = vmul.f32 %v13187_v25, %v7062_v31  ;;  %v7305_v1 = vld [vmem:[#allocation5 + $0x28] sm:$0xff]  ;;  %v15988_v31 = vld [vmem:[#allocation30 + $0x8] sm:$0xff] }
 0xd13   :  { %12461 = vmatprep.subr.mxu0 %v14075_v20  ;;  %12472 = vmatprep.subr.mxu1 %v14075_v20  ;;  %v15991_v25 = vld [vmem:[#allocation37 + $0x8] sm:$0xff] }
 0xd14   :  { %12462 = vmatpush3.msra.mxu0 %v15647_v18  ;;  %12463 = vmatprep.mubr.msk.f32.mxu0 %vm14076_vm1, %v14075_v20  ;;  %v15904_v61 = vadd.f32 %v7064_v49, %v7063_v23  ;;  %v15997_v49 = vld [vmem:[#allocation30] sm:$0xff] }
 0xd15   :  { %12473 = vmatpush3.msra.mxu1 %v15649_v19  ;;  %12474 = vmatprep.mubr.msk.f32.mxu1 %vm14076_vm1, %v14075_v20 }
 0xd16   :  { %12464 = vmatmul.mubr.msk.f32.vlgmr.msra.gmra.mxu0 %vm736_vm2, %v15880_v63  ;;  %7066 = vst.msk [vmem:[#allocation9 + $0x30] sm:$0xff] %vm736_vm2, %v15904_v61  ;;  %12475 = vmatmul.mubr.msk.f32.vlgmr.msra.gmra.mxu1 %vm736_vm2, %v15904_v61 }
 0xd17   :  { %12477 = vmatprep.subr.mxu0 %v14075_v20  ;;  %12488 = vmatprep.subr.mxu1 %v14075_v20 }
 0xd18   :  { %12478 = vmatpush3.msra.mxu0 %v15661_v62  ;;  %12489 = vmatpush3.msra.mxu1 %v15665_v2 }
 0xd19   :  { %12479 = vmatprep.subr.mxu0 %v14075_v20  ;;  %12490 = vmatprep.subr.mxu1 %v14075_v20 }
 0xd1a   :  { %12480 = vmatpush3.msra.mxu0 %v15668_v29  ;;  %12491 = vmatpush3.msra.mxu1 %v15674_v34 }
 0xd1b   :  { %12481 = vmatprep.subr.mxu0 %v14075_v20  ;;  %12492 = vmatprep.subr.mxu1 %v14075_v20 }
 0xd1c   :  { %12482 = vmatpush3.msra.mxu0 %v15677_v3  ;;  %12493 = vmatpush3.msra.mxu1 %v15682_v53 }
 0xd1d   :  { %12483 = vmatprep.subr.mxu0 %v14075_v20  ;;  %12494 = vmatprep.subr.mxu1 %v14075_v20 }
 0xd1e   :  { %12484 = vmatpush3.msra.mxu0 %v15685_v13  ;;  %12485 = vmatprep.mubr.msk.f32.mxu0 %vm14076_vm1, %v14075_v20  ;;  %v7386_v13 = vld [vmem:[#allocation6 + $0x28] sm:$0xff] }
 0xd1f   :  { %12495 = vmatpush3.msra.mxu1 %v15690_v41  ;;  %12496 = vmatprep.mubr.msk.f32.mxu1 %vm14076_vm1, %v14075_v20 }
 0xd20   :  { %12486 = vmatmul.mubr.msk.f32.vlgmr.msra.gmra.mxu0 %vm736_vm2, %v15904_v61  ;;  %12497 = vmatmul.mubr.msk.f32.vlgmr.msra.gmra.mxu1 %vm736_vm2, %v15904_v61 }
 0xd21   :  { %12499 = vmatprep.subr.mxu0 %v14075_v20  ;;  %12510 = vmatprep.subr.mxu1 %v14075_v20 }
 0xd22   :  { %12500 = vmatpush3.msra.mxu0 %v15561_v35  ;;  %12511 = vmatpush3.msra.mxu1 %v15563_v58  ;;  %v7067_v35 = vld [vmem:[#allocation2 + $0x10] sm:$0xff] }
 0xd23   :  { %12501 = vmatprep.subr.mxu0 %v14075_v20  ;;  %12512 = vmatprep.subr.mxu1 %v14075_v20 }
 0xd24   :  { %12502 = vmatpush3.msra.mxu0 %v15577_v9  ;;  %12513 = vmatpush3.msra.mxu1 %v15579_v43 }
 0xd25   :  { %12503 = vmatprep.subr.mxu0 %v14075_v20  ;;  %12514 = vmatprep.subr.mxu1 %v14075_v20 }
 0xd26   :  { %12504 = vmatpush3.msra.mxu0 %v15593_v44  ;;  %12515 = vmatpush3.msra.mxu1 %v15595_v10 }
 0xd27   :  { %12505 = vmatprep.subr.mxu0 %v14075_v20  ;;  %12516 = vmatprep.subr.mxu1 %v14075_v20 }
 0xd28   :  { %12506 = vmatpush3.msra.mxu0 %v15607_v28  ;;  %12517 = vmatpush3.msra.mxu1 %v15609_v46  ;;  %v7148_v28 = vld [vmem:[#allocation3 + $0x10] sm:$0xff] }
 0xd29   :  { %12507 = vmatprep.mubr.msk.f32.mxu0 %vm14076_vm1, %v14075_v20  ;;  %12518 = vmatprep.mubr.msk.f32.mxu1 %vm14076_vm1, %v14075_v20 }
 0xd2a   :  { %12521 = vmatprep.subr.mxu0 %v14075_v20  ;;  %12532 = vmatprep.subr.mxu1 %v14075_v20 }
 0xdcd   :  { %v7137_v58 = vpop.f32.mrf.mxu0  ;;  %v7215_v9 = vpop.f32.mrf.mxu1 }
 0xdce   :  { %v7141_v43 = vadd.f32 %v7137_v58, %v7067_v35  ;;  %v7219_v46 = vadd.f32 %v7215_v9, %v7148_v28  ;;  %v16004_v58 = vld [vmem:[#allocation37] sm:$0xff]  ;;  %v16020_v9 = vld [vmem:[#allocation40 + $0x18] sm:$0xff] }
 0xdcf   :  { %v12443_v44 = vpop.f32.mrf.mxu0  ;;  %v12454_v10 = vpop.f32.mrf.mxu1  ;;  %v16041_v28 = vld [vmem:[#allocation39] sm:$0xff] }
 0xdd0   :  { %v10825_v56 = vmul.f32 -1.442695, %v7141_v43  ;;  %v10827_v62 = vmul.f32 -1.442695, %v7219_v46  ;;  %v16025_v43 = vld [vmem:[#allocation39 + $0x10] sm:$0xff]  ;;  %v16033_v10 = vld [vmem:[#allocation39 + $0x8] sm:$0xff] }
 0xdd1   :  { %v16028_v44 = vld [vmem:[#allocation40 + $0x10] sm:$0xff]  ;;  %v16046_v46 = vld [vmem:[#allocation40] sm:$0xff] }
 0xdd2   :  { %13188 = vpow2.f32 %v10825_v56  ;;  %v16036_v56 = vld [vmem:[#allocation40 + $0x8] sm:$0xff] }
 0xdd6   :  { %v7293_v26 = vpop.f32.mrf.mxu0  ;;  %v7375_v18 = vpop.f32.mrf.mxu1 }
 0xdd7   :  { %v7379_v19 = vadd.f32 %v7375_v18, %v7305_v1  ;;  %v7294_v42 = vadd.f32 %v7293_v26, %v15789_v55  ;;  %v16057_v26 = vld [vmem:[#allocation27 + $0x18] sm:$0xff]  ;;  %v16065_v18 = vld [vmem:[#allocation27 + $0x10] sm:$0xff] }
 0xdd8   :  { %v12465_v2 = vpop.f32.mrf.mxu0  ;;  %v12476_v29 = vpop.f32.mrf.mxu1  ;;  %v16060_v1 = vld [vmem:[#allocation28 + $0x18] sm:$0xff] }
 0xdd9   :  { %v10830_v34 = vmul.f32 -1.442695, %v7379_v19  ;;  %v16068_v19 = vld [vmem:[#allocation28 + $0x10] sm:$0xff]  ;;  %v16076_v2 = vld [vmem:[#allocation28 + $0x8] sm:$0xff]  ;;  %v16081_v29 = vld [vmem:[#allocation27] sm:$0xff] }
 0xddb   :  { %13190 = vpow2.f32 %v10830_v34  ;;  %v16084_v34 = vld [vmem:[#allocation28] sm:$0xff] }
 0xddc   :  { %13192 = vpow2.f32 %v10827_v62  ;;  %v16073_v62 = vld [vmem:[#allocation27 + $0x8] sm:$0xff] }
 0xddf   :  { %v13189_v3 = vpop.eup %13188 }
 0xde0   :  { %v7145_v53 = vadd.f32 1.0, %v13189_v3  ;;  %v7453_v41 = vpop.f32.mrf.mxu0  ;;  %v7531_v11 = vpop.f32.mrf.mxu1  ;;  %v7543_v3 = vld [vmem:[#allocation2 + $0x18] sm:$0xff] }
 0xde1   :  { %v7457_v27 = vadd.f32 %v7453_v41, %v7386_v13  ;;  %v7532_v17 = vadd.f32 %v7531_v11, %v15794_v32 }
 0xde2   :  { %13194 = vrcp.f32 %v7145_v53  ;;  %v12487_v7 = vpop.f32.mrf.mxu0  ;;  %v12498_v37 = vpop.f32.mrf.mxu1 }
 0xde3   :  { %v10832_v30 = vmul.f32 -1.442695, %v7457_v27  ;;  %v7624_v37 = vld [vmem:[#allocation3 + $0x18] sm:$0xff] }
 0xde5   :  { %13196 = vpow2.f32 %v10832_v30 }
 0xde8   :  { %v13191_v33 = vpop.eup %13190 }
 0xde9   :  { %v13193_v0 = vpop.eup %13192  ;;  %v7383_v4 = vadd.f32 1.0, %v13191_v33 }
 0xdea   :  { %v7223_v50 = vadd.f32 1.0, %v13193_v0  ;;  %v7781_v0 = vld [vmem:[#allocation5 + $0x20] sm:$0xff] }
 0xdeb   :  { %13198 = vrcp.f32 %v7383_v4 }
 0xdec   :  { %13200 = vrcp.f32 %v7223_v50 }
 0xdef   :  { %v13195_v48 = vpop.eup %13194 }
 0xdf0   :  { %v7297_v47 = vmul.f32 %v13195_v48, %v7294_v42 }
 0xdf2   :  { %v13197_v22 = vpop.eup %13196  ;;  %v7298_v5 = vadd.f32 %v7297_v47, %v7226_v8 }
 0xdf3   :  { %v7461_v12 = vadd.f32 1.0, %v13197_v22 }
 0xdf4   :  { %13202 = vtanh.f32 %v7298_v5 }
 0xdf5   :  { %13204 = vrcp.f32 %v7461_v12  ;;  %v7862_v12 = vld [vmem:[#allocation6 + $0x20] sm:$0xff] }
 0xdf8   :  { %v13199_v59 = vpop.eup %13198 }
 0xdf9   :  { %v7535_v40 = vmul.f32 %v13199_v59, %v7532_v17  ;;  %v13201_v38 = vpop.eup %13200 }
 0xdfa   :  { %v7300_v14 = vsub.f32 1.0, %v13201_v38  ;;  %v7302_v16 = vmul.f32 %v13201_v38, %v15880_v63 }
 0xdfb   :  { %v7536_v39 = vadd.f32 %v7535_v40, %v7464_v6 }
 0xdfd   :  { %13206 = vtanh.f32 %v7536_v39 }
 0xe01   :  { %v13203_v60 = vpop.eup %13202 }
 0xe02   :  { %v7301_v51 = vmul.f32 %v13203_v60, %v7300_v14  ;;  %v13205_v36 = vpop.eup %13204 }
 0xe03   :  { %v7538_v57 = vsub.f32 1.0, %v13205_v36  ;;  %v7540_v23 = vmul.f32 %v13205_v36, %v15904_v61  ;;  %v16017_v61 = vld [vmem:[#allocation39 + $0x18] sm:$0xff] }
 0xe04   :  { %v15964_v45 = vadd.f32 %v7302_v16, %v7301_v51 }
 0xe06   :  { %7304 = vst.msk [vmem:[#allocation8 + $0x10] sm:$0xff] %vm736_vm2, %v15964_v45  ;;  %12508 = vmatmul.mubr.msk.f32.vlgmr.msra.gmra.mxu0 %vm736_vm2, %v15964_v45  ;;  %12519 = vmatmul.mubr.msk.f32.vlgmr.msra.gmra.mxu1 %vm736_vm2, %v15964_v45 }
 0xe07   :  { %12522 = vmatpush3.msra.mxu0 %v15972_v15  ;;  %12533 = vmatpush3.msra.mxu1 %v15975_v54 }
 0xe08   :  { %12523 = vmatprep.subr.mxu0 %v14075_v20  ;;  %12534 = vmatprep.subr.mxu1 %v14075_v20 }
 0xe09   :  { %12524 = vmatpush3.msra.mxu0 %v15980_v21  ;;  %12535 = vmatpush3.msra.mxu1 %v15983_v52 }
 0xe0a   :  { %v13207_v63 = vpop.eup %13206  ;;  %12525 = vmatprep.subr.mxu0 %v14075_v20  ;;  %12536 = vmatprep.subr.mxu1 %v14075_v20 }
 0xe0b   :  { %v7539_v24 = vmul.f32 %v13207_v63, %v7538_v57  ;;  %12526 = vmatpush3.msra.mxu0 %v15988_v31  ;;  %12537 = vmatpush3.msra.mxu1 %v15991_v25 }
 0xe0c   :  { %12527 = vmatprep.subr.mxu0 %v14075_v20  ;;  %12538 = vmatprep.subr.mxu1 %v14075_v20 }
 0xe0d   :  { %12528 = vmatpush3.msra.mxu0 %v15997_v49  ;;  %12529 = vmatprep.mubr.msk.f32.mxu0 %vm14076_vm1, %v14075_v20  ;;  %v16002_v35 = vadd.f32 %v7540_v23, %v7539_v24  ;;  %v7702_v24 = vld [vmem:[#allocation4 + $0x18] sm:$0xff] }
 0xe0e   :  { %12539 = vmatpush3.msra.mxu1 %v16004_v58  ;;  %12540 = vmatprep.mubr.msk.f32.mxu1 %vm14076_vm1, %v14075_v20 }
 0xe0f   :  { %12530 = vmatmul.mubr.msk.f32.vlgmr.msra.gmra.mxu0 %vm736_vm2, %v15964_v45  ;;  %7542 = vst.msk [vmem:[#allocation9 + $0x28] sm:$0xff] %vm736_vm2, %v16002_v35  ;;  %12541 = vmatmul.mubr.msk.f32.vlgmr.msra.gmra.mxu1 %vm736_vm2, %v16002_v35 }
 0xe10   :  { %12543 = vmatprep.subr.mxu0 %v14075_v20  ;;  %12554 = vmatprep.subr.mxu1 %v14075_v20 }
 0xe11   :  { %12544 = vmatpush3.msra.mxu0 %v16017_v61  ;;  %12555 = vmatpush3.msra.mxu1 %v16020_v9 }
 0xe12   :  { %12545 = vmatprep.subr.mxu0 %v14075_v20  ;;  %12556 = vmatprep.subr.mxu1 %v14075_v20 }
 0xe13   :  { %12546 = vmatpush3.msra.mxu0 %v16025_v43  ;;  %12557 = vmatpush3.msra.mxu1 %v16028_v44 }
 0xe14   :  { %12547 = vmatprep.subr.mxu0 %v14075_v20  ;;  %12558 = vmatprep.subr.mxu1 %v14075_v20 }
 0xe15   :  { %12548 = vmatpush3.msra.mxu0 %v16033_v10  ;;  %12559 = vmatpush3.msra.mxu1 %v16036_v56 }
 0xe16   :  { %12549 = vmatprep.subr.mxu0 %v14075_v20  ;;  %12560 = vmatprep.subr.mxu1 %v14075_v20 }
 0xe17   :  { %12550 = vmatpush3.msra.mxu0 %v16041_v28  ;;  %12551 = vmatprep.mubr.msk.f32.mxu0 %vm14076_vm1, %v14075_v20 }
 0xe18   :  { %12561 = vmatpush3.msra.mxu1 %v16046_v46  ;;  %12562 = vmatprep.mubr.msk.f32.mxu1 %vm14076_vm1, %v14075_v20 }
 0xe19   :  { %12552 = vmatmul.mubr.msk.f32.vlgmr.msra.gmra.mxu0 %vm736_vm2, %v16002_v35  ;;  %12563 = vmatmul.mubr.msk.f32.vlgmr.msra.gmra.mxu1 %vm736_vm2, %v16002_v35 }
 0xe1a   :  { %12565 = vmatprep.subr.mxu0 %v14075_v20  ;;  %12576 = vmatprep.subr.mxu1 %v14075_v20 }
 0xe1b   :  { %12566 = vmatpush3.msra.mxu0 %v16057_v26  ;;  %12577 = vmatpush3.msra.mxu1 %v16060_v1 }
 0xe1c   :  { %12567 = vmatprep.subr.mxu0 %v14075_v20  ;;  %12578 = vmatprep.subr.mxu1 %v14075_v20 }
 0xe1d   :  { %12568 = vmatpush3.msra.mxu0 %v16065_v18  ;;  %12579 = vmatpush3.msra.mxu1 %v16068_v19 }
 0xe1e   :  { %12569 = vmatprep.subr.mxu0 %v14075_v20  ;;  %12580 = vmatprep.subr.mxu1 %v14075_v20 }
 0xe1f   :  { %12570 = vmatpush3.msra.mxu0 %v16073_v62  ;;  %12581 = vmatpush3.msra.mxu1 %v16076_v2 }
 0xe20   :  { %12571 = vmatprep.subr.mxu0 %v14075_v20  ;;  %12582 = vmatprep.subr.mxu1 %v14075_v20 }
 0xe21   :  { %12572 = vmatpush3.msra.mxu0 %v16081_v29  ;;  %12583 = vmatpush3.msra.mxu1 %v16084_v34 }
 0xe22   :  { %12573 = vmatprep.mubr.msk.f32.mxu0 %vm14076_vm1, %v14075_v20  ;;  %12584 = vmatprep.mubr.msk.f32.mxu1 %vm14076_vm1, %v14075_v20 }
 0xe23   :  { %12587 = vmatprep.subr.mxu0 %v14075_v20  ;;  %12598 = vmatprep.subr.mxu1 %v14075_v20 }
 0xec6   :  { %v7613_v53 = vpop.f32.mrf.mxu0  ;;  %v7691_v13 = vpop.f32.mrf.mxu1 }
 0xec7   :  { %v7617_v41 = vadd.f32 %v7613_v53, %v7543_v3  ;;  %v7695_v30 = vadd.f32 %v7691_v13, %v7624_v37 }
 0xec8   :  { %v12509_v11 = vpop.f32.mrf.mxu0  ;;  %v12520_v27 = vpop.f32.mrf.mxu1 }
 0xec9   :  { %v10835_v7 = vmul.f32 -1.442695, %v7617_v41  ;;  %v10837_v42 = vmul.f32 -1.442695, %v7695_v30  ;;  %v7940_v27 = vld [vmem:[#allocation7 + $0x20] sm:$0xff] }
 0xecb   :  { %13208 = vpow2.f32 %v10835_v7 }
 0xecf   :  { %v7769_v33 = vpop.f32.mrf.mxu0  ;;  %v7851_v4 = vpop.f32.mrf.mxu1 }
 0xed0   :  { %v7855_v50 = vadd.f32 %v7851_v4, %v7781_v0  ;;  %v7770_v36 = vadd.f32 %v7769_v33, %v15789_v55 }
 0xed1   :  { %v12531_v48 = vpop.f32.mrf.mxu0  ;;  %v12542_v47 = vpop.f32.mrf.mxu1 }
 0xed2   :  { %v10840_v8 = vmul.f32 -1.442695, %v7855_v50 }
 0xed4   :  { %13210 = vpow2.f32 %v10840_v8 }
 0xed5   :  { %13212 = vpow2.f32 %v10837_v42 }
 0xed8   :  { %v13209_v22 = vpop.eup %13208 }
 0xed9   :  { %v7621_v5 = vadd.f32 1.0, %v13209_v22  ;;  %v7929_v17 = vpop.f32.mrf.mxu0  ;;  %v8007_v59 = vpop.f32.mrf.mxu1 }
 0xeda   :  { %v7933_v40 = vadd.f32 %v7929_v17, %v7862_v12  ;;  %v8008_v13 = vadd.f32 %v8007_v59, %v15794_v32 }
 0xedb   :  { %13214 = vrcp.f32 %v7621_v5  ;;  %v12553_v6 = vpop.f32.mrf.mxu0  ;;  %v12564_v39 = vpop.f32.mrf.mxu1 }
 0xedc   :  { %v10842_v38 = vmul.f32 -1.442695, %v7933_v40  ;;  %v8100_v39 = vld [vmem:[#allocation3 + $0x20] sm:$0xff] }
 0xede   :  { %13216 = vpow2.f32 %v10842_v38 }
 0xee1   :  { %v13211_v14 = vpop.eup %13210 }
 0xee2   :  { %v13213_v60 = vpop.eup %13212  ;;  %v7859_v51 = vadd.f32 1.0, %v13211_v14 }
 0xee3   :  { %v7699_v16 = vadd.f32 1.0, %v13213_v60  ;;  %v8257_v60 = vld [vmem:[#allocation5 + $0x18] sm:$0xff] }
 0xee4   :  { %13218 = vrcp.f32 %v7859_v51 }
 0xee5   :  { %13220 = vrcp.f32 %v7699_v16 }
 0xee8   :  { %v13215_v57 = vpop.eup %13214 }
 0xee9   :  { %v7773_v63 = vmul.f32 %v13215_v57, %v7770_v36 }
 0xeeb   :  { %v13217_v23 = vpop.eup %13216  ;;  %v7774_v3 = vadd.f32 %v7773_v63, %v7702_v24 }
 0xeec   :  { %v7937_v53 = vadd.f32 1.0, %v13217_v23 }
 0xeed   :  { %13222 = vtanh.f32 %v7774_v3 }
 0xeee   :  { %13224 = vrcp.f32 %v7937_v53  ;;  %v8338_v53 = vld [vmem:[#allocation6 + $0x18] sm:$0xff] }
 0xef1   :  { %v13219_v41 = vpop.eup %13218 }
 0xef2   :  { %v8011_v11 = vmul.f32 %v13219_v41, %v8008_v13  ;;  %v13221_v37 = vpop.eup %13220 }
 0xef3   :  { %v7776_v30 = vsub.f32 1.0, %v13221_v37  ;;  %v7778_v4 = vmul.f32 %v13221_v37, %v15964_v45 }
 0xef4   :  { %v8012_v7 = vadd.f32 %v8011_v11, %v7940_v27 }
 0xef6   :  { %13226 = vtanh.f32 %v8012_v7 }
 0xefa   :  { %v13223_v0 = vpop.eup %13222 }
 0xefb   :  { %v7777_v33 = vmul.f32 %v13223_v0, %v7776_v30  ;;  %v13225_v42 = vpop.eup %13224 }
 0xefc   :  { %v8014_v45 = vsub.f32 1.0, %v13225_v42  ;;  %v8016_v8 = vmul.f32 %v13225_v42, %v16002_v35  ;;  %v8019_v35 = vld [vmem:[#allocation2 + $0x20] sm:$0xff] }
 0xefd   :  { %v16096_v50 = vadd.f32 %v7778_v4, %v7777_v33 }
 0xeff   :  { %7780 = vst.msk [vmem:[#allocation8 + $0x18] sm:$0xff] %vm736_vm2, %v16096_v50  ;;  %12574 = vmatmul.mubr.msk.f32.vlgmr.msra.gmra.mxu0 %vm736_vm2, %v16096_v50  ;;  %12585 = vmatmul.mubr.msk.f32.vlgmr.msra.gmra.mxu1 %vm736_vm2, %v16096_v50 }
 0xf00   :  { %12588 = vmatpush3.msra.mxu0 %v15972_v15  ;;  %12599 = vmatpush3.msra.mxu1 %v15975_v54 }
 0xf01   :  { %12589 = vmatprep.subr.mxu0 %v14075_v20  ;;  %12600 = vmatprep.subr.mxu1 %v14075_v20 }
 0xf02   :  { %12590 = vmatpush3.msra.mxu0 %v15980_v21  ;;  %12601 = vmatpush3.msra.mxu1 %v15983_v52 }
 0xf03   :  { %v13227_v48 = vpop.eup %13226  ;;  %12591 = vmatprep.subr.mxu0 %v14075_v20  ;;  %12602 = vmatprep.subr.mxu1 %v14075_v20 }
 0xf04   :  { %v8015_v47 = vmul.f32 %v13227_v48, %v8014_v45  ;;  %12592 = vmatpush3.msra.mxu0 %v15988_v31  ;;  %12603 = vmatpush3.msra.mxu1 %v15991_v25 }
 0xf05   :  { %12593 = vmatprep.subr.mxu0 %v14075_v20  ;;  %12604 = vmatprep.subr.mxu1 %v14075_v20 }
 0xf06   :  { %12594 = vmatpush3.msra.mxu0 %v15997_v49  ;;  %12595 = vmatprep.mubr.msk.f32.mxu0 %vm14076_vm1, %v14075_v20  ;;  %v16120_v22 = vadd.f32 %v8016_v8, %v8015_v47  ;;  %v8178_v47 = vld [vmem:[#allocation4 + $0x20] sm:$0xff] }
 0xf07   :  { %12605 = vmatpush3.msra.mxu1 %v16004_v58  ;;  %12606 = vmatprep.mubr.msk.f32.mxu1 %vm14076_vm1, %v14075_v20 }
 0xf08   :  { %12596 = vmatmul.mubr.msk.f32.vlgmr.msra.gmra.mxu0 %vm736_vm2, %v16096_v50  ;;  %8018 = vst.msk [vmem:[#allocation9 + $0x20] sm:$0xff] %vm736_vm2, %v16120_v22  ;;  %12607 = vmatmul.mubr.msk.f32.vlgmr.msra.gmra.mxu1 %vm736_vm2, %v16120_v22 }
 0xf09   :  { %12609 = vmatprep.subr.mxu0 %v14075_v20  ;;  %12620 = vmatprep.subr.mxu1 %v14075_v20 }
 0xf0a   :  { %12610 = vmatpush3.msra.mxu0 %v16017_v61  ;;  %12621 = vmatpush3.msra.mxu1 %v16020_v9 }
 0xf0b   :  { %12611 = vmatprep.subr.mxu0 %v14075_v20  ;;  %12622 = vmatprep.subr.mxu1 %v14075_v20 }
 0xf0c   :  { %12612 = vmatpush3.msra.mxu0 %v16025_v43  ;;  %12623 = vmatpush3.msra.mxu1 %v16028_v44 }
 0xf0d   :  { %12613 = vmatprep.subr.mxu0 %v14075_v20  ;;  %12624 = vmatprep.subr.mxu1 %v14075_v20 }
 0xf0e   :  { %12614 = vmatpush3.msra.mxu0 %v16033_v10  ;;  %12625 = vmatpush3.msra.mxu1 %v16036_v56 }
 0xf0f   :  { %12615 = vmatprep.subr.mxu0 %v14075_v20  ;;  %12626 = vmatprep.subr.mxu1 %v14075_v20 }
 0xf10   :  { %12616 = vmatpush3.msra.mxu0 %v16041_v28  ;;  %12617 = vmatprep.mubr.msk.f32.mxu0 %vm14076_vm1, %v14075_v20 }
 0xf11   :  { %12627 = vmatpush3.msra.mxu1 %v16046_v46  ;;  %12628 = vmatprep.mubr.msk.f32.mxu1 %vm14076_vm1, %v14075_v20 }
 0xf12   :  { %12618 = vmatmul.mubr.msk.f32.vlgmr.msra.gmra.mxu0 %vm736_vm2, %v16120_v22  ;;  %12629 = vmatmul.mubr.msk.f32.vlgmr.msra.gmra.mxu1 %vm736_vm2, %v16120_v22 }
 0xf13   :  { %12631 = vmatprep.subr.mxu0 %v14075_v20  ;;  %12642 = vmatprep.subr.mxu1 %v14075_v20 }
 0xf14   :  { %12632 = vmatpush3.msra.mxu0 %v16057_v26  ;;  %12643 = vmatpush3.msra.mxu1 %v16060_v1 }
 0xf15   :  { %12633 = vmatprep.subr.mxu0 %v14075_v20  ;;  %12644 = vmatprep.subr.mxu1 %v14075_v20 }
 0xf16   :  { %12634 = vmatpush3.msra.mxu0 %v16065_v18  ;;  %12645 = vmatpush3.msra.mxu1 %v16068_v19 }
 0xf17   :  { %12635 = vmatprep.subr.mxu0 %v14075_v20  ;;  %12646 = vmatprep.subr.mxu1 %v14075_v20 }
 0xf18   :  { %12636 = vmatpush3.msra.mxu0 %v16073_v62  ;;  %12647 = vmatpush3.msra.mxu1 %v16076_v2 }
 0xf19   :  { %12637 = vmatprep.subr.mxu0 %v14075_v20  ;;  %12648 = vmatprep.subr.mxu1 %v14075_v20 }
 0xf1a   :  { %12638 = vmatpush3.msra.mxu0 %v16081_v29  ;;  %12649 = vmatpush3.msra.mxu1 %v16084_v34 }
 0xf1b   :  { %12639 = vmatprep.mubr.msk.f32.mxu0 %vm14076_vm1, %v14075_v20  ;;  %12650 = vmatprep.mubr.msk.f32.mxu1 %vm14076_vm1, %v14075_v20 }
 0xf1c   :  { %12653 = vmatprep.subr.mxu0 %v14075_v20  ;;  %12664 = vmatprep.subr.mxu1 %v14075_v20 }
 0xfbf   :  { %v8089_v5 = vpop.f32.mrf.mxu0  ;;  %v8167_v12 = vpop.f32.mrf.mxu1 }
 0xfc0   :  { %v8093_v17 = vadd.f32 %v8089_v5, %v8019_v35  ;;  %v8171_v38 = vadd.f32 %v8167_v12, %v8100_v39 }
 0xfc1   :  { %v12575_v59 = vpop.f32.mrf.mxu0  ;;  %v12586_v40 = vpop.f32.mrf.mxu1 }
 0xfc2   :  { %v10845_v6 = vmul.f32 -1.442695, %v8093_v17  ;;  %v10847_v36 = vmul.f32 -1.442695, %v8171_v38  ;;  %v8416_v40 = vld [vmem:[#allocation7 + $0x18] sm:$0xff] }
 0xfc4   :  { %13228 = vpow2.f32 %v10845_v6 }
 0xfc8   :  { %v8245_v14 = vpop.f32.mrf.mxu0  ;;  %v8327_v51 = vpop.f32.mrf.mxu1 }
 0xfc9   :  { %v8331_v16 = vadd.f32 %v8327_v51, %v8257_v60  ;;  %v8246_v42 = vadd.f32 %v8245_v14, %v15789_v55 }
 0xfca   :  { %v12597_v57 = vpop.f32.mrf.mxu0  ;;  %v12608_v63 = vpop.f32.mrf.mxu1 }
 0xfcb   :  { %v10850_v24 = vmul.f32 -1.442695, %v8331_v16 }
 0xfcd   :  { %13230 = vpow2.f32 %v10850_v24 }
 0xfce   :  { %13232 = vpow2.f32 %v10847_v36 }
 0xfd1   :  { %v13229_v23 = vpop.eup %13228 }
 0xfd2   :  { %v8097_v3 = vadd.f32 1.0, %v13229_v23  ;;  %v8405_v13 = vpop.f32.mrf.mxu0  ;;  %v8483_v41 = vpop.f32.mrf.mxu1 }
 0xfd3   :  { %v8409_v11 = vadd.f32 %v8405_v13, %v8338_v53  ;;  %v8484_v12 = vadd.f32 %v8483_v41, %v15794_v32 }
 0xfd4   :  { %13234 = vrcp.f32 %v8097_v3  ;;  %v12619_v27 = vpop.f32.mrf.mxu0  ;;  %v12630_v7 = vpop.f32.mrf.mxu1 }
 0xfd5   :  { %v10852_v37 = vmul.f32 -1.442695, %v8409_v11  ;;  %v8576_v7 = vld [vmem:[#allocation3 + $0x28] sm:$0xff] }
 0xfd7   :  { %13236 = vpow2.f32 %v10852_v37 }
 0xfda   :  { %v13231_v30 = vpop.eup %13230 }
 0xfdb   :  { %v13233_v0 = vpop.eup %13232  ;;  %v8335_v33 = vadd.f32 1.0, %v13231_v30 }
 0xfdc   :  { %v8175_v4 = vadd.f32 1.0, %v13233_v0  ;;  %v8733_v0 = vld [vmem:[#allocation5 + $0x10] sm:$0xff] }
 0xfdd   :  { %13238 = vrcp.f32 %v8335_v33 }
 0xfde   :  { %13240 = vrcp.f32 %v8175_v4 }
 0xfe1   :  { %v13235_v45 = vpop.eup %13234 }
 0xfe2   :  { %v8249_v48 = vmul.f32 %v13235_v45, %v8246_v42 }
 0xfe4   :  { %v13237_v8 = vpop.eup %13236  ;;  %v8250_v35 = vadd.f32 %v8249_v48, %v8178_v47 }
 0xfe5   :  { %v8413_v5 = vadd.f32 1.0, %v13237_v8 }
 0xfe6   :  { %13242 = vtanh.f32 %v8250_v35 }
 0xfe7   :  { %13244 = vrcp.f32 %v8413_v5  ;;  %v8814_v5 = vld [vmem:[#allocation6 + $0x10] sm:$0xff] }
 0xfea   :  { %v13239_v17 = vpop.eup %13238 }
 0xfeb   :  { %v8487_v59 = vmul.f32 %v13239_v17, %v8484_v12  ;;  %v13241_v39 = vpop.eup %13240 }
 0xfec   :  { %v8252_v38 = vsub.f32 1.0, %v13241_v39  ;;  %v8254_v51 = vmul.f32 %v13241_v39, %v16096_v50 }
 0xfed   :  { %v8488_v6 = vadd.f32 %v8487_v59, %v8416_v40 }
 0xfef   :  { %13246 = vtanh.f32 %v8488_v6 }
 0xff3   :  { %v13243_v60 = vpop.eup %13242 }
 0xff4   :  { %v8253_v14 = vmul.f32 %v13243_v60, %v8252_v38  ;;  %v13245_v36 = vpop.eup %13244 }
 0xff5   :  { %v8490_v50 = vsub.f32 1.0, %v13245_v36  ;;  %v8492_v24 = vmul.f32 %v13245_v36, %v16120_v22  ;;  %v8495_v22 = vld [vmem:[#allocation2 + $0x28] sm:$0xff] }
 0xff6   :  { %v16180_v16 = vadd.f32 %v8254_v51, %v8253_v14 }
 0xff8   :  { %8256 = vst.msk [vmem:[#allocation8 + $0x20] sm:$0xff] %vm736_vm2, %v16180_v16  ;;  %12640 = vmatmul.mubr.msk.f32.vlgmr.msra.gmra.mxu0 %vm736_vm2, %v16180_v16  ;;  %12651 = vmatmul.mubr.msk.f32.vlgmr.msra.gmra.mxu1 %vm736_vm2, %v16180_v16 }
 0xff9   :  { %12654 = vmatpush3.msra.mxu0 %v15972_v15  ;;  %12665 = vmatpush3.msra.mxu1 %v15975_v54 }
 0xffa   :  { %12655 = vmatprep.subr.mxu0 %v14075_v20  ;;  %12666 = vmatprep.subr.mxu1 %v14075_v20 }
 0xffb   :  { %12656 = vmatpush3.msra.mxu0 %v15980_v21  ;;  %12667 = vmatpush3.msra.mxu1 %v15983_v52 }
 0xffc   :  { %v13247_v57 = vpop.eup %13246  ;;  %12657 = vmatprep.subr.mxu0 %v14075_v20  ;;  %12668 = vmatprep.subr.mxu1 %v14075_v20 }
 0xffd   :  { %v8491_v63 = vmul.f32 %v13247_v57, %v8490_v50  ;;  %12658 = vmatpush3.msra.mxu0 %v15988_v31  ;;  %12669 = vmatpush3.msra.mxu1 %v15991_v25 }
 0xffe   :  { %12659 = vmatprep.subr.mxu0 %v14075_v20  ;;  %12670 = vmatprep.subr.mxu1 %v14075_v20 }
 0xfff   :  { %12660 = vmatpush3.msra.mxu0 %v15997_v49  ;;  %12661 = vmatprep.mubr.msk.f32.mxu0 %vm14076_vm1, %v14075_v20  ;;  %v16204_v23 = vadd.f32 %v8492_v24, %v8491_v63  ;;  %v8654_v63 = vld [vmem:[#allocation4 + $0x28] sm:$0xff] }
0x1000   :  { %12671 = vmatpush3.msra.mxu1 %v16004_v58  ;;  %12672 = vmatprep.mubr.msk.f32.mxu1 %vm14076_vm1, %v14075_v20 }
0x1001   :  { %12662 = vmatmul.mubr.msk.f32.vlgmr.msra.gmra.mxu0 %vm736_vm2, %v16180_v16  ;;  %8494 = vst.msk [vmem:[#allocation9 + $0x18] sm:$0xff] %vm736_vm2, %v16204_v23  ;;  %12673 = vmatmul.mubr.msk.f32.vlgmr.msra.gmra.mxu1 %vm736_vm2, %v16204_v23 }
0x1002   :  { %12675 = vmatprep.subr.mxu0 %v14075_v20  ;;  %12686 = vmatprep.subr.mxu1 %v14075_v20 }
0x1003   :  { %12676 = vmatpush3.msra.mxu0 %v16017_v61  ;;  %12687 = vmatpush3.msra.mxu1 %v16020_v9 }
0x1004   :  { %12677 = vmatprep.subr.mxu0 %v14075_v20  ;;  %12688 = vmatprep.subr.mxu1 %v14075_v20 }
0x1005   :  { %12678 = vmatpush3.msra.mxu0 %v16025_v43  ;;  %12689 = vmatpush3.msra.mxu1 %v16028_v44 }
0x1006   :  { %12679 = vmatprep.subr.mxu0 %v14075_v20  ;;  %12690 = vmatprep.subr.mxu1 %v14075_v20 }
0x1007   :  { %12680 = vmatpush3.msra.mxu0 %v16033_v10  ;;  %12691 = vmatpush3.msra.mxu1 %v16036_v56 }
0x1008   :  { %12681 = vmatprep.subr.mxu0 %v14075_v20  ;;  %12692 = vmatprep.subr.mxu1 %v14075_v20 }
0x1009   :  { %12682 = vmatpush3.msra.mxu0 %v16041_v28  ;;  %12683 = vmatprep.mubr.msk.f32.mxu0 %vm14076_vm1, %v14075_v20 }
0x100a   :  { %12693 = vmatpush3.msra.mxu1 %v16046_v46  ;;  %12694 = vmatprep.mubr.msk.f32.mxu1 %vm14076_vm1, %v14075_v20 }
0x100b   :  { %12684 = vmatmul.mubr.msk.f32.vlgmr.msra.gmra.mxu0 %vm736_vm2, %v16204_v23  ;;  %12695 = vmatmul.mubr.msk.f32.vlgmr.msra.gmra.mxu1 %vm736_vm2, %v16204_v23 }
0x100c   :  { %12697 = vmatprep.subr.mxu0 %v14075_v20  ;;  %12708 = vmatprep.subr.mxu1 %v14075_v20 }
0x100d   :  { %12698 = vmatpush3.msra.mxu0 %v16057_v26  ;;  %12709 = vmatpush3.msra.mxu1 %v16060_v1 }
0x100e   :  { %12699 = vmatprep.subr.mxu0 %v14075_v20  ;;  %12710 = vmatprep.subr.mxu1 %v14075_v20 }
0x100f   :  { %12700 = vmatpush3.msra.mxu0 %v16065_v18  ;;  %12711 = vmatpush3.msra.mxu1 %v16068_v19 }
0x1010   :  { %12701 = vmatprep.subr.mxu0 %v14075_v20  ;;  %12712 = vmatprep.subr.mxu1 %v14075_v20 }
0x1011   :  { %12702 = vmatpush3.msra.mxu0 %v16073_v62  ;;  %12713 = vmatpush3.msra.mxu1 %v16076_v2 }
0x1012   :  { %12703 = vmatprep.subr.mxu0 %v14075_v20  ;;  %12714 = vmatprep.subr.mxu1 %v14075_v20 }
0x1013   :  { %12704 = vmatpush3.msra.mxu0 %v16081_v29  ;;  %12715 = vmatpush3.msra.mxu1 %v16084_v34 }
0x1014   :  { %12705 = vmatprep.mubr.msk.f32.mxu0 %vm14076_vm1, %v14075_v20  ;;  %12716 = vmatprep.mubr.msk.f32.mxu1 %vm14076_vm1, %v14075_v20 }
0x1015   :  { %12719 = vmatprep.subr.mxu0 %v14075_v20  ;;  %12730 = vmatprep.subr.mxu1 %v14075_v20 }
0x10b8   :  { %v8565_v3 = vpop.f32.mrf.mxu0  ;;  %v8643_v53 = vpop.f32.mrf.mxu1 }
0x10b9   :  { %v8569_v13 = vadd.f32 %v8565_v3, %v8495_v22  ;;  %v8647_v37 = vadd.f32 %v8643_v53, %v8576_v7 }
0x10ba   :  { %v12641_v41 = vpop.f32.mrf.mxu0  ;;  %v12652_v11 = vpop.f32.mrf.mxu1 }
0x10bb   :  { %v10855_v27 = vmul.f32 -1.442695, %v8569_v13  ;;  %v10857_v42 = vmul.f32 -1.442695, %v8647_v37  ;;  %v8892_v11 = vld [vmem:[#allocation7 + $0x10] sm:$0xff] }
0x10bd   :  { %13248 = vpow2.f32 %v10855_v27 }
0x10c1   :  { %v8721_v30 = vpop.f32.mrf.mxu0  ;;  %v8803_v33 = vpop.f32.mrf.mxu1 }
0x10c2   :  { %v8807_v4 = vadd.f32 %v8803_v33, %v8733_v0  ;;  %v8722_v36 = vadd.f32 %v8721_v30, %v15789_v55 }
0x10c3   :  { %v12663_v45 = vpop.f32.mrf.mxu0  ;;  %v12674_v48 = vpop.f32.mrf.mxu1 }
0x10c4   :  { %v10860_v47 = vmul.f32 -1.442695, %v8807_v4 }
0x10c6   :  { %13250 = vpow2.f32 %v10860_v47 }
0x10c7   :  { %13252 = vpow2.f32 %v10857_v42 }
0x10ca   :  { %v13249_v8 = vpop.eup %13248 }
0x10cb   :  { %v8573_v35 = vadd.f32 1.0, %v13249_v8  ;;  %v8881_v12 = vpop.f32.mrf.mxu0  ;;  %v8959_v17 = vpop.f32.mrf.mxu1 }
0x10cc   :  { %v8885_v59 = vadd.f32 %v8881_v12, %v8814_v5  ;;  %v8960_v53 = vadd.f32 %v8959_v17, %v15794_v32  ;;  %v9209_v5 = vld [vmem:[#allocation5 + $0x8] sm:$0xff] }
0x10cd   :  { %13254 = vrcp.f32 %v8573_v35  ;;  %v12685_v40 = vpop.f32.mrf.mxu0  ;;  %v12696_v6 = vpop.f32.mrf.mxu1 }
0x10ce   :  { %v10862_v39 = vmul.f32 -1.442695, %v8885_v59 }
0x10d0   :  { %13256 = vpow2.f32 %v10862_v39 }
0x10d3   :  { %v13251_v38 = vpop.eup %13250 }
0x10d4   :  { %v13253_v60 = vpop.eup %13252  ;;  %v8811_v14 = vadd.f32 1.0, %v13251_v38 }
0x10d5   :  { %v8651_v51 = vadd.f32 1.0, %v13253_v60 }
0x10d6   :  { %13258 = vrcp.f32 %v8811_v14  ;;  %v9290_v14 = vld [vmem:[#allocation6 + $0x8] sm:$0xff] }
0x10d7   :  { %13260 = vrcp.f32 %v8651_v51 }
0x10da   :  { %v13255_v50 = vpop.eup %13254 }
0x10db   :  { %v8725_v57 = vmul.f32 %v13255_v50, %v8722_v36 }
0x10dd   :  { %v13257_v24 = vpop.eup %13256  ;;  %v8726_v22 = vadd.f32 %v8725_v57, %v8654_v63 }
0x10de   :  { %v8889_v3 = vadd.f32 1.0, %v13257_v24 }
0x10df   :  { %13262 = vtanh.f32 %v8726_v22 }
0x10e0   :  { %13264 = vrcp.f32 %v8889_v3 }
0x10e3   :  { %v13259_v13 = vpop.eup %13258 }
0x10e4   :  { %v8963_v41 = vmul.f32 %v13259_v13, %v8960_v53  ;;  %v13261_v7 = vpop.eup %13260 }
0x10e5   :  { %v8728_v37 = vsub.f32 1.0, %v13261_v7  ;;  %v8730_v33 = vmul.f32 %v13261_v7, %v16180_v16  ;;  %v9130_v7 = vld [vmem:[#allocation4 + $0x30] sm:$0xff] }
0x10e6   :  { %v8964_v27 = vadd.f32 %v8963_v41, %v8892_v11 }
0x10e8   :  { %13266 = vtanh.f32 %v8964_v27 }
0x10ec   :  { %v13263_v0 = vpop.eup %13262 }
0x10ed   :  { %v8729_v30 = vmul.f32 %v13263_v0, %v8728_v37  ;;  %v13265_v42 = vpop.eup %13264 }
0x10ee   :  { %v8966_v16 = vsub.f32 1.0, %v13265_v42  ;;  %v8968_v47 = vmul.f32 %v13265_v42, %v16204_v23 }
0x10ef   :  { %v16264_v4 = vadd.f32 %v8730_v33, %v8729_v30 }
0x10f1   :  { %8732 = vst.msk [vmem:[#allocation8 + $0x28] sm:$0xff] %vm736_vm2, %v16264_v4  ;;  %12706 = vmatmul.mubr.msk.f32.vlgmr.msra.gmra.mxu0 %vm736_vm2, %v16264_v4  ;;  %12717 = vmatmul.mubr.msk.f32.vlgmr.msra.gmra.mxu1 %vm736_vm2, %v16264_v4 }
0x10f2   :  { %12720 = vmatpush3.msra.mxu0 %v15972_v15  ;;  %12731 = vmatpush3.msra.mxu1 %v15975_v54 }
0x10f3   :  { %12721 = vmatprep.subr.mxu0 %v14075_v20  ;;  %12732 = vmatprep.subr.mxu1 %v14075_v20 }
0x10f4   :  { %12722 = vmatpush3.msra.mxu0 %v15980_v21  ;;  %12733 = vmatpush3.msra.mxu1 %v15983_v52 }
0x10f5   :  { %v13267_v45 = vpop.eup %13266  ;;  %12723 = vmatprep.subr.mxu0 %v14075_v20  ;;  %12734 = vmatprep.subr.mxu1 %v14075_v20 }
0x10f6   :  { %v8967_v48 = vmul.f32 %v13267_v45, %v8966_v16  ;;  %12724 = vmatpush3.msra.mxu0 %v15988_v31  ;;  %12735 = vmatpush3.msra.mxu1 %v15991_v25  ;;  %v9368_v45 = vld [vmem:[#allocation7 + $0x8] sm:$0xff] }
0x10f7   :  { %12725 = vmatprep.subr.mxu0 %v14075_v20  ;;  %12736 = vmatprep.subr.mxu1 %v14075_v20 }
0x10f8   :  { %12726 = vmatpush3.msra.mxu0 %v15997_v49  ;;  %12727 = vmatprep.mubr.msk.f32.mxu0 %vm14076_vm1, %v14075_v20  ;;  %v16288_v8 = vadd.f32 %v8968_v47, %v8967_v48 }
0x10f9   :  { %12737 = vmatpush3.msra.mxu1 %v16004_v58  ;;  %12738 = vmatprep.mubr.msk.f32.mxu1 %vm14076_vm1, %v14075_v20 }
0x10fa   :  { %12728 = vmatmul.mubr.msk.f32.vlgmr.msra.gmra.mxu0 %vm736_vm2, %v16264_v4  ;;  %8970 = vst.msk [vmem:[#allocation9 + $0x10] sm:$0xff] %vm736_vm2, %v16288_v8  ;;  %12739 = vmatmul.mubr.msk.f32.vlgmr.msra.gmra.mxu1 %vm736_vm2, %v16288_v8 }
0x10fb   :  { %12741 = vmatprep.subr.mxu0 %v14075_v20  ;;  %12752 = vmatprep.subr.mxu1 %v14075_v20 }
0x10fc   :  { %12742 = vmatpush3.msra.mxu0 %v16017_v61  ;;  %12753 = vmatpush3.msra.mxu1 %v16020_v9 }
0x10fd   :  { %12743 = vmatprep.subr.mxu0 %v14075_v20  ;;  %12754 = vmatprep.subr.mxu1 %v14075_v20 }
0x10fe   :  { %12744 = vmatpush3.msra.mxu0 %v16025_v43  ;;  %12755 = vmatpush3.msra.mxu1 %v16028_v44 }
0x10ff   :  { %12745 = vmatprep.subr.mxu0 %v14075_v20  ;;  %12756 = vmatprep.subr.mxu1 %v14075_v20 }
0x1100   :  { %12746 = vmatpush3.msra.mxu0 %v16033_v10  ;;  %12757 = vmatpush3.msra.mxu1 %v16036_v56 }
0x1101   :  { %12747 = vmatprep.subr.mxu0 %v14075_v20  ;;  %12758 = vmatprep.subr.mxu1 %v14075_v20 }
0x1102   :  { %12748 = vmatpush3.msra.mxu0 %v16041_v28  ;;  %12749 = vmatprep.mubr.msk.f32.mxu0 %vm14076_vm1, %v14075_v20 }
0x1103   :  { %12759 = vmatpush3.msra.mxu1 %v16046_v46  ;;  %12760 = vmatprep.mubr.msk.f32.mxu1 %vm14076_vm1, %v14075_v20 }
0x1104   :  { %12750 = vmatmul.mubr.msk.f32.vlgmr.msra.gmra.mxu0 %vm736_vm2, %v16288_v8  ;;  %12761 = vmatmul.mubr.msk.f32.vlgmr.msra.gmra.mxu1 %vm736_vm2, %v16288_v8 }
0x1105   :  { %12763 = vmatprep.subr.mxu0 %v14075_v20  ;;  %12774 = vmatprep.subr.mxu1 %v14075_v20 }
0x1106   :  { %12764 = vmatpush3.msra.mxu0 %v16057_v26  ;;  %12775 = vmatpush3.msra.mxu1 %v16060_v1  ;;  %v8971_v26 = vld [vmem:[#allocation2 + $0x30] sm:$0xff] }
0x1107   :  { %12765 = vmatprep.subr.mxu0 %v14075_v20  ;;  %12776 = vmatprep.subr.mxu1 %v14075_v20 }
0x1108   :  { %12766 = vmatpush3.msra.mxu0 %v16065_v18  ;;  %12777 = vmatpush3.msra.mxu1 %v16068_v19 }
0x1109   :  { %12767 = vmatprep.subr.mxu0 %v14075_v20  ;;  %12778 = vmatprep.subr.mxu1 %v14075_v20 }
0x110a   :  { %12768 = vmatpush3.msra.mxu0 %v16073_v62  ;;  %12779 = vmatpush3.msra.mxu1 %v16076_v2 }
0x110b   :  { %12769 = vmatprep.subr.mxu0 %v14075_v20  ;;  %12780 = vmatprep.subr.mxu1 %v14075_v20 }
0x110c   :  { %12770 = vmatpush3.msra.mxu0 %v16081_v29  ;;  %12781 = vmatpush3.msra.mxu1 %v16084_v34  ;;  %v9052_v29 = vld [vmem:[#allocation3 + $0x30] sm:$0xff] }
0x110d   :  { %12771 = vmatprep.mubr.msk.f32.mxu0 %vm14076_vm1, %v14075_v20  ;;  %12782 = vmatprep.mubr.msk.f32.mxu1 %vm14076_vm1, %v14075_v20 }
0x110e   :  { %12785 = vmatprep.subr.mxu0 %v14075_v20  ;;  %12796 = vmatprep.subr.mxu1 %v14075_v20 }
0x11b1   :  { %v9041_v1 = vpop.f32.mrf.mxu0  ;;  %v9119_v18 = vpop.f32.mrf.mxu1 }
0x11b2   :  { %v9045_v19 = vadd.f32 %v9041_v1, %v8971_v26  ;;  %v9123_v34 = vadd.f32 %v9119_v18, %v9052_v29 }
0x11b3   :  { %v12707_v62 = vpop.f32.mrf.mxu0  ;;  %v12718_v2 = vpop.f32.mrf.mxu1 }
0x11b4   :  { %v10865_v23 = vmul.f32 -1.442695, %v9045_v19  ;;  %v10867_v59 = vmul.f32 -1.442695, %v9123_v34 }
0x11b6   :  { %13268 = vpow2.f32 %v10865_v23 }
0x11ba   :  { %v9197_v35 = vpop.f32.mrf.mxu0  ;;  %v9279_v12 = vpop.f32.mrf.mxu1 }
0x11bb   :  { %v9283_v17 = vadd.f32 %v9279_v12, %v9209_v5  ;;  %v9198_v41 = vadd.f32 %v9197_v35, %v15789_v55 }
0x11bc   :  { %v12729_v40 = vpop.f32.mrf.mxu0  ;;  %v12740_v6 = vpop.f32.mrf.mxu1 }
0x11bd   :  { %v10870_v39 = vmul.f32 -1.442695, %v9283_v17  ;;  %v9528_v17 = vld [vmem:[#allocation3 + $0x38] sm:$0xff]  ;;  %v9685_v6 = vld [vmem:[#allocation5] sm:$0xff] }
0x11bf   :  { %13270 = vpow2.f32 %v10870_v39 }
0x11c0   :  { %13272 = vpow2.f32 %v10867_v59 }
0x11c3   :  { %v13269_v38 = vpop.eup %13268 }
0x11c4   :  { %v9049_v60 = vadd.f32 1.0, %v13269_v38  ;;  %v9357_v51 = vpop.f32.mrf.mxu0  ;;  %v9435_v36 = vpop.f32.mrf.mxu1 }
0x11c5   :  { %v9361_v50 = vadd.f32 %v9357_v51, %v9290_v14  ;;  %v9436_v33 = vadd.f32 %v9435_v36, %v15794_v32 }
0x11c6   :  { %13274 = vrcp.f32 %v9049_v60  ;;  %v12751_v57 = vpop.f32.mrf.mxu0  ;;  %v12762_v63 = vpop.f32.mrf.mxu1 }
0x11c7   :  { %v10872_v24 = vmul.f32 -1.442695, %v9361_v50  ;;  %v9766_v63 = vld [vmem:[#allocation6] sm:$0xff] }
0x11c9   :  { %13276 = vpow2.f32 %v10872_v24 }
0x11cc   :  { %v13271_v22 = vpop.eup %13270 }
0x11cd   :  { %v13273_v3 = vpop.eup %13272  ;;  %v9287_v53 = vadd.f32 1.0, %v13271_v22 }
0x11ce   :  { %v9127_v13 = vadd.f32 1.0, %v13273_v3 }
0x11cf   :  { %13278 = vrcp.f32 %v9287_v53 }
0x11d0   :  { %13280 = vrcp.f32 %v9127_v13 }
0x11d3   :  { %v13275_v11 = vpop.eup %13274 }
0x11d4   :  { %v9201_v27 = vmul.f32 %v13275_v11, %v9198_v41 }
0x11d6   :  { %v13277_v37 = vpop.eup %13276  ;;  %v9202_v0 = vadd.f32 %v9201_v27, %v9130_v7 }
0x11d7   :  { %v9365_v30 = vadd.f32 1.0, %v13277_v37 }
0x11d8   :  { %13282 = vtanh.f32 %v9202_v0 }
0x11d9   :  { %13284 = vrcp.f32 %v9365_v30 }
0x11dc   :  { %v13279_v42 = vpop.eup %13278 }
0x11dd   :  { %v9439_v16 = vmul.f32 %v13279_v42, %v9436_v33  ;;  %v13281_v47 = vpop.eup %13280  ;;  %v9606_v42 = vld [vmem:[#allocation4 + $0x38] sm:$0xff] }
0x11de   :  { %v9204_v26 = vsub.f32 1.0, %v13281_v47  ;;  %v9206_v19 = vmul.f32 %v13281_v47, %v16264_v4 }
0x11df   :  { %v9440_v48 = vadd.f32 %v9439_v16, %v9368_v45 }
0x11e1   :  { %13286 = vtanh.f32 %v9440_v48 }
0x11e5   :  { %v13283_v1 = vpop.eup %13282 }
0x11e6   :  { %v9205_v18 = vmul.f32 %v13283_v1, %v9204_v26  ;;  %v13285_v2 = vpop.eup %13284 }
0x11e7   :  { %v9442_v4 = vsub.f32 1.0, %v13285_v2 }
0x11e8   :  { %v16348_v62 = vadd.f32 %v9206_v19, %v9205_v18  ;;  %v9844_v18 = vld [vmem:[#allocation7] sm:$0xff] }
0x11ea   :  { %9208 = vst.msk [vmem:[#allocation8 + $0x30] sm:$0xff] %vm736_vm2, %v16348_v62  ;;  %12772 = vmatmul.mubr.msk.f32.vlgmr.msra.gmra.mxu0 %vm736_vm2, %v16348_v62  ;;  %12783 = vmatmul.mubr.msk.f32.vlgmr.msra.gmra.mxu1 %vm736_vm2, %v16348_v62 }
0x11eb   :  { %12786 = vmatpush3.msra.mxu0 %v15972_v15  ;;  %12797 = vmatpush3.msra.mxu1 %v15975_v54  ;;  %v9444_v15 = vmul.f32 %v13285_v2, %v16288_v8 }
0x11ec   :  { %12787 = vmatprep.subr.mxu0 %v14075_v20  ;;  %12798 = vmatprep.subr.mxu1 %v14075_v20 }
0x11ed   :  { %12788 = vmatpush3.msra.mxu0 %v15980_v21  ;;  %12799 = vmatpush3.msra.mxu1 %v15983_v52  ;;  %v9926_v21 = vld [vmem:[#allocation8 + $0x8] sm:$0xff] }
0x11ee   :  { %v13287_v23 = vpop.eup %13286  ;;  %12789 = vmatprep.subr.mxu0 %v14075_v20  ;;  %12800 = vmatprep.subr.mxu1 %v14075_v20 }
0x11ef   :  { %v9443_v29 = vmul.f32 %v13287_v23, %v9442_v4  ;;  %12790 = vmatpush3.msra.mxu0 %v15988_v31  ;;  %12801 = vmatpush3.msra.mxu1 %v15991_v25  ;;  %v9936_v31 = vld [vmem:[#allocation9 + $0x18] sm:$0xff] }
0x11f0   :  { %12791 = vmatprep.subr.mxu0 %v14075_v20  ;;  %12802 = vmatprep.subr.mxu1 %v14075_v20 }
0x11f1   :  { %12792 = vmatpush3.msra.mxu0 %v15997_v49  ;;  %12793 = vmatprep.mubr.msk.f32.mxu0 %vm14076_vm1, %v14075_v20  ;;  %v16372_v54 = vadd.f32 %v9444_v15, %v9443_v29  ;;  %v9928_v49 = vld [vmem:[#allocation8 + $0x18] sm:$0xff] }
0x11f2   :  { %12803 = vmatpush3.msra.mxu1 %v16004_v58  ;;  %12804 = vmatprep.mubr.msk.f32.mxu1 %vm14076_vm1, %v14075_v20 }
0x11f3   :  { %12794 = vmatmul.mubr.msk.f32.vlgmr.msra.gmra.mxu0 %vm736_vm2, %v16348_v62  ;;  %9446 = vst.msk [vmem:[#allocation9 + $0x8] sm:$0xff] %vm736_vm2, %v16372_v54  ;;  %12805 = vmatmul.mubr.msk.f32.vlgmr.msra.gmra.mxu1 %vm736_vm2, %v16372_v54 }
0x11f4   :  { %12807 = vmatprep.subr.mxu0 %v14075_v20  ;;  %12818 = vmatprep.subr.mxu1 %v14075_v20 }
0x11f5   :  { %12808 = vmatpush3.msra.mxu0 %v16017_v61  ;;  %12819 = vmatpush3.msra.mxu1 %v16020_v9  ;;  %v16411_v61 = vadd.f32 %v9936_v31, %v9928_v49  ;;  %v9930_v9 = vld [vmem:[#allocation8 + $0x28] sm:$0xff] }
0x11f6   :  { %12809 = vmatprep.subr.mxu0 %v14075_v20  ;;  %12820 = vmatprep.subr.mxu1 %v14075_v20 }
0x11f7   :  { %12810 = vmatpush3.msra.mxu0 %v16025_v43  ;;  %12821 = vmatpush3.msra.mxu1 %v16028_v44  ;;  %v9938_v43 = vld [vmem:[#allocation9 + $0x28] sm:$0xff]  ;;  %v9958_v44 = vsel %vm736_vm2, %v16411_v61, 0.0 }
0x11f8   :  { %12811 = vmatprep.subr.mxu0 %v14075_v20  ;;  %12822 = vmatprep.subr.mxu1 %v14075_v20 }
0x11f9   :  { %12812 = vmatpush3.msra.mxu0 %v16033_v10  ;;  %12823 = vmatpush3.msra.mxu1 %v16036_v56  ;;  %v16415_v10 = vadd.f32 %v9938_v43, %v9930_v9 }
0x11fa   :  { %12813 = vmatprep.subr.mxu0 %v14075_v20  ;;  %12824 = vmatprep.subr.mxu1 %v14075_v20  ;;  %v9934_v52 = vld [vmem:[#allocation9 + $0x8] sm:$0xff] }
0x11fb   :  { %12814 = vmatpush3.msra.mxu0 %v16041_v28  ;;  %12815 = vmatprep.mubr.msk.f32.mxu0 %vm14076_vm1, %v14075_v20  ;;  %v16400_v25 = vadd.f32 %v9934_v52, %v9926_v21  ;;  %v9964_v56 = vsel %vm736_vm2, %v16415_v10, 0.0  ;;  %v9447_v28 = vld [vmem:[#allocation2 + $0x38] sm:$0xff] }
0x11fc   :  { %12825 = vmatpush3.msra.mxu1 %v16046_v46  ;;  %12826 = vmatprep.mubr.msk.f32.mxu1 %vm14076_vm1, %v14075_v20 }
0x11fd   :  { %12816 = vmatmul.mubr.msk.f32.vlgmr.msra.gmra.mxu0 %vm736_vm2, %v16372_v54  ;;  %12827 = vmatmul.mubr.msk.f32.vlgmr.msra.gmra.mxu1 %vm736_vm2, %v16372_v54  ;;  %v9952_v58 = vsel %vm736_vm2, %v16400_v25, 0.0 }
0x11fe   :  { %9953 = vadd.xlane.f32.xlu1 %v9952_v58 }
0x1202   :  { %9959 = vadd.xlane.f32.xlu1 %v9958_v44 }
0x1206   :  { %9965 = vadd.xlane.f32.xlu1 %v9964_v56 }
0x12aa   :  { %v9517_v46 = vpop.f32.mrf.mxu0  ;;  %v9595_v8 = vpop.f32.mrf.mxu1 }
0x12ab   :  { %v9521_v34 = vadd.f32 %v9517_v46, %v9447_v28  ;;  %v9599_v59 = vadd.f32 %v9595_v8, %v9528_v17 }
0x12ac   :  { %v12773_v35 = vpop.f32.mrf.mxu0  ;;  %v12784_v5 = vpop.f32.mrf.mxu1 }
0x12ad   :  { %v10875_v12 = vmul.f32 -1.442695, %v9521_v34  ;;  %v10877_v60 = vmul.f32 -1.442695, %v9599_v59 }
0x12af   :  { %13288 = vpow2.f32 %v10875_v12 }
0x12b3   :  { %v9673_v40 = vpop.f32.mrf.mxu0  ;;  %v9755_v39 = vpop.f32.mrf.mxu1 }
0x12b4   :  { %v9759_v38 = vadd.f32 %v9755_v39, %v9685_v6  ;;  %v9674_v0 = vadd.f32 %v9673_v40, %v15789_v55  ;;  %v9954_v55 = vpop.xlane.xlu1 %9953  ;;  %v9925_v40 = vld [vmem:[#allocation8] sm:$0xff] }
0x12b5   :  { %v12795_v14 = vpop.f32.mrf.mxu0  ;;  %v12806_v51 = vpop.f32.mrf.mxu1  ;;  %v9974_v49 = vmul.f32 0.03125, %v9954_v55 }
0x12b6   :  { %v10880_v36 = vmul.f32 -1.442695, %v9759_v38 }
0x12b7   :  { %v16425_v44 = vsub.f32 %v16400_v25, %v9974_v49 }
0x12b8   :  { %13290 = vpow2.f32 %v10880_v36  ;;  %v9960_v31 = vpop.xlane.xlu1 %9959  ;;  %v9929_v36 = vld [vmem:[#allocation8 + $0x20] sm:$0xff] }
0x12b9   :  { %13292 = vpow2.f32 %v10877_v60  ;;  %v9976_v56 = vmul.f32 0.03125, %v9960_v31  ;;  %v9927_v60 = vld [vmem:[#allocation8 + $0x10] sm:$0xff] }
0x12bb   :  { %v16429_v35 = vsub.f32 %v16411_v61, %v9976_v56  ;;  %v9935_v61 = vld [vmem:[#allocation9 + $0x10] sm:$0xff] }
0x12bc   :  { %v13289_v50 = vpop.eup %13288  ;;  %v9966_v28 = vpop.xlane.xlu1 %9965 }
0x12bd   :  { %v9525_v57 = vadd.f32 1.0, %v13289_v50  ;;  %v9833_v24 = vpop.f32.mrf.mxu0  ;;  %v9911_v22 = vpop.f32.mrf.mxu1  ;;  %v9978_v5 = vmul.f32 0.03125, %v9966_v28  ;;  %v9992_v59 = vmul.f32 %v16429_v35, %v16429_v35 }
0x12be   :  { %v9837_v3 = vadd.f32 %v9833_v24, %v9766_v63  ;;  %v9912_v47 = vadd.f32 %v9911_v22, %v15794_v32  ;;  %v9931_v22 = vld [vmem:[#allocation8 + $0x30] sm:$0xff] }
0x12bf   :  { %13294 = vrcp.f32 %v9525_v57  ;;  %v12817_v53 = vpop.f32.mrf.mxu0  ;;  %v12828_v13 = vpop.f32.mrf.mxu1  ;;  %v16435_v25 = vsub.f32 %v16415_v10, %v9978_v5  ;;  %v10006_v38 = vsel %vm736_vm2, %v9992_v59, 0.0  ;;  %v9943_v10 = vadd.f32 %v9935_v61, %v9927_v60  ;;  %v9937_v57 = vld [vmem:[#allocation9 + $0x20] sm:$0xff] }
0x12c0   :  { %v10882_v41 = vmul.f32 -1.442695, %v9837_v3  ;;  %v9945_v24 = vadd.f32 %v9937_v57, %v9929_v36  ;;  %v9939_v3 = vld [vmem:[#allocation9 + $0x30] sm:$0xff]  ;;  %v10095_v36 = vld [vmem:[#allocation49 + $0x8] sm:$0xff]  ;;  %v10094_v57 = vld [vmem:[#allocation49] sm:$0xff] }
0x12c1   :  { %v9994_v14 = vmul.f32 %v16435_v25, %v16435_v25  ;;  %v9955_v63 = vsel %vm736_vm2, %v9943_v10, 0.0  ;;  %v9947_v13 = vadd.f32 %v9939_v3, %v9931_v22  ;;  %v13407_v22 = vld [vmem:[%s16644_s29 + $0x30] sm:$0xff] }
0x12c2   :  { %13296 = vpow2.f32 %v10882_v41  ;;  %v9961_v53 = vsel %vm736_vm2, %v9945_v24, 0.0  ;;  %v554_v3 = vsel %vm535_vm0, %v13407_v22, 0.0 }
0x12c3   :  { %v10012_v50 = vsel %vm736_vm2, %v9994_v14, 0.0  ;;  %v9967_v41 = vsel %vm736_vm2, %v9947_v13, 0.0  ;;  %v10097_v14 = vld [vmem:[#allocation49 + $0x18] sm:$0xff] }
0x12c4   :  { %12849 = vmatprep.subr.mxu1 %v10097_v14 }
0x12c5   :  { %v13291_v11 = vpop.eup %13290  ;;  %12850 = vmatpush3.msra.mxu1 %v10097_v14 }
0x12c6   :  { %v13293_v27 = vpop.eup %13292  ;;  %v9763_v7 = vadd.f32 1.0, %v13291_v11 }
0x12c7   :  { %v9603_v37 = vadd.f32 1.0, %v13293_v27 }
0x12c8   :  { %13298 = vrcp.f32 %v9763_v7 }
0x12c9   :  { %13300 = vrcp.f32 %v9603_v37 }
0x12cc   :  { %v13295_v30 = vpop.eup %13294 }
0x12cd   :  { %v9677_v33 = vmul.f32 %v13295_v30, %v9674_v0 }
0x12cf   :  { %v13297_v16 = vpop.eup %13296  ;;  %v9678_v45 = vadd.f32 %v9677_v33, %v9606_v42 }
0x12d0   :  { %v9841_v48 = vadd.f32 1.0, %v13297_v16 }
0x12d1   :  { %13302 = vtanh.f32 %v9678_v45 }
0x12d2   :  { %13304 = vrcp.f32 %v9841_v48 }
0x12d5   :  { %v13299_v26 = vpop.eup %13298 }
0x12d6   :  { %v9915_v1 = vmul.f32 %v13299_v26, %v9912_v47  ;;  %v13301_v2 = vpop.eup %13300 }
0x12d7   :  { %v9680_v4 = vsub.f32 1.0, %v13301_v2  ;;  %v9682_v29 = vmul.f32 %v13301_v2, %v16348_v62  ;;  %v9940_v62 = vld [vmem:[#allocation9 + $0x38] sm:$0xff] }
0x12d8   :  { %v9916_v19 = vadd.f32 %v9915_v1, %v9844_v18 }
0x12da   :  { %13306 = vtanh.f32 %v9916_v19 }
0x12de   :  { %v13303_v23 = vpop.eup %13302 }
0x12df   :  { %v9681_v15 = vmul.f32 %v13303_v23, %v9680_v4  ;;  %v13305_v52 = vpop.eup %13304 }
0x12e0   :  { %v9918_v32 = vsub.f32 1.0, %v13305_v52  ;;  %v9920_v9 = vmul.f32 %v13305_v52, %v16372_v54  ;;  %v9990_v54 = vmul.f32 %v16425_v44, %v16425_v44 }
0x12e1   :  { %v9683_v21 = vadd.f32 %v9682_v29, %v9681_v15 }
0x12e2   :  { %v10000_v17 = vsel %vm736_vm2, %v9990_v54, 0.0 }
0x12e3   :  { %9684 = vst.msk [vmem:[#allocation8 + $0x38] sm:$0xff] %vm736_vm2, %v9683_v21 }
0x12e7   :  { %v13307_v58 = vpop.eup %13306 }
0x12e8   :  { %v9919_v43 = vmul.f32 %v13307_v58, %v9918_v32 }
0x12ea   :  { %v9921_v46 = vadd.f32 %v9920_v9, %v9919_v43  ;;  %v9932_v8 = vld [vmem:[#allocation8 + $0x38] sm:$0xff]  ;;  %v16465_v43 = vld [vmem:[#allocation43] ss:$0 sm:$0xff] }
0x12eb   :  { %v9948_v34 = vadd.f32 %v9940_v62, %v9932_v8  ;;  %v16470_v8 = vld [vmem:[#allocation45] ss:$0 sm:$0xff] }
0x12ec   :  { %9922 = vst.msk [vmem:[#allocation9] sm:$0xff] %vm736_vm2, %v9921_v46 }
0x12ed   :  { %v9970_v12 = vsel %vm736_vm2, %v9948_v34, 0.0 }
0x12ee   :  { %9971 = vadd.xlane.f32.xlu1 %v9970_v12 }
0x12f2   :  { %10001 = vadd.xlane.f32.xlu1 %v10000_v17 }
0x12f3   :  { %v9933_v6 = vld [vmem:[#allocation9] sm:$0xff] }
0x12f4   :  { %v9941_v39 = vadd.f32 %v9933_v6, %v9925_v40 }
0x12f6   :  { %v9949_v51 = vsel %vm736_vm2, %v9941_v39, 0.0  ;;  %10007 = vadd.xlane.f32.xlu1 %v10006_v38 }
0x12f7   :  { %9950 = vadd.xlane.f32.xlu0 %v9949_v51  ;;  %v10091_v51 = vld [vmem:[#allocation46 + $0x10] sm:$0xff] }
0x12fa   :  { %10013 = vadd.xlane.f32.xlu1 %v10012_v50  ;;  %v10089_v50 = vld [vmem:[#allocation46] sm:$0xff] }
0x12fb   :  { %9956 = vadd.xlane.f32.xlu0 %v9955_v63  ;;  %v13406_v63 = vld [vmem:[%s16644_s29 + $0x38] sm:$0xff] }
0x12ff   :  { %9962 = vadd.xlane.f32.xlu0 %v9961_v53  ;;  %v13408_v53 = vld [vmem:[%s16644_s29 + $0x28] sm:$0xff] }
0x1303   :  { %9968 = vadd.xlane.f32.xlu0 %v9967_v41  ;;  %v13409_v41 = vld [vmem:[%s16644_s29 + $0x20] sm:$0xff] }
0x1377   :  { %v9972_v11 = vpop.xlane.xlu1 %9971 }
0x1378   :  { %v9980_v27 = vmul.f32 0.03125, %v9972_v11  ;;  %v548_v11 = vsel %vm535_vm0, %v13409_v41, 0.0 }
0x137a   :  { %v16448_v7 = vsub.f32 %v9948_v34, %v9980_v27  ;;  %v13410_v27 = vld [vmem:[%s16644_s29 + $0x18] sm:$0xff] }
0x137b   :  { %v10002_v37 = vpop.xlane.xlu1 %10001 }
0x137c   :  { %v10022_v0 = vmul.f32 0.03125, %v10002_v37  ;;  %v9996_v30 = vmul.f32 %v16448_v7, %v16448_v7  ;;  %v545_v37 = vsel %vm535_vm0, %v13410_v27, 0.0 }
0x137e   :  { %v10030_v33 = vadd.f32 1e-05, %v10022_v0  ;;  %v10018_v42 = vsel %vm736_vm2, %v9996_v30, 0.0  ;;  %v13411_v0 = vld [vmem:[%s16644_s29 + $0x10] sm:$0xff] }
0x137f   :  { %10019 = vadd.xlane.f32.xlu1 %v10018_v42  ;;  %v10008_v16 = vpop.xlane.xlu1 %10007  ;;  %v542_v30 = vsel %vm535_vm0, %v13411_v0, 0.0 }
0x1380   :  { %13308 = vrsqrt.f32 %v10030_v33  ;;  %v9951_v45 = vpop.xlane.xlu0 %9950  ;;  %v10024_v48 = vmul.f32 0.03125, %v10008_v16  ;;  %v13412_v33 = vld [vmem:[%s16644_s29 + $0x8] sm:$0xff]  ;;  %v13413_v16 = vld [vmem:[%s16644_s29] sm:$0xff] }
0x1381   :  { %v9973_v47 = vmul.f32 0.03125, %v9951_v45  ;;  %v539_v42 = vsel %vm535_vm0, %v13412_v33, 0.0  ;;  %v536_v45 = vsel %vm535_vm0, %v13413_v16, 0.0 }
0x1382   :  { %v10032_v26 = vadd.f32 1e-05, %v10024_v48 }
0x1383   :  { %v16453_v1 = vsub.f32 %v9941_v39, %v9973_v47  ;;  %v10014_v18 = vpop.xlane.xlu1 %10013  ;;  %555 = vadd.xlane.f32.xlu1 %v554_v3 }
0x1384   :  { %13310 = vrsqrt.f32 %v10032_v26  ;;  %v9957_v19 = vpop.xlane.xlu0 %9956  ;;  %v10026_v2 = vmul.f32 0.03125, %v10014_v18 }
0x1385   :  { %v9975_v4 = vmul.f32 0.03125, %v9957_v19  ;;  %v9989_v23 = vmul.f32 %v16453_v1, %v16453_v1 }
0x1386   :  { %v10034_v55 = vadd.f32 1e-05, %v10026_v2 }
0x1387   :  { %v16457_v29 = vsub.f32 %v9943_v10, %v9975_v4  ;;  %v9997_v15 = vsel %vm736_vm2, %v9989_v23, 0.0  ;;  %v10096_v10 = vld [vmem:[#allocation49 + $0x10] sm:$0xff]  ;;  %549 = vadd.xlane.f32.xlu1 %v548_v11 }
0x1388   :  { %13312 = vrsqrt.f32 %v10034_v55  ;;  %v9963_v21 = vpop.xlane.xlu0 %9962  ;;  %9998 = vadd.xlane.f32.xlu0 %v9997_v15  ;;  %12851 = vmatprep.subr.mxu1 %v10096_v10 }
0x1389   :  { %v9977_v52 = vmul.f32 0.03125, %v9963_v21  ;;  %v9991_v31 = vmul.f32 %v16457_v29, %v16457_v29  ;;  %12852 = vmatpush3.msra.mxu1 %v10096_v10 }
0x138a   :  { %12853 = vmatprep.subr.mxu1 %v10095_v36 }
0x138b   :  { %v16462_v49 = vsub.f32 %v9945_v24, %v9977_v52  ;;  %v10003_v32 = vsel %vm736_vm2, %v9991_v31, 0.0  ;;  %12854 = vmatpush3.msra.mxu1 %v10095_v36  ;;  %v557_v24 = vsel %vm535_vm0, %v13406_v63, 0.0  ;;  %543 = vadd.xlane.f32.xlu1 %v542_v30  ;;  %v10101_v36 = vld [vmem:[%s14280_s19 + $0x10] sm:$0xff] }
0x138c   :  { %10004 = vadd.xlane.f32.xlu0 %v10003_v32  ;;  %v9969_v58 = vpop.xlane.xlu0 %9968  ;;  %12855 = vmatprep.subr.mxu1 %v10094_v57 }
0x138d   :  { %v13309_v9 = vpop.eup %13308  ;;  %v9979_v56 = vmul.f32 0.03125, %v9969_v58  ;;  %v9993_v28 = vmul.f32 %v16462_v49, %v16462_v49  ;;  %12856 = vmatpush3.msra.mxu1 %v10094_v57  ;;  %v10099_v57 = vld [vmem:[%s14280_s19] sm:$0xff] }
0x138e   :  { %v10046_v46 = vmul.f32 %v13309_v9, %v16425_v44  ;;  %12888 = vmatprep.subr.mxu1 %v14075_v20 }
0x138f   :  { %v16472_v62 = vsub.f32 %v9947_v13, %v9979_v56  ;;  %v10009_v34 = vsel %vm736_vm2, %v9993_v28, 0.0  ;;  %v551_v13 = vsel %vm535_vm0, %v13408_v53, 0.0  ;;  %537 = vadd.xlane.f32.xlu1 %v536_v45 }
0x1390   :  { %v10060_v5 = vmul.f32 %v16465_v43, %v10046_v46  ;;  %10010 = vadd.xlane.f32.xlu0 %v10009_v34 }
0x1391   :  { %v13311_v12 = vpop.eup %13310  ;;  %v9995_v54 = vmul.f32 %v16472_v62, %v16472_v62 }
0x1392   :  { %v10074_v17 = vadd.f32 %v16470_v8, %v10060_v5  ;;  %v10048_v59 = vmul.f32 %v13311_v12, %v16429_v35  ;;  %v10092_v35 = vld [vmem:[#allocation46 + $0x18] sm:$0xff] }
0x1393   :  { %v10015_v40 = vsel %vm736_vm2, %v9995_v54, 0.0  ;;  %12829 = vmatprep.subr.mxu0 %v10092_v35 }
0x1394   :  { %10082 = vst.msk [vmem:[#allocation10 + $0x8] sm:$0xff] %vm736_vm2, %v10074_v17  ;;  %v10062_v44 = vmul.f32 %v16465_v43, %v10048_v59  ;;  %10016 = vadd.xlane.f32.xlu0 %v10015_v40  ;;  %12830 = vmatpush3.msra.mxu0 %v10092_v35 }
0x1395   :  { %v13313_v6 = vpop.eup %13312  ;;  %12831 = vmatprep.subr.mxu0 %v10091_v51 }
0x1396   :  { %v10076_v61 = vadd.f32 %v16470_v8, %v10062_v44  ;;  %v10050_v39 = vmul.f32 %v13313_v6, %v16435_v25  ;;  %12832 = vmatpush3.msra.mxu0 %v10091_v51  ;;  %v10090_v25 = vld [vmem:[#allocation46 + $0x8] sm:$0xff] }
0x1397   :  { %12833 = vmatprep.subr.mxu0 %v10090_v25 }
0x1398   :  { %10084 = vst.msk [vmem:[#allocation10 + $0x18] sm:$0xff] %vm736_vm2, %v10076_v61  ;;  %v10064_v38 = vmul.f32 %v16465_v43, %v10050_v39  ;;  %12834 = vmatpush3.msra.mxu0 %v10090_v25  ;;  %558 = vadd.xlane.f32.xlu0 %v557_v24  ;;  %v10102_v25 = vld [vmem:[%s14280_s19 + $0x18] sm:$0xff] }
0x1399   :  { %12835 = vmatprep.subr.mxu0 %v10089_v50 }
0x139a   :  { %v10078_v60 = vadd.f32 %v16470_v8, %v10064_v38  ;;  %12836 = vmatpush3.msra.mxu0 %v10089_v50  ;;  %v10100_v50 = vld [vmem:[%s14280_s19 + $0x8] sm:$0xff]  ;;  %s16654_s19 = sld [smem:[#allocation70_spill]] }
0x139b   :  { %12869 = vmatprep.subr.mxu0 %v14075_v20  ;;  %v10105_v35 = vld [vmem:[#allocation10 + $0x8] sm:$0xff] }
0x139c   :  { %10086 = vst.msk [vmem:[#allocation10 + $0x28] sm:$0xff] %vm736_vm2, %v10078_v60  ;;  %552 = vadd.xlane.f32.xlu0 %v551_v13  ;;  %v10895_v13 = vld [vmem:[#allocation51] ss:$0 sm:$0xff] }
0x13a0   :  { %546 = vadd.xlane.f32.xlu0 %v545_v37 }
0x13a4   :  { %540 = vadd.xlane.f32.xlu0 %v539_v42 }
0x1408   :  { %v10020_v48 = vpop.xlane.xlu1 %10019 }
0x1409   :  { %v10028_v47 = vmul.f32 0.03125, %v10020_v48 }
0x140b   :  { %v10036_v26 = vadd.f32 1e-05, %v10028_v47 }
0x140d   :  { %13314 = vrsqrt.f32 %v10036_v26 }
0x1411   :  { %v9999_v18 = vpop.xlane.xlu0 %9998 }
0x1412   :  { %v10021_v19 = vmul.f32 0.03125, %v9999_v18 }
0x1414   :  { %v10029_v2 = vadd.f32 1e-05, %v10021_v19 }
0x1415   :  { %v10005_v4 = vpop.xlane.xlu0 %10004 }
0x1416   :  { %13316 = vrsqrt.f32 %v10029_v2  ;;  %v10023_v23 = vmul.f32 0.03125, %v10005_v4 }
0x1418   :  { %v10031_v55 = vadd.f32 1e-05, %v10023_v23 }
0x1419   :  { %v10011_v15 = vpop.xlane.xlu0 %10010 }
0x141a   :  { %v13315_v21 = vpop.eup %13314  ;;  %13318 = vrsqrt.f32 %v10031_v55  ;;  %v10025_v52 = vmul.f32 0.03125, %v10011_v15 }
0x141b   :  { %v10052_v31 = vmul.f32 %v13315_v21, %v16448_v7 }
0x141c   :  { %v10033_v32 = vadd.f32 1e-05, %v10025_v52 }
0x141d   :  { %v10066_v58 = vmul.f32 %v16465_v43, %v10052_v31  ;;  %v10017_v9 = vpop.xlane.xlu0 %10016 }
0x141e   :  { %13320 = vrsqrt.f32 %v10033_v32  ;;  %v10027_v56 = vmul.f32 0.03125, %v10017_v9 }
0x141f   :  { %v10080_v28 = vadd.f32 %v16470_v8, %v10066_v58 }
0x1420   :  { %v10035_v46 = vadd.f32 1e-05, %v10027_v56 }
0x1421   :  { %10088 = vst.msk [vmem:[#allocation10 + $0x38] sm:$0xff] %vm736_vm2, %v10080_v28 }
0x1422   :  { %13322 = vrsqrt.f32 %v10035_v46 }
0x1423   :  { %v13317_v34 = vpop.eup %13316 }
0x1424   :  { %v10045_v5 = vmul.f32 %v13317_v34, %v16453_v1 }
0x1426   :  { %v10059_v12 = vmul.f32 %v16465_v43, %v10045_v5 }
0x1427   :  { %v13319_v54 = vpop.eup %13318 }
0x1428   :  { %v10073_v7 = vadd.f32 %v16470_v8, %v10059_v12  ;;  %v10047_v17 = vmul.f32 %v13319_v54, %v16457_v29  ;;  %v10111_v10 = vld [vmem:[#allocation10 + $0x38] sm:$0xff]  ;;  %v559_v12 = vpop.xlane.xlu0 %558 }
0x1429   :  { %vm567_vm3 = vcmp.ne.f32.partialorder %v559_v12, 0.0 }
0x142a   :  { %10081 = vst.msk [vmem:[#allocation10] sm:$0xff] %vm736_vm2, %v10073_v7  ;;  %v10061_v59 = vmul.f32 %v16465_v43, %v10047_v17  ;;  %v556_v17 = vpop.xlane.xlu1 %555 }
0x142b   :  { %v13321_v40 = vpop.eup %13320  ;;  %vm566_vm4 = vcmp.ne.f32.partialorder %v556_v17, 0.0 }
0x142c   :  { %v10075_v44 = vadd.f32 %v16470_v8, %v10061_v59  ;;  %v10049_v6 = vmul.f32 %v13321_v40, %v16462_v49  ;;  %v553_v59 = vpop.xlane.xlu0 %552 }
0x142d   :  { %vm565_vm5 = vcmp.ne.f32.partialorder %v553_v59, 0.0 }
0x142e   :  { %10083 = vst.msk [vmem:[#allocation10 + $0x10] sm:$0xff] %vm736_vm2, %v10075_v44  ;;  %v10063_v1 = vmul.f32 %v16465_v43, %v10049_v6  ;;  %v10389_v44 = vld [vmem:[%s16654_s19 + $0x38] sm:$0xff] }
0x142f   :  { %v13323_v61 = vpop.eup %13322 }
0x1430   :  { %v10077_v39 = vadd.f32 %v16470_v8, %v10063_v1  ;;  %v10051_v38 = vmul.f32 %v13323_v61, %v16472_v62  ;;  %v10107_v62 = vld [vmem:[#allocation10 + $0x18] sm:$0xff]  ;;  %v10387_v1 = vld [vmem:[%s16654_s19 + $0x28] sm:$0xff]  ;;  %v550_v61 = vpop.xlane.xlu1 %549 }
0x1431   :  { %v10104_v60 = vld [vmem:[#allocation10] sm:$0xff]  ;;  %vm564_vm6 = vcmp.ne.f32.partialorder %v550_v61, 0.0  ;;  %v10905_v61 = vld [vmem:[#allocation52] ss:$0 sm:$0xff] }
0x1432   :  { %10085 = vst.msk [vmem:[#allocation10 + $0x20] sm:$0xff] %vm736_vm2, %v10077_v39  ;;  %v10065_v29 = vmul.f32 %v16465_v43, %v10051_v38  ;;  %12837 = vmatprep.mubr.msk.f32.mxu0 %vm736_vm2, %v10104_v60  ;;  %12857 = vmatprep.mubr.msk.f32.mxu1 %vm736_vm2, %v10104_v60  ;;  %v10886_v38 = vld [vmem:[#allocation48] ss:$0 sm:$0xff] }
0x1433   :  { %12838 = vmatmul.mubr.msk.f32.vlgmr.msra.gmra.mxu0 %vm736_vm2, %v10105_v35  ;;  %12858 = vmatmul.mubr.msk.f32.vlgmr.msra.gmra.mxu1 %vm736_vm2, %v10105_v35 }
0x1434   :  { %v10079_v49 = vadd.f32 %v16470_v8, %v10065_v29  ;;  %v10109_v8 = vld [vmem:[#allocation10 + $0x28] sm:$0xff]  ;;  %12889 = vmatpush3.msra.mxu1 %v10102_v25 }
0x1435   :  { %v10106_v14 = vld [vmem:[#allocation10 + $0x10] sm:$0xff]  ;;  %12890 = vmatprep.subr.mxu1 %v14075_v20 }
0x1436   :  { %10087 = vst.msk [vmem:[#allocation10 + $0x30] sm:$0xff] %vm736_vm2, %v10079_v49  ;;  %12840 = vmatprep.mubr.msk.f32.mxu0 %vm736_vm2, %v10106_v14  ;;  %12860 = vmatprep.mubr.msk.f32.mxu1 %vm736_vm2, %v10106_v14  ;;  %v10386_v49 = vld [vmem:[%s16654_s19 + $0x20] sm:$0xff] }
0x1437   :  { %12841 = vmatmul.mubr.msk.f32.gmra.mxu0 %vm736_vm2, %v10107_v62  ;;  %12861 = vmatmul.mubr.msk.f32.gmra.mxu1 %vm736_vm2, %v10107_v62  ;;  %v10388_v62 = vld [vmem:[%s16654_s19 + $0x30] sm:$0xff] }
0x1438   :  { %12891 = vmatpush3.msra.mxu1 %v10101_v36  ;;  %v10385_v36 = vld [vmem:[%s16654_s19 + $0x18] sm:$0xff] }
0x1439   :  { %v10108_v43 = vld [vmem:[#allocation10 + $0x20] sm:$0xff]  ;;  %12892 = vmatprep.subr.mxu1 %v14075_v20 }
0x143a   :  { %12843 = vmatprep.mubr.msk.f32.mxu0 %vm736_vm2, %v10108_v43  ;;  %12863 = vmatprep.mubr.msk.f32.mxu1 %vm736_vm2, %v10108_v43 }
0x143b   :  { %12844 = vmatmul.mubr.msk.f32.gmra.mxu0 %vm736_vm2, %v10109_v8  ;;  %12864 = vmatmul.mubr.msk.f32.gmra.mxu1 %vm736_vm2, %v10109_v8  ;;  %v10637_v8 = vsel %vm567_vm3, 1.0, %v14075_v20 }
0x143c   :  { %12893 = vmatpush3.msra.mxu1 %v10100_v50 }
0x143d   :  { %v10110_v51 = vld [vmem:[#allocation10 + $0x30] sm:$0xff]  ;;  %12894 = vmatprep.subr.mxu1 %v14075_v20 }
0x143e   :  { %12846 = vmatprep.mubr.msk.f32.mxu0 %vm736_vm2, %v10110_v51  ;;  %12866 = vmatprep.mubr.msk.f32.mxu1 %vm736_vm2, %v10110_v51 }
0x143f   :  { %12847 = vmatmul.mubr.msk.f32.gmra.mxu0 %vm736_vm2, %v10111_v10  ;;  %12867 = vmatmul.mubr.msk.f32.gmra.mxu1 %vm736_vm2, %v10111_v10  ;;  %v547_v10 = vpop.xlane.xlu0 %546 }
0x1440   :  { %12885 = vmatprep.mubr.msk.f32.mxu0 %vm14076_vm1, %v14075_v20  ;;  %12896 = vmatprep.mubr.msk.f32.mxu1 %vm14076_vm1, %v14075_v20  ;;  %vm563_vm7 = vcmp.ne.f32.partialorder %v547_v10, 0.0 }
0x1441   :  { %12895 = vmatpush3.msra.mxu1 %v10099_v57 }
0x14f3   :  { %v12859_v63 = vpop.f32.mrf.mxu1  ;;  %v16554_v3 = vpop.f32.mrf.mxu0 }
0x14f4   :  { %v10325_v18 = vadd.f32 %v12859_v63, %v10895_v13 }
0x14f5   :  { %v10319_v24 = vpop.f32.mrf.mxu1  ;;  %v16556_v11 = vpop.f32.mrf.mxu0 }
0x14f6   :  { %v10320_v23 = vadd.f32 %v10895_v13, %v10319_v24  ;;  %v10359_v58 = vmul.f32 0.5, %v10325_v18 }
0x14f7   :  { %v12862_v22 = vpop.f32.mrf.mxu1  ;;  %v16558_v45 = vpop.f32.mrf.mxu0 }
0x14f8   :  { %v10335_v27 = vadd.f32 %v12862_v22, %v10895_v13  ;;  %v10358_v56 = vmul.f32 0.5, %v10320_v23  ;;  %v10368_v5 = vmul.f32 1.442695, %v10359_v58 }
0x14f9   :  { %v10329_v53 = vpop.f32.mrf.mxu1  ;;  %v16560_v31 = vpop.f32.mrf.mxu0 }
0x14fa   :  { %v10330_v42 = vadd.f32 %v10895_v13, %v10329_v53  ;;  %v10361_v48 = vmul.f32 0.5, %v10335_v27  ;;  %v10366_v54 = vmul.f32 1.442695, %v10358_v56  ;;  %v544_v27 = vpop.xlane.xlu1 %543  ;;  %v10214_v56 = vadd.f32 %v16554_v3, %v10886_v38 }
0x14fb   :  { %v12865_v41 = vpop.f32.mrf.mxu1  ;;  %v12845_v34 = vpop.f32.mrf.mxu0  ;;  %vm562_vm8 = vcmp.ne.f32.partialorder %v544_v27, 0.0 }
0x14fc   :  { %v10345_v37 = vadd.f32 %v12865_v41, %v10895_v13  ;;  %v10360_v55 = vmul.f32 0.5, %v10330_v42  ;;  %v10372_v52 = vmul.f32 1.442695, %v10361_v48  ;;  %v10234_v57 = vadd.f32 %v12845_v34, %v10886_v38  ;;  %v10384_v41 = vld [vmem:[%s16654_s19 + $0x10] sm:$0xff] }
0x14fd   :  { %v10339_v0 = vpop.f32.mrf.mxu1  ;;  %v10228_v7 = vpop.f32.mrf.mxu0  ;;  %v10635_v48 = vsel %vm565_vm5, 1.0, %v14075_v20 }
0x14fe   :  { %v10363_v30 = vmul.f32 0.5, %v10345_v37  ;;  %v10340_v33 = vadd.f32 %v10895_v13, %v10339_v0  ;;  %v10370_v28 = vmul.f32 1.442695, %v10360_v55  ;;  %v10229_v0 = vadd.f32 %v10886_v38, %v10228_v7 }
0x14ff   :  { %v12868_v16 = vpop.f32.mrf.mxu1  ;;  %v12848_v40 = vpop.f32.mrf.mxu0  ;;  %v10634_v55 = vsel %vm564_vm6, 1.0, %v14075_v20 }
0x1500   :  { %v10362_v47 = vmul.f32 0.5, %v10340_v33  ;;  %v10355_v26 = vadd.f32 %v12868_v16, %v10895_v13  ;;  %v10376_v19 = vmul.f32 1.442695, %v10363_v30  ;;  %v10244_v29 = vadd.f32 %v12848_v40, %v10886_v38 }
0x1501   :  { %v10349_v2 = vpop.f32.mrf.mxu1  ;;  %v10238_v35 = vpop.f32.mrf.mxu0 }
0x1502   :  { %v10365_v4 = vmul.f32 0.5, %v10355_v26  ;;  %v10374_v15 = vmul.f32 1.442695, %v10362_v47  ;;  %v10350_v21 = vadd.f32 %v10895_v13, %v10349_v2  ;;  %13324 = vpow2.f32 %v10376_v19  ;;  %v10383_v47 = vld [vmem:[%s16654_s19 + $0x8] sm:$0xff]  ;;  %v541_v2 = vpop.xlane.xlu0 %540 }
0x1503   :  { %v10239_v63 = vadd.f32 %v10886_v38, %v10238_v35  ;;  %v10636_v13 = vsel %vm566_vm4, 1.0, %v14075_v20  ;;  %v10224_v26 = vadd.f32 %v16558_v45, %v10886_v38  ;;  %v10633_v45 = vsel %vm563_vm7, 1.0, %v14075_v20 }
0x1504   :  { %v10380_v32 = vmul.f32 1.442695, %v10365_v4  ;;  %v10364_v9 = vmul.f32 0.5, %v10350_v21  ;;  %v10219_v21 = vadd.f32 %v10886_v38, %v16560_v31  ;;  %vm561_vm9 = vcmp.ne.f32.partialorder %v541_v2, 0.0 }
0x1505   :  { %v10632_v31 = vsel %vm562_vm8, 1.0, %v14075_v20  ;;  %v10631_v7 = vsel %vm561_vm9, 1.0, %v14075_v20 }
0x1506   :  { %13326 = vpow2.f32 %v10380_v32  ;;  %v10378_v46 = vmul.f32 1.442695, %v10364_v9  ;;  %v538_v9 = vpop.xlane.xlu1 %537 }
0x1507   :  { %13328 = vpow2.f32 %v10374_v15  ;;  %v10382_v15 = vld [vmem:[%s16654_s19] sm:$0xff]  ;;  %vm560_vm10 = vcmp.ne.f32.partialorder %v538_v9, 0.0 }
0x1508   :  { %13330 = vpow2.f32 %v10372_v52  ;;  %v10630_v59 = vsel %vm560_vm10, 1.0, %v14075_v20 }
0x1509   :  { %13332 = vpow2.f32 %v10378_v46 }
0x150a   :  { %13334 = vpow2.f32 %v10370_v28 }
0x150b   :  { %13336 = vpow2.f32 %v10368_v5  ;;  %v10209_v5 = vadd.f32 %v10886_v38, %v16556_v11 }
0x150c   :  { %13338 = vpow2.f32 %v10366_v54 }
0x150f   :  { %v13325_v6 = vpop.eup %13324 }
0x1510   :  { %v10395_v51 = vmul.f32 %v13325_v6, %v10387_v1 }
0x1512   :  { %v10403_v30 = vadd.f32 %v10395_v51, %v10234_v57 }
0x1513   :  { %v13327_v39 = vpop.eup %13326 }
0x1514   :  { %v13329_v60 = vpop.eup %13328  ;;  %v10397_v14 = vmul.f32 %v13327_v39, %v10389_v44  ;;  %v10411_v52 = vmul.f32 %v10635_v48, %v10403_v30  ;;  %v10414_v44 = vld [vmem:[%s16655_s11] sm:$0xff] }
0x1515   :  { %v13331_v43 = vpop.eup %13330  ;;  %v10394_v24 = vmul.f32 %v13329_v60, %v10386_v49 }
0x1516   :  { %v13333_v25 = vpop.eup %13332  ;;  %v10405_v50 = vadd.f32 %v10397_v14, %v10244_v29  ;;  %v10393_v33 = vmul.f32 %v13331_v43, %v10385_v36 }
0x1517   :  { %v10396_v22 = vmul.f32 %v13333_v25, %v10388_v62  ;;  %v13335_v53 = vpop.eup %13334  ;;  %v10402_v18 = vadd.f32 %v10394_v24, %v10229_v0 }
0x1518   :  { %v10413_v37 = vmul.f32 %v10637_v8, %v10405_v50  ;;  %v13337_v16 = vpop.eup %13336  ;;  %v10392_v19 = vmul.f32 %v13335_v53, %v10384_v41  ;;  %v10401_v32 = vadd.f32 %v10393_v33, %v10224_v26 }
0x1519   :  { %v10404_v42 = vadd.f32 %v10396_v22, %v10239_v63  ;;  %v13339_v23 = vpop.eup %13338  ;;  %v10391_v58 = vmul.f32 %v13337_v16, %v10383_v47  ;;  %v10410_v28 = vmul.f32 %v10634_v55, %v10402_v18 }
0x151a   :  { %12870 = vmatpush3.msra.mxu0 %v10413_v37  ;;  %v10400_v46 = vadd.f32 %v10392_v19, %v10219_v21  ;;  %v10390_v34 = vmul.f32 %v13339_v23, %v10382_v15  ;;  %v10409_v12 = vmul.f32 %v10633_v45, %v10401_v32 }
0x151b   :  { %12871 = vmatprep.subr.mxu0 %v14075_v20  ;;  %v10412_v4 = vmul.f32 %v10636_v13, %v10404_v42  ;;  %v10399_v54 = vadd.f32 %v10391_v58, %v10214_v56 }
0x151c   :  { %v10408_v3 = vmul.f32 %v10632_v31, %v10400_v46  ;;  %v10398_v17 = vadd.f32 %v10390_v34, %v10209_v5 }
0x151d   :  { %12872 = vmatpush3.msra.mxu0 %v10412_v4  ;;  %v10407_v40 = vmul.f32 %v10631_v7, %v10399_v54 }
0x151e   :  { %12873 = vmatprep.subr.mxu0 %v14075_v20  ;;  %v10406_v11 = vmul.f32 %v10630_v59, %v10398_v17 }
0x151f   :  { %12874 = vmatpush3.msra.mxu0 %v10411_v52 }
0x1520   :  { %12875 = vmatprep.subr.mxu0 %v14075_v20 }
0x1521   :  { %12876 = vmatpush3.msra.mxu0 %v10410_v28 }
0x1522   :  { %12877 = vmatprep.subr.mxu0 %v14075_v20 }
0x1523   :  { %12878 = vmatpush3.msra.mxu0 %v10409_v12 }
0x1524   :  { %12879 = vmatprep.subr.mxu0 %v14075_v20 }
0x1525   :  { %12880 = vmatpush3.msra.mxu0 %v10408_v3 }
0x1526   :  { %12881 = vmatprep.subr.mxu0 %v14075_v20 }
0x1527   :  { %12882 = vmatpush3.msra.mxu0 %v10407_v40 }
0x1528   :  { %12883 = vmatprep.subr.mxu0 %v14075_v20 }
0x1529   :  { %12884 = vmatpush3.msra.mxu0 %v10406_v11 }
0x152a   :  { %12886 = vmatmul.mubr.msk.f32.vlgmr.msra.gmra.mxu0 %vm10415_vm11, %v10414_v44 }
0x15ea   :  { %v10485_v6 = vpop.f32.mrf.mxu0 }
0x15eb   :  { %12897 = vmatmul.mubr.msk.f32.vlgmr.msra.gmra.mxu1 %vm736_vm2, %v10485_v6 }
0x15ec   :  { %v12887_v1 = vpop.f32.mrf.mxu0 }
0x16ab   :  { %v10564_v39 = vpop.f32.mrf.mxu1 }
0x16ac   :  { %v10565_v38 = vadd.f32 %v10905_v61, %v10564_v39 }
0x16ad   :  { %v12898_v60 = vpop.f32.mrf.mxu1 }
0x16ae   :  { %10569 = vst.msk [vmem:[%s14290_s25] sm:$0xff] %vm10568_vm12, %v10565_v38 }
0x16af   :  { %10574 = vsyncpa [#allocation12], 1 }
0x16b0   :  { %10575 = vsyncpa [#allocation14], 1 }
0x16b1   :  { %10576 = vsyncpa [#allocation17], 1 }
0x16b2   :  { %10577 = vsyncpa [#allocation20], 1 }
0x16b3   :  { %10578 = vsyncpa [#allocation23], 1 }
0x16b4   :  { %10579 = vsyncpa [#allocation26], 1 }
0x16b5   :  { %10580 = vsyncpa [#allocation29], 1 }
0x16b6   :  { %10581 = vsyncpa [#allocation32], 1 }
0x16b7   :  { %10582 = vsyncpa [#allocation35], 1 }
0x16b8   :  { %10583 = vsyncpa [#allocation38], 1 }
0x16b9   :  { %10584 = vsyncpa [#allocation41], 1 }
0x16ba   :  { %10585 = vsyncpa [#allocation44], 1 }
0x16bb   :  { %10586 = vsyncpa [#allocation47], 1 }
0x16bc   :  { %10587 = vsyncpa [#allocation50], 1 }
0x16bd   :  { %10588 = vsyncpa [#allocation53], 1 }

</bundles_post_ra>
